<compile_context>
chip_gen: v7x
topology: tpu7x:2x2x1
jax: 0.10.0
libtpu: 0.0.40
codegen_flags: <defaults>
</compile_context>

<pallas_src>
import functools

import jax
import jax.numpy as jnp
from jax import lax
from jax.experimental import pallas as pl
from jax.experimental.pallas import tpu as pltpu

EPS_NORM = 1e-12   # F.normalize default eps
EPS_BN = 1e-5      # nn.BatchNorm1d default eps


def _round_up(x, m):
    return ((x + m - 1) // m) * m


def avg_pooling_kernel(x_ref, w_ref, b_ref, net_ref, feas_ref):
    """x_ref: (TN, S, D) f32/bf16; w_ref: (D, E) bf16 (BN pre-folded); b_ref: (1, E) f32."""
    # inputs.mean(dim=1): accumulate in f32 regardless of the input dtype.
    net = jnp.mean(x_ref[...].astype(jnp.float32), axis=1)               # (TN, D) f32

    # eval_feas = F.normalize(net, p=2, dim=1)
    # rsqrt(max(sum_sq, eps^2)) == 1 / max(norm, eps); rsqrt issues on the EUP slot.
    inv = lax.rsqrt(jnp.maximum(jnp.sum(net * net, axis=1, keepdims=True),
                                EPS_NORM * EPS_NORM))
    feas_ref[...] = net * inv

    # Fused Linear + BatchNorm(eval): y = net @ W_fused + b_fused.
    # Weight was pre-transposed to (D, E) at prep time -> canonical (K, N) MXU layout.
    emb = jnp.dot(net.astype(w_ref.dtype), w_ref[...],
                  preferred_element_type=jnp.float32)                     # (TN, E) f32
    emb = emb + b_ref[...]

    # F.normalize(net, p=2, dim=1); Dropout is identity in eval mode.
    # TODO(synk): training-mode Dropout(p=0.5) / BatchNorm batch statistics not implemented.
    inv2 = lax.rsqrt(jnp.maximum(jnp.sum(emb * emb, axis=1, keepdims=True),
                                 EPS_NORM * EPS_NORM))
    net_ref[...] = emb * inv2


def prepare_params(emb_w, emb_b, bn_w, bn_b, bn_mean=None, bn_var=None,
                   compute_dtype=jnp.bfloat16):
    """One-time parameter prep: fold eval-mode BatchNorm into the Linear and
    pre-transpose the fused weight to (D, E) so the kernel never transposes.

    y_bn = ((x @ W^T + b) - mean) / sqrt(var + eps) * gamma + beta
         =  x @ (W * s[:, None])^T + ((b - mean) * s + beta),   s = gamma / sqrt(var + eps)
    """
    E = emb_w.shape[0]
    if bn_mean is None:
        bn_mean = jnp.zeros((E,), jnp.float32)   # freshly-initialized running_mean
    if bn_var is None:
        bn_var = jnp.ones((E,), jnp.float32)     # freshly-initialized running_var
    scale = bn_w / jnp.sqrt(bn_var + EPS_BN)
    w_fused = (emb_w * scale[:, None]).T.astype(compute_dtype)            # (D, E)
    b_fused = ((emb_b - bn_mean) * scale + bn_b).astype(jnp.float32).reshape(1, E)
    return w_fused, b_fused


@functools.partial(jax.jit, static_argnames=("block_n",))
def avg_pooling(inputs, w_fused, b_fused, *, block_n=256):
    """inputs: (N, S, D) float32 or bfloat16. Returns (net (N, E), eval_feas (N, D))."""
    N, S, D = inputs.shape
    E = w_fused.shape[1]

    # No full-array pad: Pallas masks the ragged last batch block (all math here
    # is row-local, so garbage rows are harmless and their writes are dropped).
    # Only pathologically small batches (< 8 rows) get padded up to one sublane group.
    x = inputs
    n_eff = N
    if N < 8:
        n_eff = 8
        x = jnp.pad(x, ((0, 8 - N), (0, 0), (0, 0)))

    # Batch tile: multiple of 8 sublanes, and at least 2 grid tiles once N > 8 so
    # the "parallel" axis actually shards across both v7x TensorCores.
    # (block_n=256 suits v6e/v7x; 128 is equally fine on v5e — it stays HBM-bound.)
    if n_eff > 8:
        tn = min(block_n, _round_up(pl.cdiv(n_eff, 2), 8))
    else:
        tn = 8
    grid_n = pl.cdiv(n_eff, tn)

    # VMEM budget: double-buffered input tile + grid-invariant bf16 weight (2 bufs)
    # + double-buffered f32 output tiles, capped at 56 MiB (v7x physical VMEM is 64 MiB).
    in_itemsize = jnp.dtype(x.dtype).itemsize
    w_itemsize = jnp.dtype(w_fused.dtype).itemsize
    vmem_est = (2 * tn * S * D * in_itemsize
                + 2 * D * E * w_itemsize
                + 2 * tn * (E + D) * 4
                + (2 << 20))
    vmem_limit = int(max(32 << 20, min(56 << 20, vmem_est)))

    net, eval_feas = pl.pallas_call(
        avg_pooling_kernel,
        grid=(grid_n,),
        out_shape=(jax.ShapeDtypeStruct((n_eff, E), jnp.float32),
                   jax.ShapeDtypeStruct((n_eff, D), jnp.float32)),
        in_specs=[pl.BlockSpec((tn, S, D), lambda i: (i, 0, 0)),
                  pl.BlockSpec((D, E), lambda i: (0, 0)),    # grid-invariant bf16 weight
                  pl.BlockSpec((1, E), lambda i: (0, 0))],
        out_specs=(pl.BlockSpec((tn, E), lambda i: (i, 0)),
                   pl.BlockSpec((tn, D), lambda i: (i, 0))),
        compiler_params=pltpu.CompilerParams(
            dimension_semantics=("parallel",),       # shard batch tiles across TCs (v7x)
            vmem_limit_bytes=vmem_limit),
    )(x, w_fused, b_fused)

    if n_eff != N:
        net, eval_feas = net[:N], eval_feas[:N]
    return net, eval_feas


if __name__ == "__main__":
    key = jax.random.PRNGKey(0)
    k1, k2 = jax.random.split(key)

    # Small shapes consistent with the module: (N, S, D) feature stack feeding
    # AvgPooling(input_feature_size=2048, embeding_fea_size=1024).
    N, S, D, E = 2, 8, 2048, 1024
    inputs = jax.random.normal(k1, (N, S, D), jnp.float32)

    # Parameters per the module's __init__:
    #   kaiming_normal_(weight, mode='fan_out') -> std = sqrt(2 / E); bias = 0
    #   BatchNorm1d: weight = 1, bias = 0, running_mean = 0, running_var = 1
    emb_w = jax.random.normal(k2, (E, D), jnp.float32) * jnp.sqrt(2.0 / E)
    emb_b = jnp.zeros((E,), jnp.float32)
    bn_w = jnp.ones((E,), jnp.float32)
    bn_b = jnp.zeros((E,), jnp.float32)

    w_fused, b_fused = prepare_params(emb_w, emb_b, bn_w, bn_b)   # (D, E), (1, E)

    net, eval_feas = avg_pooling(inputs, w_fused, b_fused)
    jax.block_until_ready((net, eval_feas))

    # Pure-JAX reference at matching precision (bf16 matmul operands, f32 accumulate).
    net_f32 = jnp.mean(inputs, axis=1)
    feas_ref = net_f32 / jnp.maximum(
        jnp.linalg.norm(net_f32, axis=1, keepdims=True), EPS_NORM)
    emb_ref = jnp.dot(net_f32.astype(jnp.bfloat16), w_fused,
                      preferred_element_type=jnp.float32) + b_fused
    out_ref = emb_ref / jnp.maximum(
        jnp.linalg.norm(emb_ref, axis=1, keepdims=True), EPS_NORM)

    assert net.shape == (N, E) and net.dtype == jnp.float32
    assert eval_feas.shape == (N, D) and eval_feas.dtype == jnp.float32
    assert bool(jnp.allclose(eval_feas, feas_ref, atol=1e-5, rtol=1e-4))
    assert bool(jnp.allclose(net, out_ref, atol=1e-4, rtol=1e-3))
    assert bool(jnp.allclose(jnp.linalg.norm(net, axis=1), 1.0, atol=1e-4))
    assert bool(jnp.allclose(jnp.linalg.norm(eval_feas, axis=1), 1.0, atol=1e-4))

    # Dtype-agnostic fast path: bf16 activations feed the kernel directly (half DMA).
    net_bf, feas_bf = avg_pooling(inputs.astype(jnp.bfloat16), w_fused, b_fused)
    jax.block_until_ready((net_bf, feas_bf))
    assert net_bf.shape == (N, E) and feas_bf.shape == (N, D)
    assert bool(jnp.all(jnp.isfinite(net_bf))) and bool(jnp.all(jnp.isfinite(feas_bf)))
    assert bool(jnp.allclose(net_bf, net, atol=5e-3))
    assert bool(jnp.allclose(feas_bf, eval_feas, atol=5e-3))

    print("KERNEL_OK")
</pallas_src>

<mosaic_0001>
module attributes {stable_mosaic.version = 11 : i64} {
  func.func @avg_pooling_kernel(%arg0: i32, %arg1: memref<8x8x2048xf32, #tpu.memory_space<vmem>>, %arg2: memref<2048x1024xbf16, #tpu.memory_space<vmem>>, %arg3: memref<1x1024xf32, #tpu.memory_space<vmem>>, %arg4: memref<8x1024xf32, #tpu.memory_space<vmem>>, %arg5: memref<8x2048xf32, #tpu.memory_space<vmem>>) attributes {dimension_semantics = [#tpu.dimension_semantics<parallel>], iteration_bounds = array<i64: 1>, scalar_prefetch = 0 : i64, scratch_operands = 0 : i64, tpu.core_type = #tpu.core_type<tc>, window_params = [{transform_indices = @transform_0, window_bounds = array<i64: 8, 8, 2048>}, {pipeline_mode = #tpu.pipeline_mode<synchronous>, transform_indices = @transform_1, window_bounds = array<i64: 2048, 1024>}, {pipeline_mode = #tpu.pipeline_mode<synchronous>, transform_indices = @transform_2, window_bounds = array<i64: 1, 1024>}, {transform_indices = @transform_3, window_bounds = array<i64: 8, 1024>}, {transform_indices = @transform_4, window_bounds = array<i64: 8, 2048>}]} {
    %c0 = arith.constant 0 : index
    %c0_0 = arith.constant 0 : index
    %c0_1 = arith.constant 0 : index
    %0 = vector.load %arg1[%c0, %c0_0, %c0_1] : memref<8x8x2048xf32, #tpu.memory_space<vmem>>, vector<8x8x2048xf32>
    %cst = arith.constant dense<0.000000e+00> : vector<8x2048xf32>
    %1 = vector.multi_reduction <add>, %0, %cst [1] : vector<8x8x2048xf32> to vector<8x2048xf32>
    %cst_2 = arith.constant 8.000000e+00 : f32
    %2 = vector.broadcast %cst_2 : f32 to vector<8x2048xf32>
    %3 = arith.divf %1, %2 : vector<8x2048xf32>
    %4 = arith.mulf %3, %3 : vector<8x2048xf32>
    %cst_3 = arith.constant dense<0.000000e+00> : vector<8xf32>
    %5 = vector.multi_reduction <add>, %4, %cst_3 [1] : vector<8x2048xf32> to vector<8xf32>
    %6 = vector.shape_cast %5 : vector<8xf32> to vector<8x1xf32>
    %cst_4 = arith.constant 1.000000e-24 : f32
    %7 = vector.broadcast %cst_4 : f32 to vector<8x1xf32>
    %8 = arith.maximumf %6, %7 : vector<8x1xf32>
    %9 = math.rsqrt %8 : vector<8x1xf32>
    %10 = vector.broadcast %9 : vector<8x1xf32> to vector<8x2048xf32>
    %11 = arith.mulf %3, %10 : vector<8x2048xf32>
    %c0_5 = arith.constant 0 : index
    %c0_6 = arith.constant 0 : index
    %12 = vector.load %arg5[%c0_5, %c0_6] : memref<8x2048xf32, #tpu.memory_space<vmem>>, vector<8x2048xf32>
    tpu.vector_store %arg5[%c0_5, %c0_6], %11 {strides = array<i32>} : memref<8x2048xf32, #tpu.memory_space<vmem>>, vector<8x2048xf32>,
    %13 = arith.truncf %3 : vector<8x2048xf32> to vector<8x2048xbf16>
    %c0_7 = arith.constant 0 : index
    %c0_8 = arith.constant 0 : index
    %14 = vector.load %arg2[%c0_7, %c0_8] : memref<2048x1024xbf16, #tpu.memory_space<vmem>>, vector<2048x1024xbf16>
    %cst_9 = arith.constant dense<0.000000e+00> : vector<8x1024xf32>
    %15 = tpu.matmul %13, %14, %cst_9 {dimension_numbers = #tpu.dot_dimension_numbers<[1], [0], [0], [1], [0, 0, 1, 1], [], []>} : vector<8x2048xbf16>, vector<2048x1024xbf16>, vector<8x1024xf32> -> vector<8x1024xf32>
    %c0_10 = arith.constant 0 : index
    %c0_11 = arith.constant 0 : index
    %16 = vector.load %arg3[%c0_10, %c0_11] : memref<1x1024xf32, #tpu.memory_space<vmem>>, vector<1x1024xf32>
    %17 = vector.broadcast %16 : vector<1x1024xf32> to vector<8x1024xf32>
    %18 = arith.addf %15, %17 : vector<8x1024xf32>
    %19 = arith.mulf %18, %18 : vector<8x1024xf32>
    %cst_12 = arith.constant dense<0.000000e+00> : vector<8xf32>
    %20 = vector.multi_reduction <add>, %19, %cst_12 [1] : vector<8x1024xf32> to vector<8xf32>
    %21 = vector.shape_cast %20 : vector<8xf32> to vector<8x1xf32>
    %cst_13 = arith.constant 1.000000e-24 : f32
    %22 = vector.broadcast %cst_13 : f32 to vector<8x1xf32>
    %23 = arith.maximumf %21, %22 : vector<8x1xf32>
    %24 = math.rsqrt %23 : vector<8x1xf32>
    %25 = vector.broadcast %24 : vector<8x1xf32> to vector<8x1024xf32>
    %26 = arith.mulf %18, %25 : vector<8x1024xf32>
    %c0_14 = arith.constant 0 : index
    %c0_15 = arith.constant 0 : index
    %27 = vector.load %arg4[%c0_14, %c0_15] : memref<8x1024xf32, #tpu.memory_space<vmem>>, vector<8x1024xf32>
    tpu.vector_store %arg4[%c0_14, %c0_15], %26 {strides = array<i32>} : memref<8x1024xf32, #tpu.memory_space<vmem>>, vector<8x1024xf32>,
    return
  }
  func.func @transform_0(%arg0: i32) -> (i32, i32, i32) {
    %c0_i32 = arith.constant 0 : i32
    %c0_i32_0 = arith.constant 0 : i32
    %c0_i32_1 = arith.constant 0 : i32
    return %arg0, %c0_i32, %c0_i32_0 : i32, i32, i32
  }
  func.func @transform_1(%arg0: i32) -> (i32, i32) {
    %c0_i32 = arith.constant 0 : i32
    %c0_i32_0 = arith.constant 0 : i32
    %c0_i32_1 = arith.constant 0 : i32
    return %c0_i32, %c0_i32_0 : i32, i32
  }
  func.func @transform_2(%arg0: i32) -> (i32, i32) {
    %c0_i32 = arith.constant 0 : i32
    %c0_i32_0 = arith.constant 0 : i32
    %c0_i32_1 = arith.constant 0 : i32
    return %c0_i32, %c0_i32_0 : i32, i32
  }
  func.func @transform_3(%arg0: i32) -> (i32, i32) {
    %c0_i32 = arith.constant 0 : i32
    %c0_i32_0 = arith.constant 0 : i32
    return %arg0, %c0_i32 : i32, i32
  }
  func.func @transform_4(%arg0: i32) -> (i32, i32) {
    %c0_i32 = arith.constant 0 : i32
    %c0_i32_0 = arith.constant 0 : i32
    return %arg0, %c0_i32 : i32, i32
  }
}

</mosaic_0001>

<bundles_post_ra>
// kernel: avg_pooling.1
= control target key start
LH: loop header
LB: loop body
LE: loop exit
PB: predicated region body
PF: predicated region fallthrough
CT: control target
= control target key end

     0   :  { %10 = vsyncpa [#allocation3], 0  ;;  %s16825_s0 = inlined_call_operand.vmem [shape: f32[8,8,2048], index: 0, kind: input, shape index: {}]   ;;  %s16826_s1 = inlined_call_operand.hbm [shape: bf16[2048,1024], index: 1, kind: input, shape index: {}]   ;;  %s16827_s2 = inlined_call_operand.hbm [shape: f32[1,1024], index: 2, kind: input, shape index: {}]   ;;  %s16828_s3 = inlined_call_operand.vmem [shape: f32[8,1024], index: 3, kind: output, shape index: {0}]   ;;  %s16829_s4 = inlined_call_operand.vmem [shape: f32[8,2048], index: 4, kind: output, shape index: {1}]  }
   0x1   :  { %11 = vsyncpa [#allocation5], 0  ;;  %s11276_s15 = smov [#allocation2]   ;;  %s11228_s19 = scalar_lea.hbm %s16826_s1, 131072 }
   0x2   :  { %s19_s16 = sshll.u32 %s11276_s15, 4  ;;  %p11229_p0 = scmp.ne.s32.totalorder %s16826_s1, %s11228_s19  ;;  %s20_s16 = int_to_ptr.vmem [resolvable:$true] %s19_s16 }
   0x3   :  { %p11232_p1 = scmp.lt.u32.totalorder %s11228_s19, %s16826_s1 }
   0x5   :  { %p11234_p2 = pnand %p11232_p1, %p11229_p0 }
   0x7   :  { %11237 = shalt.err (!%p11234_p2)
}
   0x8   :  { %s11238_s24 = scalar_lea.vmem %s20_s16, 131072  ;;  %p11243_p4 = scmp.lt.s32.totalorder %s20_s16, %s20_s16 }
   0x9   :  { %p11239_p3 = scmp.ne.s32.totalorder %s20_s16, %s11238_s24  ;;  %p11244_p5 = scmp.lt.s32.totalorder %s11238_s24, %s11238_s24 }
   0xb   :  { %p11245_p6 = por %p11244_p5, %p11243_p4 }
   0xd   :  { %p11246_p7 = pnand %p11245_p6, %p11239_p3 }
   0xf   :  { %11249 = shalt.err (!%p11246_p7)
}
  0x10   :  { %s11277_s25 = smov 512   ;;  %s11278_s26 = smov 32  }
  0x11   :  { %25 = dma.hbm_to_vmem [thread:$0]  %s16826_s1, 131072, %s20_s16, [#allocation3], %s11277_s25, %s11277_s25, %s11278_s26  }
  0x12   :  { %s11279_s29 = smov [#allocation4]   ;;  %s11250_s7 = scalar_lea.hbm %s16827_s2, 128 }
  0x13   :  { %s32_s30 = sshll.u32 %s11279_s29, 4  ;;  %p11251_p8 = scmp.ne.s32.totalorder %s16827_s2, %s11250_s7  ;;  %s33_s30 = int_to_ptr.vmem [resolvable:$true] %s32_s30 }
  0x14   :  { %p11254_p9 = scmp.lt.u32.totalorder %s11250_s7, %s16827_s2 }
  0x16   :  { %p11256_p10 = pnand %p11254_p9, %p11251_p8 }
  0x18   :  { %11259 = shalt.err (!%p11256_p10)
}
  0x19   :  { %s11260_s12 = scalar_lea.vmem %s33_s30, 128  ;;  %p11265_p12 = scmp.lt.s32.totalorder %s33_s30, %s33_s30 }
  0x1a   :  { %p11261_p11 = scmp.ne.s32.totalorder %s33_s30, %s11260_s12  ;;  %p11266_p13 = scmp.lt.s32.totalorder %s11260_s12, %s11260_s12 }
  0x1c   :  { %p11267_p0 = por %p11266_p13, %p11265_p12 }
  0x1e   :  { %p11268_p1 = pnand %p11267_p0, %p11261_p11 }
  0x20   :  { %11271 = shalt.err (!%p11268_p1)
}
  0x21   :  { %35 = dma.hbm_to_vmem [thread:$0]  %s16827_s2, 128, %s33_s30, [#allocation5]  }
  0x22   :  { %11272 = dma.done.wait [#allocation3], 131072  }
  0x23   :  { %11273 = vsyncadd [#allocation3], 4294836224 }
  0x24   :  { %11274 = dma.done.wait [#allocation5], 128  }
  0x25   :  { %11275 = vsyncadd [#allocation5], 4294967168  ;;  %v2133_v0 = vld [vmem:[#allocation2] sm:$0xff]  ;;  %v2134_v2 = vld [vmem:[#allocation2 + $0x8] sm:$0xff]  ;;  %vm1323_vm0 = vcmask 1041409   ;;  %vm1325_vm1 = vcmask 1042434  }
  0x26   :  { %v2137_v1 = vld [vmem:[#allocation2 + $0x20] sm:$0xff]  ;;  %v2138_v4 = vld [vmem:[#allocation2 + $0x28] sm:$0xff]  ;;  %vm1327_vm2 = vcmask 1043459   ;;  %vm1329_vm3 = vcmask 1044484   ;;  %vm1331_vm4 = vcmask 1045509   ;;  %vm1333_vm5 = vcmask 1046534  }
  0x27   :  { %v10077_v3 = vcombine.high %v2133_v0, %v2137_v1  ;;  %v10076_v5 = vcombine.low %v2133_v0, %v2137_v1  ;;  %v2141_v6 = vld [vmem:[#allocation2 + $0x40] sm:$0xff]  ;;  %v10079_v8 = vcombine.high %v2134_v2, %v2138_v4  ;;  %v10078_v9 = vcombine.low %v2134_v2, %v2138_v4  ;;  %v2142_v11 = vld [vmem:[#allocation2 + $0x48] sm:$0xff] }
  0x28   :  { %v2145_v7 = vld [vmem:[#allocation2 + $0x60] sm:$0xff]  ;;  %v2146_v12 = vld [vmem:[#allocation2 + $0x68] sm:$0xff]  ;;  %vm1335_vm6 = vcmask 1047559  }
  0x29   :  { %v10085_v10 = vcombine.high %v2141_v6, %v2145_v7  ;;  %v2149_v13 = vld [vmem:[#allocation2 + $0x80] sm:$0xff]  ;;  %8719 = vmatprep.subr.bf16.mxu0 %v10077_v3  ;;  %v10087_v14 = vcombine.high %v2142_v11, %v2146_v12  ;;  %v2150_v16 = vld [vmem:[#allocation2 + $0x88] sm:$0xff]  ;;  %9047 = vmatprep.subr.bf16.mxu1 %v10079_v8  ;;  %v10084_v18 = vcombine.low %v2141_v6, %v2145_v7 }
  0x2a   :  { %v2153_v15 = vld [vmem:[#allocation2 + $0xa0] sm:$0xff]  ;;  %v2154_v17 = vld [vmem:[#allocation2 + $0xa8] sm:$0xff]  ;;  %8720 = vmatpush1.bf16.msra.mxu0 %v10076_v5  ;;  %9048 = vmatpush1.bf16.msra.mxu1 %v10078_v9  ;;  %v10086_v19 = vcombine.low %v2142_v11, %v2146_v12 }
  0x2b   :  { %8721 = vmatprep.subr.bf16.mxu0 %v10085_v10  ;;  %v10093_v20 = vcombine.high %v2149_v13, %v2153_v15  ;;  %9049 = vmatprep.subr.bf16.mxu1 %v10087_v14  ;;  %v10095_v21 = vcombine.high %v2150_v16, %v2154_v17  ;;  %v2157_v22 = vld [vmem:[#allocation2 + $0xc0] sm:$0xff]  ;;  %v2158_v24 = vld [vmem:[#allocation2 + $0xc8] sm:$0xff]  ;;  %v10092_v26 = vcombine.low %v2149_v13, %v2153_v15 }
  0x2c   :  { %v2161_v23 = vld [vmem:[#allocation2 + $0xe0] sm:$0xff]  ;;  %v2162_v25 = vld [vmem:[#allocation2 + $0xe8] sm:$0xff]  ;;  %v10094_v27 = vcombine.low %v2150_v16, %v2154_v17 }
  0x2d   :  { %v10101_v28 = vcombine.high %v2157_v22, %v2161_v23  ;;  %v10103_v29 = vcombine.high %v2158_v24, %v2162_v25  ;;  %v2165_v30 = vld [vmem:[#allocation2 + $0x100] sm:$0xff]  ;;  %v2166_v32 = vld [vmem:[#allocation2 + $0x108] sm:$0xff]  ;;  %v10100_v34 = vcombine.low %v2157_v22, %v2161_v23  ;;  %v10102_v37 = vcombine.low %v2158_v24, %v2162_v25 }
  0x2e   :  { %8722 = vmatpush1.bf16.msra.mxu0 %v10084_v18  ;;  %9050 = vmatpush1.bf16.msra.mxu1 %v10086_v19  ;;  %v2169_v31 = vld [vmem:[#allocation2 + $0x120] sm:$0xff]  ;;  %v2170_v33 = vld [vmem:[#allocation2 + $0x128] sm:$0xff] }
  0x2f   :  { %8723 = vmatprep.subr.bf16.mxu0 %v10093_v20  ;;  %9051 = vmatprep.subr.bf16.mxu1 %v10095_v21  ;;  %v11329_v35 = vld [vmem:[#allocation2 + $0x140] sm:$0xff]  ;;  %v10109_v38 = vcombine.high %v2165_v30, %v2169_v31  ;;  %v11333_v39 = vld [vmem:[#allocation2 + $0x148] sm:$0xff]  ;;  %v10111_v42 = vcombine.high %v2166_v32, %v2170_v33  ;;  %v10108_v49 = vcombine.low %v2165_v30, %v2169_v31 }
  0x30   :  { %v11331_v36 = vld [vmem:[#allocation2 + $0x160] sm:$0xff]  ;;  %v11335_v40 = vld [vmem:[#allocation2 + $0x168] sm:$0xff]  ;;  %v10110_v50 = vcombine.low %v2166_v32, %v2170_v33 }
  0x31   :  { %v11337_v41 = vld [vmem:[#allocation2 + $0x180] sm:$0xff]  ;;  %v11341_v44 = vld [vmem:[#allocation2 + $0x188] sm:$0xff]  ;;  %v10117_v51 = vcombine.high %v11329_v35, %v11331_v36  ;;  %v10119_v55 = vcombine.high %v11333_v39, %v11335_v40  ;;  %v10116_v56 = vcombine.low %v11329_v35, %v11331_v36  ;;  %v10118_v57 = vcombine.low %v11333_v39, %v11335_v40 }
  0x32   :  { %8724 = vmatpush1.bf16.msra.mxu0 %v10092_v26  ;;  %9052 = vmatpush1.bf16.msra.mxu1 %v10094_v27  ;;  %v11339_v43 = vld [vmem:[#allocation2 + $0x1a0] sm:$0xff]  ;;  %v11343_v45 = vld [vmem:[#allocation2 + $0x1a8] sm:$0xff] }
  0x33   :  { %8725 = vmatprep.subr.bf16.mxu0 %v10101_v28  ;;  %9053 = vmatprep.subr.bf16.mxu1 %v10103_v29  ;;  %v11345_v46 = vld [vmem:[#allocation2 + $0x1c0] sm:$0xff]  ;;  %v11349_v48 = vld [vmem:[#allocation2 + $0x1c8] sm:$0xff]  ;;  %v10125_v61 = vcombine.high %v11337_v41, %v11339_v43  ;;  %v10127_v62 = vcombine.high %v11341_v44, %v11343_v45  ;;  %v10124_v63 = vcombine.low %v11337_v41, %v11339_v43 }
  0x34   :  { %v11347_v47 = vld [vmem:[#allocation2 + $0x1e0] sm:$0xff]  ;;  %v11353_v52 = vld [vmem:[#allocation2 + $0x1e8] sm:$0xff]  ;;  %v10126_v0 = vcombine.low %v11341_v44, %v11343_v45 }
  0x35   :  { %v11355_v53 = vld [vmem:[#allocation2 + $0x200] sm:$0xff]  ;;  %v11365_v58 = vld [vmem:[#allocation2 + $0x208] sm:$0xff]  ;;  %v10133_v4 = vcombine.high %v11345_v46, %v11347_v47  ;;  %v10135_v5 = vcombine.high %v11349_v48, %v11353_v52  ;;  %v10132_v6 = vcombine.low %v11345_v46, %v11347_v47  ;;  %v10134_v7 = vcombine.low %v11349_v48, %v11353_v52 }
  0x36   :  { %8726 = vmatpush1.bf16.msra.mxu0 %v10100_v34  ;;  %v11357_v54 = vld [vmem:[#allocation2 + $0x220] sm:$0xff]  ;;  %9054 = vmatpush1.bf16.msra.mxu1 %v10102_v37  ;;  %v11367_v59 = vld [vmem:[#allocation2 + $0x228] sm:$0xff] }
  0x37   :  { %8727 = vmatprep.subr.bf16.mxu0 %v10109_v38  ;;  %v11369_v60 = vld [vmem:[#allocation2 + $0x240] sm:$0xff]  ;;  %9055 = vmatprep.subr.bf16.mxu1 %v10111_v42  ;;  %v11381_v2 = vld [vmem:[#allocation2 + $0x248] sm:$0xff]  ;;  %v10141_v10 = vcombine.high %v11355_v53, %v11357_v54  ;;  %v10143_v11 = vcombine.high %v11365_v58, %v11367_v59  ;;  %v10140_v12 = vcombine.low %v11355_v53, %v11357_v54 }
  0x38   :  { %v11379_v1 = vld [vmem:[#allocation2 + $0x260] sm:$0xff]  ;;  %v11383_v3 = vld [vmem:[#allocation2 + $0x268] sm:$0xff]  ;;  %v10142_v13 = vcombine.low %v11365_v58, %v11367_v59 }
  0x39   :  { %v11393_v8 = vld [vmem:[#allocation2 + $0x280] sm:$0xff]  ;;  %v10149_v14 = vcombine.high %v11369_v60, %v11379_v1  ;;  %v10151_v15 = vcombine.high %v11381_v2, %v11383_v3  ;;  %v10148_v16 = vcombine.low %v11369_v60, %v11379_v1  ;;  %v43_v17 = vld [vmem:[%s16825_s0 + $0x8] sm:$0xff]  ;;  %v10150_v19 = vcombine.low %v11381_v2, %v11383_v3 }
  0x3a   :  { %v11395_v9 = vld [vmem:[#allocation2 + $0x2a0] sm:$0xff]  ;;  %8728 = vmatpush1.bf16.msra.mxu0 %v10108_v49  ;;  %9056 = vmatpush1.bf16.msra.mxu1 %v10110_v50  ;;  %v59_v18 = vld [vmem:[%s16825_s0 + $0x88] sm:$0xff]  ;;  %v176_v24 = vrot.slane %v43_v17, 4 }
  0x3b   :  { %8729 = vmatprep.subr.bf16.mxu0 %v10117_v51  ;;  %9057 = vmatprep.subr.bf16.mxu1 %v10119_v55  ;;  %v10157_v20 = vcombine.high %v11393_v8, %v11395_v9  ;;  %v75_v21 = vld [vmem:[%s16825_s0 + $0x108] sm:$0xff]  ;;  %v272_v25 = vrot.slane %v59_v18, 4  ;;  %v10156_v26 = vcombine.low %v11393_v8, %v11395_v9 }
  0x3c   :  { %v91_v22 = vld [vmem:[%s16825_s0 + $0x188] sm:$0xff]  ;;  %v368_v30 = vrot.slane %v75_v21, 4  ;;  %v177_v33 = vadd.f32 %v176_v24, %v43_v17 }
  0x3d   :  { %v107_v23 = vld [vmem:[%s16825_s0 + $0x208] sm:$0xff]  ;;  %v464_v31 = vrot.slane %v91_v22, 4  ;;  %v273_v34 = vadd.f32 %v272_v25, %v59_v18 }
  0x3e   :  { %v123_v27 = vld [vmem:[%s16825_s0 + $0x288] sm:$0xff]  ;;  %v560_v32 = vrot.slane %v107_v23, 4  ;;  %8730 = vmatpush1.bf16.msra.mxu0 %v10116_v56  ;;  %9058 = vmatpush1.bf16.msra.mxu1 %v10118_v57  ;;  %v369_v37 = vadd.f32 %v368_v30, %v75_v21  ;;  %v178_v41 = vrot.slane %v177_v33, 2 }
  0x3f   :  { %v139_v28 = vld [vmem:[%s16825_s0 + $0x308] sm:$0xff]  ;;  %v656_v35 = vrot.slane %v123_v27, 4  ;;  %8731 = vmatprep.subr.bf16.mxu0 %v10125_v61  ;;  %v465_v38 = vadd.f32 %v464_v31, %v91_v22  ;;  %9059 = vmatprep.subr.bf16.mxu1 %v10127_v62  ;;  %v274_v42 = vrot.slane %v273_v34, 2 }
  0x40   :  { %v155_v29 = vld [vmem:[%s16825_s0 + $0x388] sm:$0xff]  ;;  %v752_v36 = vrot.slane %v139_v28, 4  ;;  %v561_v39 = vadd.f32 %v560_v32, %v107_v23  ;;  %v370_v45 = vrot.slane %v369_v37, 2  ;;  %v179_v55 = vadd.f32 %v178_v41, %v177_v33  ;;  %v11454_v33 = vld [vmem:[#allocation2 + $0x2c0] sm:$0xff] }
  0x41   :  { %v848_v40 = vrot.slane %v155_v29, 4  ;;  %v657_v43 = vadd.f32 %v656_v35, %v123_v27  ;;  %v466_v49 = vrot.slane %v465_v38, 2  ;;  %v275_v56 = vadd.f32 %v274_v42, %v273_v34  ;;  %v11441_v27 = vld [vmem:[#allocation2 + $0x288] sm:$0xff]  ;;  %v11456_v34 = vld [vmem:[#allocation2 + $0x2e0] sm:$0xff] }
  0x42   :  { %v753_v44 = vadd.f32 %v752_v36, %v139_v28  ;;  %v562_v50 = vrot.slane %v561_v39, 2  ;;  %8732 = vmatpush1.bf16.msra.mxu0 %v10124_v63  ;;  %9060 = vmatpush1.bf16.msra.mxu1 %v10126_v0  ;;  %v371_v57 = vadd.f32 %v370_v45, %v369_v37  ;;  %v180_v62 = vrot.slane %v179_v55, 1  ;;  %v11443_v28 = vld [vmem:[#allocation2 + $0x2a8] sm:$0xff] }
  0x43   :  { %v849_v51 = vadd.f32 %v848_v40, %v155_v29  ;;  %v658_v17 = vrot.slane %v657_v43, 2  ;;  %8733 = vmatprep.subr.bf16.mxu0 %v10133_v4  ;;  %v467_v61 = vadd.f32 %v466_v49, %v465_v38  ;;  %9061 = vmatprep.subr.bf16.mxu1 %v10135_v5  ;;  %v276_v23 = vrot.slane %v275_v56, 1  ;;  %v11463_v52 = vld [vmem:[#allocation2 + $0x2c8] sm:$0xff]  ;;  %v11473_v40 = vld [vmem:[#allocation2 + $0x320] sm:$0xff] }
  0x44   :  { %v754_v18 = vrot.slane %v753_v44, 2  ;;  %v563_v21 = vadd.f32 %v562_v50, %v561_v39  ;;  %v372_v63 = vrot.slane %v371_v57, 1  ;;  %v181_v0 = vadd.f32 %v180_v62, %v179_v55  ;;  %v11471_v39 = vld [vmem:[#allocation2 + $0x300] sm:$0xff]  ;;  %v11486_v45 = vld [vmem:[#allocation2 + $0x328] sm:$0xff] }
  0x45   :  { %v850_v22 = vrot.slane %v849_v51, 2  ;;  %v659_v24 = vadd.f32 %v658_v17, %v657_v43  ;;  %v468_v29 = vrot.slane %v467_v61, 1  ;;  %v277_v4 = vadd.f32 %v276_v23, %v275_v56  ;;  %v11506_v55 = vld [vmem:[#allocation2 + $0x340] sm:$0xff] }
  0x46   :  { %v755_v25 = vadd.f32 %v754_v18, %v753_v44  ;;  %v564_v30 = vrot.slane %v563_v21, 1  ;;  %8734 = vmatpush1.bf16.msra.mxu0 %v10132_v6  ;;  %9062 = vmatpush1.bf16.msra.mxu1 %v10134_v7  ;;  %v373_v35 = vadd.f32 %v372_v63, %v371_v57  ;;  %v10159_v48 = vcombine.high %v11441_v27, %v11443_v28  ;;  %v11465_v6 = vld [vmem:[#allocation2 + $0x2e8] sm:$0xff]  ;;  %v11508_v56 = vld [vmem:[#allocation2 + $0x360] sm:$0xff] }
  0x47   :  { %v851_v31 = vadd.f32 %v850_v22, %v849_v51  ;;  %v660_v32 = vrot.slane %v659_v24, 1  ;;  %8735 = vmatprep.subr.bf16.mxu0 %v10141_v10  ;;  %v469_v36 = vadd.f32 %v468_v29, %v467_v61  ;;  %9063 = vmatprep.subr.bf16.mxu1 %v10143_v11  ;;  %v11467_v37 = vmul.f32 0.125, %v181_v0  ;;  %v11484_v44 = vld [vmem:[#allocation2 + $0x308] sm:$0xff] }
  0x48   :  { %v756_v5 = vrot.slane %v755_v25, 1  ;;  %v565_v46 = vadd.f32 %v564_v30, %v563_v21  ;;  %v10158_v38 = vcombine.low %v11441_v27, %v11443_v28  ;;  %v11475_v41 = vmul.f32 0.125, %v277_v4  ;;  %v11531_v21 = vld [vmem:[#allocation2 + $0x380] sm:$0xff]  ;;  %v11546_v63 = vld [vmem:[#allocation2 + $0x3a8] sm:$0xff] }
  0x49   :  { %v852_v47 = vrot.slane %v851_v31, 1  ;;  %v661_v7 = vadd.f32 %v660_v32, %v659_v24  ;;  %17164 = vst [vmem:[#allocation8_spill] sm:$0xff] %v11467_v37  ;;  %v11477_v42 = vmul.f32 0.125, %v373_v35  ;;  %v10165_v43 = vcombine.high %v11454_v33, %v11456_v34  ;;  %v11542_v24 = vld [vmem:[#allocation2 + $0x3a0] sm:$0xff] }
  0x4a   :  { %v757_v10 = vadd.f32 %v756_v5, %v755_v25  ;;  %17165 = vst [vmem:[#allocation9_spill] sm:$0xff] %v11475_v41  ;;  %8736 = vmatpush1.bf16.msra.mxu0 %v10140_v12  ;;  %v11488_v49 = vmul.f32 0.125, %v469_v36  ;;  %v11490_v50 = vmul.f32 0.125, %v565_v46  ;;  %9064 = vmatpush1.bf16.msra.mxu1 %v10142_v13  ;;  %v10167_v53 = vcombine.high %v11463_v52, %v11465_v6  ;;  %v11519_v13 = vld [vmem:[#allocation2 + $0x348] sm:$0xff]  ;;  %v11566_v4 = vld [vmem:[#allocation2 + $0x3c0] sm:$0xff] }
  0x4b   :  { %v853_v11 = vadd.f32 %v852_v47, %v851_v31  ;;  %17166 = vst [vmem:[#allocation10_spill] sm:$0xff] %v11477_v42  ;;  %v11492_v51 = vmul.f32 0.125, %v661_v7  ;;  %8737 = vmatprep.subr.bf16.mxu0 %v10149_v14  ;;  %v10164_v54 = vcombine.low %v11454_v33, %v11456_v34  ;;  %v10166_v12 = vcombine.low %v11463_v52, %v11465_v6  ;;  %v11521_v14 = vld [vmem:[#allocation2 + $0x368] sm:$0xff]  ;;  %v11568_v32 = vld [vmem:[#allocation2 + $0x3e0] sm:$0xff] }
  0x4c   :  { %17167 = vst [vmem:[#allocation11_spill] sm:$0xff] %v11488_v49  ;;  %17168 = vst [vmem:[#allocation12_spill] sm:$0xff] %v11490_v50  ;;  %v11510_v17 = vmul.f32 0.125, %v757_v10  ;;  %9065 = vmatprep.subr.bf16.mxu1 %v10151_v15  ;;  %v10173_v58 = vcombine.high %v11471_v39, %v11473_v40  ;;  %v10172_v59 = vcombine.low %v11471_v39, %v11473_v40  ;;  %v11544_v25 = vld [vmem:[#allocation2 + $0x388] sm:$0xff]  ;;  %v42_v5 = vld [vmem:[%s16825_s0] sm:$0xff] }
  0x4d   :  { %17169 = vst [vmem:[#allocation13_spill] sm:$0xff] %v11492_v51  ;;  %v11523_v18 = vmul.f32 0.125, %v853_v11  ;;  %v2006_v57 = vpack.c.bf16 %v11467_v37, %v11467_v37  ;;  %v10175_v61 = vcombine.high %v11484_v44, %v11486_v45  ;;  %v10174_v15 = vcombine.low %v11484_v44, %v11486_v45  ;;  %v74_v7 = vld [vmem:[%s16825_s0 + $0x100] sm:$0xff]  ;;  %v2254_v44 = vld [vmem:[#allocation2 + $0x3c8] sm:$0xff] }
  0x4e   :  { %17170 = vst [vmem:[#allocation14_spill] sm:$0xff] %v11510_v17  ;;  %v2022_v22 = vpack.c.bf16 %v11475_v41, %v11475_v41  ;;  %v2038_v62 = vpack.c.bf16 %v11477_v42, %v11477_v42  ;;  %8738 = vmatpush1.bf16.msra.mxu0 %v10148_v16  ;;  %v10181_v23 = vcombine.high %v11506_v55, %v11508_v56  ;;  %v138_v33 = vld [vmem:[%s16825_s0 + $0x300] sm:$0xff]  ;;  %v2258_v45 = vld [vmem:[#allocation2 + $0x3e8] sm:$0xff] }
  0x4f   :  { %17171 = vst [vmem:[#allocation15_spill] sm:$0xff] %v11523_v18  ;;  %v2054_v29 = vpack.c.bf16 %v11488_v49, %v11488_v49  ;;  %v2070_v30 = vpack.c.bf16 %v11490_v50, %v11490_v50  ;;  %v2086_v31 = vpack.c.bf16 %v11492_v51, %v11492_v51  ;;  %9066 = vmatpush1.bf16.msra.mxu1 %v10150_v19  ;;  %v3328_v0 = vunpack.c.l.b16 %v2006_v57  ;;  %v154_v6 = vld [vmem:[%s16825_s0 + $0x380] sm:$0xff] }
  0x50   :  { %8739 = vmatprep.subr.bf16.mxu0 %v10157_v20  ;;  %v10183_v60 = vcombine.high %v11519_v13, %v11521_v14  ;;  %v10180_v1 = vcombine.low %v11506_v55, %v11508_v56  ;;  %v2102_v16 = vpack.c.bf16 %v11510_v17, %v11510_v17  ;;  %9067 = vmatprep.subr.bf16.mxu1 %v10159_v48  ;;  %v3344_v3 = vunpack.c.l.b16 %v2022_v22  ;;  %v58_v48 = vld [vmem:[%s16825_s0 + $0x80] sm:$0xff] }
  0x51   :  { %v2118_v2 = vpack.c.bf16 %v11523_v18, %v11523_v18  ;;  %v3360_v19 = vunpack.c.l.b16 %v2038_v62  ;;  %v3376_v20 = vunpack.c.l.b16 %v2054_v29  ;;  %v10182_v35 = vcombine.low %v11519_v13, %v11521_v14  ;;  %v90_v62 = vld [vmem:[%s16825_s0 + $0x180] sm:$0xff] }
  0x52   :  { %v10189_v36 = vcombine.high %v11531_v21, %v11542_v24  ;;  %v10191_v46 = vcombine.high %v11544_v25, %v11546_v63  ;;  %v3392_v47 = vunpack.c.l.b16 %v2070_v30  ;;  %8740 = vmatpush1.bf16.msra.mxu0 %v10156_v26  ;;  %v3408_v57 = vunpack.c.l.b16 %v2086_v31  ;;  %v106_v29 = vld [vmem:[%s16825_s0 + $0x200] sm:$0xff] }
  0x53   :  { %v3462_v22 = vsel %vm1323_vm0, %v3344_v3, %v3328_v0  ;;  %9068 = vmatpush1.bf16.msra.mxu1 %v10158_v38  ;;  %8741 = vmatprep.subr.bf16.mxu0 %v10165_v43  ;;  %v3424_v9 = vunpack.c.l.b16 %v2102_v16  ;;  %v122_v30 = vld [vmem:[%s16825_s0 + $0x280] sm:$0xff]  ;;  %v170_v31 = vrot.slane %v42_v5, 4  ;;  %v3440_v0 = vunpack.c.l.b16 %v2118_v2 }
  0x54   :  { %v3463_v26 = vsel %vm1325_vm1, %v3360_v19, %v3462_v22  ;;  %9069 = vmatprep.subr.bf16.mxu1 %v10167_v53  ;;  %v266_v28 = vrot.slane %v58_v48, 4  ;;  %v362_v38 = vrot.slane %v74_v7, 4  ;;  %v458_v11 = vrot.slane %v90_v62, 4  ;;  %v11666_v56 = vld [vmem:[#allocation2 + $0x400] sm:$0xff] }
  0x55   :  { %v3464_v27 = vsel %vm1327_vm2, %v3376_v20, %v3463_v26  ;;  %v171_v43 = vadd.f32 %v170_v31, %v42_v5  ;;  %v554_v10 = vrot.slane %v106_v29, 4  ;;  %v650_v8 = vrot.slane %v122_v30, 4 }
  0x56   :  { %v3465_v3 = vsel %vm1329_vm3, %v3392_v47, %v3464_v27  ;;  %8742 = vmatpush1.bf16.msra.mxu0 %v10164_v54  ;;  %v267_v19 = vadd.f32 %v266_v28, %v58_v48  ;;  %v363_v22 = vadd.f32 %v362_v38, %v74_v7  ;;  %v459_v54 = vadd.f32 %v458_v11, %v90_v62 }
  0x57   :  { %v3466_v16 = vsel %vm1331_vm4, %v3408_v57, %v3465_v3  ;;  %9070 = vmatpush1.bf16.msra.mxu1 %v10166_v12  ;;  %8743 = vmatprep.subr.bf16.mxu0 %v10173_v58  ;;  %v172_v34 = vrot.slane %v171_v43, 2  ;;  %v555_v2 = vadd.f32 %v554_v10, %v106_v29  ;;  %v651_v20 = vadd.f32 %v650_v8, %v122_v30 }
  0x58   :  { %v3467_v53 = vsel %vm1333_vm5, %v3424_v9, %v3466_v16  ;;  %9071 = vmatprep.subr.bf16.mxu1 %v10175_v61  ;;  %v268_v12 = vrot.slane %v267_v19, 2  ;;  %v364_v58 = vrot.slane %v363_v22, 2  ;;  %v460_v48 = vrot.slane %v459_v54, 2 }
  0x59   :  { %v3468_v52 = vsel %vm1335_vm6, %v3440_v0, %v3467_v53  ;;  %v173_v47 = vadd.f32 %v172_v34, %v171_v43  ;;  %v556_v7 = vrot.slane %v555_v2, 2  ;;  %v652_v11 = vrot.slane %v651_v20, 2 }
  0x5a   :  { %v11636_v5 = vpack.c.b16 %v3468_v52, %v3468_v52  ;;  %8744 = vmatpush1.bf16.msra.mxu0 %v10172_v59  ;;  %v269_v10 = vadd.f32 %v268_v12, %v267_v19  ;;  %v365_v61 = vadd.f32 %v364_v58, %v363_v22  ;;  %v746_v57 = vrot.slane %v138_v33, 4  ;;  %v11672_v19 = vld [vmem:[#allocation2 + $0x408] sm:$0xff] }
  0x5b   :  { %9072 = vmatpush1.bf16.msra.mxu1 %v10174_v15  ;;  %8745 = vmatprep.subr.bf16.mxu0 %v10181_v23  ;;  %v174_v62 = vrot.slane %v173_v47, 1  ;;  %v461_v29 = vadd.f32 %v460_v48, %v459_v54  ;;  %v557_v8 = vadd.f32 %v556_v7, %v555_v2  ;;  %v842_v9 = vrot.slane %v154_v6, 4 }
  0x5c   :  { %17172 = vst [vmem:[#allocation16_spill] sm:$0xff] %v11636_v5  ;;  %9073 = vmatprep.subr.bf16.mxu1 %v10183_v60  ;;  %8751 = vmatprep.mubr.bf16.mxu0 %v11636_v5  ;;  %v270_v39 = vrot.slane %v269_v10, 1  ;;  %v366_v40 = vrot.slane %v365_v61, 1  ;;  %v653_v59 = vadd.f32 %v652_v11, %v651_v20  ;;  %v747_v26 = vadd.f32 %v746_v57, %v138_v33 }
  0x5d   :  { %9079 = vmatprep.mubr.bf16.mxu1 %v11636_v5  ;;  %v175_v15 = vadd.f32 %v174_v62, %v173_v47  ;;  %v462_v23 = vrot.slane %v461_v29, 1  ;;  %v558_v30 = vrot.slane %v557_v8, 1  ;;  %v843_v31 = vadd.f32 %v842_v9, %v154_v6 }
  0x5e   :  { %8746 = vmatpush1.bf16.msra.mxu0 %v10180_v1  ;;  %v271_v0 = vadd.f32 %v270_v39, %v269_v10  ;;  %v367_v60 = vadd.f32 %v366_v40, %v365_v61  ;;  %v654_v27 = vrot.slane %v653_v59, 1  ;;  %v748_v28 = vrot.slane %v747_v26, 2  ;;  %v11668_v1 = vld [vmem:[#allocation2 + $0x420] sm:$0xff] }
  0x5f   :  { %9074 = vmatpush1.bf16.msra.mxu1 %v10182_v35  ;;  %8747 = vmatprep.subr.bf16.mxu0 %v10189_v36  ;;  %v463_v38 = vadd.f32 %v462_v23, %v461_v29  ;;  %v559_v3 = vadd.f32 %v558_v30, %v557_v8  ;;  %v844_v43 = vrot.slane %v843_v31, 2  ;;  %v11661_v16 = vmul.f32 0.125, %v175_v15  ;;  %v11674_v36 = vld [vmem:[#allocation2 + $0x428] sm:$0xff] }
  0x60   :  { %9075 = vmatprep.subr.bf16.mxu1 %v10191_v46  ;;  %v10199_v55 = vcombine.high %v2254_v44, %v2258_v45  ;;  %v655_v13 = vadd.f32 %v654_v27, %v653_v59  ;;  %v749_v14 = vadd.f32 %v748_v28, %v747_v26  ;;  %v11670_v35 = vmul.f32 0.125, %v271_v0  ;;  %v2270_v27 = vld [vmem:[#allocation2 + $0x448] sm:$0xff] }
  0x61   :  { %17173 = vst [vmem:[#allocation17_spill] sm:$0xff] %v11661_v16  ;;  %v845_v22 = vadd.f32 %v844_v43, %v843_v31  ;;  %v11676_v53 = vmul.f32 0.125, %v367_v60  ;;  %v11678_v33 = vmul.f32 0.125, %v463_v38  ;;  %v17177_v46 = vcombine.low %v11531_v21, %v11542_v24  ;;  %v2269_v31 = vld [vmem:[#allocation2 + $0x440] sm:$0xff]  ;;  %v2274_v28 = vld [vmem:[#allocation2 + $0x468] sm:$0xff] }
  0x62   :  { %17174 = vst [vmem:[#allocation18_spill] sm:$0xff] %v11670_v35  ;;  %v10196_v34 = vcombine.low %v11566_v4, %v11568_v32  ;;  %v750_v54 = vrot.slane %v749_v14, 1  ;;  %v11685_v2 = vmul.f32 0.125, %v559_v3  ;;  %v11687_v52 = vmul.f32 0.125, %v655_v13  ;;  %v2273_v60 = vld [vmem:[#allocation2 + $0x460] sm:$0xff] }
  0x63   :  { %17175 = vst [vmem:[#allocation19_spill] sm:$0xff] %v11676_v53  ;;  %17176 = vst [vmem:[#allocation20_spill] sm:$0xff] %v11678_v33  ;;  %8748 = vmatpush1.bf16.msra.mxu0 %v17177_v46  ;;  %v17180_v6 = vcombine.low %v11544_v25, %v11546_v63  ;;  %v17181_v12 = vcombine.high %v11566_v4, %v11568_v32  ;;  %v10198_v58 = vcombine.low %v2254_v44, %v2258_v45  ;;  %v11725_v3 = vld [vmem:[#allocation2 + $0x480] sm:$0xff]  ;;  %v11736_v46 = vld [vmem:[#allocation2 + $0x4a8] sm:$0xff] }
  0x64   :  { %17178 = vst [vmem:[#allocation21_spill] sm:$0xff] %v11685_v2  ;;  %17179 = vst [vmem:[#allocation22_spill] sm:$0xff] %v11687_v52  ;;  %v10205_v21 = vcombine.high %v11666_v56, %v11668_v1  ;;  %v846_v24 = vrot.slane %v845_v22, 1  ;;  %v2005_v20 = vpack.c.bf16 %v11661_v16, %v11661_v16  ;;  %v10207_v47 = vcombine.high %v11672_v19, %v11674_v36  ;;  %v11727_v43 = vld [vmem:[#allocation2 + $0x4a0] sm:$0xff] }
  0x65   :  { %9076 = vmatpush1.bf16.msra.mxu1 %v17180_v6  ;;  %8749 = vmatprep.subr.bf16.mxu0 %v17181_v12  ;;  %v751_v48 = vadd.f32 %v750_v54, %v749_v14  ;;  %v2021_v25 = vpack.c.bf16 %v11670_v35, %v11670_v35  ;;  %v2037_v4 = vpack.c.bf16 %v11676_v53, %v11676_v53  ;;  %v11740_v54 = vld [vmem:[#allocation2 + $0x4e0] sm:$0xff] }
  0x66   :  { %9077 = vmatprep.subr.bf16.mxu1 %v10199_v55  ;;  %v847_v63 = vadd.f32 %v846_v24, %v845_v22  ;;  %v2053_v32 = vpack.c.bf16 %v11678_v33, %v11678_v33  ;;  %v2069_v10 = vpack.c.bf16 %v11685_v2, %v11685_v2  ;;  %v2085_v61 = vpack.c.bf16 %v11687_v52, %v11687_v52  ;;  %v11729_v55 = vld [vmem:[#allocation2 + $0x488] sm:$0xff] }
  0x67   :  { %8750 = vmatpush1.bf16.msra.mxu0 %v10196_v34  ;;  %v11707_v7 = vmul.f32 0.125, %v751_v48  ;;  %v3327_v57 = vunpack.c.l.b16 %v2005_v20  ;;  %v3343_v62 = vunpack.c.l.b16 %v2021_v25  ;;  %v3359_v8 = vunpack.c.l.b16 %v2037_v4  ;;  %v11738_v34 = vld [vmem:[#allocation2 + $0x4c0] sm:$0xff]  ;;  %v11746_v24 = vld [vmem:[#allocation2 + $0x4e8] sm:$0xff] }
  0x68   :  { %8760 = vmatprep.subr.bf16.mxu0 %v10205_v21  ;;  %v11713_v11 = vmul.f32 0.125, %v847_v63  ;;  %v3375_v39 = vunpack.c.l.b16 %v2053_v32  ;;  %v3391_v40 = vunpack.c.l.b16 %v2069_v10  ;;  %v3407_v59 = vunpack.c.l.b16 %v2085_v61  ;;  %v11744_v21 = vld [vmem:[#allocation2 + $0x4c8] sm:$0xff]  ;;  %v11758_v48 = vld [vmem:[#allocation2 + $0x540] sm:$0xff] }
  0x69   :  { %17182 = vst [vmem:[#allocation23_spill] sm:$0xff] %v11707_v7  ;;  %9078 = vmatpush1.bf16.msra.mxu1 %v10198_v58  ;;  %v2101_v29 = vpack.c.bf16 %v11707_v7, %v11707_v7  ;;  %v3455_v26 = vsel %vm1323_vm0, %v3343_v62, %v3327_v57  ;;  %v10204_v13 = vcombine.low %v11666_v56, %v11668_v1  ;;  %v11748_v56 = vld [vmem:[#allocation2 + $0x500] sm:$0xff]  ;;  %v11762_v63 = vld [vmem:[#allocation2 + $0x548] sm:$0xff] }
  0x6a   :  { %17183 = vst [vmem:[#allocation24_spill] sm:$0xff] %v11713_v11  ;;  %9088 = vmatprep.subr.bf16.mxu1 %v10207_v47  ;;  %v2117_v9 = vpack.c.bf16 %v11713_v11, %v11713_v11  ;;  %v3456_v45 = vsel %vm1325_vm1, %v3359_v8, %v3455_v26  ;;  %v10206_v14 = vcombine.low %v11672_v19, %v11674_v36  ;;  %v11750_v1 = vld [vmem:[#allocation2 + $0x520] sm:$0xff]  ;;  %v11752_v19 = vld [vmem:[#allocation2 + $0x508] sm:$0xff] }
  0x6b   :  { %v3423_v44 = vunpack.c.l.b16 %v2101_v29  ;;  %v3457_v23 = vsel %vm1327_vm2, %v3375_v39, %v3456_v45  ;;  %v10213_v12 = vcombine.high %v2269_v31, %v2273_v60  ;;  %v10215_v58 = vcombine.high %v2270_v27, %v2274_v28  ;;  %v11754_v36 = vld [vmem:[#allocation2 + $0x528] sm:$0xff]  ;;  %v11760_v25 = vld [vmem:[#allocation2 + $0x560] sm:$0xff] }
  0x6c   :  { %v3439_v15 = vunpack.c.l.b16 %v2117_v9  ;;  %v3458_v30 = vsel %vm1329_vm3, %v3391_v40, %v3457_v23  ;;  %v10212_v20 = vcombine.low %v2269_v31, %v2273_v60  ;;  %v10214_v47 = vcombine.low %v2270_v27, %v2274_v28  ;;  %v11770_v61 = vld [vmem:[#allocation2 + $0x568] sm:$0xff]  ;;  %v11772_v57 = vld [vmem:[#allocation2 + $0x580] sm:$0xff] }
  0x6d   :  { %v3459_v0 = vsel %vm1331_vm4, %v3407_v59, %v3458_v30  ;;  %v10220_v4 = vcombine.low %v11725_v3, %v11727_v43  ;;  %v10221_v32 = vcombine.high %v11725_v3, %v11727_v43  ;;  %v10222_v10 = vcombine.low %v11729_v55, %v11736_v46  ;;  %v11774_v62 = vld [vmem:[#allocation2 + $0x5a0] sm:$0xff]  ;;  %v11782_v39 = vld [vmem:[#allocation2 + $0x588] sm:$0xff]  ;;  %v45_v3 = vld [vmem:[%s16825_s0 + $0x18] sm:$0xff] }
  0x6e   :  { %v3460_v38 = vsel %vm1333_vm5, %v3423_v44, %v3459_v0  ;;  %v10223_v29 = vcombine.high %v11729_v55, %v11736_v46  ;;  %v10229_v9 = vcombine.high %v11738_v34, %v11740_v54  ;;  %v11784_v40 = vld [vmem:[#allocation2 + $0x5a8] sm:$0xff]  ;;  %v11786_v59 = vld [vmem:[#allocation2 + $0x5c0] sm:$0xff]  ;;  %v10231_v44 = vcombine.high %v11744_v21, %v11746_v24  ;;  %v61_v43 = vld [vmem:[%s16825_s0 + $0x98] sm:$0xff] }
  0x6f   :  { %v3461_v22 = vsel %vm1335_vm6, %v3439_v15, %v3460_v38  ;;  %v11796_v23 = vld [vmem:[#allocation2 + $0x5e0] sm:$0xff]  ;;  %v11798_v30 = vld [vmem:[#allocation2 + $0x5c8] sm:$0xff]  ;;  %v10239_v60 = vcombine.high %v11752_v19, %v11754_v36  ;;  %v77_v55 = vld [vmem:[%s16825_s0 + $0x118] sm:$0xff]  ;;  %v284_v28 = vrot.slane %v61_v43, 4  ;;  %v17185_v15 = vcombine.low %v11738_v34, %v11740_v54 }
  0x70   :  { %v11742_v6 = vpack.c.b16 %v3461_v22, %v3461_v22  ;;  %v11800_v31 = vld [vmem:[#allocation2 + $0x5e8] sm:$0xff]  ;;  %v11810_v38 = vld [vmem:[#allocation2 + $0x600] sm:$0xff]  ;;  %v188_v22 = vrot.slane %v45_v3, 4  ;;  %v380_v0 = vrot.slane %v77_v55, 4 }
  0x71   :  { %v11827_v46 = vld [vmem:[#allocation2 + $0x620] sm:$0xff]  ;;  %v11843_v27 = vld [vmem:[#allocation2 + $0x628] sm:$0xff] }
  0x72   :  { %17184 = vst [vmem:[#allocation25_spill] sm:$0xff] %v11742_v6  ;;  %8752 = vmatmul.mubr.bf16.vlgmr.msra.gmra.mrb[0].mxu0 %v11742_v6  ;;  %9080 = vmatmul.mubr.bf16.vlgmr.msra.gmra.mrb[0].mxu1 %v11742_v6 }
  0x73   :  { %8761 = vmatpush1.bf16.msra.mxu0 %v10204_v13  ;;  %9089 = vmatpush1.bf16.msra.mxu1 %v10206_v14  ;;  %v11841_v13 = vld [vmem:[#allocation2 + $0x608] sm:$0xff]  ;;  %v125_v14 = vld [vmem:[%s16825_s0 + $0x298] sm:$0xff] }
  0x74   :  { %8762 = vmatprep.subr.bf16.mxu0 %v10213_v12  ;;  %9090 = vmatprep.subr.bf16.mxu1 %v10215_v58  ;;  %v93_v12 = vld [vmem:[%s16825_s0 + $0x198] sm:$0xff]  ;;  %v668_v7 = vrot.slane %v125_v14, 4 }
  0x75   :  { %v109_v58 = vld [vmem:[%s16825_s0 + $0x218] sm:$0xff]  ;;  %v476_v26 = vrot.slane %v93_v12, 4 }
  0x76   :  { %v572_v8 = vrot.slane %v109_v58, 4  ;;  %v669_v45 = vadd.f32 %v668_v7, %v125_v14  ;;  %v17189_v14 = vcombine.low %v11752_v19, %v11754_v36 }
  0x77   :  { %8763 = vmatpush1.bf16.msra.mxu0 %v10212_v20  ;;  %9091 = vmatpush1.bf16.msra.mxu1 %v10214_v47  ;;  %v11852_v20 = vld [vmem:[#allocation2 + $0x660] sm:$0xff]  ;;  %v141_v47 = vld [vmem:[%s16825_s0 + $0x318] sm:$0xff]  ;;  %v477_v17 = vadd.f32 %v476_v26, %v93_v12 }
  0x78   :  { %8764 = vmatprep.subr.bf16.mxu0 %v10221_v32  ;;  %9092 = vmatprep.subr.bf16.mxu1 %v10223_v29  ;;  %v11850_v29 = vld [vmem:[#allocation2 + $0x640] sm:$0xff]  ;;  %v764_v11 = vrot.slane %v141_v47, 4  ;;  %v189_v32 = vadd.f32 %v188_v22, %v45_v3  ;;  %v573_v52 = vadd.f32 %v572_v8, %v109_v58 }
  0x79   :  { %v10277_v18 = vcombine.high %v11850_v29, %v11852_v20  ;;  %v478_v8 = vrot.slane %v477_v17, 2 }
  0x7a   :  { %v765_v51 = vadd.f32 %v764_v11, %v141_v47  ;;  %v190_v2 = vrot.slane %v189_v32, 2  ;;  %v574_v7 = vrot.slane %v573_v52, 2  ;;  %v670_v11 = vrot.slane %v669_v45, 2 }
  0x7b   :  { %8765 = vmatpush1.bf16.msra.mxu0 %v10220_v4  ;;  %9093 = vmatpush1.bf16.msra.mxu1 %v10222_v10  ;;  %v157_v10 = vld [vmem:[%s16825_s0 + $0x398] sm:$0xff]  ;;  %v17186_v4 = vcombine.low %v11744_v21, %v11746_v24  ;;  %v479_v3 = vadd.f32 %v478_v8, %v477_v17  ;;  %v17191_v17 = vcombine.high %v11762_v63, %v11770_v61 }
  0x7c   :  { %8766 = vmatprep.subr.bf16.mxu0 %v10229_v9  ;;  %9094 = vmatprep.subr.bf16.mxu1 %v10231_v44  ;;  %v285_v9 = vadd.f32 %v284_v28, %v61_v43  ;;  %v381_v44 = vadd.f32 %v380_v0, %v77_v55  ;;  %v860_v53 = vrot.slane %v157_v10, 4  ;;  %v17187_v28 = vcombine.high %v11748_v56, %v11750_v1 }
  0x7d   :  { %v766_v26 = vrot.slane %v765_v51, 2  ;;  %v191_v0 = vadd.f32 %v190_v2, %v189_v32  ;;  %v575_v21 = vadd.f32 %v574_v7, %v573_v52  ;;  %v671_v24 = vadd.f32 %v670_v11, %v669_v45  ;;  %v11899_v52 = vld [vmem:[#allocation2 + $0x648] sm:$0xff]  ;;  %v11905_v32 = vld [vmem:[#allocation2 + $0x6a0] sm:$0xff] }
  0x7e   :  { %v286_v33 = vrot.slane %v285_v9, 2  ;;  %v382_v50 = vrot.slane %v381_v44, 2  ;;  %v17188_v55 = vcombine.low %v11748_v56, %v11750_v1  ;;  %v11901_v56 = vld [vmem:[#allocation2 + $0x668] sm:$0xff]  ;;  %v11903_v1 = vld [vmem:[#allocation2 + $0x680] sm:$0xff]  ;;  %v17192_v7 = vcombine.low %v11758_v48, %v11760_v25 }
  0x7f   :  { %8767 = vmatpush1.bf16.msra.mxu0 %v17185_v15  ;;  %9095 = vmatpush1.bf16.msra.mxu1 %v17186_v4  ;;  %v861_v15 = vadd.f32 %v860_v53, %v157_v10  ;;  %v767_v43 = vadd.f32 %v766_v26, %v765_v51  ;;  %v480_v51 = vrot.slane %v479_v3, 1  ;;  %v576_v53 = vrot.slane %v575_v21, 1  ;;  %v11907_v4 = vld [vmem:[#allocation2 + $0x688] sm:$0xff]  ;;  %v11917_v26 = vld [vmem:[#allocation2 + $0x6c0] sm:$0xff] }
  0x80   :  { %8768 = vmatprep.subr.bf16.mxu0 %v17187_v28  ;;  %9096 = vmatprep.subr.bf16.mxu1 %v10239_v60  ;;  %v287_v34 = vadd.f32 %v286_v33, %v285_v9  ;;  %v383_v54 = vadd.f32 %v382_v50, %v381_v44  ;;  %v192_v60 = vrot.slane %v191_v0, 1  ;;  %v17190_v50 = vcombine.high %v11758_v48, %v11760_v25  ;;  %v11909_v10 = vld [vmem:[#allocation2 + $0x6a8] sm:$0xff] }
  0x81   :  { %v862_v58 = vrot.slane %v861_v15, 2  ;;  %v672_v33 = vrot.slane %v671_v24, 1  ;;  %v768_v2 = vrot.slane %v767_v43, 1  ;;  %v481_v9 = vadd.f32 %v480_v51, %v479_v3 }
  0x82   :  { %v288_v22 = vrot.slane %v287_v34, 1  ;;  %v384_v12 = vrot.slane %v383_v54, 1  ;;  %v193_v19 = vadd.f32 %v192_v60, %v191_v0  ;;  %v577_v44 = vadd.f32 %v576_v53, %v575_v21  ;;  %v11919_v0 = vld [vmem:[#allocation2 + $0x6e0] sm:$0xff] }
  0x83   :  { %8769 = vmatpush1.bf16.msra.mxu0 %v17188_v55  ;;  %9097 = vmatpush1.bf16.msra.mxu1 %v17189_v14  ;;  %v863_v47 = vadd.f32 %v862_v58, %v861_v15  ;;  %v673_v28 = vadd.f32 %v672_v33, %v671_v24  ;;  %v769_v8 = vadd.f32 %v768_v2, %v767_v43  ;;  %v11964_v33 = vld [vmem:[#allocation2 + $0x6c8] sm:$0xff] }
  0x84   :  { %8770 = vmatprep.subr.bf16.mxu0 %v17190_v50  ;;  %9098 = vmatprep.subr.bf16.mxu1 %v17191_v17  ;;  %v289_v36 = vadd.f32 %v288_v22, %v287_v34  ;;  %v385_v45 = vadd.f32 %v384_v12, %v383_v54  ;;  %v17193_v11 = vcombine.low %v11762_v63, %v11770_v61  ;;  %v11921_v54 = vmul.f32 0.125, %v193_v19  ;;  %v44_v17 = vld [vmem:[%s16825_s0 + $0x10] sm:$0xff] }
  0x85   :  { %v864_v34 = vrot.slane %v863_v47, 1  ;;  %v17197_v21 = vcombine.high %v11772_v57, %v11774_v62  ;;  %v17198_v48 = vcombine.high %v11782_v39, %v11784_v40  ;;  %v11935_v63 = vmul.f32 0.125, %v481_v9 }
  0x86   :  { %17194 = vst [vmem:[#allocation26_spill] sm:$0xff] %v11921_v54  ;;  %v11923_v15 = vmul.f32 0.125, %v289_v36  ;;  %v11925_v3 = vmul.f32 0.125, %v385_v45  ;;  %v11937_v61 = vmul.f32 0.125, %v577_v44  ;;  %v11939_v24 = vmul.f32 0.125, %v673_v28 }
  0x87   :  { %8771 = vmatpush1.bf16.msra.mxu0 %v17192_v7  ;;  %9099 = vmatpush1.bf16.msra.mxu1 %v17193_v11  ;;  %17199 = vst [vmem:[#allocation29_spill] sm:$0xff] %v11935_v63  ;;  %v10279_v43 = vcombine.high %v11899_v52, %v11901_v56  ;;  %v865_v14 = vadd.f32 %v864_v34, %v863_v47  ;;  %v11945_v60 = vmul.f32 0.125, %v769_v8  ;;  %v11984_v47 = vld [vmem:[#allocation2 + $0x720] sm:$0xff]  ;;  %v60_v34 = vld [vmem:[%s16825_s0 + $0x90] sm:$0xff] }
  0x88   :  { %17195 = vst [vmem:[#allocation27_spill] sm:$0xff] %v11923_v15  ;;  %17196 = vst [vmem:[#allocation28_spill] sm:$0xff] %v11925_v3  ;;  %8772 = vmatprep.subr.bf16.mxu0 %v17197_v21  ;;  %9100 = vmatprep.subr.bf16.mxu1 %v17198_v48  ;;  %v17203_v51 = vcombine.low %v11772_v57, %v11774_v62  ;;  %v17204_v53 = vcombine.low %v11782_v39, %v11784_v40  ;;  %v11980_v39 = vld [vmem:[#allocation2 + $0x6e8] sm:$0xff]  ;;  %v11982_v40 = vld [vmem:[#allocation2 + $0x700] sm:$0xff]  ;;  %v182_v21 = vrot.slane %v44_v17, 4 }
  0x89   :  { %17200 = vst [vmem:[#allocation30_spill] sm:$0xff] %v11937_v61  ;;  %17201 = vst [vmem:[#allocation31_spill] sm:$0xff] %v11939_v24  ;;  %v11966_v2 = vmul.f32 0.125, %v865_v14  ;;  %v2008_v19 = vpack.c.bf16 %v11921_v54, %v11921_v54  ;;  %v2024_v36 = vpack.c.bf16 %v11923_v15, %v11923_v15  ;;  %v2040_v45 = vpack.c.bf16 %v11925_v3, %v11925_v3  ;;  %v92_v48 = vld [vmem:[%s16825_s0 + $0x190] sm:$0xff]  ;;  %v12271_v3 = vld [vmem:[#allocation2 + $0xa28] sm:$0xff] }
  0x8a   :  { %17202 = vst [vmem:[#allocation32_spill] sm:$0xff] %v11945_v60  ;;  %v17206_v57 = vcombine.high %v11786_v59, %v11796_v23  ;;  %v17207_v62 = vcombine.high %v11798_v30, %v11800_v31  ;;  %v2056_v9 = vpack.c.bf16 %v11935_v63, %v11935_v63  ;;  %v2072_v44 = vpack.c.bf16 %v11937_v61, %v11937_v61  ;;  %v95_v61 = vld [vmem:[%s16825_s0 + $0x1a8] sm:$0xff]  ;;  %v12284_v15 = vld [vmem:[#allocation2 + $0xa40] sm:$0xff] }
  0x8b   :  { %8773 = vmatpush1.bf16.msra.mxu0 %v17203_v51  ;;  %9101 = vmatpush1.bf16.msra.mxu1 %v17204_v53  ;;  %17205 = vst [vmem:[#allocation33_spill] sm:$0xff] %v11966_v2  ;;  %v2088_v28 = vpack.c.bf16 %v11939_v24, %v11939_v24  ;;  %v2104_v8 = vpack.c.bf16 %v11945_v60, %v11945_v60  ;;  %v3330_v11 = vunpack.c.l.b16 %v2008_v19  ;;  %v3346_v14 = vunpack.c.l.b16 %v2024_v36  ;;  %v12255_v24 = vld [vmem:[#allocation2 + $0xa20] sm:$0xff]  ;;  %v12269_v63 = vld [vmem:[#allocation2 + $0xa08] sm:$0xff] }
  0x8c   :  { %8774 = vmatprep.subr.bf16.mxu0 %v17206_v57  ;;  %9102 = vmatprep.subr.bf16.mxu1 %v17207_v62  ;;  %v2120_v7 = vpack.c.bf16 %v11966_v2, %v11966_v2  ;;  %v3362_v51 = vunpack.c.l.b16 %v2040_v45  ;;  %v3378_v53 = vunpack.c.l.b16 %v2056_v9  ;;  %v76_v57 = vld [vmem:[%s16825_s0 + $0x110] sm:$0xff]  ;;  %v17208_v62 = vcombine.low %v11786_v59, %v11796_v23  ;;  %v12244_v2 = vld [vmem:[#allocation2 + $0x9e8] sm:$0xff] }
  0x8d   :  { %v17209_v19 = vcombine.low %v11798_v30, %v11800_v31  ;;  %v3394_v9 = vunpack.c.l.b16 %v2072_v44  ;;  %v108_v59 = vld [vmem:[%s16825_s0 + $0x210] sm:$0xff]  ;;  %v17210_v23 = vcombine.high %v11810_v38, %v11827_v46  ;;  %v17211_v30 = vcombine.high %v11841_v13, %v11843_v27  ;;  %v127_v54 = vld [vmem:[%s16825_s0 + $0x2a8] sm:$0xff] }
  0x8e   :  { %v3410_v31 = vunpack.c.l.b16 %v2088_v28  ;;  %v3476_v44 = vsel %vm1323_vm0, %v3346_v14, %v3330_v11  ;;  %v278_v45 = vrot.slane %v60_v34, 4  ;;  %v3442_v50 = vunpack.c.l.b16 %v2120_v7 }
  0x8f   :  { %8775 = vmatpush1.bf16.msra.mxu0 %v17208_v62  ;;  %9103 = vmatpush1.bf16.msra.mxu1 %v17209_v19  ;;  %v3426_v62 = vunpack.c.l.b16 %v2104_v8  ;;  %v124_v19 = vld [vmem:[%s16825_s0 + $0x290] sm:$0xff]  ;;  %v3477_v36 = vsel %vm1325_vm1, %v3362_v51, %v3476_v44  ;;  %v183_v12 = vadd.f32 %v182_v21, %v44_v17  ;;  %v374_v55 = vrot.slane %v76_v57, 4 }
  0x90   :  { %8776 = vmatprep.subr.bf16.mxu0 %v17210_v23  ;;  %9104 = vmatprep.subr.bf16.mxu1 %v17211_v30  ;;  %v3478_v23 = vsel %vm1327_vm2, %v3378_v53, %v3477_v36  ;;  %v279_v58 = vadd.f32 %v278_v45, %v60_v34  ;;  %v470_v22 = vrot.slane %v92_v48, 4  ;;  %v566_v25 = vrot.slane %v108_v59, 4 }
  0x91   :  { %v17212_v28 = vcombine.low %v11810_v38, %v11827_v46  ;;  %v17213_v8 = vcombine.low %v11841_v13, %v11843_v27  ;;  %v3479_v11 = vsel %vm1329_vm3, %v3394_v9, %v3478_v23  ;;  %v184_v7 = vrot.slane %v183_v12, 2  ;;  %v140_v13 = vld [vmem:[%s16825_s0 + $0x310] sm:$0xff] }
  0x92   :  { %v375_v14 = vadd.f32 %v374_v55, %v76_v57  ;;  %v662_v51 = vrot.slane %v124_v19, 4  ;;  %v3480_v38 = vsel %vm1331_vm4, %v3410_v31, %v3479_v11  ;;  %v280_v46 = vrot.slane %v279_v58, 2 }
  0x93   :  { %8777 = vmatpush1.bf16.msra.mxu0 %v17212_v28  ;;  %9105 = vmatpush1.bf16.msra.mxu1 %v17213_v8  ;;  %v471_v17 = vadd.f32 %v470_v22, %v92_v48  ;;  %v567_v34 = vadd.f32 %v566_v25, %v108_v59  ;;  %v3481_v27 = vsel %vm1333_vm5, %v3426_v62, %v3480_v38  ;;  %v758_v31 = vrot.slane %v140_v13, 4  ;;  %v2358_v62 = vld [vmem:[#allocation2 + $0x708] sm:$0xff] }
  0x94   :  { %8778 = vmatprep.subr.bf16.mxu0 %v10277_v18  ;;  %9106 = vmatprep.subr.bf16.mxu1 %v10279_v43  ;;  %v185_v55 = vadd.f32 %v184_v7, %v183_v12  ;;  %v376_v21 = vrot.slane %v375_v14, 2  ;;  %v663_v53 = vadd.f32 %v662_v51, %v124_v19  ;;  %v3482_v18 = vsel %vm1335_vm6, %v3442_v50, %v3481_v27  ;;  %v156_v43 = vld [vmem:[%s16825_s0 + $0x390] sm:$0xff] }
  0x95   :  { %v281_v57 = vadd.f32 %v280_v46, %v279_v58  ;;  %v472_v36 = vrot.slane %v471_v17, 2  ;;  %v568_v45 = vrot.slane %v567_v34, 2  ;;  %v17214_v25 = vcombine.low %v11850_v29, %v11852_v20 }
  0x96   :  { %v17215_v22 = vcombine.low %v11899_v52, %v11901_v56  ;;  %v12062_v12 = vpack.c.b16 %v3482_v18, %v3482_v18  ;;  %v186_v48 = vrot.slane %v185_v55, 1  ;;  %v377_v9 = vadd.f32 %v376_v21, %v375_v14  ;;  %v2362_v52 = vld [vmem:[#allocation2 + $0x728] sm:$0xff] }
  0x97   :  { %8779 = vmatpush1.bf16.msra.mxu0 %v17214_v25  ;;  %v664_v50 = vrot.slane %v663_v53, 2  ;;  %v17217_v59 = vcombine.high %v11903_v1, %v11905_v32  ;;  %v17218_v58 = vcombine.high %v11907_v4, %v11909_v10  ;;  %v282_v30 = vrot.slane %v281_v57, 1  ;;  %v2370_v18 = vld [vmem:[#allocation2 + $0x768] sm:$0xff] }
  0x98   :  { %9107 = vmatpush1.bf16.msra.mxu1 %v17215_v22  ;;  %17216 = vst [vmem:[#allocation34_spill] sm:$0xff] %v12062_v12  ;;  %v473_v20 = vadd.f32 %v472_v36, %v471_v17  ;;  %v569_v29 = vadd.f32 %v568_v45, %v567_v34  ;;  %8792 = vmatprep.mubr.bf16.mxu0 %v12062_v12  ;;  %v378_v44 = vrot.slane %v377_v9, 1  ;;  %v854_v23 = vrot.slane %v156_v43, 4 }
  0x99   :  { %8780 = vmatprep.subr.bf16.mxu0 %v17217_v59  ;;  %9108 = vmatprep.subr.bf16.mxu1 %v17218_v58  ;;  %v187_v56 = vadd.f32 %v186_v48, %v185_v55  ;;  %v665_v19 = vadd.f32 %v664_v50, %v663_v53  ;;  %v283_v28 = vadd.f32 %v282_v30, %v281_v57 }
  0x9a   :  { %9120 = vmatprep.mubr.bf16.mxu1 %v12062_v12  ;;  %v474_v8 = vrot.slane %v473_v20, 1  ;;  %v570_v11 = vrot.slane %v569_v29, 1  ;;  %v759_v7 = vadd.f32 %v758_v31, %v140_v13  ;;  %v17219_v14 = vcombine.low %v11903_v1, %v11905_v32  ;;  %v2365_v1 = vld [vmem:[#allocation2 + $0x740] sm:$0xff] }
  0x9b   :  { %v17220_v51 = vcombine.low %v11907_v4, %v11909_v10  ;;  %v379_v38 = vadd.f32 %v378_v44, %v377_v9  ;;  %v666_v46 = vrot.slane %v665_v19, 1  ;;  %v855_v17 = vadd.f32 %v854_v23, %v156_v43  ;;  %v2369_v4 = vld [vmem:[#allocation2 + $0x760] sm:$0xff]  ;;  %v2366_v10 = vld [vmem:[#allocation2 + $0x748] sm:$0xff] }
  0x9c   :  { %8781 = vmatpush1.bf16.msra.mxu0 %v17219_v14  ;;  %v12078_v34 = vmul.f32 0.125, %v187_v56  ;;  %v17222_v27 = vcombine.high %v11917_v26, %v11919_v0  ;;  %v17223_v13 = vcombine.high %v11964_v33, %v11980_v39  ;;  %v10303_v55 = vcombine.high %v2358_v62, %v2362_v52 }
  0x9d   :  { %9109 = vmatpush1.bf16.msra.mxu1 %v17220_v51  ;;  %v475_v32 = vadd.f32 %v474_v8, %v473_v20  ;;  %v571_v21 = vadd.f32 %v570_v11, %v569_v29  ;;  %v760_v53 = vrot.slane %v759_v7, 2  ;;  %v667_v57 = vadd.f32 %v666_v46, %v665_v19  ;;  %v2381_v46 = vld [vmem:[#allocation2 + $0x7c0] sm:$0xff] }
  0x9e   :  { %17221 = vst [vmem:[#allocation35_spill] sm:$0xff] %v12078_v34  ;;  %8782 = vmatprep.subr.bf16.mxu0 %v17222_v27  ;;  %9110 = vmatprep.subr.bf16.mxu1 %v17223_v13  ;;  %v856_v43 = vrot.slane %v855_v17, 2  ;;  %v12086_v36 = vmul.f32 0.125, %v283_v28  ;;  %v10300_v45 = vcombine.low %v11982_v40, %v11984_v47  ;;  %v12090_v22 = vmul.f32 0.125, %v379_v38 }
  0x9f   :  { %v761_v25 = vadd.f32 %v760_v53, %v759_v7  ;;  %v12092_v48 = vmul.f32 0.125, %v475_v32  ;;  %v17227_v9 = vcombine.low %v11917_v26, %v11919_v0  ;;  %v17228_v50 = vcombine.low %v11964_v33, %v11980_v39  ;;  %v2373_v26 = vld [vmem:[#allocation2 + $0x780] sm:$0xff]  ;;  %v2374_v39 = vld [vmem:[#allocation2 + $0x788] sm:$0xff] }
  0xa0   :  { %17224 = vst [vmem:[#allocation36_spill] sm:$0xff] %v12086_v36  ;;  %17225 = vst [vmem:[#allocation37_spill] sm:$0xff] %v12090_v22  ;;  %v10302_v59 = vcombine.low %v2358_v62, %v2362_v52  ;;  %v857_v58 = vadd.f32 %v856_v43, %v855_v17  ;;  %v12100_v30 = vmul.f32 0.125, %v571_v21  ;;  %v2007_v20 = vpack.c.bf16 %v12078_v34, %v12078_v34  ;;  %v2377_v0 = vld [vmem:[#allocation2 + $0x7a0] sm:$0xff]  ;;  %v2378_v62 = vld [vmem:[#allocation2 + $0x7a8] sm:$0xff] }
  0xa1   :  { %17226 = vst [vmem:[#allocation38_spill] sm:$0xff] %v12092_v48  ;;  %8783 = vmatpush1.bf16.msra.mxu0 %v17227_v9  ;;  %9111 = vmatpush1.bf16.msra.mxu1 %v17228_v50  ;;  %v17230_v29 = vcombine.high %v11982_v40, %v11984_v47  ;;  %v10309_v31 = vcombine.high %v2365_v1, %v2369_v4  ;;  %v762_v44 = vrot.slane %v761_v25, 1  ;;  %v12107_v19 = vmul.f32 0.125, %v667_v57  ;;  %v2386_v32 = vld [vmem:[#allocation2 + $0x7e8] sm:$0xff] }
  0xa2   :  { %17229 = vst [vmem:[#allocation39_spill] sm:$0xff] %v12100_v30  ;;  %9112 = vmatprep.subr.bf16.mxu1 %v10303_v55  ;;  %v10311_v56 = vcombine.high %v2366_v10, %v2370_v18  ;;  %v10308_v33 = vcombine.low %v2365_v1, %v2369_v4  ;;  %v858_v52 = vrot.slane %v857_v58, 1  ;;  %v2023_v23 = vpack.c.bf16 %v12086_v36, %v12086_v36  ;;  %v2385_v55 = vld [vmem:[#allocation2 + $0x7e0] sm:$0xff]  ;;  %v2382_v1 = vld [vmem:[#allocation2 + $0x7c8] sm:$0xff] }
  0xa3   :  { %8784 = vmatprep.subr.bf16.mxu0 %v17230_v29  ;;  %17231 = vst [vmem:[#allocation40_spill] sm:$0xff] %v12107_v19  ;;  %v10310_v28 = vcombine.low %v2366_v10, %v2370_v18  ;;  %v763_v8 = vadd.f32 %v762_v44, %v761_v25  ;;  %v2039_v40 = vpack.c.bf16 %v12090_v22, %v12090_v22  ;;  %v3329_v51 = vunpack.c.l.b16 %v2007_v20  ;;  %v12129_v20 = vld [vmem:[#allocation2 + $0x800] sm:$0xff] }
  0xa4   :  { %v2055_v47 = vpack.c.bf16 %v12092_v48, %v12092_v48  ;;  %v10317_v11 = vcombine.high %v2373_v26, %v2377_v0  ;;  %v859_v7 = vadd.f32 %v858_v52, %v857_v58  ;;  %v2071_v14 = vpack.c.bf16 %v12100_v30, %v12100_v30  ;;  %v159_v30 = vld [vmem:[%s16825_s0 + $0x3a8] sm:$0xff]  ;;  %v12315_v22 = vld [vmem:[#allocation2 + $0xaa0] sm:$0xff] }
  0xa5   :  { %8785 = vmatpush1.bf16.msra.mxu0 %v10300_v45  ;;  %9113 = vmatpush1.bf16.msra.mxu1 %v10302_v59  ;;  %v10319_v38 = vcombine.high %v2374_v39, %v2378_v62  ;;  %v12117_v17 = vmul.f32 0.125, %v763_v8  ;;  %v2087_v27 = vpack.c.bf16 %v12107_v19, %v12107_v19  ;;  %v3345_v13 = vunpack.c.l.b16 %v2023_v23  ;;  %v12141_v8 = vld [vmem:[#allocation2 + $0x860] sm:$0xff]  ;;  %v12300_v19 = vld [vmem:[#allocation2 + $0xa48] sm:$0xff] }
  0xa6   :  { %8786 = vmatprep.subr.bf16.mxu0 %v10309_v31  ;;  %9114 = vmatprep.subr.bf16.mxu1 %v10311_v56  ;;  %v12121_v21 = vmul.f32 0.125, %v859_v7  ;;  %v3361_v53 = vunpack.c.l.b16 %v2039_v40  ;;  %v3377_v4 = vunpack.c.l.b16 %v2055_v47  ;;  %v3393_v10 = vunpack.c.l.b16 %v2071_v14  ;;  %v12132_v56 = vld [vmem:[#allocation2 + $0x820] sm:$0xff]  ;;  %v12143_v40 = vld [vmem:[#allocation2 + $0x848] sm:$0xff] }
  0xa7   :  { %17232 = vst [vmem:[#allocation41_spill] sm:$0xff] %v12117_v17  ;;  %v10316_v18 = vcombine.low %v2373_v26, %v2377_v0  ;;  %v2103_v57 = vpack.c.bf16 %v12117_v17, %v12117_v17  ;;  %v3409_v43 = vunpack.c.l.b16 %v2087_v27  ;;  %v3469_v45 = vsel %vm1323_vm0, %v3345_v13, %v3329_v51  ;;  %v12134_v26 = vld [vmem:[#allocation2 + $0x808] sm:$0xff]  ;;  %v12151_v51 = vld [vmem:[#allocation2 + $0x880] sm:$0xff] }
  0xa8   :  { %17233 = vst [vmem:[#allocation42_spill] sm:$0xff] %v12121_v21  ;;  %v10318_v25 = vcombine.low %v2374_v39, %v2378_v62  ;;  %v2119_v9 = vpack.c.bf16 %v12121_v21, %v12121_v21  ;;  %v3470_v50 = vsel %vm1325_vm1, %v3361_v53, %v3469_v45  ;;  %v10325_v59 = vcombine.high %v2381_v46, %v2385_v55  ;;  %v2394_v0 = vld [vmem:[#allocation2 + $0x828] sm:$0xff]  ;;  %v12159_v13 = vld [vmem:[#allocation2 + $0x8c0] sm:$0xff] }
  0xa9   :  { %8787 = vmatpush1.bf16.msra.mxu0 %v10308_v33  ;;  %9115 = vmatpush1.bf16.msra.mxu1 %v10310_v28  ;;  %v10327_v58 = vcombine.high %v2382_v1, %v2386_v32  ;;  %v3425_v29 = vunpack.c.l.b16 %v2103_v57  ;;  %v3471_v31 = vsel %vm1327_vm2, %v3377_v4, %v3470_v50  ;;  %v10324_v62 = vcombine.low %v2381_v46, %v2385_v55  ;;  %v12139_v28 = vld [vmem:[#allocation2 + $0x840] sm:$0xff]  ;;  %v12149_v14 = vld [vmem:[#allocation2 + $0x868] sm:$0xff] }
  0xaa   :  { %8788 = vmatprep.subr.bf16.mxu0 %v10317_v11  ;;  %9116 = vmatprep.subr.bf16.mxu1 %v10319_v38  ;;  %v3441_v44 = vunpack.c.l.b16 %v2119_v9  ;;  %v3472_v33 = vsel %vm1329_vm3, %v3393_v10, %v3471_v31  ;;  %v10326_v52 = vcombine.low %v2382_v1, %v2386_v32  ;;  %v10333_v47 = vcombine.high %v12129_v20, %v12132_v56  ;;  %v12153_v38 = vld [vmem:[#allocation2 + $0x8a0] sm:$0xff]  ;;  %v12155_v46 = vld [vmem:[#allocation2 + $0x888] sm:$0xff] }
  0xab   :  { %v3473_v39 = vsel %vm1331_vm4, %v3409_v43, %v3472_v33  ;;  %v10335_v11 = vcombine.high %v12134_v26, %v2394_v0  ;;  %v12157_v27 = vld [vmem:[#allocation2 + $0x8a8] sm:$0xff]  ;;  %v12163_v1 = vld [vmem:[#allocation2 + $0x8e0] sm:$0xff]  ;;  %v10332_v4 = vcombine.low %v12129_v20, %v12132_v56  ;;  %v10334_v10 = vcombine.low %v12134_v26, %v2394_v0 }
  0xac   :  { %v3474_v23 = vsel %vm1333_vm5, %v3425_v29, %v3473_v39  ;;  %v12165_v32 = vld [vmem:[#allocation2 + $0x8c8] sm:$0xff]  ;;  %v12174_v57 = vld [vmem:[#allocation2 + $0x920] sm:$0xff]  ;;  %v10341_v9 = vcombine.high %v12139_v28, %v12141_v8  ;;  %v10343_v50 = vcombine.high %v12143_v40, %v12149_v14  ;;  %v10340_v56 = vcombine.low %v12139_v28, %v12141_v8 }
  0xad   :  { %8789 = vmatpush1.bf16.msra.mxu0 %v10316_v18  ;;  %9117 = vmatpush1.bf16.msra.mxu1 %v10318_v25  ;;  %v3475_v7 = vsel %vm1335_vm6, %v3441_v44, %v3474_v23  ;;  %v12167_v53 = vld [vmem:[#allocation2 + $0x8e8] sm:$0xff]  ;;  %v12172_v18 = vld [vmem:[#allocation2 + $0x900] sm:$0xff]  ;;  %v10342_v26 = vcombine.low %v12143_v40, %v12149_v14  ;;  %v10349_v44 = vcombine.high %v12151_v51, %v12153_v38  ;;  %v488_v48 = vrot.slane %v95_v61, 4 }
  0xae   :  { %8790 = vmatprep.subr.bf16.mxu0 %v10325_v59  ;;  %9118 = vmatprep.subr.bf16.mxu1 %v10327_v58  ;;  %v12161_v55 = vpack.c.b16 %v3475_v7, %v3475_v7  ;;  %v12176_v43 = vld [vmem:[#allocation2 + $0x908] sm:$0xff]  ;;  %v12189_v59 = vld [vmem:[#allocation2 + $0x940] sm:$0xff]  ;;  %v10351_v23 = vcombine.high %v12155_v46, %v12157_v27  ;;  %v10357_v7 = vcombine.high %v12159_v13, %v12163_v1  ;;  %v872_v35 = vrot.slane %v159_v30, 4 }
  0xaf   :  { %v12178_v45 = vld [vmem:[#allocation2 + $0x928] sm:$0xff]  ;;  %v12191_v58 = vld [vmem:[#allocation2 + $0x960] sm:$0xff]  ;;  %v17235_v16 = vcombine.low %v12151_v51, %v12153_v38 }
  0xb0   :  { %17234 = vst [vmem:[#allocation43_spill] sm:$0xff] %v12161_v55  ;;  %v12183_v25 = vld [vmem:[%s16825_s0 + $0x28] sm:$0xff]  ;;  %v12210_v33 = vld [vmem:[#allocation2 + $0x980] sm:$0xff]  ;;  %v873_v37 = vadd.f32 %v872_v35, %v159_v30 }
  0xb1   :  { %8791 = vmatpush1.bf16.msra.mxu0 %v10324_v62  ;;  %9119 = vmatpush1.bf16.msra.mxu1 %v10326_v52  ;;  %v12193_v20 = vld [vmem:[#allocation2 + $0x948] sm:$0xff]  ;;  %v12212_v39 = vld [vmem:[#allocation2 + $0x9a0] sm:$0xff]  ;;  %v10359_v52 = vcombine.high %v12165_v32, %v12167_v53  ;;  %v17237_v49 = vrot.slane %v12183_v25, 4 }
  0xb2   :  { %8801 = vmatprep.subr.bf16.mxu0 %v10333_v47  ;;  %9129 = vmatprep.subr.bf16.mxu1 %v10335_v11  ;;  %v12195_v29 = vld [vmem:[#allocation2 + $0x968] sm:$0xff]  ;;  %v12231_v47 = vld [vmem:[#allocation2 + $0x9c0] sm:$0xff] }
  0xb3   :  { %v12200_v31 = vld [vmem:[%s16825_s0 + $0xa8] sm:$0xff]  ;;  %v12240_v28 = vld [vmem:[#allocation2 + $0x9e0] sm:$0xff]  ;;  %v201_v51 = vadd.f32 %v17237_v49, %v12183_v25 }
  0xb4   :  { %v12217_v62 = vld [vmem:[%s16825_s0 + $0x128] sm:$0xff]  ;;  %8793 = vmatmul.mubr.bf16.vlgmr.msra.gmra.mrb[0].mxu0 %v12161_v55  ;;  %9121 = vmatmul.mubr.bf16.vlgmr.msra.gmra.mrb[0].mxu1 %v12161_v55  ;;  %v296_v60 = vrot.slane %v12200_v31, 4  ;;  %v12253_v11 = vld [vmem:[#allocation2 + $0xa00] sm:$0xff] }
  0xb5   :  { %v12227_v8 = vld [vmem:[#allocation2 + $0x988] sm:$0xff]  ;;  %8802 = vmatpush1.bf16.msra.mxu0 %v10332_v4  ;;  %9130 = vmatpush1.bf16.msra.mxu1 %v10334_v10  ;;  %v12313_v4 = vld [vmem:[#allocation2 + $0xa80] sm:$0xff]  ;;  %v202_v42 = vrot.slane %v201_v51, 2 }
  0xb6   :  { %v12229_v40 = vld [vmem:[#allocation2 + $0x9a8] sm:$0xff]  ;;  %8803 = vmatprep.subr.bf16.mxu0 %v10341_v9  ;;  %9131 = vmatprep.subr.bf16.mxu1 %v10343_v50  ;;  %v392_v9 = vrot.slane %v12217_v62, 4  ;;  %v12298_v50 = vld [vmem:[#allocation2 + $0xa60] sm:$0xff] }
  0xb7   :  { %v12242_v0 = vld [vmem:[#allocation2 + $0x9c8] sm:$0xff]  ;;  %v203_v35 = vadd.f32 %v202_v42, %v201_v51 }
  0xb8   :  { %v111_v21 = vld [vmem:[%s16825_s0 + $0x228] sm:$0xff]  ;;  %v393_v38 = vadd.f32 %v392_v9, %v12217_v62  ;;  %v17242_v9 = vcombine.low %v12172_v18, %v12174_v57 }
  0xb9   :  { %v143_v17 = vld [vmem:[%s16825_s0 + $0x328] sm:$0xff]  ;;  %8804 = vmatpush1.bf16.msra.mxu0 %v10340_v56  ;;  %9132 = vmatpush1.bf16.msra.mxu1 %v10342_v26  ;;  %v584_v36 = vrot.slane %v111_v21, 4  ;;  %v680_v56 = vrot.slane %v127_v54, 4 }
  0xba   :  { %8805 = vmatprep.subr.bf16.mxu0 %v10349_v44  ;;  %9133 = vmatprep.subr.bf16.mxu1 %v10351_v23  ;;  %v12311_v14 = vld [vmem:[#allocation2 + $0xa68] sm:$0xff]  ;;  %v776_v34 = vrot.slane %v143_v17, 4  ;;  %v17236_v44 = vcombine.low %v12155_v46, %v12157_v27  ;;  %v489_v46 = vadd.f32 %v488_v48, %v95_v61  ;;  %v394_v26 = vrot.slane %v393_v38, 2 }
  0xbb   :  { %v585_v27 = vadd.f32 %v584_v36, %v111_v21  ;;  %v17241_v61 = vcombine.high %v12176_v43, %v12178_v45  ;;  %v874_v48 = vrot.slane %v873_v37, 2 }
  0xbc   :  { %v777_v23 = vadd.f32 %v776_v34, %v143_v17  ;;  %v490_v49 = vrot.slane %v489_v46, 2  ;;  %v395_v36 = vadd.f32 %v394_v26, %v393_v38 }
  0xbd   :  { %8806 = vmatpush1.bf16.msra.mxu0 %v17235_v16  ;;  %9134 = vmatpush1.bf16.msra.mxu1 %v17236_v44  ;;  %v297_v16 = vadd.f32 %v296_v60, %v12200_v31  ;;  %v681_v44 = vadd.f32 %v680_v56, %v127_v54  ;;  %v586_v60 = vrot.slane %v585_v27, 2  ;;  %v17240_v54 = vcombine.high %v12172_v18, %v12174_v57 }
  0xbe   :  { %8807 = vmatprep.subr.bf16.mxu0 %v10357_v7  ;;  %9135 = vmatprep.subr.bf16.mxu1 %v10359_v52  ;;  %v17238_v7 = vcombine.low %v12159_v13, %v12163_v1  ;;  %v17239_v52 = vcombine.low %v12165_v32, %v12167_v53  ;;  %v778_v31 = vrot.slane %v777_v23, 2  ;;  %v491_v30 = vadd.f32 %v490_v49, %v489_v46 }
  0xbf   :  { %v298_v41 = vrot.slane %v297_v16, 2  ;;  %v682_v25 = vrot.slane %v681_v44, 2  ;;  %v587_v17 = vadd.f32 %v586_v60, %v585_v27  ;;  %v204_v1 = vrot.slane %v203_v35, 1  ;;  %v12374_v27 = vld [vmem:[#allocation2 + $0xae0] sm:$0xff]  ;;  %v12376_v60 = vld [vmem:[#allocation2 + $0xac8] sm:$0xff] }
  0xc0   :  { %v779_v13 = vadd.f32 %v778_v31, %v777_v23  ;;  %v396_v53 = vrot.slane %v395_v36, 1  ;;  %v875_v62 = vadd.f32 %v874_v48, %v873_v37  ;;  %v17243_v56 = vcombine.low %v12176_v43, %v12178_v45  ;;  %v12368_v37 = vld [vmem:[#allocation2 + $0xa88] sm:$0xff]  ;;  %v12372_v45 = vld [vmem:[#allocation2 + $0xac0] sm:$0xff] }
  0xc1   :  { %8808 = vmatpush1.bf16.msra.mxu0 %v17238_v7  ;;  %9136 = vmatpush1.bf16.msra.mxu1 %v17239_v52  ;;  %v299_v34 = vadd.f32 %v298_v41, %v297_v16  ;;  %v683_v21 = vadd.f32 %v682_v25, %v681_v44  ;;  %v492_v42 = vrot.slane %v491_v30, 1  ;;  %v588_v41 = vrot.slane %v587_v17, 1  ;;  %v12370_v43 = vld [vmem:[#allocation2 + $0xaa8] sm:$0xff] }
  0xc2   :  { %8809 = vmatprep.subr.bf16.mxu0 %v17240_v54  ;;  %9137 = vmatprep.subr.bf16.mxu1 %v17241_v61  ;;  %v780_v51 = vrot.slane %v779_v13, 1  ;;  %v17244_v16 = vcombine.high %v12189_v59, %v12191_v58  ;;  %v17245_v23 = vcombine.high %v12193_v20, %v12195_v29  ;;  %v205_v18 = vadd.f32 %v204_v1, %v203_v35  ;;  %v12378_v25 = vld [vmem:[#allocation2 + $0xae8] sm:$0xff]  ;;  %v62_v1 = vld [vmem:[%s16825_s0 + $0xa0] sm:$0xff] }
  0xc3   :  { %v300_v32 = vrot.slane %v299_v34, 1  ;;  %v684_v26 = vrot.slane %v683_v21, 1  ;;  %v397_v38 = vadd.f32 %v396_v53, %v395_v36  ;;  %v876_v46 = vrot.slane %v875_v62, 1 }
  0xc4   :  { %v493_v44 = vadd.f32 %v492_v42, %v491_v30  ;;  %v589_v7 = vadd.f32 %v588_v41, %v587_v17  ;;  %v781_v49 = vadd.f32 %v780_v51, %v779_v13  ;;  %v12380_v54 = vmul.f32 0.125, %v205_v18 }
  0xc5   :  { %8810 = vmatpush1.bf16.msra.mxu0 %v17242_v9  ;;  %9138 = vmatpush1.bf16.msra.mxu1 %v17243_v56  ;;  %v301_v57 = vadd.f32 %v300_v32, %v299_v34  ;;  %v685_v52 = vadd.f32 %v684_v26, %v683_v21  ;;  %v877_v31 = vadd.f32 %v876_v46, %v875_v62  ;;  %v12384_v35 = vmul.f32 0.125, %v397_v38  ;;  %v46_v34 = vld [vmem:[%s16825_s0 + $0x20] sm:$0xff] }
  0xc6   :  { %8811 = vmatprep.subr.bf16.mxu0 %v17244_v16  ;;  %9139 = vmatprep.subr.bf16.mxu1 %v17245_v23  ;;  %17246 = vst [vmem:[#allocation44_spill] sm:$0xff] %v12380_v54  ;;  %v17249_v36 = vcombine.low %v12189_v59, %v12191_v58  ;;  %v17250_v48 = vcombine.low %v12193_v20, %v12195_v29  ;;  %v12397_v17 = vmul.f32 0.125, %v493_v44  ;;  %v12399_v21 = vmul.f32 0.125, %v589_v7  ;;  %v78_v62 = vld [vmem:[%s16825_s0 + $0x120] sm:$0xff] }
  0xc7   :  { %v12382_v61 = vmul.f32 0.125, %v301_v57  ;;  %17248 = vst [vmem:[#allocation46_spill] sm:$0xff] %v12384_v35  ;;  %v10413_v30 = vcombine.high %v12313_v4, %v12315_v22  ;;  %v12401_v13 = vmul.f32 0.125, %v685_v52  ;;  %v17254_v59 = vcombine.high %v12210_v33, %v12212_v39  ;;  %v94_v23 = vld [vmem:[%s16825_s0 + $0x1a0] sm:$0xff] }
  0xc8   :  { %17251 = vst [vmem:[#allocation47_spill] sm:$0xff] %v12397_v17  ;;  %17252 = vst [vmem:[#allocation48_spill] sm:$0xff] %v12399_v21  ;;  %v17255_v58 = vcombine.high %v12227_v8, %v12229_v40  ;;  %v12416_v32 = vmul.f32 0.125, %v781_v49  ;;  %v12418_v53 = vmul.f32 0.125, %v877_v31  ;;  %v194_v41 = vrot.slane %v46_v34, 4  ;;  %v110_v52 = vld [vmem:[%s16825_s0 + $0x220] sm:$0xff] }
  0xc9   :  { %17247 = vst [vmem:[#allocation45_spill] sm:$0xff] %v12382_v61  ;;  %8812 = vmatpush1.bf16.msra.mxu0 %v17249_v36  ;;  %9140 = vmatpush1.bf16.msra.mxu1 %v17250_v48  ;;  %17253 = vst [vmem:[#allocation49_spill] sm:$0xff] %v12401_v13  ;;  %v2010_v26 = vpack.c.bf16 %v12380_v54, %v12380_v54  ;;  %v2026_v51 = vpack.c.bf16 %v12382_v61, %v12382_v61  ;;  %v290_v18 = vrot.slane %v62_v1, 4 }
  0xca   :  { %8813 = vmatprep.subr.bf16.mxu0 %v17254_v59  ;;  %9141 = vmatprep.subr.bf16.mxu1 %v17255_v58  ;;  %17256 = vst [vmem:[#allocation50_spill] sm:$0xff] %v12416_v32  ;;  %17257 = vst [vmem:[#allocation51_spill] sm:$0xff] %v12418_v53  ;;  %v2042_v16 = vpack.c.bf16 %v12384_v35, %v12384_v35  ;;  %v17258_v57 = vcombine.low %v12210_v33, %v12212_v39  ;;  %v386_v49 = vrot.slane %v78_v62, 4  ;;  %v126_v58 = vld [vmem:[%s16825_s0 + $0x2a0] sm:$0xff] }
  0xcb   :  { %v17259_v38 = vcombine.low %v12227_v8, %v12229_v40  ;;  %v2058_v46 = vpack.c.bf16 %v12397_v17, %v12397_v17  ;;  %v2074_v44 = vpack.c.bf16 %v12399_v21, %v12399_v21  ;;  %v2090_v7 = vpack.c.bf16 %v12401_v13, %v12401_v13  ;;  %v12459_v8 = vld [vmem:[#allocation2 + $0xb00] sm:$0xff]  ;;  %v12819_v13 = vld [vmem:[%s16825_s0 + $0x30] sm:$0xff] }
  0xcc   :  { %v17260_v33 = vcombine.high %v12231_v47, %v12240_v28  ;;  %v17261_v39 = vcombine.high %v12242_v0, %v12244_v2  ;;  %v12461_v40 = vld [vmem:[#allocation2 + $0xb20] sm:$0xff]  ;;  %v2106_v31 = vpack.c.bf16 %v12416_v32, %v12416_v32  ;;  %v2122_v36 = vpack.c.bf16 %v12418_v53, %v12418_v53  ;;  %v12838_v32 = vld [vmem:[%s16825_s0 + $0x1b0] sm:$0xff] }
  0xcd   :  { %8814 = vmatpush1.bf16.msra.mxu0 %v17258_v57  ;;  %9142 = vmatpush1.bf16.msra.mxu1 %v17259_v38  ;;  %v3332_v48 = vunpack.c.l.b16 %v2010_v26  ;;  %v3348_v59 = vunpack.c.l.b16 %v2026_v51  ;;  %v3364_v57 = vunpack.c.l.b16 %v2042_v16  ;;  %v3380_v38 = vunpack.c.l.b16 %v2058_v46  ;;  %v12803_v21 = vld [vmem:[#allocation2 + $0xe40] sm:$0xff] }
  0xce   :  { %8815 = vmatprep.subr.bf16.mxu0 %v17260_v33  ;;  %9143 = vmatprep.subr.bf16.mxu1 %v17261_v39  ;;  %v3396_v33 = vunpack.c.l.b16 %v2074_v44  ;;  %v142_v39 = vld [vmem:[%s16825_s0 + $0x320] sm:$0xff]  ;;  %v482_v42 = vrot.slane %v94_v23, 4  ;;  %v3412_v56 = vunpack.c.l.b16 %v2090_v7  ;;  %v578_v26 = vrot.slane %v110_v52, 4 }
  0xcf   :  { %v3490_v20 = vsel %vm1323_vm0, %v3348_v59, %v3332_v48  ;;  %v17262_v51 = vcombine.low %v12231_v47, %v12240_v28  ;;  %v17263_v16 = vcombine.low %v12242_v0, %v12244_v2  ;;  %v3428_v44 = vunpack.c.l.b16 %v2106_v31  ;;  %v12805_v17 = vld [vmem:[#allocation2 + $0xe60] sm:$0xff] }
  0xd0   :  { %v3491_v10 = vsel %vm1325_vm1, %v3364_v57, %v3490_v20  ;;  %v674_v29 = vrot.slane %v126_v58, 4  ;;  %v17264_v7 = vcombine.high %v12253_v11, %v12255_v24  ;;  %v17265_v48 = vcombine.high %v12269_v63, %v12271_v3 }
  0xd1   :  { %8816 = vmatpush1.bf16.msra.mxu0 %v17262_v51  ;;  %9144 = vmatpush1.bf16.msra.mxu1 %v17263_v16  ;;  %v3444_v28 = vunpack.c.l.b16 %v2122_v36  ;;  %v3492_v47 = vsel %vm1327_vm2, %v3380_v38, %v3491_v10  ;;  %v195_v2 = vadd.f32 %v194_v41, %v46_v34  ;;  %v770_v0 = vrot.slane %v142_v39, 4 }
  0xd2   :  { %8817 = vmatprep.subr.bf16.mxu0 %v17264_v7  ;;  %9145 = vmatprep.subr.bf16.mxu1 %v17265_v48  ;;  %v3493_v59 = vsel %vm1329_vm3, %v3396_v33, %v3492_v47  ;;  %v291_v51 = vadd.f32 %v290_v18, %v62_v1  ;;  %v387_v31 = vadd.f32 %v386_v49, %v78_v62 }
  0xd3   :  { %v483_v16 = vadd.f32 %v482_v42, %v94_v23  ;;  %v3494_v20 = vsel %vm1331_vm4, %v3412_v56, %v3493_v59  ;;  %v196_v57 = vrot.slane %v195_v2, 2  ;;  %v579_v46 = vadd.f32 %v578_v26, %v110_v52 }
  0xd4   :  { %v675_v9 = vadd.f32 %v674_v29, %v126_v58  ;;  %v17266_v7 = vcombine.low %v12253_v11, %v12255_v24  ;;  %v17267_v36 = vcombine.low %v12269_v63, %v12271_v3  ;;  %v3495_v10 = vsel %vm1333_vm5, %v3428_v44, %v3494_v20  ;;  %v158_v3 = vld [vmem:[%s16825_s0 + $0x3a0] sm:$0xff] }
  0xd5   :  { %v292_v34 = vrot.slane %v291_v51, 2  ;;  %v388_v41 = vrot.slane %v387_v31, 2  ;;  %v484_v1 = vrot.slane %v483_v16, 2  ;;  %v17268_v62 = vcombine.high %v12284_v15, %v12298_v50 }
  0xd6   :  { %8818 = vmatpush1.bf16.msra.mxu0 %v17266_v7  ;;  %9146 = vmatpush1.bf16.msra.mxu1 %v17267_v36  ;;  %v17269_v29 = vcombine.high %v12300_v19, %v12311_v14  ;;  %v3496_v24 = vsel %vm1335_vm6, %v3444_v28, %v3495_v10  ;;  %v197_v63 = vadd.f32 %v196_v57, %v195_v2  ;;  %v580_v11 = vrot.slane %v579_v46, 2 }
  0xd7   :  { %8819 = vmatprep.subr.bf16.mxu0 %v17268_v62  ;;  %v676_v56 = vrot.slane %v675_v9, 2  ;;  %v12511_v42 = vpack.c.b16 %v3496_v24, %v3496_v24  ;;  %v293_v23 = vadd.f32 %v292_v34, %v291_v51  ;;  %v389_v18 = vadd.f32 %v388_v41, %v387_v31  ;;  %v12529_v31 = vld [vmem:[#allocation2 + $0xb40] sm:$0xff]  ;;  %v12540_v41 = vld [vmem:[#allocation2 + $0xb48] sm:$0xff] }
  0xd8   :  { %9147 = vmatprep.subr.bf16.mxu1 %v17269_v29  ;;  %v485_v52 = vadd.f32 %v484_v1, %v483_v16  ;;  %v198_v49 = vrot.slane %v197_v63, 1  ;;  %v581_v58 = vadd.f32 %v580_v11, %v579_v46  ;;  %v771_v33 = vadd.f32 %v770_v0, %v142_v39  ;;  %v12525_v39 = vld [vmem:[#allocation2 + $0xb08] sm:$0xff] }
  0xd9   :  { %17270 = vst [vmem:[#allocation52_spill] sm:$0xff] %v12511_v42  ;;  %v677_v38 = vadd.f32 %v676_v56, %v675_v9  ;;  %v17271_v26 = vcombine.low %v12284_v15, %v12298_v50  ;;  %v17272_v44 = vcombine.low %v12300_v19, %v12311_v14  ;;  %v294_v48 = vrot.slane %v293_v23, 1  ;;  %v2490_v15 = vld [vmem:[#allocation2 + $0xb28] sm:$0xff]  ;;  %8833 = vmatprep.mubr.bf16.mxu0 %v12511_v42 }
  0xda   :  { %v390_v28 = vrot.slane %v389_v18, 1  ;;  %v486_v47 = vrot.slane %v485_v52, 1  ;;  %v866_v2 = vrot.slane %v158_v3, 4  ;;  %v17273_v9 = vcombine.high %v12368_v37, %v12370_v43  ;;  %9161 = vmatprep.mubr.bf16.mxu1 %v12511_v42  ;;  %v12542_v1 = vld [vmem:[#allocation2 + $0xb68] sm:$0xff] }
  0xdb   :  { %8820 = vmatpush1.bf16.msra.mxu0 %v17271_v26  ;;  %9148 = vmatpush1.bf16.msra.mxu1 %v17272_v44  ;;  %v199_v50 = vadd.f32 %v198_v49, %v197_v63  ;;  %v582_v46 = vrot.slane %v581_v58, 1  ;;  %v678_v0 = vrot.slane %v677_v38, 1  ;;  %v772_v19 = vrot.slane %v771_v33, 2 }
  0xdc   :  { %8821 = vmatprep.subr.bf16.mxu0 %v10413_v30  ;;  %9149 = vmatprep.subr.bf16.mxu1 %v17273_v9  ;;  %v295_v14 = vadd.f32 %v294_v48, %v293_v23  ;;  %v391_v59 = vadd.f32 %v390_v28, %v389_v18  ;;  %v487_v51 = vadd.f32 %v486_v47, %v485_v52  ;;  %v12531_v30 = vld [vmem:[#allocation2 + $0xb60] sm:$0xff] }
  0xdd   :  { %v583_v16 = vadd.f32 %v582_v46, %v581_v58  ;;  %v679_v20 = vadd.f32 %v678_v0, %v677_v38  ;;  %v773_v57 = vadd.f32 %v772_v19, %v771_v33  ;;  %v867_v7 = vadd.f32 %v866_v2, %v158_v3 }
  0xde   :  { %v17274_v36 = vcombine.low %v12313_v4, %v12315_v22  ;;  %v17275_v10 = vcombine.low %v12368_v37, %v12370_v43  ;;  %v10431_v34 = vcombine.high %v12525_v39, %v2490_v15  ;;  %v12544_v62 = vmul.f32 0.125, %v199_v50 }
  0xdf   :  { %v12546_v29 = vmul.f32 0.125, %v295_v14  ;;  %v12548_v24 = vmul.f32 0.125, %v391_v59  ;;  %v17279_v22 = vcombine.high %v12372_v45, %v12374_v27  ;;  %v17280_v4 = vcombine.high %v12376_v60, %v12378_v25 }
  0xe0   :  { %8822 = vmatpush1.bf16.msra.mxu0 %v17274_v36  ;;  %9150 = vmatpush1.bf16.msra.mxu1 %v17275_v10  ;;  %17276 = vst [vmem:[#allocation53_spill] sm:$0xff] %v12544_v62  ;;  %v774_v37 = vrot.slane %v773_v57, 1  ;;  %v868_v43 = vrot.slane %v867_v7, 2  ;;  %v12556_v3 = vmul.f32 0.125, %v487_v51  ;;  %v12558_v63 = vmul.f32 0.125, %v583_v16 }
  0xe1   :  { %17277 = vst [vmem:[#allocation54_spill] sm:$0xff] %v12546_v29  ;;  %17278 = vst [vmem:[#allocation55_spill] sm:$0xff] %v12548_v24  ;;  %8823 = vmatprep.subr.bf16.mxu0 %v17279_v22  ;;  %9151 = vmatprep.subr.bf16.mxu1 %v17280_v4  ;;  %v10428_v11 = vcombine.low %v12459_v8, %v12461_v40  ;;  %v10430_v56 = vcombine.low %v12525_v39, %v2490_v15  ;;  %v12565_v18 = vmul.f32 0.125, %v679_v20  ;;  %v2502_v39 = vld [vmem:[#allocation2 + $0xb88] sm:$0xff]  ;;  %v12617_v4 = vld [vmem:[#allocation2 + $0xc00] sm:$0xff] }
  0xe2   :  { %17281 = vst [vmem:[#allocation56_spill] sm:$0xff] %v12556_v3  ;;  %17282 = vst [vmem:[#allocation57_spill] sm:$0xff] %v12558_v63  ;;  %v10436_v23 = vcombine.low %v12529_v31, %v12531_v30  ;;  %v10437_v52 = vcombine.high %v12529_v31, %v12531_v30  ;;  %v10439_v49 = vcombine.high %v12540_v41, %v12542_v1  ;;  %v2506_v15 = vld [vmem:[#allocation2 + $0xba8] sm:$0xff] }
  0xe3   :  { %17283 = vst [vmem:[#allocation58_spill] sm:$0xff] %v12565_v18  ;;  %v775_v58 = vadd.f32 %v774_v37, %v773_v57  ;;  %v869_v38 = vadd.f32 %v868_v43, %v867_v7  ;;  %v17284_v33 = vcombine.low %v12372_v45, %v12374_v27  ;;  %v17285_v26 = vcombine.low %v12376_v60, %v12378_v25  ;;  %v12586_v45 = vld [vmem:[#allocation2 + $0xb80] sm:$0xff]  ;;  %v12621_v43 = vld [vmem:[#allocation2 + $0xc08] sm:$0xff] }
  0xe4   :  { %v2009_v44 = vpack.c.bf16 %v12544_v62, %v12544_v62  ;;  %v2025_v48 = vpack.c.bf16 %v12546_v29, %v12546_v29  ;;  %v2041_v28 = vpack.c.bf16 %v12548_v24, %v12548_v24  ;;  %v17286_v47 = vcombine.high %v12459_v8, %v12461_v40  ;;  %v12588_v27 = vld [vmem:[#allocation2 + $0xba0] sm:$0xff]  ;;  %v113_v24 = vld [vmem:[%s16825_s0 + $0x238] sm:$0xff] }
  0xe5   :  { %8824 = vmatpush1.bf16.msra.mxu0 %v17284_v33  ;;  %9152 = vmatpush1.bf16.msra.mxu1 %v17285_v26  ;;  %v870_v60 = vrot.slane %v869_v38, 1  ;;  %v12590_v25 = vmul.f32 0.125, %v775_v58  ;;  %v2057_v2 = vpack.c.bf16 %v12556_v3, %v12556_v3  ;;  %v2073_v9 = vpack.c.bf16 %v12558_v63, %v12558_v63  ;;  %v12605_v57 = vld [vmem:[#allocation2 + $0xbc0] sm:$0xff]  ;;  %v12628_v58 = vld [vmem:[#allocation2 + $0xc28] sm:$0xff]  ;;  %v129_v29 = vld [vmem:[%s16825_s0 + $0x2b8] sm:$0xff] }
  0xe6   :  { %8825 = vmatprep.subr.bf16.mxu0 %v17286_v47  ;;  %9153 = vmatprep.subr.bf16.mxu1 %v10431_v34  ;;  %v2089_v8 = vpack.c.bf16 %v12565_v18, %v12565_v18  ;;  %v3331_v40 = vunpack.c.l.b16 %v2009_v44  ;;  %v3347_v50 = vunpack.c.l.b16 %v2025_v48  ;;  %v3363_v46 = vunpack.c.l.b16 %v2041_v28  ;;  %v12610_v34 = vld [vmem:[#allocation2 + $0xbe0] sm:$0xff]  ;;  %v12640_v47 = vld [vmem:[#allocation2 + $0xc48] sm:$0xff]  ;;  %v97_v18 = vld [vmem:[%s16825_s0 + $0x1b8] sm:$0xff] }
  0xe7   :  { %17287 = vst [vmem:[#allocation59_spill] sm:$0xff] %v12590_v25  ;;  %v10438_v0 = vcombine.low %v12540_v41, %v12542_v1  ;;  %v871_v19 = vadd.f32 %v870_v60, %v869_v38  ;;  %v2105_v14 = vpack.c.bf16 %v12590_v25, %v12590_v25  ;;  %v3379_v59 = vunpack.c.l.b16 %v2057_v2  ;;  %v12612_v41 = vld [vmem:[#allocation2 + $0xbc8] sm:$0xff]  ;;  %v12619_v37 = vld [vmem:[#allocation2 + $0xc20] sm:$0xff]  ;;  %v145_v62 = vld [vmem:[%s16825_s0 + $0x338] sm:$0xff] }
  0xe8   :  { %v10445_v51 = vcombine.high %v12586_v45, %v12588_v27  ;;  %v3395_v31 = vunpack.c.l.b16 %v2073_v9  ;;  %v3411_v30 = vunpack.c.l.b16 %v2089_v8  ;;  %v3483_v16 = vsel %vm1323_vm0, %v3347_v50, %v3331_v40  ;;  %v12614_v1 = vld [vmem:[#allocation2 + $0xbe8] sm:$0xff]  ;;  %v12631_v33 = vld [vmem:[#allocation2 + $0xc40] sm:$0xff] }
  0xe9   :  { %8826 = vmatpush1.bf16.msra.mxu0 %v10428_v11  ;;  %9154 = vmatpush1.bf16.msra.mxu1 %v10430_v56  ;;  %v10447_v20 = vcombine.high %v2502_v39, %v2506_v15  ;;  %v12607_v7 = vmul.f32 0.125, %v871_v19  ;;  %v3427_v36 = vunpack.c.l.b16 %v2105_v14  ;;  %v3484_v10 = vsel %vm1325_vm1, %v3363_v46, %v3483_v16  ;;  %v12633_v26 = vld [vmem:[#allocation2 + $0xc60] sm:$0xff]  ;;  %v12648_v2 = vld [vmem:[#allocation2 + $0xc88] sm:$0xff] }
  0xea   :  { %8827 = vmatprep.subr.bf16.mxu0 %v10437_v52  ;;  %9155 = vmatprep.subr.bf16.mxu1 %v10439_v49  ;;  %v3485_v22 = vsel %vm1327_vm2, %v3379_v59, %v3484_v10  ;;  %v10444_v52 = vcombine.low %v12586_v45, %v12588_v27  ;;  %v10446_v49 = vcombine.low %v2502_v39, %v2506_v15  ;;  %v12642_v45 = vld [vmem:[#allocation2 + $0xc68] sm:$0xff]  ;;  %v12644_v27 = vld [vmem:[#allocation2 + $0xc80] sm:$0xff] }
  0xeb   :  { %17288 = vst [vmem:[#allocation60_spill] sm:$0xff] %v12607_v7  ;;  %v2121_v11 = vpack.c.bf16 %v12607_v7, %v12607_v7  ;;  %v3486_v56 = vsel %vm1329_vm3, %v3395_v31, %v3485_v22  ;;  %v10453_v44 = vcombine.high %v12605_v57, %v12610_v34  ;;  %v12646_v60 = vld [vmem:[#allocation2 + $0xca0] sm:$0xff]  ;;  %v12650_v9 = vld [vmem:[#allocation2 + $0xca8] sm:$0xff]  ;;  %v10452_v15 = vcombine.low %v12605_v57, %v12610_v34  ;;  %v12696_v22 = vld [vmem:[%s16825_s0 + $0x38] sm:$0xff] }
  0xec   :  { %v3487_v38 = vsel %vm1331_vm4, %v3411_v30, %v3486_v56  ;;  %v12652_v39 = vld [vmem:[#allocation2 + $0xcc0] sm:$0xff]  ;;  %v10454_v8 = vcombine.low %v12612_v41, %v12614_v1  ;;  %v12662_v46 = vld [vmem:[#allocation2 + $0xcc8] sm:$0xff]  ;;  %v10461_v19 = vcombine.high %v12617_v4, %v12619_v37  ;;  %v10471_v56 = vcombine.high %v12640_v47, %v12642_v45  ;;  %v12742_v7 = vld [vmem:[%s16825_s0 + $0x138] sm:$0xff] }
  0xed   :  { %8828 = vmatpush1.bf16.msra.mxu0 %v10436_v23  ;;  %9156 = vmatpush1.bf16.msra.mxu1 %v10438_v0  ;;  %v10455_v23 = vcombine.high %v12612_v41, %v12614_v1  ;;  %v3443_v48 = vunpack.c.l.b16 %v2121_v11  ;;  %v3488_v28 = vsel %vm1333_vm5, %v3427_v36, %v3487_v38  ;;  %v12660_v50 = vld [vmem:[#allocation2 + $0xce0] sm:$0xff]  ;;  %v12664_v0 = vld [vmem:[#allocation2 + $0xce8] sm:$0xff]  ;;  %v10469_v36 = vcombine.high %v12631_v33, %v12633_v26 }
  0xee   :  { %8829 = vmatprep.subr.bf16.mxu0 %v10445_v51  ;;  %9157 = vmatprep.subr.bf16.mxu1 %v10447_v20  ;;  %v12671_v51 = vld [vmem:[#allocation2 + $0xd00] sm:$0xff]  ;;  %v12675_v30 = vld [vmem:[#allocation2 + $0xd08] sm:$0xff]  ;;  %v10463_v20 = vcombine.high %v12621_v43, %v12628_v58  ;;  %v404_v53 = vrot.slane %v12742_v7, 4  ;;  %v17294_v54 = vcombine.high %v12644_v27, %v12646_v60  ;;  %v17296_v5 = vcombine.low %v12644_v27, %v12646_v60 }
  0xef   :  { %v3489_v59 = vsel %vm1335_vm6, %v3443_v48, %v3488_v28  ;;  %v12673_v31 = vld [vmem:[#allocation2 + $0xd20] sm:$0xff]  ;;  %v12677_v16 = vld [vmem:[#allocation2 + $0xd28] sm:$0xff]  ;;  %v17291_v28 = vcombine.low %v12621_v43, %v12628_v58  ;;  %v692_v43 = vrot.slane %v129_v29, 4 }
  0xf0   :  { %v12685_v10 = vld [vmem:[#allocation2 + $0xd40] sm:$0xff]  ;;  %v12689_v41 = vld [vmem:[#allocation2 + $0xd48] sm:$0xff]  ;;  %v12715_v48 = vpack.c.b16 %v3489_v59, %v3489_v59 }
  0xf1   :  { %8830 = vmatpush1.bf16.msra.mxu0 %v10444_v52  ;;  %9158 = vmatpush1.bf16.msra.mxu1 %v10446_v49  ;;  %v12687_v34 = vld [vmem:[#allocation2 + $0xd60] sm:$0xff]  ;;  %v12691_v1 = vld [vmem:[#allocation2 + $0xd68] sm:$0xff]  ;;  %v788_v52 = vrot.slane %v145_v62, 4  ;;  %v693_v55 = vadd.f32 %v692_v43, %v129_v29  ;;  %v17298_v29 = vcombine.high %v12652_v39, %v12660_v50 }
  0xf2   :  { %8831 = vmatprep.subr.bf16.mxu0 %v10453_v44  ;;  %9159 = vmatprep.subr.bf16.mxu1 %v10455_v23  ;;  %v12706_v38 = vld [vmem:[#allocation2 + $0xd80] sm:$0xff]  ;;  %v12713_v23 = vld [vmem:[%s16825_s0 + $0xb8] sm:$0xff]  ;;  %17289 = vst [vmem:[#allocation61_spill] sm:$0xff] %v12715_v48  ;;  %v12723_v11 = vld [vmem:[#allocation2 + $0xd88] sm:$0xff] }
  0xf3   :  { %v12708_v44 = vld [vmem:[#allocation2 + $0xda0] sm:$0xff]  ;;  %v12725_v57 = vld [vmem:[#allocation2 + $0xda8] sm:$0xff]  ;;  %v789_v61 = vadd.f32 %v788_v52, %v145_v62  ;;  %v17299_v62 = vcombine.high %v12662_v46, %v12664_v0 }
  0xf4   :  { %v12727_v14 = vld [vmem:[#allocation2 + $0xdc0] sm:$0xff]  ;;  %v12737_v49 = vld [vmem:[#allocation2 + $0xdc8] sm:$0xff] }
  0xf5   :  { %8832 = vmatpush1.bf16.msra.mxu0 %v10452_v15  ;;  %9160 = vmatpush1.bf16.msra.mxu1 %v10454_v8  ;;  %v12735_v40 = vld [vmem:[#allocation2 + $0xde0] sm:$0xff]  ;;  %v212_v15 = vrot.slane %v12696_v22, 4  ;;  %v12751_v59 = vld [vmem:[#allocation2 + $0xde8] sm:$0xff]  ;;  %v17290_v8 = vcombine.low %v12617_v4, %v12619_v37  ;;  %v161_v4 = vld [vmem:[%s16825_s0 + $0x3b8] sm:$0xff]  ;;  %v500_v37 = vrot.slane %v97_v18, 4 }
  0xf6   :  { %8842 = vmatprep.subr.bf16.mxu0 %v10461_v19  ;;  %9170 = vmatprep.subr.bf16.mxu1 %v10463_v20  ;;  %v12753_v25 = vld [vmem:[#allocation2 + $0xe00] sm:$0xff]  ;;  %v308_v19 = vrot.slane %v12713_v23, 4  ;;  %v12769_v3 = vld [vmem:[#allocation2 + $0xe08] sm:$0xff]  ;;  %v884_v58 = vrot.slane %v161_v4, 4 }
  0xf7   :  { %v12767_v63 = vld [vmem:[#allocation2 + $0xe20] sm:$0xff]  ;;  %v12782_v20 = vld [vmem:[#allocation2 + $0xe28] sm:$0xff] }
  0xf8   :  { %8834 = vmatmul.mubr.bf16.vlgmr.msra.gmra.mrb[0].mxu0 %v12715_v48  ;;  %9162 = vmatmul.mubr.bf16.vlgmr.msra.gmra.mrb[0].mxu1 %v12715_v48  ;;  %v17293_v48 = vcombine.low %v12640_v47, %v12642_v45  ;;  %v309_v47 = vadd.f32 %v308_v19, %v12713_v23  ;;  %v405_v45 = vadd.f32 %v404_v53, %v12742_v7  ;;  %v694_v7 = vrot.slane %v693_v55, 2 }
  0xf9   :  { %8843 = vmatpush1.bf16.msra.mxu0 %v17290_v8  ;;  %9171 = vmatpush1.bf16.msra.mxu1 %v17291_v28  ;;  %v596_v8 = vrot.slane %v113_v24, 4  ;;  %v17292_v28 = vcombine.low %v12631_v33, %v12633_v26  ;;  %v17295_v33 = vcombine.high %v12648_v2, %v12650_v9  ;;  %v213_v26 = vadd.f32 %v212_v15, %v12696_v22 }
  0xfa   :  { %8844 = vmatprep.subr.bf16.mxu0 %v10469_v36  ;;  %9172 = vmatprep.subr.bf16.mxu1 %v10471_v56  ;;  %v12824_v36 = vld [vmem:[%s16825_s0 + $0xb0] sm:$0xff]  ;;  %v310_v12 = vrot.slane %v309_v47, 2  ;;  %v406_v6 = vrot.slane %v405_v45, 2  ;;  %v17297_v22 = vcombine.low %v12648_v2, %v12650_v9  ;;  %v790_v15 = vrot.slane %v789_v61, 2 }
  0xfb   :  { %v12829_v56 = vld [vmem:[%s16825_s0 + $0x130] sm:$0xff]  ;;  %v597_v42 = vadd.f32 %v596_v8, %v113_v24  ;;  %v214_v35 = vrot.slane %v213_v26, 2  ;;  %v695_v2 = vadd.f32 %v694_v7, %v693_v55  ;;  %v17301_v8 = vcombine.low %v12662_v46, %v12664_v0 }
  0xfc   :  { %v407_v27 = vadd.f32 %v406_v6, %v405_v45  ;;  %v791_v9 = vadd.f32 %v790_v15, %v789_v61  ;;  %v17302_v55 = vcombine.high %v12671_v51, %v12673_v31  ;;  %v17303_v61 = vcombine.high %v12675_v30, %v12677_v16 }
  0xfd   :  { %8845 = vmatpush1.bf16.msra.mxu0 %v17292_v28  ;;  %9173 = vmatpush1.bf16.msra.mxu1 %v17293_v48  ;;  %v494_v48 = vrot.slane %v12838_v32, 4  ;;  %v501_v28 = vadd.f32 %v500_v37, %v97_v18  ;;  %v598_v53 = vrot.slane %v597_v42, 2  ;;  %v215_v24 = vadd.f32 %v214_v35, %v213_v26 }
  0xfe   :  { %8846 = vmatprep.subr.bf16.mxu0 %v17294_v54  ;;  %9174 = vmatprep.subr.bf16.mxu1 %v17295_v33  ;;  %v885_v54 = vadd.f32 %v884_v58, %v161_v4  ;;  %v311_v18 = vadd.f32 %v310_v12, %v309_v47  ;;  %v408_v37 = vrot.slane %v407_v27, 1  ;;  %v17300_v58 = vcombine.low %v12652_v39, %v12660_v50 }
  0xff   :  { %v502_v23 = vrot.slane %v501_v28, 2  ;;  %v599_v52 = vadd.f32 %v598_v53, %v597_v42  ;;  %v216_v19 = vrot.slane %v215_v24, 1  ;;  %v696_v6 = vrot.slane %v695_v2, 1 }
 0x100   :  { %v312_v4 = vrot.slane %v311_v18, 1  ;;  %v792_v33 = vrot.slane %v791_v9, 1  ;;  %v409_v39 = vadd.f32 %v408_v37, %v407_v27  ;;  %v17307_v53 = vcombine.low %v12671_v51, %v12673_v31  ;;  %v12917_v31 = vld [vmem:[#allocation2 + $0xe48] sm:$0xff] }
 0x101   :  { %8847 = vmatpush1.bf16.msra.mxu0 %v17296_v5  ;;  %9175 = vmatpush1.bf16.msra.mxu1 %v17297_v22  ;;  %v886_v5 = vrot.slane %v885_v54, 2  ;;  %v503_v60 = vadd.f32 %v502_v23, %v501_v28  ;;  %v600_v12 = vrot.slane %v599_v52, 1  ;;  %v217_v42 = vadd.f32 %v216_v19, %v215_v24  ;;  %v12935_v19 = vld [vmem:[#allocation2 + $0xea8] sm:$0xff] }
 0x102   :  { %8848 = vmatprep.subr.bf16.mxu0 %v17298_v29  ;;  %9176 = vmatprep.subr.bf16.mxu1 %v17299_v62  ;;  %v313_v26 = vadd.f32 %v312_v4, %v311_v18  ;;  %v697_v46 = vadd.f32 %v696_v6, %v695_v2  ;;  %v793_v0 = vadd.f32 %v792_v33, %v791_v9  ;;  %v12895_v23 = vmul.f32 0.125, %v409_v39  ;;  %v12931_v2 = vld [vmem:[#allocation2 + $0xea0] sm:$0xff]  ;;  %v12933_v9 = vld [vmem:[#allocation2 + $0xe88] sm:$0xff] }
 0x103   :  { %v887_v43 = vadd.f32 %v886_v5, %v885_v54  ;;  %v504_v35 = vrot.slane %v503_v60, 1  ;;  %v601_v45 = vadd.f32 %v600_v12, %v599_v52  ;;  %v12891_v54 = vmul.f32 0.125, %v217_v42 }
 0x104   :  { %v12893_v22 = vmul.f32 0.125, %v313_v26  ;;  %17306 = vst [vmem:[#allocation64_spill] sm:$0xff] %v12895_v23  ;;  %v17308_v7 = vcombine.low %v12675_v30, %v12677_v16  ;;  %v12907_v62 = vmul.f32 0.125, %v697_v46  ;;  %v12909_v24 = vmul.f32 0.125, %v793_v0  ;;  %v12919_v30 = vld [vmem:[#allocation2 + $0xe68] sm:$0xff]  ;;  %v12921_v16 = vld [vmem:[#allocation2 + $0xe80] sm:$0xff] }
 0x105   :  { %8849 = vmatpush1.bf16.msra.mxu0 %v17300_v58  ;;  %9177 = vmatpush1.bf16.msra.mxu1 %v17301_v8  ;;  %v888_v50 = vrot.slane %v887_v43, 1  ;;  %v505_v47 = vadd.f32 %v504_v35, %v503_v60  ;;  %17304 = vst [vmem:[#allocation62_spill] sm:$0xff] %v12891_v54  ;;  %v12905_v29 = vmul.f32 0.125, %v601_v45  ;;  %v17313_v18 = vcombine.high %v12685_v10, %v12687_v34  ;;  %v112_v45 = vld [vmem:[%s16825_s0 + $0x230] sm:$0xff] }
 0x106   :  { %8850 = vmatprep.subr.bf16.mxu0 %v17302_v55  ;;  %9178 = vmatprep.subr.bf16.mxu1 %v17303_v61  ;;  %17305 = vst [vmem:[#allocation63_spill] sm:$0xff] %v12893_v22  ;;  %17311 = vst [vmem:[#allocation67_spill] sm:$0xff] %v12907_v62  ;;  %v17314_v51 = vcombine.high %v12689_v41, %v12691_v1  ;;  %v2012_v5 = vpack.c.bf16 %v12891_v54, %v12891_v54  ;;  %v128_v46 = vld [vmem:[%s16825_s0 + $0x2b0] sm:$0xff]  ;;  %v13319_v54 = vld [vmem:[#allocation2 + $0x1208] sm:$0xff] }
 0x107   :  { %v889_v28 = vadd.f32 %v888_v50, %v887_v43  ;;  %v12903_v15 = vmul.f32 0.125, %v505_v47  ;;  %17310 = vst [vmem:[#allocation66_spill] sm:$0xff] %v12905_v29  ;;  %17312 = vst [vmem:[#allocation68_spill] sm:$0xff] %v12909_v24  ;;  %v2028_v60 = vpack.c.bf16 %v12893_v22, %v12893_v22  ;;  %v2044_v52 = vpack.c.bf16 %v12895_v23, %v12895_v23  ;;  %v13310_v23 = vld [vmem:[#allocation2 + $0x1220] sm:$0xff]  ;;  %v163_v22 = vld [vmem:[%s16825_s0 + $0x3c8] sm:$0xff] }
 0x108   :  { %v2076_v37 = vpack.c.bf16 %v12905_v29, %v12905_v29  ;;  %v2092_v43 = vpack.c.bf16 %v12907_v62, %v12907_v62  ;;  %v2108_v58 = vpack.c.bf16 %v12909_v24, %v12909_v24  ;;  %v3334_v35 = vunpack.c.l.b16 %v2012_v5  ;;  %v115_v24 = vld [vmem:[%s16825_s0 + $0x248] sm:$0xff] }
 0x109   :  { %8851 = vmatpush1.bf16.msra.mxu0 %v17307_v53  ;;  %9179 = vmatpush1.bf16.msra.mxu1 %v17308_v7  ;;  %17309 = vst [vmem:[#allocation65_spill] sm:$0xff] %v12903_v15  ;;  %v12923_v27 = vmul.f32 0.125, %v889_v28  ;;  %v2060_v4 = vpack.c.bf16 %v12903_v15, %v12903_v15  ;;  %v3350_v12 = vunpack.c.l.b16 %v2028_v60  ;;  %v3366_v6 = vunpack.c.l.b16 %v2044_v52  ;;  %v131_v62 = vld [vmem:[%s16825_s0 + $0x2c8] sm:$0xff]  ;;  %v13308_v15 = vld [vmem:[#allocation2 + $0x1200] sm:$0xff] }
 0x10a   :  { %8852 = vmatprep.subr.bf16.mxu0 %v17313_v18  ;;  %9180 = vmatprep.subr.bf16.mxu1 %v17314_v51  ;;  %v17316_v33 = vcombine.low %v12685_v10, %v12687_v34  ;;  %v17317_v55 = vcombine.low %v12689_v41, %v12691_v1  ;;  %v10534_v61 = vcombine.low %v12917_v31, %v12919_v30  ;;  %v3398_v39 = vunpack.c.l.b16 %v2076_v37 }
 0x10b   :  { %17315 = vst [vmem:[#allocation69_spill] sm:$0xff] %v12923_v27  ;;  %v2124_v8 = vpack.c.bf16 %v12923_v27, %v12923_v27  ;;  %v10535_v42 = vcombine.high %v12917_v31, %v12919_v30  ;;  %v3382_v26 = vunpack.c.l.b16 %v2060_v4  ;;  %v17318_v50 = vcombine.high %v12706_v38, %v12708_v44 }
 0x10c   :  { %v17319_v10 = vcombine.high %v12723_v11, %v12725_v57  ;;  %v10541_v34 = vcombine.high %v12921_v16, %v12931_v2  ;;  %v10543_v41 = vcombine.high %v12933_v9, %v12935_v19  ;;  %v3414_v1 = vunpack.c.l.b16 %v2092_v43 }
 0x10d   :  { %8853 = vmatpush1.bf16.msra.mxu0 %v17316_v33  ;;  %9181 = vmatpush1.bf16.msra.mxu1 %v17317_v55  ;;  %v3504_v47 = vsel %vm1323_vm0, %v3350_v12, %v3334_v35  ;;  %v3430_v0 = vunpack.c.l.b16 %v2108_v58  ;;  %v3446_v28 = vunpack.c.l.b16 %v2124_v8  ;;  %v17320_v7 = vrot.slane %v12819_v13, 4 }
 0x10e   :  { %8854 = vmatprep.subr.bf16.mxu0 %v17318_v50  ;;  %9182 = vmatprep.subr.bf16.mxu1 %v17319_v10  ;;  %v3505_v53 = vsel %vm1325_vm1, %v3366_v6, %v3504_v47  ;;  %v17321_v5 = vrot.slane %v12824_v36, 4  ;;  %v17322_v52 = vrot.slane %v12829_v56, 4  ;;  %v495_v37 = vadd.f32 %v494_v48, %v12838_v32 }
 0x10f   :  { %v207_v18 = vadd.f32 %v17320_v7, %v12819_v13  ;;  %v3506_v51 = vsel %vm1327_vm2, %v3382_v26, %v3505_v53  ;;  %v17323_v43 = vcombine.low %v12706_v38, %v12708_v44  ;;  %v17324_v13 = vcombine.low %v12723_v11, %v12725_v57  ;;  %v144_v11 = vld [vmem:[%s16825_s0 + $0x330] sm:$0xff] }
 0x110   :  { %v303_v60 = vadd.f32 %v17321_v5, %v12824_v36  ;;  %v399_v4 = vadd.f32 %v17322_v52, %v12829_v56  ;;  %v3507_v58 = vsel %vm1329_vm3, %v3398_v39, %v3506_v51  ;;  %v590_v36 = vrot.slane %v112_v45, 4  ;;  %v160_v39 = vld [vmem:[%s16825_s0 + $0x3b0] sm:$0xff] }
 0x111   :  { %8855 = vmatpush1.bf16.msra.mxu0 %v17323_v43  ;;  %9183 = vmatpush1.bf16.msra.mxu1 %v17324_v13  ;;  %v208_v8 = vrot.slane %v207_v18, 2  ;;  %v686_v35 = vrot.slane %v128_v46, 4  ;;  %v17325_v56 = vcombine.high %v12727_v14, %v12735_v40  ;;  %v17326_v32 = vcombine.high %v12737_v49, %v12751_v59 }
 0x112   :  { %v3508_v38 = vsel %vm1331_vm4, %v3414_v1, %v3507_v58  ;;  %v304_v44 = vrot.slane %v303_v60, 2  ;;  %v400_v48 = vrot.slane %v399_v4, 2  ;;  %v496_v12 = vrot.slane %v495_v37, 2 }
 0x113   :  { %8856 = vmatprep.subr.bf16.mxu0 %v17325_v56  ;;  %9184 = vmatprep.subr.bf16.mxu1 %v17326_v32  ;;  %v3509_v57 = vsel %vm1333_vm5, %v3430_v0, %v3508_v38  ;;  %v209_v6 = vadd.f32 %v208_v8, %v207_v18  ;;  %v591_v33 = vadd.f32 %v590_v36, %v112_v45  ;;  %v782_v5 = vrot.slane %v144_v11, 4  ;;  %v13036_v56 = vld [vmem:[#allocation2 + $0xec8] sm:$0xff] }
 0x114   :  { %v687_v55 = vadd.f32 %v686_v35, %v128_v46  ;;  %v3510_v26 = vsel %vm1335_vm6, %v3446_v28, %v3509_v57  ;;  %v305_v50 = vadd.f32 %v304_v44, %v303_v60  ;;  %v401_v10 = vadd.f32 %v400_v48, %v399_v4  ;;  %v13026_v4 = vld [vmem:[#allocation2 + $0xec0] sm:$0xff]  ;;  %v13038_v32 = vld [vmem:[#allocation2 + $0xee8] sm:$0xff] }
 0x115   :  { %v497_v1 = vadd.f32 %v496_v12, %v495_v37  ;;  %v17327_v47 = vcombine.low %v12727_v14, %v12735_v40  ;;  %v17328_v0 = vcombine.low %v12737_v49, %v12751_v59  ;;  %v13016_v53 = vpack.c.b16 %v3510_v26, %v3510_v26  ;;  %v13034_v35 = vld [vmem:[#allocation2 + $0xee0] sm:$0xff] }
 0x116   :  { %v210_v45 = vrot.slane %v209_v6, 1  ;;  %v592_v46 = vrot.slane %v591_v33, 2  ;;  %v688_v28 = vrot.slane %v687_v55, 2  ;;  %v17330_v7 = vcombine.high %v12753_v25, %v12767_v63 }
 0x117   :  { %8857 = vmatpush1.bf16.msra.mxu0 %v17327_v47  ;;  %9185 = vmatpush1.bf16.msra.mxu1 %v17328_v0  ;;  %17329 = vst [vmem:[#allocation70_spill] sm:$0xff] %v13016_v53  ;;  %v17331_v18 = vcombine.high %v12769_v3, %v12782_v20  ;;  %v306_v51 = vrot.slane %v305_v50, 1  ;;  %v402_v40 = vrot.slane %v401_v10, 1  ;;  %v498_v14 = vrot.slane %v497_v1, 1 }
 0x118   :  { %8858 = vmatprep.subr.bf16.mxu0 %v17330_v7  ;;  %8874 = vmatprep.mubr.bf16.mxu0 %v13016_v53  ;;  %v211_v49 = vadd.f32 %v210_v45, %v209_v6  ;;  %v593_v59 = vadd.f32 %v592_v46, %v591_v33  ;;  %v689_v60 = vadd.f32 %v688_v28, %v687_v55  ;;  %v878_v52 = vrot.slane %v160_v39, 4 }
 0x119   :  { %9186 = vmatprep.subr.bf16.mxu1 %v17331_v18  ;;  %9202 = vmatprep.mubr.bf16.mxu1 %v13016_v53  ;;  %v307_v37 = vadd.f32 %v306_v51, %v305_v50  ;;  %v403_v43 = vadd.f32 %v402_v40, %v401_v10  ;;  %v499_v13 = vadd.f32 %v498_v14, %v497_v1  ;;  %v608_v29 = vrot.slane %v115_v24, 4 }
 0x11a   :  { %v783_v58 = vadd.f32 %v782_v5, %v144_v11  ;;  %v17332_v8 = vcombine.low %v12753_v25, %v12767_v63  ;;  %v17333_v36 = vcombine.low %v12769_v3, %v12782_v20  ;;  %v594_v38 = vrot.slane %v593_v59, 1 }
 0x11b   :  { %v690_v44 = vrot.slane %v689_v60, 1  ;;  %v879_v48 = vadd.f32 %v878_v52, %v160_v39  ;;  %v13040_v12 = vmul.f32 0.125, %v211_v49  ;;  %v17335_v57 = vcombine.high %v12803_v21, %v12805_v17  ;;  %v13097_v52 = vld [vmem:[#allocation2 + $0xf40] sm:$0xff] }
 0x11c   :  { %8859 = vmatpush1.bf16.msra.mxu0 %v17332_v8  ;;  %9187 = vmatpush1.bf16.msra.mxu1 %v17333_v36  ;;  %v784_v3 = vrot.slane %v783_v58, 2  ;;  %v13048_v63 = vmul.f32 0.125, %v307_v37  ;;  %v13050_v25 = vmul.f32 0.125, %v403_v43  ;;  %v13052_v20 = vmul.f32 0.125, %v499_v13  ;;  %v13102_v43 = vld [vmem:[#allocation2 + $0xf60] sm:$0xff]  ;;  %v13104_v13 = vld [vmem:[#allocation2 + $0xf48] sm:$0xff] }
 0x11d   :  { %17334 = vst [vmem:[#allocation71_spill] sm:$0xff] %v13040_v12  ;;  %8860 = vmatprep.subr.bf16.mxu0 %v17335_v57  ;;  %9188 = vmatprep.subr.bf16.mxu1 %v10535_v42  ;;  %v10540_v11 = vcombine.low %v12921_v16, %v12931_v2  ;;  %v595_v6 = vadd.f32 %v594_v38, %v593_v59  ;;  %v880_v55 = vrot.slane %v879_v48, 2 }
 0x11e   :  { %17336 = vst [vmem:[#allocation72_spill] sm:$0xff] %v13048_v63  ;;  %17337 = vst [vmem:[#allocation73_spill] sm:$0xff] %v13050_v25  ;;  %v691_v33 = vadd.f32 %v690_v44, %v689_v60  ;;  %v10542_v26 = vcombine.low %v12933_v9, %v12935_v19  ;;  %v10549_v39 = vcombine.high %v13026_v4, %v13034_v35  ;;  %v2617_v9 = vld [vmem:[#allocation2 + $0xf20] sm:$0xff]  ;;  %v2614_v19 = vld [vmem:[#allocation2 + $0xf08] sm:$0xff] }
 0x11f   :  { %17338 = vst [vmem:[#allocation74_spill] sm:$0xff] %v13052_v20  ;;  %v10551_v42 = vcombine.high %v13036_v56, %v13038_v32  ;;  %v785_v50 = vadd.f32 %v784_v3, %v783_v58  ;;  %v17339_v10 = vcombine.low %v12803_v21, %v12805_v17  ;;  %v881_v1 = vadd.f32 %v880_v55, %v879_v48  ;;  %v13080_v17 = vld [vmem:[#allocation2 + $0xf00] sm:$0xff]  ;;  %v13106_v58 = vld [vmem:[#allocation2 + $0xf68] sm:$0xff] }
 0x120   :  { %9189 = vmatpush1.bf16.msra.mxu1 %v10534_v61  ;;  %v13068_v47 = vmul.f32 0.125, %v595_v6  ;;  %v13070_v0 = vmul.f32 0.125, %v691_v33  ;;  %v2011_v45 = vpack.c.bf16 %v13040_v12, %v13040_v12  ;;  %v2027_v31 = vpack.c.bf16 %v13048_v63, %v13048_v63  ;;  %v13123_v6 = vld [vmem:[#allocation2 + $0xfc0] sm:$0xff] }
 0x121   :  { %8861 = vmatpush1.bf16.msra.mxu0 %v17339_v10  ;;  %9190 = vmatprep.subr.bf16.mxu1 %v10543_v41  ;;  %v786_v21 = vrot.slane %v785_v50, 1  ;;  %v2043_v30 = vpack.c.bf16 %v13050_v25, %v13050_v25  ;;  %v2059_v61 = vpack.c.bf16 %v13052_v20, %v13052_v20  ;;  %v10548_v16 = vcombine.low %v13026_v4, %v13034_v35  ;;  %v13111_v35 = vld [vmem:[#allocation2 + $0xf80] sm:$0xff] }
 0x122   :  { %17340 = vst [vmem:[#allocation75_spill] sm:$0xff] %v13068_v47  ;;  %17341 = vst [vmem:[#allocation76_spill] sm:$0xff] %v13070_v0  ;;  %8862 = vmatprep.subr.bf16.mxu0 %v10541_v34  ;;  %v10550_v2 = vcombine.low %v13036_v56, %v13038_v32  ;;  %v2618_v34 = vld [vmem:[#allocation2 + $0xf28] sm:$0xff]  ;;  %v882_v41 = vrot.slane %v881_v1, 1  ;;  %v2075_v46 = vpack.c.bf16 %v13068_v47, %v13068_v47  ;;  %v3333_v18 = vunpack.c.l.b16 %v2011_v45  ;;  %v13113_v56 = vld [vmem:[#allocation2 + $0xfa0] sm:$0xff] }
 0x123   :  { %v787_v28 = vadd.f32 %v786_v21, %v785_v50  ;;  %v2091_v7 = vpack.c.bf16 %v13070_v0, %v13070_v0  ;;  %v3349_v51 = vunpack.c.l.b16 %v2027_v31  ;;  %v3365_v14 = vunpack.c.l.b16 %v2043_v30  ;;  %v13115_v32 = vld [vmem:[#allocation2 + $0xf88] sm:$0xff]  ;;  %v13125_v33 = vld [vmem:[#allocation2 + $0xfe0] sm:$0xff] }
 0x124   :  { %9191 = vmatpush1.bf16.msra.mxu1 %v10542_v26  ;;  %v883_v40 = vadd.f32 %v882_v41, %v881_v1  ;;  %v3381_v5 = vunpack.c.l.b16 %v2059_v61  ;;  %v3397_v49 = vunpack.c.l.b16 %v2075_v46  ;;  %v10557_v59 = vcombine.high %v13080_v17, %v2617_v9  ;;  %v13134_v50 = vld [vmem:[#allocation2 + $0xfe8] sm:$0xff]  ;;  %v13136_v10 = vld [vmem:[#allocation2 + $0x1000] sm:$0xff] }
 0x125   :  { %8863 = vmatpush1.bf16.msra.mxu0 %v10540_v11  ;;  %9192 = vmatprep.subr.bf16.mxu1 %v10551_v42  ;;  %v10559_v60 = vcombine.high %v2614_v19, %v2618_v34  ;;  %v13099_v4 = vmul.f32 0.125, %v787_v28  ;;  %v3497_v37 = vsel %vm1323_vm0, %v3349_v51, %v3333_v18  ;;  %v3413_v44 = vunpack.c.l.b16 %v2091_v7  ;;  %v13121_v11 = vld [vmem:[#allocation2 + $0xfa8] sm:$0xff]  ;;  %v13140_v45 = vld [vmem:[#allocation2 + $0x1020] sm:$0xff] }
 0x126   :  { %8864 = vmatprep.subr.bf16.mxu0 %v10549_v39  ;;  %v13108_v8 = vmul.f32 0.125, %v883_v40  ;;  %v3498_v36 = vsel %vm1325_vm1, %v3365_v14, %v3497_v37  ;;  %v10556_v57 = vcombine.low %v13080_v17, %v2617_v9  ;;  %v10558_v3 = vcombine.low %v2614_v19, %v2618_v34  ;;  %v13132_v42 = vld [vmem:[#allocation2 + $0xfc8] sm:$0xff]  ;;  %v13153_v9 = vld [vmem:[#allocation2 + $0x1060] sm:$0xff] }
 0x127   :  { %17342 = vst [vmem:[#allocation77_spill] sm:$0xff] %v13099_v4  ;;  %v2107_v38 = vpack.c.bf16 %v13099_v4, %v13099_v4  ;;  %v3499_v48 = vsel %vm1327_vm2, %v3381_v5, %v3498_v36  ;;  %v10565_v26 = vcombine.high %v13097_v52, %v13102_v43  ;;  %v10567_v39 = vcombine.high %v13104_v13, %v13106_v58  ;;  %v13142_v17 = vld [vmem:[#allocation2 + $0x1008] sm:$0xff]  ;;  %v13165_v7 = vld [vmem:[#allocation2 + $0x1080] sm:$0xff] }
 0x128   :  { %17343 = vst [vmem:[#allocation78_spill] sm:$0xff] %v13108_v8  ;;  %9193 = vmatpush1.bf16.msra.mxu1 %v10550_v2  ;;  %v3500_v55 = vsel %vm1329_vm3, %v3397_v49, %v3499_v48  ;;  %v2123_v1 = vpack.c.bf16 %v13108_v8, %v13108_v8  ;;  %v13144_v21 = vld [vmem:[#allocation2 + $0x1028] sm:$0xff]  ;;  %v10564_v30 = vcombine.low %v13097_v52, %v13102_v43  ;;  %v13151_v2 = vld [vmem:[#allocation2 + $0x1040] sm:$0xff]  ;;  %v704_v20 = vrot.slane %v131_v62, 4 }
 0x129   :  { %8865 = vmatpush1.bf16.msra.mxu0 %v10548_v16  ;;  %9194 = vmatprep.subr.bf16.mxu1 %v10559_v60  ;;  %v3429_v31 = vunpack.c.l.b16 %v2107_v38  ;;  %v10566_v61 = vcombine.low %v13104_v13, %v13106_v58  ;;  %v3501_v16 = vsel %vm1331_vm4, %v3413_v44, %v3500_v55  ;;  %v13155_v19 = vld [vmem:[#allocation2 + $0x1048] sm:$0xff]  ;;  %v10572_v34 = vcombine.low %v13111_v35, %v13113_v56  ;;  %v13167_v18 = vld [vmem:[#allocation2 + $0x10a0] sm:$0xff] }
 0x12a   :  { %8866 = vmatprep.subr.bf16.mxu0 %v10557_v59  ;;  %v10573_v41 = vcombine.high %v13111_v35, %v13113_v56  ;;  %v10574_v46 = vcombine.low %v13115_v32, %v13121_v11  ;;  %v13163_v28 = vld [vmem:[#allocation2 + $0x1068] sm:$0xff]  ;;  %v10575_v51 = vcombine.high %v13115_v32, %v13121_v11  ;;  %v10581_v14 = vcombine.high %v13123_v6, %v13125_v33  ;;  %v13179_v60 = vld [vmem:[#allocation2 + $0x10c0] sm:$0xff] }
 0x12b   :  { %v3445_v5 = vunpack.c.l.b16 %v2123_v1  ;;  %v13175_v49 = vld [vmem:[#allocation2 + $0x1088] sm:$0xff]  ;;  %v13181_v52 = vld [vmem:[#allocation2 + $0x10e0] sm:$0xff]  ;;  %v10583_v43 = vcombine.high %v13132_v42, %v13134_v50  ;;  %v3502_v58 = vsel %vm1333_vm5, %v3429_v31, %v3501_v16  ;;  %v17345_v0 = vcombine.low %v13123_v6, %v13125_v33 }
 0x12c   :  { %9195 = vmatpush1.bf16.msra.mxu1 %v10558_v3  ;;  %v13177_v59 = vld [vmem:[#allocation2 + $0x10a8] sm:$0xff]  ;;  %v13194_v56 = vld [vmem:[#allocation2 + $0x1100] sm:$0xff]  ;;  %v17348_v6 = vcombine.high %v13142_v17, %v13144_v21  ;;  %v17351_v12 = vcombine.high %v13151_v2, %v13153_v9 }
 0x12d   :  { %8867 = vmatpush1.bf16.msra.mxu0 %v10556_v57  ;;  %9196 = vmatprep.subr.bf16.mxu1 %v10567_v39  ;;  %v13190_v36 = vld [vmem:[#allocation2 + $0x10c8] sm:$0xff]  ;;  %v13209_v3 = vld [vmem:[#allocation2 + $0x1120] sm:$0xff] }
 0x12e   :  { %8868 = vmatprep.subr.bf16.mxu0 %v10565_v26  ;;  %v13192_v35 = vld [vmem:[#allocation2 + $0x10e8] sm:$0xff]  ;;  %v13221_v31 = vld [vmem:[#allocation2 + $0x1140] sm:$0xff] }
 0x12f   :  { %v13199_v32 = vld [vmem:[%s16825_s0 + $0x48] sm:$0xff]  ;;  %v13223_v16 = vld [vmem:[#allocation2 + $0x1160] sm:$0xff] }
 0x130   :  { %v13211_v11 = vld [vmem:[#allocation2 + $0x1108] sm:$0xff]  ;;  %9197 = vmatpush1.bf16.msra.mxu1 %v10566_v61  ;;  %v13234_v44 = vld [vmem:[#allocation2 + $0x1180] sm:$0xff] }
 0x131   :  { %v13213_v55 = vld [vmem:[#allocation2 + $0x1128] sm:$0xff]  ;;  %8869 = vmatpush1.bf16.msra.mxu0 %v10564_v30  ;;  %9198 = vmatprep.subr.bf16.mxu1 %v10575_v51  ;;  %v3503_v30 = vsel %vm1335_vm6, %v3445_v5, %v3502_v58  ;;  %v13250_v26 = vld [vmem:[#allocation2 + $0x11a0] sm:$0xff] }
 0x132   :  { %v13225_v57 = vld [vmem:[#allocation2 + $0x1148] sm:$0xff]  ;;  %8870 = vmatprep.subr.bf16.mxu0 %v10573_v41  ;;  %v224_v41 = vrot.slane %v13199_v32, 4  ;;  %v13267_v37 = vld [vmem:[#allocation2 + $0x11c0] sm:$0xff]  ;;  %v13271_v27 = vpack.c.b16 %v3503_v30, %v3503_v30 }
 0x133   :  { %v13232_v39 = vld [vmem:[#allocation2 + $0x1168] sm:$0xff]  ;;  %v13269_v40 = vld [vmem:[#allocation2 + $0x11e0] sm:$0xff] }
 0x134   :  { %v13239_v1 = vld [vmem:[%s16825_s0 + $0xc8] sm:$0xff]  ;;  %9199 = vmatpush1.bf16.msra.mxu1 %v10574_v46  ;;  %17344 = vst [vmem:[#allocation79_spill] sm:$0xff] %v13271_v27  ;;  %v13326_v4 = vld [vmem:[%s16825_s0 + $0x40] sm:$0xff]  ;;  %v17346_v46 = vcombine.low %v13132_v42, %v13134_v50  ;;  %v225_v30 = vadd.f32 %v224_v41, %v13199_v32  ;;  %v609_v42 = vadd.f32 %v608_v29, %v115_v24 }
 0x135   :  { %v13252_v13 = vld [vmem:[#allocation2 + $0x1188] sm:$0xff]  ;;  %8871 = vmatpush1.bf16.msra.mxu0 %v10572_v34  ;;  %v320_v34 = vrot.slane %v13239_v1, 4  ;;  %9200 = vmatprep.subr.bf16.mxu1 %v10583_v43  ;;  %v13341_v63 = vld [vmem:[%s16825_s0 + $0xc0] sm:$0xff]  ;;  %v17349_v50 = vcombine.low %v13136_v10, %v13140_v45  ;;  %v17350_v32 = vcombine.low %v13142_v17, %v13144_v21  ;;  %v17352_v29 = vcombine.high %v13155_v19, %v13163_v28 }
 0x136   :  { %v83_v48 = vld [vmem:[%s16825_s0 + $0x148] sm:$0xff]  ;;  %8872 = vmatprep.subr.bf16.mxu0 %v10581_v14  ;;  %v314_v53 = vrot.slane %v13341_v63, 4 }
 0x137   :  { %v13265_v38 = vld [vmem:[#allocation2 + $0x11a8] sm:$0xff]  ;;  %v416_v43 = vrot.slane %v83_v48, 4 }
 0x138   :  { %v13277_v58 = vld [vmem:[#allocation2 + $0x11c8] sm:$0xff]  ;;  %9201 = vmatpush1.bf16.msra.mxu1 %v17346_v46  ;;  %v896_v46 = vrot.slane %v163_v22, 4 }
 0x139   :  { %v99_v61 = vld [vmem:[%s16825_s0 + $0x1c8] sm:$0xff]  ;;  %8873 = vmatpush1.bf16.msra.mxu0 %v17345_v0  ;;  %v17347_v0 = vcombine.high %v13136_v10, %v13140_v45  ;;  %9211 = vmatprep.subr.bf16.mxu1 %v17348_v6  ;;  %v417_v6 = vadd.f32 %v416_v43, %v83_v48  ;;  %v610_v10 = vrot.slane %v609_v42, 2 }
 0x13a   :  { %v13292_v5 = vld [vmem:[#allocation2 + $0x11e8] sm:$0xff]  ;;  %v512_v8 = vrot.slane %v99_v61, 4  ;;  %v897_v45 = vadd.f32 %v896_v46, %v163_v22 }
 0x13b   :  { %v147_v14 = vld [vmem:[%s16825_s0 + $0x348] sm:$0xff]  ;;  %8883 = vmatprep.subr.bf16.mxu0 %v17347_v0  ;;  %v321_v0 = vadd.f32 %v320_v34, %v13239_v1  ;;  %9203 = vmatmul.mubr.bf16.vlgmr.msra.gmra.mrb[0].mxu1 %v13271_v27  ;;  %v226_v1 = vrot.slane %v225_v30, 2  ;;  %v705_v34 = vadd.f32 %v704_v20, %v131_v62  ;;  %v418_v24 = vrot.slane %v417_v6, 2 }
 0x13c   :  { %v13321_v51 = vld [vmem:[#allocation2 + $0x1228] sm:$0xff]  ;;  %v800_v25 = vrot.slane %v147_v14, 4  ;;  %8875 = vmatmul.mubr.bf16.vlgmr.msra.gmra.mrb[0].mxu0 %v13271_v27  ;;  %v513_v33 = vadd.f32 %v512_v8, %v99_v61  ;;  %9212 = vmatpush1.bf16.msra.mxu1 %v17350_v32  ;;  %v611_v62 = vadd.f32 %v610_v10, %v609_v42  ;;  %v17353_v20 = vcombine.low %v13151_v2, %v13153_v9 }
 0x13d   :  { %8884 = vmatpush1.bf16.msra.mxu0 %v17349_v50  ;;  %v322_v41 = vrot.slane %v321_v0, 2  ;;  %9213 = vmatprep.subr.bf16.mxu1 %v17352_v29  ;;  %v227_v48 = vadd.f32 %v226_v1, %v225_v30  ;;  %v706_v17 = vrot.slane %v705_v34, 2  ;;  %v419_v43 = vadd.f32 %v418_v24, %v417_v6 }
 0x13e   :  { %v801_v47 = vadd.f32 %v800_v25, %v147_v14  ;;  %8885 = vmatprep.subr.bf16.mxu0 %v17351_v12  ;;  %v514_v8 = vrot.slane %v513_v33, 2  ;;  %v898_v25 = vrot.slane %v897_v45, 2  ;;  %v17354_v12 = vcombine.low %v13155_v19, %v13163_v28 }
 0x13f   :  { %v323_v61 = vadd.f32 %v322_v41, %v321_v0  ;;  %v228_v14 = vrot.slane %v227_v48, 1  ;;  %v707_v29 = vadd.f32 %v706_v17, %v705_v34  ;;  %v17355_v30 = vcombine.high %v13165_v7, %v13167_v18 }
 0x140   :  { %v802_v21 = vrot.slane %v801_v47, 2  ;;  %v515_v50 = vadd.f32 %v514_v8, %v513_v33  ;;  %9214 = vmatpush1.bf16.msra.mxu1 %v17354_v12  ;;  %v17356_v33 = vcombine.high %v13175_v49, %v13177_v59  ;;  %v420_v42 = vrot.slane %v419_v43, 1  ;;  %v13419_v12 = vld [vmem:[#allocation2 + $0x1260] sm:$0xff] }
 0x141   :  { %8886 = vmatpush1.bf16.msra.mxu0 %v17353_v20  ;;  %v324_v32 = vrot.slane %v323_v61, 1  ;;  %v612_v2 = vrot.slane %v611_v62, 1  ;;  %v899_v9 = vadd.f32 %v898_v25, %v897_v45  ;;  %v229_v0 = vadd.f32 %v228_v14, %v227_v48  ;;  %v13417_v20 = vld [vmem:[#allocation2 + $0x1240] sm:$0xff] }
 0x142   :  { %v803_v22 = vadd.f32 %v802_v21, %v801_v47  ;;  %8887 = vmatprep.subr.bf16.mxu0 %v17355_v30  ;;  %9215 = vmatprep.subr.bf16.mxu1 %v17356_v33  ;;  %v516_v46 = vrot.slane %v515_v50, 1  ;;  %v708_v19 = vrot.slane %v707_v29, 1  ;;  %v421_v1 = vadd.f32 %v420_v42, %v419_v43  ;;  %v13435_v42 = vld [vmem:[#allocation2 + $0x1248] sm:$0xff] }
 0x143   :  { %v325_v6 = vadd.f32 %v324_v32, %v323_v61  ;;  %v613_v34 = vadd.f32 %v612_v2, %v611_v62  ;;  %v900_v47 = vrot.slane %v899_v9, 1  ;;  %v17357_v24 = vcombine.low %v13165_v7, %v13167_v18 }
 0x144   :  { %v804_v28 = vrot.slane %v803_v22, 1  ;;  %v517_v41 = vadd.f32 %v516_v46, %v515_v50  ;;  %v17358_v8 = vcombine.low %v13175_v49, %v13177_v59  ;;  %v709_v10 = vadd.f32 %v708_v19, %v707_v29  ;;  %v13437_v46 = vld [vmem:[#allocation2 + $0x1268] sm:$0xff] }
 0x145   :  { %8888 = vmatpush1.bf16.msra.mxu0 %v17357_v24  ;;  %v13393_v21 = vmul.f32 0.125, %v229_v0  ;;  %v13395_v45 = vmul.f32 0.125, %v325_v6  ;;  %v17361_v48 = vcombine.high %v13179_v60, %v13181_v52  ;;  %v17362_v61 = vcombine.high %v13190_v36, %v13192_v35 }
 0x146   :  { %9216 = vmatpush1.bf16.msra.mxu1 %v17358_v8  ;;  %v805_v17 = vadd.f32 %v804_v28, %v803_v22  ;;  %v901_v7 = vadd.f32 %v900_v47, %v899_v9  ;;  %v13403_v18 = vmul.f32 0.125, %v421_v1  ;;  %v13405_v43 = vmul.f32 0.125, %v517_v41  ;;  %v82_v1 = vld [vmem:[%s16825_s0 + $0x140] sm:$0xff] }
 0x147   :  { %17359 = vst [vmem:[#allocation80_spill] sm:$0xff] %v13393_v21  ;;  %17360 = vst [vmem:[#allocation81_spill] sm:$0xff] %v13395_v45  ;;  %8889 = vmatprep.subr.bf16.mxu0 %v17361_v48  ;;  %9217 = vmatprep.subr.bf16.mxu1 %v17362_v61  ;;  %v13407_v49 = vmul.f32 0.125, %v613_v34  ;;  %v13409_v59 = vmul.f32 0.125, %v709_v10  ;;  %v2014_v62 = vpack.c.bf16 %v13393_v21, %v13393_v21  ;;  %v98_v8 = vld [vmem:[%s16825_s0 + $0x1c0] sm:$0xff] }
 0x148   :  { %17363 = vst [vmem:[#allocation82_spill] sm:$0xff] %v13403_v18  ;;  %17364 = vst [vmem:[#allocation83_spill] sm:$0xff] %v13405_v43  ;;  %v13411_v50 = vmul.f32 0.125, %v805_v17  ;;  %v2030_v25 = vpack.c.bf16 %v13395_v45, %v13395_v45  ;;  %v13421_v14 = vmul.f32 0.125, %v901_v7  ;;  %v2046_v32 = vpack.c.bf16 %v13403_v18, %v13403_v18  ;;  %v114_v10 = vld [vmem:[%s16825_s0 + $0x240] sm:$0xff] }
 0x149   :  { %17365 = vst [vmem:[#allocation84_spill] sm:$0xff] %v13407_v49  ;;  %17366 = vst [vmem:[#allocation85_spill] sm:$0xff] %v13409_v59  ;;  %v2062_v29 = vpack.c.bf16 %v13405_v43, %v13405_v43  ;;  %v2078_v22 = vpack.c.bf16 %v13407_v49, %v13407_v49  ;;  %v17369_v30 = vcombine.low %v13179_v60, %v13181_v52  ;;  %v3336_v0 = vunpack.c.l.b16 %v2014_v62  ;;  %v130_v62 = vld [vmem:[%s16825_s0 + $0x2c0] sm:$0xff] }
 0x14a   :  { %17367 = vst [vmem:[#allocation86_spill] sm:$0xff] %v13411_v50  ;;  %17368 = vst [vmem:[#allocation87_spill] sm:$0xff] %v13421_v14  ;;  %v17370_v33 = vcombine.low %v13190_v36, %v13192_v35  ;;  %v2094_v2 = vpack.c.bf16 %v13409_v59, %v13409_v59  ;;  %v2110_v9 = vpack.c.bf16 %v13411_v50, %v13411_v50  ;;  %v3352_v6 = vunpack.c.l.b16 %v2030_v25  ;;  %v85_v50 = vld [vmem:[%s16825_s0 + $0x158] sm:$0xff]  ;;  %v13781_v59 = vld [vmem:[#allocation2 + $0x1548] sm:$0xff] }
 0x14b   :  { %8890 = vmatpush1.bf16.msra.mxu0 %v17369_v30  ;;  %v17371_v60 = vcombine.high %v13194_v56, %v13209_v3  ;;  %v17372_v52 = vcombine.high %v13211_v11, %v13213_v55  ;;  %v2126_v36 = vpack.c.bf16 %v13421_v14, %v13421_v14  ;;  %v3368_v35 = vunpack.c.l.b16 %v2046_v32  ;;  %v13763_v14 = vld [vmem:[#allocation2 + $0x1540] sm:$0xff] }
 0x14c   :  { %9218 = vmatpush1.bf16.msra.mxu1 %v17370_v33  ;;  %v3384_v19 = vunpack.c.l.b16 %v2062_v29  ;;  %v3400_v28 = vunpack.c.l.b16 %v2078_v22  ;;  %v10655_v41 = vcombine.high %v13319_v54, %v13321_v51  ;;  %v10660_v34 = vcombine.low %v13417_v20, %v13419_v12 }
 0x14d   :  { %8891 = vmatprep.subr.bf16.mxu0 %v17371_v60  ;;  %9219 = vmatprep.subr.bf16.mxu1 %v17372_v52  ;;  %v3416_v47 = vunpack.c.l.b16 %v2094_v2  ;;  %v3518_v24 = vsel %vm1323_vm0, %v3352_v6, %v3336_v0  ;;  %v10661_v17 = vcombine.high %v13417_v20, %v13419_v12  ;;  %v10663_v48 = vcombine.high %v13435_v42, %v13437_v46 }
 0x14e   :  { %v3432_v61 = vunpack.c.l.b16 %v2110_v9  ;;  %v3519_v7 = vsel %vm1325_vm1, %v3368_v35, %v3518_v24  ;;  %v17373_v25 = vcombine.low %v13194_v56, %v13209_v3  ;;  %v17374_v32 = vcombine.low %v13211_v11, %v13213_v55  ;;  %v146_v35 = vld [vmem:[%s16825_s0 + $0x340] sm:$0xff] }
 0x14f   :  { %v3448_v29 = vunpack.c.l.b16 %v2126_v36  ;;  %v3520_v22 = vsel %vm1327_vm2, %v3384_v19, %v3519_v7  ;;  %v17375_v30 = vrot.slane %v13326_v4, 4  ;;  %v410_v2 = vrot.slane %v82_v1, 4 }
 0x150   :  { %8892 = vmatpush1.bf16.msra.mxu0 %v17373_v25  ;;  %9220 = vmatpush1.bf16.msra.mxu1 %v17374_v32  ;;  %v17376_v9 = vcombine.high %v13221_v31, %v13223_v16  ;;  %v17377_v56 = vcombine.high %v13225_v57, %v13232_v39  ;;  %v3521_v3 = vsel %vm1329_vm3, %v3400_v28, %v3520_v22  ;;  %v506_v55 = vrot.slane %v98_v8, 4 }
 0x151   :  { %v219_v33 = vadd.f32 %v17375_v30, %v13326_v4  ;;  %v315_v11 = vadd.f32 %v314_v53, %v13341_v63  ;;  %v602_v0 = vrot.slane %v114_v10, 4  ;;  %v3522_v6 = vsel %vm1331_vm4, %v3416_v47, %v3521_v3 }
 0x152   :  { %8893 = vmatprep.subr.bf16.mxu0 %v17376_v9  ;;  %9221 = vmatprep.subr.bf16.mxu1 %v17377_v56  ;;  %v411_v60 = vadd.f32 %v410_v2, %v82_v1  ;;  %v698_v52 = vrot.slane %v130_v62, 4  ;;  %v3523_v36 = vsel %vm1333_vm5, %v3432_v61, %v3522_v6  ;;  %v507_v24 = vadd.f32 %v506_v55, %v98_v8  ;;  %v162_v1 = vld [vmem:[%s16825_s0 + $0x3c0] sm:$0xff] }
 0x153   :  { %v220_v4 = vrot.slane %v219_v33, 2  ;;  %v316_v19 = vrot.slane %v315_v11, 2  ;;  %v603_v28 = vadd.f32 %v602_v0, %v114_v10  ;;  %v17378_v7 = vcombine.low %v13221_v31, %v13223_v16 }
 0x154   :  { %v17379_v53 = vcombine.low %v13225_v57, %v13232_v39  ;;  %v3524_v63 = vsel %vm1335_vm6, %v3448_v29, %v3523_v36  ;;  %v412_v61 = vrot.slane %v411_v60, 2  ;;  %v699_v25 = vadd.f32 %v698_v52, %v130_v62 }
 0x155   :  { %8894 = vmatpush1.bf16.msra.mxu0 %v17378_v7  ;;  %v221_v47 = vadd.f32 %v220_v4, %v219_v33  ;;  %v17380_v8 = vcombine.high %v13234_v44, %v13250_v26  ;;  %v17381_v31 = vcombine.high %v13252_v13, %v13265_v38  ;;  %v13514_v16 = vpack.c.b16 %v3524_v63, %v3524_v63 }
 0x156   :  { %9222 = vmatpush1.bf16.msra.mxu1 %v17379_v53  ;;  %v317_v57 = vadd.f32 %v316_v19, %v315_v11  ;;  %v508_v39 = vrot.slane %v507_v24, 2  ;;  %v604_v10 = vrot.slane %v603_v28, 2  ;;  %v413_v29 = vadd.f32 %v412_v61, %v411_v60 }
 0x157   :  { %8895 = vmatprep.subr.bf16.mxu0 %v17380_v8  ;;  %9223 = vmatprep.subr.bf16.mxu1 %v17381_v31  ;;  %17382 = vst [vmem:[#allocation88_spill] sm:$0xff] %v13514_v16  ;;  %v222_v32 = vrot.slane %v221_v47, 1  ;;  %v700_v22 = vrot.slane %v699_v25, 2  ;;  %v794_v30 = vrot.slane %v146_v35, 4  ;;  %v890_v9 = vrot.slane %v162_v1, 4 }
 0x158   :  { %8915 = vmatprep.mubr.bf16.mxu0 %v13514_v16  ;;  %9243 = vmatprep.mubr.bf16.mxu1 %v13514_v16  ;;  %v318_v62 = vrot.slane %v317_v57, 1  ;;  %v509_v33 = vadd.f32 %v508_v39, %v507_v24  ;;  %v605_v2 = vadd.f32 %v604_v10, %v603_v28  ;;  %v17383_v56 = vcombine.low %v13234_v44, %v13250_v26  ;;  %v13560_v10 = vld [vmem:[#allocation2 + $0x1288] sm:$0xff] }
 0x159   :  { %v17384_v3 = vcombine.low %v13252_v13, %v13265_v38  ;;  %v223_v11 = vadd.f32 %v222_v32, %v221_v47  ;;  %v414_v55 = vrot.slane %v413_v29, 1  ;;  %v701_v0 = vadd.f32 %v700_v22, %v699_v25  ;;  %v13562_v32 = vld [vmem:[#allocation2 + $0x12a8] sm:$0xff] }
 0x15a   :  { %8896 = vmatpush1.bf16.msra.mxu0 %v17383_v56  ;;  %v795_v6 = vadd.f32 %v794_v30, %v146_v35  ;;  %v17385_v4 = vcombine.high %v13267_v37, %v13269_v40  ;;  %v17386_v60 = vcombine.high %v13277_v58, %v13292_v5  ;;  %v319_v52 = vadd.f32 %v318_v62, %v317_v57 }
 0x15b   :  { %9224 = vmatpush1.bf16.msra.mxu1 %v17384_v3  ;;  %v510_v36 = vrot.slane %v509_v33, 1  ;;  %v606_v44 = vrot.slane %v605_v2, 1  ;;  %v891_v26 = vadd.f32 %v890_v9, %v162_v1  ;;  %v415_v19 = vadd.f32 %v414_v55, %v413_v29 }
 0x15c   :  { %8897 = vmatprep.subr.bf16.mxu0 %v17385_v4  ;;  %9225 = vmatprep.subr.bf16.mxu1 %v17386_v60  ;;  %v702_v24 = vrot.slane %v701_v0, 1  ;;  %v796_v13 = vrot.slane %v795_v6, 2  ;;  %v13530_v38 = vmul.f32 0.125, %v223_v11  ;;  %v13532_v53 = vmul.f32 0.125, %v319_v52 }
 0x15d   :  { %v511_v28 = vadd.f32 %v510_v36, %v509_v33  ;;  %v607_v7 = vadd.f32 %v606_v44, %v605_v2  ;;  %v892_v35 = vrot.slane %v891_v26, 2  ;;  %v17389_v63 = vcombine.low %v13267_v37, %v13269_v40  ;;  %v13550_v40 = vld [vmem:[#allocation2 + $0x1280] sm:$0xff]  ;;  %v13597_v36 = vld [vmem:[#allocation2 + $0x12e8] sm:$0xff] }
 0x15e   :  { %17387 = vst [vmem:[#allocation89_spill] sm:$0xff] %v13530_v38  ;;  %17388 = vst [vmem:[#allocation90_spill] sm:$0xff] %v13532_v53  ;;  %v17390_v47 = vcombine.low %v13277_v58, %v13292_v5  ;;  %v703_v61 = vadd.f32 %v702_v24, %v701_v0  ;;  %v797_v1 = vadd.f32 %v796_v13, %v795_v6  ;;  %v13540_v25 = vmul.f32 0.125, %v415_v19  ;;  %v13552_v37 = vld [vmem:[#allocation2 + $0x12a0] sm:$0xff]  ;;  %v13610_v19 = vld [vmem:[#allocation2 + $0x1328] sm:$0xff] }
 0x15f   :  { %8898 = vmatpush1.bf16.msra.mxu0 %v17389_v63  ;;  %v2013_v8 = vpack.c.bf16 %v13530_v38, %v13530_v38  ;;  %v17392_v31 = vcombine.high %v13308_v15, %v13310_v23  ;;  %v893_v5 = vadd.f32 %v892_v35, %v891_v26  ;;  %v13554_v58 = vmul.f32 0.125, %v511_v28  ;;  %v13601_v44 = vld [vmem:[#allocation2 + $0x1320] sm:$0xff]  ;;  %v13608_v26 = vld [vmem:[#allocation2 + $0x1308] sm:$0xff] }
 0x160   :  { %9226 = vmatpush1.bf16.msra.mxu1 %v17390_v47  ;;  %17391 = vst [vmem:[#allocation91_spill] sm:$0xff] %v13540_v25  ;;  %v13556_v57 = vmul.f32 0.125, %v607_v7  ;;  %v2029_v39 = vpack.c.bf16 %v13532_v53, %v13532_v53  ;;  %v798_v29 = vrot.slane %v797_v1, 1  ;;  %v13564_v22 = vmul.f32 0.125, %v703_v61  ;;  %v13612_v24 = vld [vmem:[#allocation2 + $0x1340] sm:$0xff]  ;;  %v13623_v63 = vld [vmem:[#allocation2 + $0x1348] sm:$0xff] }
 0x161   :  { %8899 = vmatprep.subr.bf16.mxu0 %v17392_v31  ;;  %9227 = vmatprep.subr.bf16.mxu1 %v10655_v41  ;;  %17393 = vst [vmem:[#allocation92_spill] sm:$0xff] %v13554_v58  ;;  %v2045_v41 = vpack.c.bf16 %v13540_v25, %v13540_v25  ;;  %v3335_v30 = vunpack.c.l.b16 %v2013_v8  ;;  %v894_v62 = vrot.slane %v893_v5, 1  ;;  %v2061_v33 = vpack.c.bf16 %v13554_v58, %v13554_v58  ;;  %v13621_v35 = vld [vmem:[#allocation2 + $0x1360] sm:$0xff]  ;;  %v13625_v47 = vld [vmem:[#allocation2 + $0x1368] sm:$0xff] }
 0x162   :  { %17394 = vst [vmem:[#allocation93_spill] sm:$0xff] %v13556_v57  ;;  %17395 = vst [vmem:[#allocation94_spill] sm:$0xff] %v13564_v22  ;;  %v2077_v2 = vpack.c.bf16 %v13556_v57, %v13556_v57  ;;  %v3351_v9 = vunpack.c.l.b16 %v2029_v39  ;;  %v17396_v56 = vcombine.low %v13308_v15, %v13310_v23  ;;  %v17397_v3 = vcombine.low %v13319_v54, %v13321_v51  ;;  %v13590_v23 = vld [vmem:[#allocation2 + $0x12c0] sm:$0xff]  ;;  %v13594_v51 = vld [vmem:[#allocation2 + $0x12c8] sm:$0xff] }
 0x163   :  { %v10662_v11 = vcombine.low %v13435_v42, %v13437_v46  ;;  %v10669_v55 = vcombine.high %v13550_v40, %v13552_v37  ;;  %v799_v0 = vadd.f32 %v798_v29, %v797_v1  ;;  %v3367_v6 = vunpack.c.l.b16 %v2045_v41  ;;  %v13592_v15 = vld [vmem:[#allocation2 + $0x12e0] sm:$0xff]  ;;  %v13638_v31 = vld [vmem:[#allocation2 + $0x1388] sm:$0xff]  ;;  %v69_v41 = vld [vmem:[%s16825_s0 + $0xd8] sm:$0xff] }
 0x164   :  { %8900 = vmatpush1.bf16.msra.mxu0 %v17396_v56  ;;  %9228 = vmatpush1.bf16.msra.mxu1 %v17397_v3  ;;  %v10671_v54 = vcombine.high %v13560_v10, %v13562_v32  ;;  %v895_v4 = vadd.f32 %v894_v62, %v893_v5  ;;  %v3383_v60 = vunpack.c.l.b16 %v2061_v33  ;;  %v3511_v52 = vsel %vm1323_vm0, %v3351_v9, %v3335_v30  ;;  %v13636_v8 = vld [vmem:[#allocation2 + $0x13a0] sm:$0xff]  ;;  %v13646_v39 = vld [vmem:[#allocation2 + $0x13a8] sm:$0xff] }
 0x165   :  { %8901 = vmatprep.subr.bf16.mxu0 %v10661_v17  ;;  %9229 = vmatprep.subr.bf16.mxu1 %v10663_v48  ;;  %v13599_v17 = vld [vmem:[#allocation2 + $0x1300] sm:$0xff]  ;;  %v13603_v42 = vmul.f32 0.125, %v799_v0  ;;  %v2093_v46 = vpack.c.bf16 %v13564_v22, %v13564_v22  ;;  %v3512_v48 = vsel %vm1325_vm1, %v3367_v6, %v3511_v52  ;;  %v3399_v13 = vunpack.c.l.b16 %v2077_v2  ;;  %v13658_v33 = vld [vmem:[#allocation2 + $0x13c8] sm:$0xff]  ;;  %v101_v22 = vld [vmem:[%s16825_s0 + $0x1d8] sm:$0xff] }
 0x166   :  { %v10668_v28 = vcombine.low %v13550_v40, %v13552_v37  ;;  %v10670_v7 = vcombine.low %v13560_v10, %v13562_v32  ;;  %v13627_v61 = vmul.f32 0.125, %v895_v4  ;;  %v3513_v1 = vsel %vm1327_vm2, %v3383_v60, %v3512_v48  ;;  %v13648_v10 = vld [vmem:[#allocation2 + $0x13c0] sm:$0xff]  ;;  %v13660_v2 = vld [vmem:[#allocation2 + $0x13e8] sm:$0xff] }
 0x167   :  { %17398 = vst [vmem:[#allocation95_spill] sm:$0xff] %v13603_v42  ;;  %v10677_v20 = vcombine.high %v13590_v23, %v13592_v15  ;;  %v10679_v12 = vcombine.high %v13594_v51, %v13597_v36  ;;  %v2109_v40 = vpack.c.bf16 %v13603_v42, %v13603_v42  ;;  %v10676_v37 = vcombine.low %v13590_v23, %v13592_v15  ;;  %v13650_v32 = vld [vmem:[#allocation2 + $0x13e0] sm:$0xff]  ;;  %v13671_v0 = vld [vmem:[#allocation2 + $0x1408] sm:$0xff] }
 0x168   :  { %8902 = vmatpush1.bf16.msra.mxu0 %v10660_v34  ;;  %9230 = vmatpush1.bf16.msra.mxu1 %v10662_v11  ;;  %17399 = vst [vmem:[#allocation96_spill] sm:$0xff] %v13627_v61  ;;  %v13634_v34 = vld [vmem:[#allocation2 + $0x1380] sm:$0xff]  ;;  %v10678_v5 = vcombine.low %v13594_v51, %v13597_v36  ;;  %v3415_v29 = vunpack.c.l.b16 %v2093_v46  ;;  %v10685_v30 = vcombine.high %v13599_v17, %v13601_v44  ;;  %v13673_v6 = vld [vmem:[#allocation2 + $0x1428] sm:$0xff]  ;;  %v428_v49 = vrot.slane %v85_v50, 4 }
 0x169   :  { %8903 = vmatprep.subr.bf16.mxu0 %v10669_v55  ;;  %9231 = vmatprep.subr.bf16.mxu1 %v10671_v54  ;;  %v13662_v9 = vld [vmem:[#allocation2 + $0x1400] sm:$0xff]  ;;  %v3514_v56 = vsel %vm1329_vm3, %v3399_v13, %v3513_v1  ;;  %v10687_v3 = vcombine.high %v13608_v26, %v13610_v19  ;;  %v2125_v54 = vpack.c.bf16 %v13627_v61, %v13627_v61  ;;  %v3431_v4 = vunpack.c.l.b16 %v2109_v40  ;;  %v13687_v36 = vld [vmem:[#allocation2 + $0x1448] sm:$0xff] }
 0x16a   :  { %v13669_v55 = vld [vmem:[#allocation2 + $0x1420] sm:$0xff]  ;;  %v10693_v23 = vcombine.high %v13612_v24, %v13621_v35  ;;  %v10695_v51 = vcombine.high %v13623_v63, %v13625_v47  ;;  %v13710_v48 = vld [vmem:[#allocation2 + $0x1488] sm:$0xff]  ;;  %v524_v58 = vrot.slane %v101_v22, 4  ;;  %v17403_v18 = vcombine.low %v13612_v24, %v13621_v35 }
 0x16b   :  { %v13683_v60 = vld [vmem:[#allocation2 + $0x1440] sm:$0xff]  ;;  %v3447_v15 = vunpack.c.l.b16 %v2125_v54  ;;  %v13724_v13 = vld [vmem:[#allocation2 + $0x14c8] sm:$0xff]  ;;  %v53_v54 = vld [vmem:[%s16825_s0 + $0x58] sm:$0xff]  ;;  %v17405_v21 = vcombine.high %v13634_v34, %v13636_v8  ;;  %v17406_v38 = vcombine.high %v13638_v31, %v13646_v39  ;;  %v429_v16 = vadd.f32 %v428_v49, %v85_v50 }
 0x16c   :  { %8904 = vmatpush1.bf16.msra.mxu0 %v10668_v28  ;;  %9232 = vmatpush1.bf16.msra.mxu1 %v10670_v7  ;;  %v13685_v52 = vld [vmem:[#allocation2 + $0x1460] sm:$0xff]  ;;  %v3515_v28 = vsel %vm1331_vm4, %v3415_v29, %v3514_v56  ;;  %v13696_v7 = vld [vmem:[#allocation2 + $0x1468] sm:$0xff]  ;;  %v17408_v24 = vcombine.low %v13638_v31, %v13646_v39  ;;  %v17410_v49 = vcombine.high %v13658_v33, %v13660_v2 }
 0x16d   :  { %8905 = vmatprep.subr.bf16.mxu0 %v10677_v20  ;;  %9233 = vmatprep.subr.bf16.mxu1 %v10679_v12  ;;  %v13698_v1 = vld [vmem:[#allocation2 + $0x1480] sm:$0xff]  ;;  %v13712_v29 = vld [vmem:[#allocation2 + $0x14a8] sm:$0xff]  ;;  %v3516_v40 = vsel %vm1333_vm5, %v3431_v4, %v3515_v28 }
 0x16e   :  { %v13700_v20 = vld [vmem:[#allocation2 + $0x14a0] sm:$0xff]  ;;  %v13726_v62 = vld [vmem:[#allocation2 + $0x14e8] sm:$0xff] }
 0x16f   :  { %v13714_v56 = vld [vmem:[#allocation2 + $0x14c0] sm:$0xff]  ;;  %v13748_v28 = vld [vmem:[#allocation2 + $0x1508] sm:$0xff] }
 0x170   :  { %8906 = vmatpush1.bf16.msra.mxu0 %v10676_v37  ;;  %9234 = vmatpush1.bf16.msra.mxu1 %v10678_v5  ;;  %v13722_v11 = vld [vmem:[#allocation2 + $0x14e0] sm:$0xff]  ;;  %v13750_v5 = vld [vmem:[#allocation2 + $0x1528] sm:$0xff]  ;;  %v3517_v37 = vsel %vm1335_vm6, %v3447_v15, %v3516_v40  ;;  %v133_v40 = vld [vmem:[%s16825_s0 + $0x2d8] sm:$0xff] }
 0x171   :  { %8907 = vmatprep.subr.bf16.mxu0 %v10685_v30  ;;  %9235 = vmatprep.subr.bf16.mxu1 %v10687_v3  ;;  %v13733_v12 = vld [vmem:[#allocation2 + $0x1500] sm:$0xff]  ;;  %v17400_v30 = vcombine.low %v13599_v17, %v13601_v44  ;;  %v17401_v3 = vcombine.low %v13608_v26, %v13610_v19  ;;  %v117_v17 = vld [vmem:[%s16825_s0 + $0x258] sm:$0xff]  ;;  %v236_v44 = vrot.slane %v53_v54, 4  ;;  %v13810_v4 = vld [vmem:[#allocation2 + $0x1568] sm:$0xff]  ;;  %v13816_v57 = vpack.c.b16 %v3517_v37, %v3517_v37 }
 0x172   :  { %v13735_v46 = vld [vmem:[#allocation2 + $0x1520] sm:$0xff]  ;;  %17402 = vst [vmem:[#allocation97_spill] sm:$0xff] %v13810_v4  ;;  %v13823_v26 = vld [vmem:[%s16825_s0 + $0x50] sm:$0xff]  ;;  %v17404_v37 = vcombine.low %v13623_v63, %v13625_v47  ;;  %v716_v25 = vrot.slane %v133_v40, 4 }
 0x173   :  { %v13765_v61 = vld [vmem:[#allocation2 + $0x1560] sm:$0xff]  ;;  %v13828_v15 = vld [vmem:[%s16825_s0 + $0xd0] sm:$0xff]  ;;  %v237_v47 = vadd.f32 %v236_v44, %v53_v54  ;;  %v17409_v44 = vcombine.high %v13648_v10, %v13650_v32 }
 0x174   :  { %8908 = vmatpush1.bf16.msra.mxu0 %v17400_v30  ;;  %9236 = vmatpush1.bf16.msra.mxu1 %v17401_v3  ;;  %v149_v30 = vld [vmem:[%s16825_s0 + $0x358] sm:$0xff]  ;;  %v13812_v19 = vld [vmem:[#allocation2 + $0x1580] sm:$0xff]  ;;  %v620_v3 = vrot.slane %v117_v17, 4  ;;  %v717_v4 = vadd.f32 %v716_v25, %v133_v40  ;;  %v17411_v40 = vcombine.low %v13648_v10, %v13650_v32 }
 0x175   :  { %8909 = vmatprep.subr.bf16.mxu0 %v10693_v23  ;;  %9237 = vmatprep.subr.bf16.mxu1 %v10695_v51  ;;  %v165_v23 = vld [vmem:[%s16825_s0 + $0x3d8] sm:$0xff]  ;;  %v332_v51 = vrot.slane %v69_v41, 4  ;;  %v13814_v42 = vld [vmem:[#allocation2 + $0x15a0] sm:$0xff]  ;;  %v812_v45 = vrot.slane %v149_v30, 4  ;;  %v238_v35 = vrot.slane %v237_v47, 2 }
 0x176   :  { %v908_v53 = vrot.slane %v165_v23, 4  ;;  %v621_v27 = vadd.f32 %v620_v3, %v117_v17 }
 0x177   :  { %v333_v43 = vadd.f32 %v332_v51, %v69_v41  ;;  %v813_v63 = vadd.f32 %v812_v45, %v149_v30  ;;  %v718_v41 = vrot.slane %v717_v4, 2  ;;  %v17412_v30 = vcombine.low %v13658_v33, %v13660_v2 }
 0x178   :  { %8910 = vmatpush1.bf16.msra.mxu0 %v17403_v18  ;;  %9238 = vmatpush1.bf16.msra.mxu1 %v17404_v37  ;;  %v230_v37 = vrot.slane %v13823_v26, 4  ;;  %v17407_v18 = vcombine.low %v13634_v34, %v13636_v8  ;;  %v909_v54 = vadd.f32 %v908_v53, %v165_v23  ;;  %v622_v34 = vrot.slane %v621_v27, 2 }
 0x179   :  { %8911 = vmatprep.subr.bf16.mxu0 %v17405_v21  ;;  %9239 = vmatprep.subr.bf16.mxu1 %v17406_v38  ;;  %v326_v21 = vrot.slane %v13828_v15, 4  ;;  %v525_v38 = vadd.f32 %v524_v58, %v101_v22  ;;  %v334_v50 = vrot.slane %v333_v43, 2  ;;  %v430_v58 = vrot.slane %v429_v16, 2 }
 0x17a   :  { %v239_v8 = vadd.f32 %v238_v35, %v237_v47  ;;  %v814_v31 = vrot.slane %v813_v63, 2  ;;  %v910_v39 = vrot.slane %v909_v54, 2  ;;  %v623_v53 = vadd.f32 %v622_v34, %v621_v27 }
 0x17b   :  { %v526_v22 = vrot.slane %v525_v38, 2  ;;  %v335_v17 = vadd.f32 %v334_v50, %v333_v43  ;;  %v431_v25 = vadd.f32 %v430_v58, %v429_v16  ;;  %v719_v51 = vadd.f32 %v718_v41, %v717_v4 }
 0x17c   :  { %8912 = vmatpush1.bf16.msra.mxu0 %v17407_v18  ;;  %9240 = vmatpush1.bf16.msra.mxu1 %v17408_v24  ;;  %v240_v23 = vrot.slane %v239_v8, 1  ;;  %v815_v3 = vadd.f32 %v814_v31, %v813_v63  ;;  %v911_v18 = vadd.f32 %v910_v39, %v909_v54  ;;  %v13875_v24 = vld [vmem:[%s16825_s0 + $0x150] sm:$0xff]  ;;  %v17413_v27 = vcombine.high %v13662_v9, %v13669_v55 }
 0x17d   :  { %8913 = vmatprep.subr.bf16.mxu0 %v17409_v44  ;;  %9241 = vmatprep.subr.bf16.mxu1 %v17410_v49  ;;  %v527_v45 = vadd.f32 %v526_v22, %v525_v38  ;;  %v17414_v43 = vcombine.high %v13671_v0, %v13673_v6  ;;  %v336_v16 = vrot.slane %v335_v17, 1  ;;  %v432_v10 = vrot.slane %v431_v25, 1 }
 0x17e   :  { %v624_v33 = vrot.slane %v623_v53, 1  ;;  %v241_v2 = vadd.f32 %v240_v23, %v239_v8  ;;  %v720_v4 = vrot.slane %v719_v51, 1  ;;  %v816_v35 = vrot.slane %v815_v3, 1  ;;  %v13920_v23 = vld [vmem:[#allocation2 + $0x15e0] sm:$0xff] }
 0x17f   :  { %v528_v32 = vrot.slane %v527_v45, 1  ;;  %v912_v63 = vrot.slane %v911_v18, 1  ;;  %v337_v47 = vadd.f32 %v336_v16, %v335_v17  ;;  %v433_v38 = vadd.f32 %v432_v10, %v431_v25  ;;  %v13936_v10 = vld [vmem:[#allocation2 + $0x15c8] sm:$0xff] }
 0x180   :  { %8914 = vmatpush1.bf16.msra.mxu0 %v17411_v40  ;;  %9242 = vmatpush1.bf16.msra.mxu1 %v17412_v30  ;;  %v422_v44 = vrot.slane %v13875_v24, 4  ;;  %v17415_v49 = vcombine.low %v13662_v9, %v13669_v55  ;;  %v17416_v50 = vcombine.low %v13671_v0, %v13673_v6  ;;  %v625_v58 = vadd.f32 %v624_v33, %v623_v53  ;;  %v13906_v6 = vld [vmem:[#allocation2 + $0x1588] sm:$0xff]  ;;  %v13918_v30 = vld [vmem:[#allocation2 + $0x15c0] sm:$0xff] }
 0x181   :  { %8924 = vmatprep.subr.bf16.mxu0 %v17413_v27  ;;  %9252 = vmatprep.subr.bf16.mxu1 %v17414_v43  ;;  %v529_v54 = vadd.f32 %v528_v32, %v527_v45  ;;  %v721_v22 = vadd.f32 %v720_v4, %v719_v51  ;;  %v817_v34 = vadd.f32 %v816_v35, %v815_v3  ;;  %v13892_v8 = vmul.f32 0.125, %v241_v2  ;;  %v13916_v40 = vld [vmem:[#allocation2 + $0x15a8] sm:$0xff] }
 0x182   :  { %v17418_v41 = vcombine.high %v13683_v60, %v13685_v52  ;;  %v17419_v31 = vcombine.high %v13687_v36, %v13696_v7  ;;  %v913_v39 = vadd.f32 %v912_v63, %v911_v18  ;;  %v13900_v9 = vmul.f32 0.125, %v337_v47  ;;  %v13938_v32 = vld [vmem:[#allocation2 + $0x15e8] sm:$0xff] }
 0x183   :  { %8916 = vmatmul.mubr.bf16.vlgmr.msra.gmra.mrb[0].mxu0 %v13816_v57  ;;  %9244 = vmatmul.mubr.bf16.vlgmr.msra.gmra.mrb[0].mxu1 %v13816_v57  ;;  %17417 = vst [vmem:[#allocation98_spill] sm:$0xff] %v13892_v8  ;;  %v13902_v55 = vmul.f32 0.125, %v433_v38  ;;  %v13904_v0 = vmul.f32 0.125, %v529_v54  ;;  %v13908_v17 = vmul.f32 0.125, %v625_v58  ;;  %v13910_v25 = vmul.f32 0.125, %v721_v22  ;;  %v100_v38 = vld [vmem:[%s16825_s0 + $0x1d0] sm:$0xff] }
 0x184   :  { %8925 = vmatpush1.bf16.msra.mxu0 %v17415_v49  ;;  %9253 = vmatpush1.bf16.msra.mxu1 %v17416_v50  ;;  %17420 = vst [vmem:[#allocation99_spill] sm:$0xff] %v13900_v9  ;;  %v13912_v45 = vmul.f32 0.125, %v817_v34  ;;  %v2016_v53 = vpack.c.bf16 %v13892_v8, %v13892_v8  ;;  %v13922_v51 = vmul.f32 0.125, %v913_v39  ;;  %v2032_v3 = vpack.c.bf16 %v13900_v9, %v13900_v9  ;;  %v116_v22 = vld [vmem:[%s16825_s0 + $0x250] sm:$0xff] }
 0x185   :  { %8926 = vmatprep.subr.bf16.mxu0 %v17418_v41  ;;  %9254 = vmatprep.subr.bf16.mxu1 %v17419_v31  ;;  %17421 = vst [vmem:[#allocation100_spill] sm:$0xff] %v13902_v55  ;;  %17422 = vst [vmem:[#allocation101_spill] sm:$0xff] %v13904_v0  ;;  %v2048_v18 = vpack.c.bf16 %v13902_v55, %v13902_v55  ;;  %v2064_v27 = vpack.c.bf16 %v13904_v0, %v13904_v0 }
 0x186   :  { %17423 = vst [vmem:[#allocation102_spill] sm:$0xff] %v13908_v17  ;;  %17424 = vst [vmem:[#allocation103_spill] sm:$0xff] %v13910_v25  ;;  %v17427_v43 = vcombine.low %v13683_v60, %v13685_v52  ;;  %v17428_v16 = vcombine.low %v13687_v36, %v13696_v7  ;;  %v2080_v33 = vpack.c.bf16 %v13908_v17, %v13908_v17  ;;  %v3338_v35 = vunpack.c.l.b16 %v2016_v53  ;;  %v132_v53 = vld [vmem:[%s16825_s0 + $0x2d0] sm:$0xff] }
 0x187   :  { %17425 = vst [vmem:[#allocation104_spill] sm:$0xff] %v13912_v45  ;;  %17426 = vst [vmem:[#allocation105_spill] sm:$0xff] %v13922_v51  ;;  %v2096_v2 = vpack.c.bf16 %v13910_v25, %v13910_v25  ;;  %v2112_v4 = vpack.c.bf16 %v13912_v45, %v13912_v45  ;;  %v17429_v60 = vcombine.high %v13698_v1, %v13700_v20  ;;  %v3354_v7 = vunpack.c.l.b16 %v2032_v3 }
 0x188   :  { %8927 = vmatpush1.bf16.msra.mxu0 %v17427_v43  ;;  %9255 = vmatpush1.bf16.msra.mxu1 %v17428_v16  ;;  %v17430_v52 = vcombine.high %v13710_v48, %v13712_v29  ;;  %v2128_v36 = vpack.c.bf16 %v13922_v51, %v13922_v51  ;;  %v3370_v63 = vunpack.c.l.b16 %v2048_v18  ;;  %v3386_v47 = vunpack.c.l.b16 %v2064_v27 }
 0x189   :  { %8928 = vmatprep.subr.bf16.mxu0 %v17429_v60  ;;  %v10766_v54 = vcombine.low %v13906_v6, %v13916_v40  ;;  %v10767_v49 = vcombine.high %v13906_v6, %v13916_v40  ;;  %v10773_v50 = vcombine.high %v13918_v30, %v13920_v23  ;;  %v3402_v58 = vunpack.c.l.b16 %v2080_v33  ;;  %v2849_v40 = vld [vmem:[#allocation2 + $0x1660] sm:$0xff] }
 0x18a   :  { %9256 = vmatprep.subr.bf16.mxu1 %v17430_v52  ;;  %v10775_v34 = vcombine.high %v13936_v10, %v13938_v32  ;;  %v3418_v41 = vunpack.c.l.b16 %v2096_v2  ;;  %v3434_v31 = vunpack.c.l.b16 %v2112_v4  ;;  %v3532_v39 = vsel %vm1323_vm0, %v3354_v7, %v3338_v35 }
 0x18b   :  { %v17431_v3 = vcombine.low %v13698_v1, %v13700_v20  ;;  %v17432_v18 = vcombine.low %v13710_v48, %v13712_v29  ;;  %v3450_v27 = vunpack.c.l.b16 %v2128_v36  ;;  %v3533_v43 = vsel %vm1325_vm1, %v3370_v63, %v3532_v39 }
 0x18c   :  { %v231_v16 = vadd.f32 %v230_v37, %v13823_v26  ;;  %v518_v33 = vrot.slane %v100_v38, 4  ;;  %v17433_v2 = vcombine.high %v13714_v56, %v13722_v11  ;;  %v17434_v1 = vcombine.high %v13724_v13, %v13726_v62 }
 0x18d   :  { %8929 = vmatpush1.bf16.msra.mxu0 %v17431_v3  ;;  %9257 = vmatpush1.bf16.msra.mxu1 %v17432_v18  ;;  %v3534_v20 = vsel %vm1327_vm2, %v3386_v47, %v3533_v43  ;;  %v327_v48 = vadd.f32 %v326_v21, %v13828_v15  ;;  %v423_v29 = vadd.f32 %v422_v44, %v13875_v24  ;;  %v614_v4 = vrot.slane %v116_v22, 4  ;;  %v148_v24 = vld [vmem:[%s16825_s0 + $0x350] sm:$0xff] }
 0x18e   :  { %8930 = vmatprep.subr.bf16.mxu0 %v17433_v2  ;;  %9258 = vmatprep.subr.bf16.mxu1 %v17434_v1  ;;  %v3535_v26 = vsel %vm1329_vm3, %v3402_v58, %v3534_v20  ;;  %v232_v37 = vrot.slane %v231_v16, 2  ;;  %v519_v35 = vadd.f32 %v518_v33, %v100_v38  ;;  %v710_v60 = vrot.slane %v132_v53, 4 }
 0x18f   :  { %v3536_v52 = vsel %vm1331_vm4, %v3418_v41, %v3535_v26  ;;  %v328_v36 = vrot.slane %v327_v48, 2  ;;  %v424_v7 = vrot.slane %v423_v29, 2  ;;  %v615_v63 = vadd.f32 %v614_v4, %v116_v22 }
 0x190   :  { %v17435_v47 = vcombine.low %v13714_v56, %v13722_v11  ;;  %v17436_v15 = vcombine.low %v13724_v13, %v13726_v62  ;;  %v3537_v21 = vsel %vm1333_vm5, %v3434_v31, %v3536_v52  ;;  %v233_v44 = vadd.f32 %v232_v37, %v231_v16  ;;  %v164_v13 = vld [vmem:[%s16825_s0 + $0x3d0] sm:$0xff] }
 0x191   :  { %v520_v38 = vrot.slane %v519_v35, 2  ;;  %v711_v58 = vadd.f32 %v710_v60, %v132_v53  ;;  %v17437_v22 = vcombine.high %v13733_v12, %v13735_v46  ;;  %v17438_v11 = vcombine.high %v13748_v28, %v13750_v5  ;;  %v17442_v37 = vld [vmem:[#allocation97_spill] sm:$0xff] }
 0x192   :  { %8931 = vmatpush1.bf16.msra.mxu0 %v17435_v47  ;;  %9259 = vmatpush1.bf16.msra.mxu1 %v17436_v15  ;;  %v3538_v62 = vsel %vm1335_vm6, %v3450_v27, %v3537_v21  ;;  %v329_v56 = vadd.f32 %v328_v36, %v327_v48  ;;  %v425_v41 = vadd.f32 %v424_v7, %v423_v29  ;;  %v616_v31 = vrot.slane %v615_v63, 2 }
 0x193   :  { %8932 = vmatprep.subr.bf16.mxu0 %v17437_v22  ;;  %9260 = vmatprep.subr.bf16.mxu1 %v17438_v11  ;;  %v14015_v39 = vpack.c.b16 %v3538_v62, %v3538_v62  ;;  %v234_v53 = vrot.slane %v233_v44, 1  ;;  %v521_v3 = vadd.f32 %v520_v38, %v519_v35  ;;  %v712_v18 = vrot.slane %v711_v58, 2 }
 0x194   :  { %v330_v43 = vrot.slane %v329_v56, 1  ;;  %v426_v16 = vrot.slane %v425_v41, 1  ;;  %v617_v33 = vadd.f32 %v616_v31, %v615_v63  ;;  %v806_v2 = vrot.slane %v148_v24, 4  ;;  %v2842_v31 = vld [vmem:[#allocation2 + $0x1628] sm:$0xff] }
 0x195   :  { %v17439_v1 = vcombine.low %v13733_v12, %v13735_v46  ;;  %v17440_v27 = vcombine.low %v13748_v28, %v13750_v5  ;;  %v235_v20 = vadd.f32 %v234_v53, %v233_v44  ;;  %v522_v48 = vrot.slane %v521_v3, 1  ;;  %8956 = vmatprep.mubr.bf16.mxu0 %v14015_v39  ;;  %9284 = vmatprep.mubr.bf16.mxu1 %v14015_v39 }
 0x196   :  { %v713_v29 = vadd.f32 %v712_v18, %v711_v58  ;;  %v902_v4 = vrot.slane %v164_v13, 4  ;;  %v17441_v26 = vcombine.high %v13763_v14, %v13765_v61  ;;  %v17443_v35 = vcombine.high %v13781_v59, %v17442_v37 }
 0x197   :  { %8933 = vmatpush1.bf16.msra.mxu0 %v17439_v1  ;;  %9261 = vmatpush1.bf16.msra.mxu1 %v17440_v27  ;;  %v331_v60 = vadd.f32 %v330_v43, %v329_v56  ;;  %v427_v52 = vadd.f32 %v426_v16, %v425_v41  ;;  %v618_v46 = vrot.slane %v617_v33, 1  ;;  %v807_v12 = vadd.f32 %v806_v2, %v148_v24  ;;  %v2838_v41 = vld [vmem:[#allocation2 + $0x1608] sm:$0xff] }
 0x198   :  { %8934 = vmatprep.subr.bf16.mxu0 %v17441_v26  ;;  %9262 = vmatprep.subr.bf16.mxu1 %v17443_v35  ;;  %v523_v5 = vadd.f32 %v522_v48, %v521_v3  ;;  %v714_v28 = vrot.slane %v713_v29, 1  ;;  %v903_v36 = vadd.f32 %v902_v4, %v164_v13  ;;  %v14031_v7 = vmul.f32 0.125, %v235_v20  ;;  %v2850_v26 = vld [vmem:[#allocation2 + $0x1668] sm:$0xff] }
 0x199   :  { %v619_v63 = vadd.f32 %v618_v46, %v617_v33  ;;  %v808_v47 = vrot.slane %v807_v12, 2  ;;  %v14033_v15 = vmul.f32 0.125, %v331_v60  ;;  %v14035_v21 = vmul.f32 0.125, %v427_v52  ;;  %v14085_v52 = vld [vmem:[#allocation2 + $0x1680] sm:$0xff] }
 0x19a   :  { %17444 = vst [vmem:[#allocation97_spill] sm:$0xff] %v14031_v7  ;;  %v17447_v44 = vcombine.low %v13763_v14, %v13765_v61  ;;  %v17448_v24 = vcombine.low %v13781_v59, %v17442_v37  ;;  %v715_v38 = vadd.f32 %v714_v28, %v713_v29  ;;  %v904_v58 = vrot.slane %v903_v36, 2  ;;  %v2837_v14 = vld [vmem:[#allocation2 + $0x1600] sm:$0xff]  ;;  %v14093_v28 = vld [vmem:[#allocation2 + $0x16a8] sm:$0xff] }
 0x19b   :  { %17445 = vst [vmem:[#allocation106_spill] sm:$0xff] %v14033_v15  ;;  %17446 = vst [vmem:[#allocation107_spill] sm:$0xff] %v14035_v21  ;;  %v14043_v22 = vmul.f32 0.125, %v523_v5  ;;  %v2015_v11 = vpack.c.bf16 %v14031_v7, %v14031_v7  ;;  %v17450_v62 = vcombine.high %v13812_v19, %v13814_v42  ;;  %v2841_v61 = vld [vmem:[#allocation2 + $0x1620] sm:$0xff]  ;;  %v809_v13 = vadd.f32 %v808_v47, %v807_v12  ;;  %v14091_v5 = vld [vmem:[#allocation2 + $0x1688] sm:$0xff] }
 0x19c   :  { %8935 = vmatpush1.bf16.msra.mxu0 %v17447_v44  ;;  %9263 = vmatpush1.bf16.msra.mxu1 %v17448_v24  ;;  %v2031_v59 = vpack.c.bf16 %v14033_v15, %v14033_v15  ;;  %v2047_v56 = vpack.c.bf16 %v14035_v21, %v14035_v21  ;;  %v905_v53 = vadd.f32 %v904_v58, %v903_v36  ;;  %v14057_v3 = vmul.f32 0.125, %v619_v63  ;;  %v14089_v12 = vld [vmem:[#allocation2 + $0x16a0] sm:$0xff]  ;;  %v14099_v44 = vld [vmem:[#allocation2 + $0x16c8] sm:$0xff] }
 0x19d   :  { %17449 = vst [vmem:[#allocation108_spill] sm:$0xff] %v14043_v22  ;;  %8936 = vmatprep.subr.bf16.mxu0 %v17450_v62  ;;  %9264 = vmatprep.subr.bf16.mxu1 %v10767_v49  ;;  %v3337_v18 = vunpack.c.l.b16 %v2015_v11  ;;  %v10772_v43 = vcombine.low %v13918_v30, %v13920_v23  ;;  %v810_v16 = vrot.slane %v809_v13, 1  ;;  %v2063_v49 = vpack.c.bf16 %v14043_v22, %v14043_v22  ;;  %v14095_v63 = vld [vmem:[#allocation2 + $0x16c0] sm:$0xff]  ;;  %v14104_v62 = vld [vmem:[#allocation2 + $0x16e8] sm:$0xff] }
 0x19e   :  { %17451 = vst [vmem:[#allocation109_spill] sm:$0xff] %v14057_v3  ;;  %v3353_v33 = vunpack.c.l.b16 %v2031_v59  ;;  %v17452_v2 = vcombine.low %v13812_v19, %v13814_v42  ;;  %v10774_v1 = vcombine.low %v13936_v10, %v13938_v32  ;;  %v10781_v27 = vcombine.high %v2837_v14, %v2841_v61  ;;  %v2845_v19 = vld [vmem:[#allocation2 + $0x1640] sm:$0xff] }
 0x19f   :  { %v906_v20 = vrot.slane %v905_v53, 1  ;;  %v3369_v48 = vunpack.c.l.b16 %v2047_v56  ;;  %v10783_v42 = vcombine.high %v2838_v41, %v2842_v31  ;;  %v811_v29 = vadd.f32 %v810_v16, %v809_v13  ;;  %v14097_v47 = vld [vmem:[#allocation2 + $0x16e0] sm:$0xff] }
 0x1a0   :  { %8937 = vmatpush1.bf16.msra.mxu0 %v17452_v2  ;;  %9265 = vmatpush1.bf16.msra.mxu1 %v10766_v54  ;;  %v14077_v4 = vmul.f32 0.125, %v715_v38  ;;  %v3525_v6 = vsel %vm1323_vm0, %v3353_v33, %v3337_v18  ;;  %v2846_v54 = vld [vmem:[#allocation2 + $0x1648] sm:$0xff]  ;;  %v2079_v37 = vpack.c.bf16 %v14057_v3, %v14057_v3  ;;  %v3385_v30 = vunpack.c.l.b16 %v2063_v49  ;;  %v14122_v18 = vld [vmem:[#allocation2 + $0x1740] sm:$0xff] }
 0x1a1   :  { %8938 = vmatprep.subr.bf16.mxu0 %v10773_v50  ;;  %9266 = vmatprep.subr.bf16.mxu1 %v10775_v34  ;;  %v907_v35 = vadd.f32 %v906_v20, %v905_v53  ;;  %v10780_v23 = vcombine.low %v2837_v14, %v2841_v61  ;;  %v10782_v10 = vcombine.low %v2838_v41, %v2842_v31  ;;  %v14082_v32 = vmul.f32 0.125, %v811_v29  ;;  %v14106_v14 = vld [vmem:[#allocation2 + $0x1700] sm:$0xff]  ;;  %v14118_v31 = vld [vmem:[#allocation2 + $0x1708] sm:$0xff] }
 0x1a2   :  { %17453 = vst [vmem:[#allocation110_spill] sm:$0xff] %v14077_v4  ;;  %v3526_v50 = vsel %vm1325_vm1, %v3369_v48, %v3525_v6  ;;  %v10789_v34 = vcombine.high %v2845_v19, %v2849_v40  ;;  %v10791_v60 = vcombine.high %v2846_v54, %v2850_v26  ;;  %v2095_v46 = vpack.c.bf16 %v14077_v4, %v14077_v4  ;;  %v14108_v61 = vld [vmem:[#allocation2 + $0x1720] sm:$0xff]  ;;  %v14120_v53 = vld [vmem:[#allocation2 + $0x1728] sm:$0xff] }
 0x1a3   :  { %17454 = vst [vmem:[#allocation111_spill] sm:$0xff] %v14082_v32  ;;  %v3401_v36 = vunpack.c.l.b16 %v2079_v37  ;;  %v14101_v24 = vmul.f32 0.125, %v907_v35  ;;  %v3527_v38 = vsel %vm1327_vm2, %v3385_v30, %v3526_v50  ;;  %v10788_v58 = vcombine.low %v2845_v19, %v2849_v40  ;;  %v14130_v2 = vld [vmem:[#allocation2 + $0x1760] sm:$0xff]  ;;  %v14147_v40 = vld [vmem:[#allocation2 + $0x1788] sm:$0xff] }
 0x1a4   :  { %8939 = vmatpush1.bf16.msra.mxu0 %v10772_v43  ;;  %9267 = vmatpush1.bf16.msra.mxu1 %v10774_v1  ;;  %v10790_v11 = vcombine.low %v2846_v54, %v2850_v26  ;;  %v2111_v13 = vpack.c.bf16 %v14082_v32, %v14082_v32  ;;  %v10796_v59 = vcombine.low %v14085_v52, %v14089_v12  ;;  %v3417_v43 = vunpack.c.l.b16 %v2095_v46  ;;  %v14132_v1 = vld [vmem:[#allocation2 + $0x1748] sm:$0xff]  ;;  %v14143_v29 = vld [vmem:[#allocation2 + $0x1780] sm:$0xff] }
 0x1a5   :  { %8940 = vmatprep.subr.bf16.mxu0 %v10781_v27  ;;  %9268 = vmatprep.subr.bf16.mxu1 %v10783_v42  ;;  %17455 = vst [vmem:[#allocation112_spill] sm:$0xff] %v14101_v24  ;;  %v10797_v56 = vcombine.high %v14085_v52, %v14089_v12  ;;  %v10799_v41 = vcombine.high %v14091_v5, %v14093_v28  ;;  %v14134_v27 = vld [vmem:[#allocation2 + $0x1768] sm:$0xff]  ;;  %v14145_v6 = vld [vmem:[#allocation2 + $0x17a0] sm:$0xff] }
 0x1a6   :  { %v10798_v16 = vcombine.low %v14091_v5, %v14093_v28  ;;  %v10805_v33 = vcombine.high %v14095_v63, %v14097_v47  ;;  %v3528_v20 = vsel %vm1329_vm3, %v3401_v36, %v3527_v38  ;;  %v10807_v42 = vcombine.high %v14099_v44, %v14104_v62  ;;  %v14157_v30 = vld [vmem:[#allocation2 + $0x17a8] sm:$0xff]  ;;  %v14171_v12 = vld [vmem:[#allocation2 + $0x1800] sm:$0xff] }
 0x1a7   :  { %v2127_v54 = vpack.c.bf16 %v14101_v24, %v14101_v24  ;;  %v10815_v35 = vcombine.high %v14118_v31, %v14120_v53  ;;  %v3433_v50 = vunpack.c.l.b16 %v2111_v13  ;;  %v14167_v52 = vld [vmem:[#allocation2 + $0x17c8] sm:$0xff]  ;;  %v3529_v5 = vsel %vm1331_vm4, %v3417_v43, %v3528_v20  ;;  %v14194_v38 = vld [vmem:[#allocation2 + $0x1840] sm:$0xff] }
 0x1a8   :  { %8941 = vmatpush1.bf16.msra.mxu0 %v10780_v23  ;;  %9269 = vmatpush1.bf16.msra.mxu1 %v10782_v10  ;;  %v14159_v23 = vld [vmem:[#allocation2 + $0x17c0] sm:$0xff]  ;;  %v14169_v46 = vld [vmem:[#allocation2 + $0x17e8] sm:$0xff]  ;;  %v17456_v32 = vcombine.low %v14095_v63, %v14097_v47  ;;  %v17458_v17 = vcombine.high %v14106_v14, %v14108_v61 }
 0x1a9   :  { %8942 = vmatprep.subr.bf16.mxu0 %v10789_v34  ;;  %9270 = vmatprep.subr.bf16.mxu1 %v10791_v60  ;;  %v14161_v10 = vld [vmem:[#allocation2 + $0x17e0] sm:$0xff]  ;;  %v14184_v13 = vld [vmem:[#allocation2 + $0x1808] sm:$0xff]  ;;  %v3449_v28 = vunpack.c.l.b16 %v2127_v54  ;;  %v3530_v43 = vsel %vm1333_vm5, %v3433_v50, %v3529_v5 }
 0x1aa   :  { %v14196_v34 = vld [vmem:[#allocation2 + $0x1860] sm:$0xff]  ;;  %v71_v36 = vld [vmem:[%s16825_s0 + $0xe8] sm:$0xff] }
 0x1ab   :  { %v103_v60 = vld [vmem:[%s16825_s0 + $0x1e8] sm:$0xff]  ;;  %v344_v26 = vrot.slane %v71_v36, 4  ;;  %v3531_v49 = vsel %vm1335_vm6, %v3449_v28, %v3530_v43 }
 0x1ac   :  { %8943 = vmatpush1.bf16.msra.mxu0 %v10788_v58  ;;  %9271 = vmatpush1.bf16.msra.mxu1 %v10790_v11  ;;  %v14182_v11 = vld [vmem:[#allocation2 + $0x1820] sm:$0xff]  ;;  %v55_v58 = vld [vmem:[%s16825_s0 + $0x68] sm:$0xff]  ;;  %v536_v51 = vrot.slane %v103_v60, 4 }
 0x1ad   :  { %8944 = vmatprep.subr.bf16.mxu0 %v10797_v56  ;;  %9272 = vmatprep.subr.bf16.mxu1 %v10799_v41  ;;  %v14186_v56 = vld [vmem:[#allocation2 + $0x1828] sm:$0xff]  ;;  %v248_v5 = vrot.slane %v55_v58, 4  ;;  %v345_v4 = vadd.f32 %v344_v26, %v71_v36  ;;  %v17461_v26 = vcombine.high %v14122_v18, %v14130_v2 }
 0x1ae   :  { %v87_v41 = vld [vmem:[%s16825_s0 + $0x168] sm:$0xff]  ;;  %v537_v25 = vadd.f32 %v536_v51, %v103_v60 }
 0x1af   :  { %v119_v37 = vld [vmem:[%s16825_s0 + $0x268] sm:$0xff]  ;;  %v440_v48 = vrot.slane %v87_v41, 4  ;;  %v346_v47 = vrot.slane %v345_v4, 2 }
 0x1b0   :  { %8945 = vmatpush1.bf16.msra.mxu0 %v10796_v59  ;;  %9273 = vmatpush1.bf16.msra.mxu1 %v10798_v16  ;;  %v135_v59 = vld [vmem:[%s16825_s0 + $0x2e8] sm:$0xff]  ;;  %v14238_v16 = vld [vmem:[#allocation2 + $0x18a0] sm:$0xff]  ;;  %v632_v24 = vrot.slane %v119_v37, 4  ;;  %v538_v51 = vrot.slane %v537_v25, 2 }
 0x1b1   :  { %8946 = vmatprep.subr.bf16.mxu0 %v10805_v33  ;;  %9274 = vmatprep.subr.bf16.mxu1 %v10807_v42  ;;  %v14227_v20 = vld [vmem:[#allocation2 + $0x1848] sm:$0xff]  ;;  %v14236_v42 = vld [vmem:[#allocation2 + $0x1880] sm:$0xff]  ;;  %v728_v45 = vrot.slane %v135_v59, 4  ;;  %v17457_v33 = vcombine.low %v14099_v44, %v14104_v62  ;;  %v14265_v62 = vpack.c.b16 %v3531_v49, %v3531_v49  ;;  %v441_v28 = vadd.f32 %v440_v48, %v87_v41 }
 0x1b2   :  { %v14229_v54 = vld [vmem:[#allocation2 + $0x1868] sm:$0xff]  ;;  %v633_v3 = vadd.f32 %v632_v24, %v119_v37  ;;  %v539_v37 = vadd.f32 %v538_v51, %v537_v25  ;;  %v17463_v41 = vcombine.low %v14122_v18, %v14130_v2 }
 0x1b3   :  { %v151_v19 = vld [vmem:[%s16825_s0 + $0x368] sm:$0xff]  ;;  %v729_v0 = vadd.f32 %v728_v45, %v135_v59  ;;  %v442_v22 = vrot.slane %v441_v28, 2  ;;  %v17462_v45 = vcombine.high %v14132_v1, %v14134_v27  ;;  %v17464_v59 = vcombine.low %v14132_v1, %v14134_v27 }
 0x1b4   :  { %v167_v50 = vld [vmem:[%s16825_s0 + $0x3e8] sm:$0xff]  ;;  %8947 = vmatpush1.bf16.msra.mxu0 %v17456_v32  ;;  %9275 = vmatpush1.bf16.msra.mxu1 %v17457_v33  ;;  %v824_v43 = vrot.slane %v151_v19, 4  ;;  %v249_v33 = vadd.f32 %v248_v5, %v55_v58  ;;  %v17460_v32 = vcombine.low %v14118_v31, %v14120_v53  ;;  %v634_v24 = vrot.slane %v633_v3, 2 }
 0x1b5   :  { %8948 = vmatprep.subr.bf16.mxu0 %v17458_v17  ;;  %9276 = vmatprep.subr.bf16.mxu1 %v10815_v35  ;;  %v920_v44 = vrot.slane %v167_v50, 4  ;;  %v17459_v35 = vcombine.low %v14106_v14, %v14108_v61  ;;  %v730_v14 = vrot.slane %v729_v0, 2  ;;  %v443_v31 = vadd.f32 %v442_v22, %v441_v28 }
 0x1b6   :  { %v825_v17 = vadd.f32 %v824_v43, %v151_v19  ;;  %v250_v63 = vrot.slane %v249_v33, 2  ;;  %v347_v19 = vadd.f32 %v346_v47, %v345_v4  ;;  %v635_v60 = vadd.f32 %v634_v24, %v633_v3 }
 0x1b7   :  { %v921_v49 = vadd.f32 %v920_v44, %v167_v50  ;;  %v731_v36 = vadd.f32 %v730_v14, %v729_v0  ;;  %v444_v43 = vrot.slane %v443_v31, 1  ;;  %v17465_v22 = vcombine.high %v14143_v29, %v14145_v6 }
 0x1b8   :  { %8949 = vmatpush1.bf16.msra.mxu0 %v17459_v35  ;;  %9277 = vmatpush1.bf16.msra.mxu1 %v17460_v32  ;;  %v826_v61 = vrot.slane %v825_v17, 2  ;;  %v251_v48 = vadd.f32 %v250_v63, %v249_v33  ;;  %v348_v5 = vrot.slane %v347_v19, 1  ;;  %v17466_v0 = vcombine.high %v14147_v40, %v14157_v30 }
 0x1b9   :  { %8950 = vmatprep.subr.bf16.mxu0 %v17461_v26  ;;  %9278 = vmatprep.subr.bf16.mxu1 %v17462_v45  ;;  %v922_v53 = vrot.slane %v921_v49, 2  ;;  %v540_v25 = vrot.slane %v539_v37, 1  ;;  %v636_v3 = vrot.slane %v635_v60, 1  ;;  %v732_v4 = vrot.slane %v731_v36, 1 }
 0x1ba   :  { %v827_v58 = vadd.f32 %v826_v61, %v825_v17  ;;  %v252_v50 = vrot.slane %v251_v48, 1  ;;  %v349_v28 = vadd.f32 %v348_v5, %v347_v19  ;;  %v445_v1 = vadd.f32 %v444_v43, %v443_v31  ;;  %v14317_v61 = vld [vmem:[#allocation2 + $0x1888] sm:$0xff] }
 0x1bb   :  { %v923_v32 = vadd.f32 %v922_v53, %v921_v49  ;;  %v541_v63 = vadd.f32 %v540_v25, %v539_v37  ;;  %v637_v47 = vadd.f32 %v636_v3, %v635_v60  ;;  %v733_v44 = vadd.f32 %v732_v4, %v731_v36  ;;  %v14329_v60 = vld [vmem:[#allocation2 + $0x18c0] sm:$0xff] }
 0x1bc   :  { %8951 = vmatpush1.bf16.msra.mxu0 %v17463_v41  ;;  %9279 = vmatpush1.bf16.msra.mxu1 %v17464_v59  ;;  %v828_v18 = vrot.slane %v827_v58, 1  ;;  %v253_v2 = vadd.f32 %v252_v50, %v251_v48  ;;  %v17467_v17 = vcombine.low %v14143_v29, %v14145_v6  ;;  %v17468_v35 = vcombine.low %v14147_v40, %v14157_v30  ;;  %v14319_v48 = vld [vmem:[#allocation2 + $0x18a8] sm:$0xff]  ;;  %v14331_v36 = vld [vmem:[#allocation2 + $0x18e0] sm:$0xff] }
 0x1bd   :  { %8952 = vmatprep.subr.bf16.mxu0 %v17465_v22  ;;  %9280 = vmatprep.subr.bf16.mxu1 %v17466_v0  ;;  %v924_v27 = vrot.slane %v923_v32, 1  ;;  %v14299_v45 = vmul.f32 0.125, %v349_v28  ;;  %v14301_v51 = vmul.f32 0.125, %v445_v1  ;;  %v17472_v24 = vcombine.high %v14159_v23, %v14161_v10  ;;  %v54_v3 = vld [vmem:[%s16825_s0 + $0x60] sm:$0xff] }
 0x1be   :  { %v829_v33 = vadd.f32 %v828_v18, %v827_v58  ;;  %v14297_v26 = vmul.f32 0.125, %v253_v2  ;;  %v17473_v14 = vcombine.high %v14167_v52, %v14169_v46  ;;  %v14309_v29 = vmul.f32 0.125, %v541_v63  ;;  %v70_v2 = vld [vmem:[%s16825_s0 + $0xe0] sm:$0xff] }
 0x1bf   :  { %v925_v49 = vadd.f32 %v924_v27, %v923_v32  ;;  %17470 = vst [vmem:[#allocation114_spill] sm:$0xff] %v14299_v45  ;;  %17471 = vst [vmem:[#allocation115_spill] sm:$0xff] %v14301_v51  ;;  %v14311_v6 = vmul.f32 0.125, %v637_v47  ;;  %v14313_v40 = vmul.f32 0.125, %v733_v44  ;;  %v2034_v53 = vpack.c.bf16 %v14299_v45, %v14299_v45  ;;  %v86_v28 = vld [vmem:[%s16825_s0 + $0x160] sm:$0xff] }
 0x1c0   :  { %8953 = vmatpush1.bf16.msra.mxu0 %v17467_v17  ;;  %9281 = vmatpush1.bf16.msra.mxu1 %v17468_v35  ;;  %17469 = vst [vmem:[#allocation113_spill] sm:$0xff] %v14297_v26  ;;  %17474 = vst [vmem:[#allocation116_spill] sm:$0xff] %v14309_v29  ;;  %v14315_v30 = vmul.f32 0.125, %v829_v33  ;;  %v2018_v31 = vpack.c.bf16 %v14297_v26, %v14297_v26  ;;  %v2050_v37 = vpack.c.bf16 %v14301_v51, %v14301_v51  ;;  %v102_v1 = vld [vmem:[%s16825_s0 + $0x1e0] sm:$0xff] }
 0x1c1   :  { %8954 = vmatprep.subr.bf16.mxu0 %v17472_v24  ;;  %9282 = vmatprep.subr.bf16.mxu1 %v17473_v14  ;;  %17475 = vst [vmem:[#allocation117_spill] sm:$0xff] %v14311_v6  ;;  %17476 = vst [vmem:[#allocation118_spill] sm:$0xff] %v14313_v40  ;;  %v14321_v19 = vmul.f32 0.125, %v925_v49  ;;  %v2066_v58 = vpack.c.bf16 %v14309_v29, %v14309_v29  ;;  %v2082_v41 = vpack.c.bf16 %v14311_v6, %v14311_v6  ;;  %v118_v33 = vld [vmem:[%s16825_s0 + $0x260] sm:$0xff] }
 0x1c2   :  { %17477 = vst [vmem:[#allocation119_spill] sm:$0xff] %v14315_v30  ;;  %v2098_v59 = vpack.c.bf16 %v14313_v40, %v14313_v40  ;;  %v2114_v50 = vpack.c.bf16 %v14315_v30, %v14315_v30  ;;  %v17479_v5 = vcombine.low %v14159_v23, %v14161_v10  ;;  %v17480_v43 = vcombine.low %v14167_v52, %v14169_v46  ;;  %v134_v17 = vld [vmem:[%s16825_s0 + $0x2e0] sm:$0xff]  ;;  %v153_v40 = vld [vmem:[%s16825_s0 + $0x378] sm:$0xff] }
 0x1c3   :  { %17478 = vst [vmem:[#allocation120_spill] sm:$0xff] %v14321_v19  ;;  %v2130_v32 = vpack.c.bf16 %v14321_v19, %v14321_v19  ;;  %v3340_v22 = vunpack.c.l.b16 %v2018_v31  ;;  %v3356_v0 = vunpack.c.l.b16 %v2034_v53  ;;  %v3372_v25 = vunpack.c.l.b16 %v2050_v37  ;;  %v14391_v37 = vld [vmem:[#allocation2 + $0x18c8] sm:$0xff] }
 0x1c4   :  { %8955 = vmatpush1.bf16.msra.mxu0 %v17479_v5  ;;  %9283 = vmatpush1.bf16.msra.mxu1 %v17480_v43  ;;  %v17481_v4 = vcombine.high %v14171_v12, %v14182_v11  ;;  %v17482_v23 = vcombine.high %v14184_v13, %v14186_v56  ;;  %v10861_v10 = vcombine.high %v14236_v42, %v14238_v16  ;;  %v3388_v46 = vunpack.c.l.b16 %v2066_v58  ;;  %v14393_v58 = vld [vmem:[#allocation2 + $0x18e8] sm:$0xff] }
 0x1c5   :  { %v10862_v52 = vcombine.low %v14317_v61, %v14319_v48  ;;  %v3404_v18 = vunpack.c.l.b16 %v2082_v41  ;;  %v10863_v27 = vcombine.high %v14317_v61, %v14319_v48  ;;  %v10869_v63 = vcombine.high %v14329_v60, %v14331_v36  ;;  %v2942_v48 = vld [vmem:[#allocation2 + $0x1948] sm:$0xff] }
 0x1c6   :  { %8965 = vmatprep.subr.bf16.mxu0 %v17481_v4  ;;  %9293 = vmatprep.subr.bf16.mxu1 %v17482_v23  ;;  %v3420_v47 = vunpack.c.l.b16 %v2098_v59  ;;  %v3546_v44 = vsel %vm1323_vm0, %v3356_v0, %v3340_v22  ;;  %v3436_v35 = vunpack.c.l.b16 %v2114_v50  ;;  %v3452_v49 = vunpack.c.l.b16 %v2130_v32  ;;  %v14575_v19 = vld [vmem:[#allocation2 + $0x1b88] sm:$0xff] }
 0x1c7   :  { %8957 = vmatmul.mubr.bf16.vlgmr.msra.gmra.mrb[0].mxu0 %v14265_v62  ;;  %9285 = vmatmul.mubr.bf16.vlgmr.msra.gmra.mrb[0].mxu1 %v14265_v62  ;;  %v3547_v24 = vsel %vm1325_vm1, %v3372_v25, %v3546_v44  ;;  %v242_v14 = vrot.slane %v54_v3, 4  ;;  %v17483_v31 = vcombine.low %v14171_v12, %v14182_v11  ;;  %v17484_v53 = vcombine.low %v14184_v13, %v14186_v56  ;;  %v150_v44 = vld [vmem:[%s16825_s0 + $0x360] sm:$0xff] }
 0x1c8   :  { %v3548_v41 = vsel %vm1327_vm2, %v3388_v46, %v3547_v24  ;;  %v338_v59 = vrot.slane %v70_v2, 4  ;;  %v434_v50 = vrot.slane %v86_v28, 4  ;;  %v530_v5 = vrot.slane %v102_v1, 4 }
 0x1c9   :  { %8966 = vmatpush1.bf16.msra.mxu0 %v17483_v31  ;;  %9294 = vmatpush1.bf16.msra.mxu1 %v17484_v53  ;;  %v17485_v43 = vcombine.high %v14194_v38, %v14196_v34  ;;  %v17486_v12 = vcombine.high %v14227_v20, %v14229_v54  ;;  %v3549_v11 = vsel %vm1329_vm3, %v3404_v18, %v3548_v41  ;;  %v626_v56 = vrot.slane %v118_v33, 4  ;;  %v2937_v53 = vld [vmem:[#allocation2 + $0x1920] sm:$0xff]  ;;  %v2934_v41 = vld [vmem:[#allocation2 + $0x1908] sm:$0xff] }
 0x1ca   :  { %v243_v13 = vadd.f32 %v242_v14, %v54_v3  ;;  %v722_v32 = vrot.slane %v134_v17, 4  ;;  %v3550_v22 = vsel %vm1331_vm4, %v3420_v47, %v3549_v11  ;;  %v339_v0 = vadd.f32 %v338_v59, %v70_v2 }
 0x1cb   :  { %8967 = vmatprep.subr.bf16.mxu0 %v17485_v43  ;;  %9295 = vmatprep.subr.bf16.mxu1 %v17486_v12  ;;  %v435_v25 = vadd.f32 %v434_v50, %v86_v28  ;;  %v531_v4 = vadd.f32 %v530_v5, %v102_v1  ;;  %v10871_v23 = vcombine.high %v14391_v37, %v14393_v58  ;;  %v166_v28 = vld [vmem:[%s16825_s0 + $0x3e0] sm:$0xff]  ;;  %v818_v50 = vrot.slane %v150_v44, 4 }
 0x1cc   :  { %v3551_v46 = vsel %vm1333_vm5, %v3436_v35, %v3550_v22  ;;  %v244_v24 = vrot.slane %v243_v13, 2  ;;  %v627_v31 = vadd.f32 %v626_v56, %v118_v33  ;;  %v17487_v3 = vcombine.low %v14194_v38, %v14196_v34  ;;  %v2933_v33 = vld [vmem:[#allocation2 + $0x1900] sm:$0xff] }
 0x1cd   :  { %v17488_v18 = vcombine.low %v14227_v20, %v14229_v54  ;;  %v3552_v2 = vsel %vm1335_vm6, %v3452_v49, %v3551_v46  ;;  %v340_v1 = vrot.slane %v339_v0, 2  ;;  %v436_v47 = vrot.slane %v435_v25, 2  ;;  %v2938_v20 = vld [vmem:[#allocation2 + $0x1928] sm:$0xff] }
 0x1ce   :  { %8968 = vmatpush1.bf16.msra.mxu0 %v17487_v3  ;;  %v532_v35 = vrot.slane %v531_v4, 2  ;;  %v14420_v14 = vpack.c.b16 %v3552_v2, %v3552_v2  ;;  %v245_v34 = vadd.f32 %v244_v24, %v243_v13  ;;  %v723_v38 = vadd.f32 %v722_v32, %v134_v17  ;;  %v2945_v32 = vld [vmem:[#allocation2 + $0x1960] sm:$0xff] }
 0x1cf   :  { %9296 = vmatpush1.bf16.msra.mxu1 %v17488_v18  ;;  %8969 = vmatprep.subr.bf16.mxu0 %v10861_v10  ;;  %v341_v54 = vadd.f32 %v340_v1, %v339_v0  ;;  %v437_v59 = vadd.f32 %v436_v47, %v435_v25  ;;  %v628_v49 = vrot.slane %v627_v31, 2  ;;  %v914_v10 = vrot.slane %v166_v28, 4  ;;  %v2953_v3 = vld [vmem:[#allocation2 + $0x19a0] sm:$0xff] }
 0x1d0   :  { %9297 = vmatprep.subr.bf16.mxu1 %v10863_v27  ;;  %8997 = vmatprep.mubr.bf16.mxu0 %v14420_v14  ;;  %v246_v5 = vrot.slane %v245_v34, 1  ;;  %v533_v43 = vadd.f32 %v532_v35, %v531_v4  ;;  %v17489_v27 = vcombine.low %v14236_v42, %v14238_v16  ;;  %v10868_v17 = vcombine.low %v14329_v60, %v14331_v36  ;;  %v2941_v42 = vld [vmem:[#allocation2 + $0x1940] sm:$0xff] }
 0x1d1   :  { %9325 = vmatprep.mubr.bf16.mxu1 %v14420_v14  ;;  %v10870_v12 = vcombine.low %v14391_v37, %v14393_v58  ;;  %v342_v11 = vrot.slane %v341_v54, 1  ;;  %v438_v13 = vrot.slane %v437_v59, 1  ;;  %v10877_v56 = vcombine.high %v2933_v33, %v2937_v53 }
 0x1d2   :  { %8970 = vmatpush1.bf16.msra.mxu0 %v17489_v27  ;;  %v10879_v16 = vcombine.high %v2934_v41, %v2938_v20  ;;  %v247_v22 = vadd.f32 %v246_v5, %v245_v34  ;;  %v724_v61 = vrot.slane %v723_v38, 2  ;;  %v629_v25 = vadd.f32 %v628_v49, %v627_v31  ;;  %v2950_v31 = vld [vmem:[#allocation2 + $0x1988] sm:$0xff] }
 0x1d3   :  { %9298 = vmatpush1.bf16.msra.mxu1 %v10862_v52  ;;  %8971 = vmatprep.subr.bf16.mxu0 %v10869_v63  ;;  %v2946_v52 = vld [vmem:[#allocation2 + $0x1968] sm:$0xff]  ;;  %v343_v0 = vadd.f32 %v342_v11, %v341_v54  ;;  %v819_v4 = vadd.f32 %v818_v50, %v150_v44  ;;  %v915_v46 = vadd.f32 %v914_v10, %v166_v28  ;;  %v534_v58 = vrot.slane %v533_v43, 1  ;;  %v14443_v54 = vld [vmem:[#allocation2 + $0x19c0] sm:$0xff] }
 0x1d4   :  { %9299 = vmatprep.subr.bf16.mxu1 %v10871_v23  ;;  %v10876_v37 = vcombine.low %v2933_v33, %v2937_v53  ;;  %v10878_v24 = vcombine.low %v2934_v41, %v2938_v20  ;;  %v10885_v60 = vcombine.high %v2941_v42, %v2945_v32  ;;  %v439_v36 = vadd.f32 %v438_v13, %v437_v59  ;;  %v2949_v23 = vld [vmem:[#allocation2 + $0x1980] sm:$0xff]  ;;  %v2954_v44 = vld [vmem:[#allocation2 + $0x19a8] sm:$0xff] }
 0x1d5   :  { %v10887_v63 = vcombine.high %v2942_v48, %v2946_v52  ;;  %v725_v18 = vadd.f32 %v724_v61, %v723_v38  ;;  %v14437_v2 = vmul.f32 0.125, %v247_v22  ;;  %v14439_v1 = vmul.f32 0.125, %v343_v0  ;;  %v14445_v59 = vld [vmem:[#allocation2 + $0x19e0] sm:$0xff]  ;;  %v14453_v10 = vld [vmem:[#allocation2 + $0x19e8] sm:$0xff] }
 0x1d6   :  { %8972 = vmatpush1.bf16.msra.mxu0 %v10868_v17  ;;  %v630_v28 = vrot.slane %v629_v25, 1  ;;  %v820_v47 = vrot.slane %v819_v4, 2  ;;  %v916_v35 = vrot.slane %v915_v46, 2  ;;  %v535_v33 = vadd.f32 %v534_v58, %v533_v43  ;;  %v14451_v43 = vld [vmem:[#allocation2 + $0x19c8] sm:$0xff]  ;;  %v14463_v22 = vld [vmem:[#allocation2 + $0x1a20] sm:$0xff] }
 0x1d7   :  { %9300 = vmatpush1.bf16.msra.mxu1 %v10870_v12  ;;  %8973 = vmatprep.subr.bf16.mxu0 %v10877_v56  ;;  %17490 = vst [vmem:[#allocation121_spill] sm:$0xff] %v14437_v2  ;;  %17491 = vst [vmem:[#allocation122_spill] sm:$0xff] %v14439_v1  ;;  %v10884_v34 = vcombine.low %v2941_v42, %v2945_v32  ;;  %v10886_v53 = vcombine.low %v2942_v48, %v2946_v52  ;;  %v14441_v20 = vmul.f32 0.125, %v439_v36  ;;  %v14455_v56 = vld [vmem:[#allocation2 + $0x1a00] sm:$0xff]  ;;  %v14465_v61 = vld [vmem:[#allocation2 + $0x1a08] sm:$0xff] }
 0x1d8   :  { %9301 = vmatprep.subr.bf16.mxu1 %v10879_v16  ;;  %v10893_v41 = vcombine.high %v2949_v23, %v2953_v3  ;;  %v10895_v38 = vcombine.high %v2950_v31, %v2954_v44  ;;  %v726_v49 = vrot.slane %v725_v18, 1  ;;  %v2017_v50 = vpack.c.bf16 %v14437_v2, %v14437_v2  ;;  %v14467_v48 = vld [vmem:[#allocation2 + $0x1a28] sm:$0xff] }
 0x1d9   :  { %17492 = vst [vmem:[#allocation123_spill] sm:$0xff] %v14441_v20  ;;  %v2033_v5 = vpack.c.bf16 %v14439_v1, %v14439_v1  ;;  %v631_v27 = vadd.f32 %v630_v28, %v629_v25  ;;  %v821_v17 = vadd.f32 %v820_v47, %v819_v4  ;;  %v917_v12 = vadd.f32 %v916_v35, %v915_v46  ;;  %v14473_v25 = vld [vmem:[#allocation2 + $0x1a40] sm:$0xff]  ;;  %v14481_v36 = vld [vmem:[#allocation2 + $0x1a68] sm:$0xff] }
 0x1da   :  { %8974 = vmatpush1.bf16.msra.mxu0 %v10876_v37  ;;  %v10892_v11 = vcombine.low %v2949_v23, %v2953_v3  ;;  %v10894_v13 = vcombine.low %v2950_v31, %v2954_v44  ;;  %v14457_v16 = vmul.f32 0.125, %v535_v33  ;;  %v10900_v42 = vcombine.low %v14443_v54, %v14445_v59  ;;  %v14475_v4 = vld [vmem:[#allocation2 + $0x1a60] sm:$0xff]  ;;  %v137_v31 = vld [vmem:[%s16825_s0 + $0x2f8] sm:$0xff] }
 0x1db   :  { %9302 = vmatpush1.bf16.msra.mxu1 %v10878_v24  ;;  %8975 = vmatprep.subr.bf16.mxu0 %v10885_v60  ;;  %v10901_v32 = vcombine.high %v14443_v54, %v14445_v59  ;;  %v2049_v52 = vpack.c.bf16 %v14441_v20, %v14441_v20  ;;  %v10903_v0 = vcombine.high %v14451_v43, %v14453_v10  ;;  %v3339_v37 = vunpack.c.l.b16 %v2017_v50  ;;  %v14479_v60 = vld [vmem:[#allocation2 + $0x1a48] sm:$0xff]  ;;  %v14491_v28 = vld [vmem:[#allocation2 + $0x1a80] sm:$0xff]  ;;  %v89_v59 = vld [vmem:[%s16825_s0 + $0x178] sm:$0xff] }
 0x1dc   :  { %9303 = vmatprep.subr.bf16.mxu1 %v10887_v63  ;;  %17493 = vst [vmem:[#allocation124_spill] sm:$0xff] %v14457_v16  ;;  %v727_v46 = vadd.f32 %v726_v49, %v725_v18  ;;  %v3355_v58 = vunpack.c.l.b16 %v2033_v5  ;;  %v10902_v24 = vcombine.low %v14451_v43, %v14453_v10  ;;  %v822_v63 = vrot.slane %v821_v17, 1  ;;  %v14493_v47 = vld [vmem:[#allocation2 + $0x1aa0] sm:$0xff] }
 0x1dd   :  { %v918_v23 = vrot.slane %v917_v12, 1  ;;  %v14483_v3 = vmul.f32 0.125, %v631_v27  ;;  %v10909_v44 = vcombine.high %v14455_v56, %v14463_v22  ;;  %v10910_v18 = vcombine.low %v14465_v61, %v14467_v48  ;;  %v14511_v50 = vld [vmem:[#allocation2 + $0x1ac0] sm:$0xff] }
 0x1de   :  { %8976 = vmatpush1.bf16.msra.mxu0 %v10884_v34  ;;  %v2065_v35 = vpack.c.bf16 %v14457_v16, %v14457_v16  ;;  %v10911_v33 = vcombine.high %v14465_v61, %v14467_v48  ;;  %v3371_v54 = vunpack.c.l.b16 %v2049_v52  ;;  %v10919_v49 = vcombine.high %v14479_v60, %v14481_v36  ;;  %v14513_v5 = vld [vmem:[#allocation2 + $0x1ae0] sm:$0xff] }
 0x1df   :  { %9304 = vmatpush1.bf16.msra.mxu1 %v10886_v53  ;;  %8977 = vmatprep.subr.bf16.mxu0 %v10893_v41  ;;  %17494 = vst [vmem:[#allocation125_spill] sm:$0xff] %v14483_v3  ;;  %v10917_v53 = vcombine.high %v14473_v25, %v14475_v4  ;;  %v14503_v41 = vld [vmem:[#allocation2 + $0x1a88] sm:$0xff]  ;;  %v14515_v43 = vmul.f32 0.125, %v727_v46  ;;  %v3539_v10 = vsel %vm1323_vm0, %v3355_v58, %v3339_v37  ;;  %v14532_v37 = vld [vmem:[#allocation2 + $0x1b00] sm:$0xff]  ;;  %v452_v29 = vrot.slane %v89_v59, 4 }
 0x1e0   :  { %9305 = vmatprep.subr.bf16.mxu1 %v10895_v38  ;;  %v14505_v38 = vld [vmem:[#allocation2 + $0x1aa8] sm:$0xff]  ;;  %v919_v61 = vadd.f32 %v918_v23, %v917_v12  ;;  %v2081_v48 = vpack.c.bf16 %v14483_v3, %v14483_v3  ;;  %v14534_v58 = vld [vmem:[#allocation2 + $0x1b20] sm:$0xff]  ;;  %v3387_v27 = vunpack.c.l.b16 %v2065_v35  ;;  %v3540_v46 = vsel %vm1325_vm1, %v3371_v54, %v3539_v10 }
 0x1e1   :  { %17495 = vst [vmem:[#allocation126_spill] sm:$0xff] %v14515_v43  ;;  %v14542_v23 = vld [vmem:[#allocation2 + $0x1b28] sm:$0xff]  ;;  %v14551_v35 = vld [vmem:[#allocation2 + $0x1b60] sm:$0xff]  ;;  %v2097_v52 = vpack.c.bf16 %v14515_v43, %v14515_v43  ;;  %v17499_v20 = vcombine.low %v14473_v25, %v14475_v4  ;;  %v17500_v55 = vcombine.low %v14479_v60, %v14481_v36  ;;  %v740_v21 = vrot.slane %v137_v31, 4 }
 0x1e2   :  { %8978 = vmatpush1.bf16.msra.mxu0 %v10892_v11  ;;  %v14520_v11 = vld [vmem:[#allocation2 + $0x1ac8] sm:$0xff]  ;;  %v3541_v30 = vsel %vm1327_vm2, %v3387_v27, %v3540_v46  ;;  %v14595_v46 = vld [vmem:[#allocation2 + $0x1bc0] sm:$0xff]  ;;  %v453_v1 = vadd.f32 %v452_v29, %v89_v59 }
 0x1e3   :  { %9306 = vmatpush1.bf16.msra.mxu1 %v10894_v13  ;;  %8979 = vmatprep.subr.bf16.mxu0 %v10901_v32  ;;  %v14522_v13 = vld [vmem:[#allocation2 + $0x1ae8] sm:$0xff]  ;;  %v823_v32 = vadd.f32 %v822_v63, %v821_v17  ;;  %v3419_v34 = vunpack.c.l.b16 %v2097_v52  ;;  %v741_v25 = vadd.f32 %v740_v21, %v137_v31  ;;  %v17507_v31 = vcombine.low %v14511_v50, %v14513_v5 }
 0x1e4   :  { %9307 = vmatprep.subr.bf16.mxu1 %v10903_v0  ;;  %v14540_v63 = vld [vmem:[#allocation2 + $0x1b08] sm:$0xff]  ;;  %v14544_v0 = vld [vmem:[#allocation2 + $0x1b40] sm:$0xff]  ;;  %v17506_v29 = vcombine.high %v14520_v11, %v14522_v13 }
 0x1e5   :  { %v14553_v17 = vld [vmem:[#allocation2 + $0x1b48] sm:$0xff]  ;;  %v14565_v10 = vmul.f32 0.125, %v823_v32  ;;  %v57_v32 = vld [vmem:[%s16825_s0 + $0x78] sm:$0xff] }
 0x1e6   :  { %8980 = vmatpush1.bf16.msra.mxu0 %v10900_v42  ;;  %v14555_v12 = vld [vmem:[#allocation2 + $0x1b68] sm:$0xff]  ;;  %v14567_v42 = vmul.f32 0.125, %v919_v61  ;;  %v73_v61 = vld [vmem:[%s16825_s0 + $0xf8] sm:$0xff]  ;;  %v260_v6 = vrot.slane %v57_v32, 4 }
 0x1e7   :  { %9308 = vmatpush1.bf16.msra.mxu1 %v10902_v24  ;;  %8981 = vmatprep.subr.bf16.mxu0 %v10909_v44  ;;  %v14561_v44 = vld [vmem:[#allocation2 + $0x1b80] sm:$0xff]  ;;  %17496 = vst [vmem:[#allocation127_spill] sm:$0xff] %v14565_v10  ;;  %v3403_v24 = vunpack.c.l.b16 %v2081_v48  ;;  %v14577_v54 = vld [vmem:[#allocation2 + $0x1ba8] sm:$0xff]  ;;  %v17498_v48 = vcombine.low %v14455_v56, %v14463_v22  ;;  %v105_v56 = vld [vmem:[%s16825_s0 + $0x1f8] sm:$0xff]  ;;  %v2113_v52 = vpack.c.bf16 %v14565_v10, %v14565_v10  ;;  %v356_v3 = vrot.slane %v73_v61, 4 }
 0x1e8   :  { %9309 = vmatprep.subr.bf16.mxu1 %v10911_v33  ;;  %v14563_v33 = vld [vmem:[#allocation2 + $0x1ba0] sm:$0xff]  ;;  %17497 = vst [vmem:[#allocation128_spill] sm:$0xff] %v14567_v42  ;;  %v121_v22 = vld [vmem:[%s16825_s0 + $0x278] sm:$0xff]  ;;  %v2129_v27 = vpack.c.bf16 %v14567_v42, %v14567_v42  ;;  %v548_v16 = vrot.slane %v105_v56, 4  ;;  %v836_v42 = vrot.slane %v153_v40, 4 }
 0x1e9   :  { %v3542_v43 = vsel %vm1329_vm3, %v3403_v24, %v3541_v30  ;;  %v644_v51 = vrot.slane %v121_v22, 4  ;;  %v17501_v30 = vcombine.high %v14491_v28, %v14493_v47  ;;  %v17502_v24 = vcombine.high %v14503_v41, %v14505_v38 }
 0x1ea   :  { %8982 = vmatpush1.bf16.msra.mxu0 %v17498_v48  ;;  %v14625_v48 = vld [vmem:[#allocation2 + $0x1be8] sm:$0xff]  ;;  %v14652_v4 = vunpack.c.l.b16 %v2113_v52  ;;  %v14654_v60 = vunpack.c.l.b16 %v2129_v27  ;;  %v14657_v36 = vsel %vm1331_vm4, %v3419_v34, %v3542_v43  ;;  %v357_v10 = vadd.f32 %v356_v3, %v73_v61 }
 0x1eb   :  { %9310 = vmatpush1.bf16.msra.mxu1 %v10910_v18  ;;  %8983 = vmatprep.subr.bf16.mxu0 %v10917_v53  ;;  %v169_v53 = vld [vmem:[%s16825_s0 + $0x3f8] sm:$0xff]  ;;  %v14623_v18 = vld [vmem:[#allocation2 + $0x1bc8] sm:$0xff]  ;;  %v645_v9 = vadd.f32 %v644_v51, %v121_v22  ;;  %v837_v27 = vadd.f32 %v836_v42, %v153_v40  ;;  %v17505_v34 = vcombine.high %v14511_v50, %v14513_v5 }
 0x1ec   :  { %9311 = vmatprep.subr.bf16.mxu1 %v10919_v49  ;;  %v14621_v49 = vld [vmem:[#allocation2 + $0x1be0] sm:$0xff]  ;;  %v932_v45 = vrot.slane %v169_v53, 4  ;;  %v358_v51 = vrot.slane %v357_v10, 2  ;;  %v17508_v43 = vcombine.low %v14520_v11, %v14522_v13  ;;  %v17509_v22 = vcombine.high %v14532_v37, %v14534_v58 }
 0x1ed   :  { %v646_v3 = vrot.slane %v645_v9, 2 }
 0x1ee   :  { %8984 = vmatpush1.bf16.msra.mxu0 %v17499_v20  ;;  %v17503_v20 = vcombine.low %v14491_v28, %v14493_v47  ;;  %v933_v15 = vadd.f32 %v932_v45, %v169_v53  ;;  %v742_v47 = vrot.slane %v741_v25, 2  ;;  %v359_v59 = vadd.f32 %v358_v51, %v357_v10 }
 0x1ef   :  { %9312 = vmatpush1.bf16.msra.mxu1 %v17500_v55  ;;  %8985 = vmatprep.subr.bf16.mxu0 %v17501_v30  ;;  %v261_v30 = vadd.f32 %v260_v6, %v57_v32  ;;  %v17504_v55 = vcombine.low %v14503_v41, %v14505_v38  ;;  %v454_v6 = vrot.slane %v453_v1, 2  ;;  %v838_v41 = vrot.slane %v837_v27, 2 }
 0x1f0   :  { %9313 = vmatprep.subr.bf16.mxu1 %v17502_v24  ;;  %v549_v24 = vadd.f32 %v548_v16, %v105_v56  ;;  %v934_v38 = vrot.slane %v933_v15, 2  ;;  %v647_v45 = vadd.f32 %v646_v3, %v645_v9  ;;  %v743_v32 = vadd.f32 %v742_v47, %v741_v25 }
 0x1f1   :  { %v262_v52 = vrot.slane %v261_v30, 2  ;;  %v455_v21 = vadd.f32 %v454_v6, %v453_v1  ;;  %v839_v61 = vadd.f32 %v838_v41, %v837_v27  ;;  %v17510_v1 = vcombine.high %v14540_v63, %v14542_v23 }
 0x1f2   :  { %8986 = vmatpush1.bf16.msra.mxu0 %v17503_v20  ;;  %v550_v16 = vrot.slane %v549_v24, 2  ;;  %v935_v56 = vadd.f32 %v934_v38, %v933_v15  ;;  %v360_v9 = vrot.slane %v359_v59, 1  ;;  %v648_v5 = vrot.slane %v647_v45, 1 }
 0x1f3   :  { %9314 = vmatpush1.bf16.msra.mxu1 %v17504_v55  ;;  %8987 = vmatprep.subr.bf16.mxu0 %v17505_v34  ;;  %v263_v28 = vadd.f32 %v262_v52, %v261_v30  ;;  %v456_v10 = vrot.slane %v455_v21, 1  ;;  %v744_v20 = vrot.slane %v743_v32, 1  ;;  %v840_v11 = vrot.slane %v839_v61, 1 }
 0x1f4   :  { %9315 = vmatprep.subr.bf16.mxu1 %v17506_v29  ;;  %v551_v40 = vadd.f32 %v550_v16, %v549_v24  ;;  %v936_v13 = vrot.slane %v935_v56, 1  ;;  %v361_v55 = vadd.f32 %v360_v9, %v359_v59  ;;  %v649_v15 = vadd.f32 %v648_v5, %v647_v45  ;;  %v3034_v9 = vld [vmem:[#allocation2 + $0x1c28] sm:$0xff] }
 0x1f5   :  { %v264_v42 = vrot.slane %v263_v28, 1  ;;  %v457_v25 = vadd.f32 %v456_v10, %v455_v21  ;;  %v17511_v24 = vcombine.low %v14532_v37, %v14534_v58  ;;  %v17512_v52 = vcombine.low %v14540_v63, %v14542_v23 }
 0x1f6   :  { %8988 = vmatpush1.bf16.msra.mxu0 %v17507_v31  ;;  %v552_v50 = vrot.slane %v551_v40, 1  ;;  %v745_v27 = vadd.f32 %v744_v20, %v743_v32  ;;  %v841_v34 = vadd.f32 %v840_v11, %v839_v61  ;;  %v937_v29 = vadd.f32 %v936_v13, %v935_v56 }
 0x1f7   :  { %9316 = vmatpush1.bf16.msra.mxu1 %v17508_v43  ;;  %8989 = vmatprep.subr.bf16.mxu0 %v17509_v22  ;;  %v265_v53 = vadd.f32 %v264_v42, %v263_v28  ;;  %v17514_v6 = vcombine.high %v14544_v0, %v14551_v35  ;;  %v17515_v16 = vcombine.high %v14553_v17, %v14555_v12  ;;  %v14697_v3 = vmul.f32 0.125, %v361_v55  ;;  %v3033_v22 = vld [vmem:[#allocation2 + $0x1c20] sm:$0xff] }
 0x1f8   :  { %9317 = vmatprep.subr.bf16.mxu1 %v17510_v1  ;;  %v553_v30 = vadd.f32 %v552_v50, %v551_v40  ;;  %v14699_v37 = vmul.f32 0.125, %v457_v25  ;;  %v14703_v63 = vmul.f32 0.125, %v649_v15  ;;  %v14705_v23 = vmul.f32 0.125, %v745_v27  ;;  %v3030_v1 = vld [vmem:[#allocation2 + $0x1c08] sm:$0xff]  ;;  %v3041_v27 = vld [vmem:[#allocation2 + $0x1c60] sm:$0xff] }
 0x1f9   :  { %v14689_v51 = vmul.f32 0.125, %v265_v53  ;;  %17516 = vst [vmem:[#allocation130_spill] sm:$0xff] %v14697_v3  ;;  %v14707_v28 = vmul.f32 0.125, %v841_v34  ;;  %v14709_v47 = vmul.f32 0.125, %v937_v29  ;;  %v2036_v38 = vpack.c.bf16 %v14697_v3, %v14697_v3  ;;  %v3038_v34 = vld [vmem:[#allocation2 + $0x1c48] sm:$0xff] }
 0x1fa   :  { %8990 = vmatpush1.bf16.msra.mxu0 %v17511_v24  ;;  %17517 = vst [vmem:[#allocation131_spill] sm:$0xff] %v14699_v37  ;;  %v14701_v58 = vmul.f32 0.125, %v553_v30  ;;  %17519 = vst [vmem:[#allocation133_spill] sm:$0xff] %v14703_v63  ;;  %v2052_v59 = vpack.c.bf16 %v14699_v37, %v14699_v37  ;;  %v2084_v40 = vpack.c.bf16 %v14703_v63, %v14703_v63  ;;  %v15227_v63 = vld [vmem:[#allocation2 + $0x1a90] sm:$0xff] }
 0x1fb   :  { %9318 = vmatpush1.bf16.msra.mxu1 %v17512_v52  ;;  %17513 = vst [vmem:[#allocation129_spill] sm:$0xff] %v14689_v51  ;;  %8991 = vmatprep.subr.bf16.mxu0 %v17514_v6  ;;  %17520 = vst [vmem:[#allocation134_spill] sm:$0xff] %v14705_v23  ;;  %v2020_v41 = vpack.c.bf16 %v14689_v51, %v14689_v51  ;;  %v17523_v45 = vcombine.low %v14544_v0, %v14551_v35  ;;  %v3358_v35 = vunpack.c.l.b16 %v2036_v38  ;;  %v3045_v38 = vld [vmem:[#allocation2 + $0x1c80] sm:$0xff] }
 0x1fc   :  { %9319 = vmatprep.subr.bf16.mxu1 %v17515_v16  ;;  %17518 = vst [vmem:[#allocation132_spill] sm:$0xff] %v14701_v58  ;;  %17521 = vst [vmem:[#allocation135_spill] sm:$0xff] %v14707_v28  ;;  %v2068_v21 = vpack.c.bf16 %v14701_v58, %v14701_v58  ;;  %v17524_v31 = vcombine.low %v14553_v17, %v14555_v12  ;;  %v3544_v43 = vsel %vm1333_vm5, %v14652_v4, %v14657_v36  ;;  %v3029_v17 = vld [vmem:[#allocation2 + $0x1c00] sm:$0xff] }
 0x1fd   :  { %17522 = vst [vmem:[#allocation136_spill] sm:$0xff] %v14709_v47  ;;  %v2100_v42 = vpack.c.bf16 %v14705_v23, %v14705_v23  ;;  %v2116_v32 = vpack.c.bf16 %v14707_v28, %v14707_v28  ;;  %v3342_v61 = vunpack.c.l.b16 %v2020_v41  ;;  %v17525_v56 = vcombine.high %v14561_v44, %v14563_v33  ;;  %v17627_v28 = vld [vmem:[#allocation72_spill] sm:$0xff]  ;;  %v15163_v23 = vld [vmem:[#allocation2 + $0x19b0] sm:$0xff]  ;;  %17647 = vst [vmem:[#allocation179_spill] sm:$0xff] %v15227_v63 }
 0x1fe   :  { %8992 = vmatpush1.bf16.msra.mxu0 %v17523_v45  ;;  %v17526_v0 = vcombine.high %v14575_v19, %v14577_v54  ;;  %v2132_v12 = vpack.c.bf16 %v14709_v47, %v14709_v47  ;;  %v3374_v4 = vunpack.c.l.b16 %v2052_v59  ;;  %v3390_v36 = vunpack.c.l.b16 %v2068_v21  ;;  %v3049_v21 = vld [vmem:[#allocation2 + $0x1ca0] sm:$0xff]  ;;  %v3050_v45 = vld [vmem:[#allocation2 + $0x1ca8] sm:$0xff]  ;;  %v15045_v47 = vld [vmem:[#allocation2 + $0x1818] sm:$0xff] }
 0x1ff   :  { %9320 = vmatpush1.bf16.msra.mxu1 %v17524_v31  ;;  %8993 = vmatprep.subr.bf16.mxu0 %v17525_v56  ;;  %v3406_v10 = vunpack.c.l.b16 %v2084_v40  ;;  %v10964_v50 = vcombine.low %v14595_v46, %v14621_v49  ;;  %v3422_v5 = vunpack.c.l.b16 %v2100_v42  ;;  %v3560_v53 = vsel %vm1323_vm0, %v3358_v35, %v3342_v61  ;;  %v3046_v40 = vld [vmem:[#allocation2 + $0x1c88] sm:$0xff]  ;;  %v72_v42 = vld [vmem:[%s16825_s0 + $0xf0] sm:$0xff] }
 0x200   :  { %9321 = vmatprep.subr.bf16.mxu1 %v17526_v0  ;;  %v17527_v20 = vcombine.low %v14561_v44, %v14563_v33  ;;  %v17528_v11 = vcombine.low %v14575_v19, %v14577_v54  ;;  %v10966_v13 = vcombine.low %v14623_v18, %v14625_v48  ;;  %v3545_v55 = vsel %vm1335_vm6, %v14654_v60, %v3544_v43  ;;  %v3037_v54 = vld [vmem:[#allocation2 + $0x1c40] sm:$0xff]  ;;  %v3042_v60 = vld [vmem:[#allocation2 + $0x1c68] sm:$0xff]  ;;  %v56_v43 = vld [vmem:[%s16825_s0 + $0x70] sm:$0xff] }
 0x201   :  { %v3438_v25 = vunpack.c.l.b16 %v2116_v32  ;;  %v3561_v30 = vsel %vm1325_vm1, %v3374_v4, %v3560_v53  ;;  %v17529_v15 = vcombine.high %v14595_v46, %v14621_v49  ;;  %v17530_v44 = vcombine.high %v14623_v18, %v14625_v48  ;;  %v3054_v35 = vld [vmem:[#allocation2 + $0x1cc8] sm:$0xff]  ;;  %v3061_v53 = vld [vmem:[#allocation2 + $0x1d00] sm:$0xff] }
 0x202   :  { %8994 = vmatpush1.bf16.msra.mxu0 %v17527_v20  ;;  %v10973_v33 = vcombine.high %v3029_v17, %v3033_v22  ;;  %v10975_v19 = vcombine.high %v3030_v1, %v3034_v9  ;;  %v3454_v24 = vunpack.c.l.b16 %v2132_v12  ;;  %v3562_v52 = vsel %vm1327_vm2, %v3390_v36, %v3561_v30  ;;  %v3057_v12 = vld [vmem:[#allocation2 + $0x1ce0] sm:$0xff]  ;;  %v3058_v4 = vld [vmem:[#allocation2 + $0x1ce8] sm:$0xff]  ;;  %v88_v36 = vld [vmem:[%s16825_s0 + $0x170] sm:$0xff] }
 0x203   :  { %9322 = vmatpush1.bf16.msra.mxu1 %v17528_v11  ;;  %8995 = vmatprep.subr.bf16.mxu0 %v17529_v15  ;;  %v3563_v29 = vsel %vm1329_vm3, %v3406_v10, %v3562_v52  ;;  %v14764_v6 = vpack.c.b16 %v3545_v55, %v3545_v55  ;;  %v10972_v49 = vcombine.low %v3029_v17, %v3033_v22  ;;  %v3053_v17 = vld [vmem:[#allocation2 + $0x1cc0] sm:$0xff]  ;;  %v254_v22 = vrot.slane %v56_v43, 4  ;;  %v104_v20 = vld [vmem:[%s16825_s0 + $0x1f0] sm:$0xff]  ;;  %v3062_v55 = vld [vmem:[#allocation2 + $0x1d08] sm:$0xff] }
 0x204   :  { %9323 = vmatprep.subr.bf16.mxu1 %v17530_v44  ;;  %v3564_v46 = vsel %vm1331_vm4, %v3422_v5, %v3563_v29  ;;  %v10974_v18 = vcombine.low %v3030_v1, %v3034_v9  ;;  %v10981_v16 = vcombine.high %v3037_v54, %v3041_v27  ;;  %v10983_v41 = vcombine.high %v3038_v34, %v3042_v60  ;;  %v3070_v29 = vld [vmem:[#allocation2 + $0x1d48] sm:$0xff] }
 0x205   :  { %17531 = vst [vmem:[#allocation137_spill] sm:$0xff] %v14764_v6  ;;  %v3565_v48 = vsel %vm1333_vm5, %v3438_v25, %v3564_v46  ;;  %v10980_v32 = vcombine.low %v3037_v54, %v3041_v27  ;;  %v10982_v61 = vcombine.low %v3038_v34, %v3042_v60  ;;  %v10989_v56 = vcombine.high %v3045_v38, %v3049_v21  ;;  %v3066_v25 = vld [vmem:[#allocation2 + $0x1d28] sm:$0xff]  ;;  %v3069_v27 = vld [vmem:[#allocation2 + $0x1d40] sm:$0xff] }
 0x206   :  { %8996 = vmatpush1.bf16.msra.mxu0 %v10964_v50  ;;  %v3566_v59 = vsel %vm1335_vm6, %v3454_v24, %v3565_v48  ;;  %v10991_v0 = vcombine.high %v3046_v40, %v3050_v45  ;;  %v350_v1 = vrot.slane %v72_v42, 4  ;;  %v10988_v9 = vcombine.low %v3045_v38, %v3049_v21  ;;  %v3073_v60 = vld [vmem:[#allocation2 + $0x1d60] sm:$0xff]  ;;  %v3074_v46 = vld [vmem:[#allocation2 + $0x1d68] sm:$0xff]  ;;  %v136_v48 = vld [vmem:[%s16825_s0 + $0x2f0] sm:$0xff] }
 0x207   :  { %9324 = vmatpush1.bf16.msra.mxu1 %v10966_v13  ;;  %9006 = vmatprep.subr.bf16.mxu0 %v10973_v33  ;;  %v14769_v31 = vpack.c.b16 %v3566_v59, %v3566_v59  ;;  %v10990_v10 = vcombine.low %v3046_v40, %v3050_v45  ;;  %v10997_v50 = vcombine.high %v3053_v17, %v3057_v12  ;;  %v446_v11 = vrot.slane %v88_v36, 4  ;;  %v3065_v13 = vld [vmem:[#allocation2 + $0x1d20] sm:$0xff] }
 0x208   :  { %9334 = vmatprep.subr.bf16.mxu1 %v10975_v19  ;;  %v10999_v5 = vcombine.high %v3054_v35, %v3058_v4  ;;  %v255_v30 = vadd.f32 %v254_v22, %v56_v43  ;;  %v351_v15 = vadd.f32 %v350_v1, %v72_v42  ;;  %v10996_v44 = vcombine.low %v3053_v17, %v3057_v12  ;;  %v120_v19 = vld [vmem:[%s16825_s0 + $0x270] sm:$0xff]  ;;  %v3077_v45 = vld [vmem:[#allocation2 + $0x1d80] sm:$0xff] }
 0x209   :  { %17532 = vst [vmem:[#allocation138_spill] sm:$0xff] %v14769_v31  ;;  %8998 = vmatmul.mubr.bf16.vlgmr.msra.gmra.mrb[0].mxu0 %v14764_v6  ;;  %v10998_v33 = vcombine.low %v3054_v35, %v3058_v4  ;;  %v542_v54 = vrot.slane %v104_v20, 4  ;;  %v11005_v24 = vcombine.high %v3061_v53, %v3065_v13  ;;  %v11007_v52 = vcombine.high %v3062_v55, %v3066_v25  ;;  %v3081_v43 = vld [vmem:[#allocation2 + $0x1da0] sm:$0xff] }
 0x20a   :  { %9326 = vmatmul.mubr.bf16.vlgmr.msra.gmra.mrb[0].mxu1 %v14764_v6  ;;  %9007 = vmatpush1.bf16.msra.mxu0 %v10972_v49  ;;  %v447_v34 = vadd.f32 %v446_v11, %v88_v36  ;;  %v256_v49 = vrot.slane %v255_v30, 2  ;;  %v11006_v38 = vcombine.low %v3062_v55, %v3066_v25  ;;  %v11013_v21 = vcombine.high %v3069_v27, %v3073_v60  ;;  %v3086_v11 = vld [vmem:[#allocation2 + $0x1dc8] sm:$0xff]  ;;  %v15041_v6 = vld [vmem:[#allocation2 + $0x1810] sm:$0xff] }
 0x20b   :  { %9335 = vmatpush1.bf16.msra.mxu1 %v10974_v18  ;;  %9008 = vmatprep.subr.bf16.mxu0 %v10981_v16  ;;  %v352_v18 = vrot.slane %v351_v15, 2  ;;  %v638_v16 = vrot.slane %v120_v19, 4  ;;  %v543_v59 = vadd.f32 %v542_v54, %v104_v20  ;;  %v11015_v40 = vcombine.high %v3070_v29, %v3074_v46  ;;  %v3089_v20 = vld [vmem:[#allocation2 + $0x1de0] sm:$0xff] }
 0x20c   :  { %9336 = vmatprep.subr.bf16.mxu1 %v10983_v41  ;;  %9038 = vmatprep.mubr.bf16.mxu0 %v14769_v31  ;;  %v11004_v41 = vcombine.low %v3061_v53, %v3065_v13  ;;  %v448_v42 = vrot.slane %v447_v34, 2  ;;  %v734_v12 = vrot.slane %v136_v48, 4  ;;  %v11012_v4 = vcombine.low %v3069_v27, %v3073_v60  ;;  %v3090_v13 = vld [vmem:[#allocation2 + $0x1de8] sm:$0xff]  ;;  %v3093_v27 = vld [vmem:[#allocation2 + $0x1e00] sm:$0xff] }
 0x20d   :  { %9366 = vmatprep.mubr.bf16.mxu1 %v14769_v31  ;;  %v353_v17 = vadd.f32 %v352_v18, %v351_v15  ;;  %v639_v35 = vadd.f32 %v638_v16, %v120_v19  ;;  %v11014_v36 = vcombine.low %v3070_v29, %v3074_v46  ;;  %v544_v22 = vrot.slane %v543_v59, 2  ;;  %v3097_v29 = vld [vmem:[#allocation2 + $0x1e20] sm:$0xff]  ;;  %v3094_v46 = vld [vmem:[#allocation2 + $0x1e08] sm:$0xff] }
 0x20e   :  { %9009 = vmatpush1.bf16.msra.mxu0 %v10980_v32  ;;  %v3078_v32 = vld [vmem:[#allocation2 + $0x1d88] sm:$0xff]  ;;  %v11021_v1 = vcombine.high %v3077_v45, %v3081_v43 }
 0x20f   :  { %9337 = vmatpush1.bf16.msra.mxu1 %v10982_v61  ;;  %9010 = vmatprep.subr.bf16.mxu0 %v10989_v56  ;;  %v3082_v61 = vld [vmem:[#allocation2 + $0x1da8] sm:$0xff]  ;;  %v152_v56 = vld [vmem:[%s16825_s0 + $0x370] sm:$0xff]  ;;  %v354_v25 = vrot.slane %v353_v17, 1  ;;  %v640_v15 = vrot.slane %v639_v35, 2  ;;  %v545_v19 = vadd.f32 %v544_v22, %v543_v59  ;;  %v11036_v22 = vcombine.low %v3093_v27, %v3097_v29 }
 0x210   :  { %9338 = vmatprep.subr.bf16.mxu1 %v10991_v0  ;;  %v257_v0 = vadd.f32 %v256_v49, %v255_v30  ;;  %v830_v53 = vrot.slane %v152_v56, 4  ;;  %v735_v30 = vadd.f32 %v734_v12, %v136_v48  ;;  %v3098_v49 = vld [vmem:[#allocation2 + $0x1e28] sm:$0xff] }
 0x211   :  { %v355_v16 = vadd.f32 %v354_v25, %v353_v17  ;;  %v546_v59 = vrot.slane %v545_v19, 1  ;;  %v3102_v12 = vld [vmem:[#allocation2 + $0x1e48] sm:$0xff] }
 0x212   :  { %9011 = vmatpush1.bf16.msra.mxu0 %v10988_v9  ;;  %v11023_v9 = vcombine.high %v3078_v32, %v3082_v61  ;;  %v258_v55 = vrot.slane %v257_v0, 1  ;;  %v831_v60 = vadd.f32 %v830_v53, %v152_v56  ;;  %v736_v48 = vrot.slane %v735_v30, 2  ;;  %v3105_v56 = vld [vmem:[#allocation2 + $0x1e60] sm:$0xff]  ;;  %v3114_v25 = vld [vmem:[#allocation2 + $0x1ea8] sm:$0xff] }
 0x213   :  { %9339 = vmatpush1.bf16.msra.mxu1 %v10990_v10  ;;  %9012 = vmatprep.subr.bf16.mxu0 %v10997_v50  ;;  %v3085_v10 = vld [vmem:[#allocation2 + $0x1dc0] sm:$0xff]  ;;  %v168_v50 = vld [vmem:[%s16825_s0 + $0x3f0] sm:$0xff] }
 0x214   :  { %9340 = vmatprep.subr.bf16.mxu1 %v10999_v5  ;;  %v449_v5 = vadd.f32 %v448_v42, %v447_v34  ;;  %v926_v54 = vrot.slane %v168_v50, 4  ;;  %v259_v18 = vadd.f32 %v258_v55, %v257_v0  ;;  %v3101_v42 = vld [vmem:[#allocation2 + $0x1e40] sm:$0xff]  ;;  %v737_v0 = vadd.f32 %v736_v48, %v735_v30  ;;  %v3110_v55 = vld [vmem:[#allocation2 + $0x1e88] sm:$0xff] }
 0x215   :  { %v3109_v53 = vld [vmem:[#allocation2 + $0x1e80] sm:$0xff] }
 0x216   :  { %9013 = vmatpush1.bf16.msra.mxu0 %v10996_v44  ;;  %v11020_v44 = vcombine.low %v3077_v45, %v3081_v43  ;;  %v450_v34 = vrot.slane %v449_v5, 1  ;;  %v11037_v45 = vcombine.high %v3093_v27, %v3097_v29  ;;  %v11039_v43 = vcombine.high %v3094_v46, %v3098_v49 }
 0x217   :  { %9341 = vmatpush1.bf16.msra.mxu1 %v10998_v33  ;;  %9014 = vmatprep.subr.bf16.mxu0 %v11005_v24  ;;  %v11022_v33 = vcombine.low %v3078_v32, %v3082_v61  ;;  %v11029_v24 = vcombine.high %v3085_v10, %v3089_v20  ;;  %v832_v61 = vrot.slane %v831_v60, 2  ;;  %v14799_v17 = vmul.f32 0.125, %v259_v18  ;;  %v3118_v18 = vld [vmem:[#allocation2 + $0x1ec8] sm:$0xff] }
 0x218   :  { %9342 = vmatprep.subr.bf16.mxu1 %v11007_v52  ;;  %v11031_v52 = vcombine.high %v3086_v11, %v3090_v13  ;;  %v451_v32 = vadd.f32 %v450_v34, %v449_v5  ;;  %v738_v30 = vrot.slane %v737_v0, 1  ;;  %v11055_v34 = vcombine.high %v3110_v55, %v3114_v25 }
 0x219   :  { %17533 = vst [vmem:[#allocation139_spill] sm:$0xff] %v14799_v17 }
 0x21a   :  { %9015 = vmatpush1.bf16.msra.mxu0 %v11004_v41  ;;  %v641_v41 = vadd.f32 %v640_v15, %v639_v35  ;;  %v14801_v35 = vmul.f32 0.125, %v355_v16  ;;  %v2019_v15 = vpack.c.bf16 %v14799_v17, %v14799_v17  ;;  %v3122_v16 = vld [vmem:[#allocation2 + $0x1ee8] sm:$0xff]  ;;  %v739_v48 = vadd.f32 %v738_v30, %v737_v0 }
 0x21b   :  { %9343 = vmatpush1.bf16.msra.mxu1 %v11006_v38  ;;  %9016 = vmatprep.subr.bf16.mxu0 %v11013_v21  ;;  %v11028_v38 = vcombine.low %v3085_v10, %v3089_v20  ;;  %v11030_v21 = vcombine.low %v3086_v11, %v3090_v13  ;;  %v833_v20 = vadd.f32 %v832_v61, %v831_v60  ;;  %v14803_v11 = vmul.f32 0.125, %v451_v32  ;;  %v3113_v13 = vld [vmem:[#allocation2 + $0x1ea0] sm:$0xff]  ;;  %v3126_v0 = vld [vmem:[#allocation2 + $0x1f08] sm:$0xff] }
 0x21c   :  { %9344 = vmatprep.subr.bf16.mxu1 %v11015_v40  ;;  %v927_v40 = vadd.f32 %v926_v54, %v168_v50  ;;  %17534 = vst [vmem:[#allocation140_spill] sm:$0xff] %v14801_v35  ;;  %v11045_v50 = vcombine.high %v3101_v42, %v3105_v56  ;;  %v11053_v27 = vcombine.high %v3109_v53, %v3113_v13  ;;  %v3117_v60 = vld [vmem:[#allocation2 + $0x1ec0] sm:$0xff] }
 0x21d   :  { %17535 = vst [vmem:[#allocation141_spill] sm:$0xff] %v14803_v11  ;;  %v834_v29 = vrot.slane %v833_v20, 1  ;;  %v11063_v32 = vcombine.high %v3118_v18, %v3122_v16  ;;  %v3125_v61 = vld [vmem:[#allocation2 + $0x1f00] sm:$0xff] }
 0x21e   :  { %9017 = vmatpush1.bf16.msra.mxu0 %v11012_v4  ;;  %v3106_v4 = vld [vmem:[#allocation2 + $0x1e68] sm:$0xff]  ;;  %v928_v10 = vrot.slane %v927_v40, 2 }
 0x21f   :  { %9345 = vmatpush1.bf16.msra.mxu1 %v11014_v36  ;;  %9018 = vmatprep.subr.bf16.mxu0 %v11021_v1  ;;  %v642_v36 = vrot.slane %v641_v41, 1  ;;  %v11038_v1 = vcombine.low %v3094_v46, %v3098_v49  ;;  %v11047_v5 = vcombine.high %v3102_v12, %v3106_v4  ;;  %v11046_v54 = vcombine.low %v3102_v12, %v3106_v4  ;;  %v3121_v49 = vld [vmem:[#allocation2 + $0x1ee0] sm:$0xff] }
 0x220   :  { %9346 = vmatprep.subr.bf16.mxu1 %v11023_v9  ;;  %v547_v9 = vadd.f32 %v546_v59, %v545_v19  ;;  %v11044_v19 = vcombine.low %v3101_v42, %v3105_v56  ;;  %v2051_v46 = vpack.c.bf16 %v14803_v11, %v14803_v11  ;;  %v11052_v59 = vcombine.low %v3109_v53, %v3113_v13  ;;  %v3129_v4 = vld [vmem:[#allocation2 + $0x1f20] sm:$0xff] }
 0x221   :  { %v11061_v42 = vcombine.high %v3117_v60, %v3121_v49  ;;  %v835_v56 = vadd.f32 %v834_v29, %v833_v20  ;;  %v11069_v20 = vcombine.high %v3125_v61, %v3129_v4 }
 0x222   :  { %9019 = vmatpush1.bf16.msra.mxu0 %v11020_v44  ;;  %v2035_v44 = vpack.c.bf16 %v14801_v35, %v14801_v35  ;;  %v3373_v12 = vunpack.c.l.b16 %v2051_v46 }
 0x223   :  { %9347 = vmatpush1.bf16.msra.mxu1 %v11022_v33  ;;  %9020 = vmatprep.subr.bf16.mxu0 %v11029_v24  ;;  %v643_v33 = vadd.f32 %v642_v36, %v641_v41  ;;  %v929_v24 = vadd.f32 %v928_v10, %v927_v40  ;;  %v3341_v41 = vunpack.c.l.b16 %v2019_v15  ;;  %v11054_v40 = vcombine.low %v3110_v55, %v3114_v25  ;;  %v3130_v36 = vld [vmem:[#allocation2 + $0x1f28] sm:$0xff]  ;;  %v3133_v55 = vld [vmem:[#allocation2 + $0x1f40] sm:$0xff] }
 0x224   :  { %9348 = vmatprep.subr.bf16.mxu1 %v11031_v52  ;;  %v14809_v52 = vmul.f32 0.125, %v547_v9  ;;  %v11060_v10 = vcombine.low %v3117_v60, %v3121_v49  ;;  %v11071_v13 = vcombine.high %v3126_v0, %v3130_v36  ;;  %v14822_v25 = vmul.f32 0.125, %v835_v56  ;;  %v3137_v15 = vld [vmem:[#allocation2 + $0x1f60] sm:$0xff] }
 0x225   :  { %v11077_v29 = vcombine.high %v3133_v55, %v3137_v15  ;;  %v3141_v49 = vld [vmem:[#allocation2 + $0x1f80] sm:$0xff] }
 0x226   :  { %9021 = vmatpush1.bf16.msra.mxu0 %v11028_v38  ;;  %17536 = vst [vmem:[#allocation142_spill] sm:$0xff] %v14809_v52  ;;  %v3357_v38 = vunpack.c.l.b16 %v2035_v44  ;;  %17539 = vst [vmem:[#allocation145_spill] sm:$0xff] %v14822_v25  ;;  %v3134_v44 = vld [vmem:[#allocation2 + $0x1f48] sm:$0xff] }
 0x227   :  { %9349 = vmatpush1.bf16.msra.mxu1 %v11030_v21  ;;  %9022 = vmatprep.subr.bf16.mxu0 %v11037_v45  ;;  %v14813_v21 = vmul.f32 0.125, %v643_v33  ;;  %v930_v45 = vrot.slane %v929_v24, 1  ;;  %v3138_v33 = vld [vmem:[#allocation2 + $0x1f68] sm:$0xff] }
 0x228   :  { %9350 = vmatprep.subr.bf16.mxu1 %v11039_v43  ;;  %v2067_v43 = vpack.c.bf16 %v14809_v52, %v14809_v52  ;;  %v11079_v46 = vcombine.high %v3134_v44, %v3138_v33 }
 0x229   :  { %17537 = vst [vmem:[#allocation143_spill] sm:$0xff] %v14813_v21  ;;  %v2083_v9 = vpack.c.bf16 %v14813_v21, %v14813_v21  ;;  %v15239_v21 = vld [vmem:[#allocation2 + $0x1ab8] sm:$0xff] }
 0x22a   :  { %9023 = vmatpush1.bf16.msra.mxu0 %v11036_v22  ;;  %v14817_v22 = vmul.f32 0.125, %v739_v48  ;;  %v3389_v53 = vunpack.c.l.b16 %v2067_v43  ;;  %v3142_v48 = vld [vmem:[#allocation2 + $0x1f88] sm:$0xff]  ;;  %17649 = vst [vmem:[#allocation181_spill] sm:$0xff] %v15239_v21  ;;  %v15327_v21 = vld [vmem:[#allocation2 + $0x1bb8] sm:$0xff] }
 0x22b   :  { %9351 = vmatpush1.bf16.msra.mxu1 %v11038_v1  ;;  %9024 = vmatprep.subr.bf16.mxu0 %v11045_v50  ;;  %v3553_v1 = vsel %vm1323_vm0, %v3357_v38, %v3341_v41  ;;  %v11062_v50 = vcombine.low %v3118_v18, %v3122_v16  ;;  %v2115_v18 = vpack.c.bf16 %v14822_v25, %v14822_v25  ;;  %v3145_v16 = vld [vmem:[#allocation2 + $0x1fa0] sm:$0xff]  ;;  %v3146_v41 = vld [vmem:[#allocation2 + $0x1fa8] sm:$0xff] }
 0x22c   :  { %9352 = vmatprep.subr.bf16.mxu1 %v11047_v5  ;;  %17538 = vst [vmem:[#allocation144_spill] sm:$0xff] %v14817_v22  ;;  %v931_v5 = vadd.f32 %v930_v45, %v929_v24  ;;  %v3554_v30 = vsel %vm1325_vm1, %v3373_v12, %v3553_v1  ;;  %v11068_v24 = vcombine.low %v3125_v61, %v3129_v4  ;;  %v3149_v61 = vld [vmem:[#allocation2 + $0x1fc0] sm:$0xff]  ;;  %v3150_v4 = vld [vmem:[#allocation2 + $0x1fc8] sm:$0xff]  ;;  %17666 = vst [vmem:[#allocation194_spill] sm:$0xff] %v15327_v21 }
 0x22d   :  { %v3555_v60 = vsel %vm1327_vm2, %v3389_v53, %v3554_v30  ;;  %v11078_v45 = vcombine.low %v3134_v44, %v3138_v33  ;;  %v3437_v56 = vunpack.c.l.b16 %v2115_v18  ;;  %v3153_v12 = vld [vmem:[#allocation2 + $0x1fe0] sm:$0xff]  ;;  %v11084_v1 = vcombine.low %v3141_v49, %v3145_v16  ;;  %v2140_v30 = vld [vmem:[#allocation2 + $0x38] sm:$0xff] }
 0x22e   :  { %9025 = vmatpush1.bf16.msra.mxu0 %v11044_v19  ;;  %v2099_v19 = vpack.c.bf16 %v14817_v22, %v14817_v22  ;;  %v15075_v25 = vmul.f32 %v17627_v28, %v17627_v28  ;;  %v15175_v22 = vld [vmem:[#allocation2 + $0x19d0] sm:$0xff] }
 0x22f   :  { %9353 = vmatpush1.bf16.msra.mxu1 %v11046_v54  ;;  %9026 = vmatprep.subr.bf16.mxu0 %v11053_v27  ;;  %v3405_v54 = vunpack.c.l.b16 %v2083_v9  ;;  %v11070_v27 = vcombine.low %v3126_v0, %v3130_v36  ;;  %v3154_v0 = vld [vmem:[#allocation2 + $0x1fe8] sm:$0xff]  ;;  %v11086_v9 = vcombine.low %v3142_v48, %v3146_v41 }
 0x230   :  { %9354 = vmatprep.subr.bf16.mxu1 %v11055_v34  ;;  %v14827_v34 = vmul.f32 0.125, %v931_v5  ;;  %v3421_v38 = vunpack.c.l.b16 %v2099_v19  ;;  %v11095_v5 = vcombine.high %v3150_v4, %v3154_v0  ;;  %v11094_v44 = vcombine.low %v3150_v4, %v3154_v0  ;;  %v2164_v4 = vld [vmem:[#allocation2 + $0xf8] sm:$0xff]  ;;  %v17542_v0 = vld [vmem:[#allocation16_spill] sm:$0xff]  ;;  %17628 = vst [vmem:[#allocation166_spill] sm:$0xff] %v15075_v25 }
 0x231   :  { %v15251_v25 = vld [vmem:[#allocation2 + $0x1ad8] sm:$0xff] }
 0x232   :  { %9027 = vmatpush1.bf16.msra.mxu0 %v11052_v59  ;;  %17540 = vst [vmem:[#allocation146_spill] sm:$0xff] %v14827_v34  ;;  %v3556_v59 = vsel %vm1329_vm3, %v3405_v54, %v3555_v60  ;;  %v2131_v43 = vpack.c.bf16 %v14827_v34, %v14827_v34  ;;  %v2144_v60 = vld [vmem:[#allocation2 + $0x58] sm:$0xff] }
 0x233   :  { %9355 = vmatpush1.bf16.msra.mxu1 %v11054_v40  ;;  %9028 = vmatprep.subr.bf16.mxu0 %v11061_v42  ;;  %v11076_v40 = vcombine.low %v3133_v55, %v3137_v15  ;;  %v11085_v42 = vcombine.high %v3141_v49, %v3145_v16  ;;  %v3557_v36 = vsel %vm1331_vm4, %v3421_v38, %v3556_v59  ;;  %v2136_v55 = vld [vmem:[#allocation2 + $0x18] sm:$0xff]  ;;  %v2155_v38 = vld [vmem:[#allocation2 + $0xb0] sm:$0xff] }
 0x234   :  { %9356 = vmatprep.subr.bf16.mxu1 %v11063_v32  ;;  %v11087_v32 = vcombine.high %v3142_v48, %v3146_v41  ;;  %v3558_v53 = vsel %vm1333_vm5, %v3437_v56, %v3557_v36  ;;  %v11092_v15 = vcombine.low %v3149_v61, %v3153_v12  ;;  %v10083_v54 = vcombine.high %v2136_v55, %v2140_v30  ;;  %v2151_v41 = vld [vmem:[#allocation2 + $0x90] sm:$0xff]  ;;  %v2152_v59 = vld [vmem:[#allocation2 + $0x98] sm:$0xff] }
 0x235   :  { %v10082_v18 = vcombine.low %v2136_v55, %v2140_v30  ;;  %v2163_v56 = vld [vmem:[#allocation2 + $0xf0] sm:$0xff]  ;;  %v10096_v36 = vcombine.low %v2151_v41, %v2155_v38 }
 0x236   :  { %9029 = vmatpush1.bf16.msra.mxu0 %v11060_v10  ;;  %v3453_v10 = vunpack.c.l.b16 %v2131_v43 }
 0x237   :  { %9357 = vmatpush1.bf16.msra.mxu1 %v11062_v50  ;;  %9030 = vmatprep.subr.bf16.mxu0 %v11069_v20  ;;  %v11093_v50 = vcombine.high %v3149_v61, %v3153_v12  ;;  %v2135_v20 = vld [vmem:[#allocation2 + $0x10] sm:$0xff]  ;;  %v2160_v12 = vld [vmem:[#allocation2 + $0xd8] sm:$0xff] }
 0x238   :  { %9358 = vmatprep.subr.bf16.mxu1 %v11071_v13  ;;  %v2139_v13 = vld [vmem:[#allocation2 + $0x30] sm:$0xff]  ;;  %v3559_v33 = vsel %vm1335_vm6, %v3453_v10, %v3558_v53  ;;  %v10107_v10 = vcombine.high %v2160_v12, %v2164_v4  ;;  %v2168_v53 = vld [vmem:[#allocation2 + $0x118] sm:$0xff]  ;;  %v10106_v55 = vcombine.low %v2160_v12, %v2164_v4 }
 0x239   :  { %v10081_v19 = vcombine.high %v2135_v20, %v2139_v13  ;;  %v10080_v49 = vcombine.low %v2135_v20, %v2139_v13  ;;  %v2159_v61 = vld [vmem:[#allocation2 + $0xd0] sm:$0xff]  ;;  %v2172_v20 = vld [vmem:[#allocation2 + $0x138] sm:$0xff] }
 0x23a   :  { %9031 = vmatpush1.bf16.msra.mxu0 %v11068_v24  ;;  %v2143_v24 = vld [vmem:[#allocation2 + $0x50] sm:$0xff]  ;;  %v10104_v13 = vcombine.low %v2159_v61, %v2163_v56 }
 0x23b   :  { %9359 = vmatpush1.bf16.msra.mxu1 %v11070_v27  ;;  %9032 = vmatprep.subr.bf16.mxu0 %v11077_v29  ;;  %v2147_v27 = vld [vmem:[#allocation2 + $0x70] sm:$0xff]  ;;  %v2148_v29 = vld [vmem:[#allocation2 + $0x78] sm:$0xff] }
 0x23c   :  { %9360 = vmatprep.subr.bf16.mxu1 %v11079_v46  ;;  %v14838_v46 = vpack.c.b16 %v3559_v33, %v3559_v33  ;;  %v10089_v16 = vcombine.high %v2143_v24, %v2147_v27  ;;  %v10091_v48 = vcombine.high %v2144_v60, %v2148_v29  ;;  %v10090_v43 = vcombine.low %v2144_v60, %v2148_v29  ;;  %v2179_v33 = vld [vmem:[#allocation2 + $0x170] sm:$0xff] }
 0x23e   :  { %9033 = vmatpush1.bf16.msra.mxu0 %v11076_v40  ;;  %17541 = vst [vmem:[#allocation147_spill] sm:$0xff] %v14838_v46  ;;  %v2156_v40 = vld [vmem:[#allocation2 + $0xb8] sm:$0xff] }
 0x23f   :  { %9361 = vmatpush1.bf16.msra.mxu1 %v11078_v45  ;;  %9034 = vmatprep.subr.bf16.mxu0 %v11085_v42  ;;  %v10088_v45 = vcombine.low %v2143_v24, %v2147_v27  ;;  %v10097_v42 = vcombine.high %v2151_v41, %v2155_v38  ;;  %v10114_v27 = vcombine.low %v2168_v53, %v2172_v20 }
 0x240   :  { %9362 = vmatprep.subr.bf16.mxu1 %v11087_v32  ;;  %v10099_v32 = vcombine.high %v2152_v59, %v2156_v40 }
 0x242   :  { %9035 = vmatpush1.bf16.msra.mxu0 %v11084_v1  ;;  %v10098_v1 = vcombine.low %v2152_v59, %v2156_v40 }
 0x243   :  { %9363 = vmatpush1.bf16.msra.mxu1 %v11086_v9  ;;  %9036 = vmatprep.subr.bf16.mxu0 %v11093_v50  ;;  %v10105_v9 = vcombine.high %v2159_v61, %v2163_v56  ;;  %v2167_v50 = vld [vmem:[#allocation2 + $0x110] sm:$0xff] }
 0x244   :  { %9364 = vmatprep.subr.bf16.mxu1 %v11095_v5  ;;  %v2171_v5 = vld [vmem:[#allocation2 + $0x130] sm:$0xff] }
 0x245   :  { %v10113_v30 = vcombine.high %v2167_v50, %v2171_v5  ;;  %v10112_v24 = vcombine.low %v2167_v50, %v2171_v5 }
 0x246   :  { %9037 = vmatpush1.bf16.msra.mxu0 %v11092_v15  ;;  %v10115_v15 = vcombine.high %v2168_v53, %v2172_v20  ;;  %v2207_v20 = vld [vmem:[#allocation2 + $0x250] sm:$0xff] }
 0x247   :  { %9365 = vmatpush1.bf16.msra.mxu1 %v11094_v44  ;;  %9375 = vmatprep.subr.bf16.mxu0 %v10081_v19  ;;  %v2175_v44 = vld [vmem:[#allocation2 + $0x150] sm:$0xff]  ;;  %v2176_v19 = vld [vmem:[#allocation2 + $0x158] sm:$0xff] }
 0x248   :  { %9703 = vmatprep.subr.bf16.mxu1 %v10083_v54  ;;  %v2180_v54 = vld [vmem:[#allocation2 + $0x178] sm:$0xff]  ;;  %v10121_v60 = vcombine.high %v2175_v44, %v2179_v33  ;;  %v10120_v41 = vcombine.low %v2175_v44, %v2179_v33 }
 0x249   :  { %9039 = vmatmul.mubr.bf16.vlgmr.msra.gmra.mrb[0].mxu0 %v14838_v46  ;;  %v10123_v29 = vcombine.high %v2176_v19, %v2180_v54  ;;  %v10122_v38 = vcombine.low %v2176_v19, %v2180_v54  ;;  %v2215_v54 = vld [vmem:[#allocation2 + $0x290] sm:$0xff] }
 0x24a   :  { %9367 = vmatmul.mubr.bf16.vlgmr.msra.gmra.mrb[0].mxu1 %v14838_v46  ;;  %9376 = vmatpush1.bf16.msra.mxu0 %v10080_v49  ;;  %v2183_v49 = vld [vmem:[#allocation2 + $0x190] sm:$0xff] }
 0x24b   :  { %9704 = vmatpush1.bf16.msra.mxu1 %v10082_v18  ;;  %9377 = vmatprep.subr.bf16.mxu0 %v10089_v16  ;;  %v2187_v18 = vld [vmem:[#allocation2 + $0x1b0] sm:$0xff]  ;;  %v2184_v16 = vld [vmem:[#allocation2 + $0x198] sm:$0xff] }
 0x24c   :  { %9705 = vmatprep.subr.bf16.mxu1 %v10091_v48  ;;  %9407 = vmatprep.mubr.bf16.mxu0 %v17542_v0  ;;  %v2188_v48 = vld [vmem:[#allocation2 + $0x1b8] sm:$0xff]  ;;  %v10129_v59 = vcombine.high %v2183_v49, %v2187_v18  ;;  %v10128_v61 = vcombine.low %v2183_v49, %v2187_v18 }
 0x24d   :  { %9735 = vmatprep.mubr.bf16.mxu1 %v17542_v0  ;;  %v10131_v40 = vcombine.high %v2184_v16, %v2188_v48  ;;  %v10130_v56 = vcombine.low %v2184_v16, %v2188_v48  ;;  %v2199_v0 = vld [vmem:[#allocation2 + $0x210] sm:$0xff] }
 0x24e   :  { %9378 = vmatpush1.bf16.msra.mxu0 %v10088_v45  ;;  %v2191_v45 = vld [vmem:[#allocation2 + $0x1d0] sm:$0xff] }
 0x24f   :  { %9706 = vmatpush1.bf16.msra.mxu1 %v10090_v43  ;;  %9379 = vmatprep.subr.bf16.mxu0 %v10097_v42  ;;  %v2195_v43 = vld [vmem:[#allocation2 + $0x1f0] sm:$0xff]  ;;  %v2192_v42 = vld [vmem:[#allocation2 + $0x1d8] sm:$0xff] }
 0x250   :  { %9707 = vmatprep.subr.bf16.mxu1 %v10099_v32  ;;  %v2196_v32 = vld [vmem:[#allocation2 + $0x1f8] sm:$0xff]  ;;  %v10137_v12 = vcombine.high %v2191_v45, %v2195_v43  ;;  %v2223_v48 = vld [vmem:[#allocation2 + $0x2d0] sm:$0xff] }
 0x251   :  { %v10139_v4 = vcombine.high %v2192_v42, %v2196_v32  ;;  %v10138_v50 = vcombine.low %v2192_v42, %v2196_v32  ;;  %v2231_v32 = vld [vmem:[#allocation2 + $0x310] sm:$0xff] }
 0x252   :  { %9380 = vmatpush1.bf16.msra.mxu0 %v10096_v36  ;;  %v2203_v36 = vld [vmem:[#allocation2 + $0x230] sm:$0xff] }
 0x253   :  { %9708 = vmatpush1.bf16.msra.mxu1 %v10098_v1  ;;  %9381 = vmatprep.subr.bf16.mxu0 %v10105_v9  ;;  %v2200_v1 = vld [vmem:[#allocation2 + $0x218] sm:$0xff]  ;;  %v10145_v5 = vcombine.high %v2199_v0, %v2203_v36 }
 0x254   :  { %9709 = vmatprep.subr.bf16.mxu1 %v10107_v10  ;;  %v2204_v9 = vld [vmem:[#allocation2 + $0x238] sm:$0xff]  ;;  %v10136_v10 = vcombine.low %v2191_v45, %v2195_v43 }
 0x255   :  { %v10147_v53 = vcombine.high %v2200_v1, %v2204_v9  ;;  %v10146_v44 = vcombine.low %v2200_v1, %v2204_v9  ;;  %v2239_v9 = vld [vmem:[#allocation2 + $0x350] sm:$0xff] }
 0x256   :  { %9382 = vmatpush1.bf16.msra.mxu0 %v10104_v13  ;;  %v2211_v13 = vld [vmem:[#allocation2 + $0x270] sm:$0xff] }
 0x257   :  { %9710 = vmatpush1.bf16.msra.mxu1 %v10106_v55  ;;  %9383 = vmatprep.subr.bf16.mxu0 %v10113_v30  ;;  %v2208_v55 = vld [vmem:[#allocation2 + $0x258] sm:$0xff]  ;;  %v10153_v33 = vcombine.high %v2207_v20, %v2211_v13 }
 0x258   :  { %9711 = vmatprep.subr.bf16.mxu1 %v10115_v15  ;;  %v2212_v30 = vld [vmem:[#allocation2 + $0x278] sm:$0xff]  ;;  %v10144_v15 = vcombine.low %v2199_v0, %v2203_v36 }
 0x259   :  { %v10155_v19 = vcombine.high %v2208_v55, %v2212_v30  ;;  %v10154_v49 = vcombine.low %v2208_v55, %v2212_v30  ;;  %v2247_v30 = vld [vmem:[#allocation2 + $0x390] sm:$0xff] }
 0x25a   :  { %9384 = vmatpush1.bf16.msra.mxu0 %v10112_v24  ;;  %v2219_v24 = vld [vmem:[#allocation2 + $0x2b0] sm:$0xff] }
 0x25b   :  { %9712 = vmatpush1.bf16.msra.mxu1 %v10114_v27  ;;  %9385 = vmatprep.subr.bf16.mxu0 %v10121_v60  ;;  %v2216_v27 = vld [vmem:[#allocation2 + $0x298] sm:$0xff]  ;;  %v10161_v18 = vcombine.high %v2215_v54, %v2219_v24 }
 0x25c   :  { %9713 = vmatprep.subr.bf16.mxu1 %v10123_v29  ;;  %v2220_v60 = vld [vmem:[#allocation2 + $0x2b8] sm:$0xff]  ;;  %v10152_v29 = vcombine.low %v2207_v20, %v2211_v13 }
 0x25d   :  { %v10163_v16 = vcombine.high %v2216_v27, %v2220_v60  ;;  %v10162_v45 = vcombine.low %v2216_v27, %v2220_v60  ;;  %v2255_v60 = vld [vmem:[#allocation2 + $0x3d0] sm:$0xff] }
 0x25e   :  { %9386 = vmatpush1.bf16.msra.mxu0 %v10120_v41  ;;  %v2227_v41 = vld [vmem:[#allocation2 + $0x2f0] sm:$0xff] }
 0x25f   :  { %9714 = vmatpush1.bf16.msra.mxu1 %v10122_v38  ;;  %9387 = vmatprep.subr.bf16.mxu0 %v10129_v59  ;;  %v2224_v38 = vld [vmem:[#allocation2 + $0x2d8] sm:$0xff]  ;;  %v10169_v43 = vcombine.high %v2223_v48, %v2227_v41 }
 0x260   :  { %9715 = vmatprep.subr.bf16.mxu1 %v10131_v40  ;;  %v2228_v59 = vld [vmem:[#allocation2 + $0x2f8] sm:$0xff]  ;;  %v10160_v40 = vcombine.low %v2215_v54, %v2219_v24 }
 0x261   :  { %v10171_v42 = vcombine.high %v2224_v38, %v2228_v59  ;;  %v10170_v0 = vcombine.low %v2224_v38, %v2228_v59  ;;  %v2263_v59 = vld [vmem:[#allocation2 + $0x410] sm:$0xff] }
 0x262   :  { %9388 = vmatpush1.bf16.msra.mxu0 %v10128_v61  ;;  %v2235_v61 = vld [vmem:[#allocation2 + $0x330] sm:$0xff] }
 0x263   :  { %9716 = vmatpush1.bf16.msra.mxu1 %v10130_v56  ;;  %9389 = vmatprep.subr.bf16.mxu0 %v10137_v12  ;;  %v2232_v56 = vld [vmem:[#allocation2 + $0x318] sm:$0xff]  ;;  %v10177_v36 = vcombine.high %v2231_v32, %v2235_v61 }
 0x264   :  { %9717 = vmatprep.subr.bf16.mxu1 %v10139_v4  ;;  %v2236_v12 = vld [vmem:[#allocation2 + $0x338] sm:$0xff]  ;;  %v10168_v4 = vcombine.low %v2223_v48, %v2227_v41 }
 0x265   :  { %v10179_v1 = vcombine.high %v2232_v56, %v2236_v12  ;;  %v10178_v20 = vcombine.low %v2232_v56, %v2236_v12  ;;  %v2271_v12 = vld [vmem:[#allocation2 + $0x450] sm:$0xff] }
 0x266   :  { %9390 = vmatpush1.bf16.msra.mxu0 %v10136_v10  ;;  %v2243_v10 = vld [vmem:[#allocation2 + $0x370] sm:$0xff] }
 0x267   :  { %9718 = vmatpush1.bf16.msra.mxu1 %v10138_v50  ;;  %9391 = vmatprep.subr.bf16.mxu0 %v10145_v5  ;;  %v2240_v50 = vld [vmem:[#allocation2 + $0x358] sm:$0xff]  ;;  %v10185_v13 = vcombine.high %v2239_v9, %v2243_v10 }
 0x268   :  { %9719 = vmatprep.subr.bf16.mxu1 %v10147_v53  ;;  %v2244_v5 = vld [vmem:[#allocation2 + $0x378] sm:$0xff]  ;;  %v10176_v53 = vcombine.low %v2231_v32, %v2235_v61 }
 0x269   :  { %v10187_v55 = vcombine.high %v2240_v50, %v2244_v5  ;;  %v10186_v54 = vcombine.low %v2240_v50, %v2244_v5  ;;  %v2279_v5 = vld [vmem:[#allocation2 + $0x490] sm:$0xff] }
 0x26a   :  { %9392 = vmatpush1.bf16.msra.mxu0 %v10144_v15  ;;  %v2251_v15 = vld [vmem:[#allocation2 + $0x3b0] sm:$0xff] }
 0x26b   :  { %9720 = vmatpush1.bf16.msra.mxu1 %v10146_v44  ;;  %9393 = vmatprep.subr.bf16.mxu0 %v10153_v33  ;;  %v2248_v44 = vld [vmem:[#allocation2 + $0x398] sm:$0xff]  ;;  %v10193_v24 = vcombine.high %v2247_v30, %v2251_v15 }
 0x26c   :  { %9721 = vmatprep.subr.bf16.mxu1 %v10155_v19  ;;  %v2252_v33 = vld [vmem:[#allocation2 + $0x3b8] sm:$0xff]  ;;  %v10184_v19 = vcombine.low %v2239_v9, %v2243_v10 }
 0x26d   :  { %v10195_v27 = vcombine.high %v2248_v44, %v2252_v33  ;;  %v10194_v48 = vcombine.low %v2248_v44, %v2252_v33 }
 0x26e   :  { %9394 = vmatpush1.bf16.msra.mxu0 %v10152_v29  ;;  %v2259_v29 = vld [vmem:[#allocation2 + $0x3f0] sm:$0xff] }
 0x26f   :  { %9722 = vmatpush1.bf16.msra.mxu1 %v10154_v49  ;;  %9395 = vmatprep.subr.bf16.mxu0 %v10161_v18  ;;  %v2256_v49 = vld [vmem:[#allocation2 + $0x3d8] sm:$0xff]  ;;  %v10201_v41 = vcombine.high %v2255_v60, %v2259_v29 }
 0x270   :  { %9723 = vmatprep.subr.bf16.mxu1 %v10163_v16  ;;  %v2260_v18 = vld [vmem:[#allocation2 + $0x3f8] sm:$0xff]  ;;  %v10192_v16 = vcombine.low %v2247_v30, %v2251_v15 }
 0x271   :  { %v10203_v38 = vcombine.high %v2256_v49, %v2260_v18  ;;  %v10202_v32 = vcombine.low %v2256_v49, %v2260_v18 }
 0x272   :  { %9396 = vmatpush1.bf16.msra.mxu0 %v10160_v40  ;;  %v2267_v40 = vld [vmem:[#allocation2 + $0x430] sm:$0xff] }
 0x273   :  { %9724 = vmatpush1.bf16.msra.mxu1 %v10162_v45  ;;  %9397 = vmatprep.subr.bf16.mxu0 %v10169_v43  ;;  %v2264_v45 = vld [vmem:[#allocation2 + $0x418] sm:$0xff]  ;;  %v10209_v61 = vcombine.high %v2263_v59, %v2267_v40 }
 0x274   :  { %9725 = vmatprep.subr.bf16.mxu1 %v10171_v42  ;;  %v2268_v43 = vld [vmem:[#allocation2 + $0x438] sm:$0xff]  ;;  %v10200_v42 = vcombine.low %v2255_v60, %v2259_v29 }
 0x275   :  { %v10211_v56 = vcombine.high %v2264_v45, %v2268_v43  ;;  %v10210_v9 = vcombine.low %v2264_v45, %v2268_v43  ;;  %v17544_v60 = vld [vmem:[#allocation34_spill] sm:$0xff] }
 0x276   :  { %9398 = vmatpush1.bf16.msra.mxu0 %v10168_v4  ;;  %v2275_v4 = vld [vmem:[#allocation2 + $0x470] sm:$0xff] }
 0x277   :  { %9726 = vmatpush1.bf16.msra.mxu1 %v10170_v0  ;;  %9399 = vmatprep.subr.bf16.mxu0 %v10177_v36  ;;  %v2272_v0 = vld [vmem:[#allocation2 + $0x458] sm:$0xff]  ;;  %v10217_v10 = vcombine.high %v2271_v12, %v2275_v4  ;;  %v10216_v30 = vcombine.low %v2271_v12, %v2275_v4 }
 0x278   :  { %9727 = vmatprep.subr.bf16.mxu1 %v10179_v1  ;;  %v2276_v36 = vld [vmem:[#allocation2 + $0x478] sm:$0xff]  ;;  %v10208_v1 = vcombine.low %v2263_v59, %v2267_v40 }
 0x279   :  { %v10219_v50 = vcombine.high %v2272_v0, %v2276_v36  ;;  %v10218_v15 = vcombine.low %v2272_v0, %v2276_v36  ;;  %v2300_v59 = vld [vmem:[#allocation2 + $0x538] sm:$0xff] }
 0x27a   :  { %9400 = vmatpush1.bf16.msra.mxu0 %v10176_v53  ;;  %v2283_v53 = vld [vmem:[#allocation2 + $0x4b0] sm:$0xff]  ;;  %v2308_v12 = vld [vmem:[#allocation2 + $0x578] sm:$0xff] }
 0x27b   :  { %9728 = vmatpush1.bf16.msra.mxu1 %v10178_v20  ;;  %9401 = vmatprep.subr.bf16.mxu0 %v10185_v13  ;;  %v2280_v20 = vld [vmem:[#allocation2 + $0x498] sm:$0xff]  ;;  %v10225_v44 = vcombine.high %v2279_v5, %v2283_v53  ;;  %v10224_v29 = vcombine.low %v2279_v5, %v2283_v53 }
 0x27c   :  { %9729 = vmatprep.subr.bf16.mxu1 %v10187_v55  ;;  %v2284_v13 = vld [vmem:[#allocation2 + $0x4b8] sm:$0xff]  ;;  %v17543_v55 = vld [vmem:[#allocation25_spill] sm:$0xff] }
 0x27d   :  { %v10227_v33 = vcombine.high %v2280_v20, %v2284_v13  ;;  %v10226_v49 = vcombine.low %v2280_v20, %v2284_v13  ;;  %v2316_v5 = vld [vmem:[#allocation2 + $0x5b8] sm:$0xff] }
 0x27e   :  { %9402 = vmatpush1.bf16.msra.mxu0 %v10184_v19  ;;  %v2287_v19 = vld [vmem:[#allocation2 + $0x4d0] sm:$0xff] }
 0x27f   :  { %9730 = vmatpush1.bf16.msra.mxu1 %v10186_v54  ;;  %9403 = vmatprep.subr.bf16.mxu0 %v10193_v24  ;;  %v2291_v54 = vld [vmem:[#allocation2 + $0x4f0] sm:$0xff]  ;;  %v2288_v24 = vld [vmem:[#allocation2 + $0x4d8] sm:$0xff] }
 0x280   :  { %9731 = vmatprep.subr.bf16.mxu1 %v10195_v27  ;;  %v2292_v27 = vld [vmem:[#allocation2 + $0x4f8] sm:$0xff]  ;;  %v10233_v18 = vcombine.high %v2287_v19, %v2291_v54  ;;  %v10232_v40 = vcombine.low %v2287_v19, %v2291_v54 }
 0x281   :  { %v10234_v45 = vcombine.low %v2288_v24, %v2292_v27 }
 0x282   :  { %9404 = vmatpush1.bf16.msra.mxu0 %v10192_v16  ;;  %v10235_v16 = vcombine.high %v2288_v24, %v2292_v27 }
 0x283   :  { %9732 = vmatpush1.bf16.msra.mxu1 %v10194_v48  ;;  %9405 = vmatprep.subr.bf16.mxu0 %v10201_v41  ;;  %v2295_v48 = vld [vmem:[#allocation2 + $0x510] sm:$0xff] }
 0x284   :  { %9733 = vmatprep.subr.bf16.mxu1 %v10203_v38  ;;  %v2299_v41 = vld [vmem:[#allocation2 + $0x530] sm:$0xff]  ;;  %v2296_v38 = vld [vmem:[#allocation2 + $0x518] sm:$0xff] }
 0x285   :  { %v10241_v43 = vcombine.high %v2295_v48, %v2299_v41  ;;  %v10240_v4 = vcombine.low %v2295_v48, %v2299_v41  ;;  %v10242_v0 = vcombine.low %v2296_v38, %v2300_v59 }
 0x286   :  { %9406 = vmatpush1.bf16.msra.mxu0 %v10200_v42  ;;  %v10243_v42 = vcombine.high %v2296_v38, %v2300_v59  ;;  %v2335_v59 = vld [vmem:[#allocation2 + $0x650] sm:$0xff] }
 0x287   :  { %9734 = vmatpush1.bf16.msra.mxu1 %v10202_v32  ;;  %9416 = vmatprep.subr.bf16.mxu0 %v10209_v61  ;;  %v2303_v32 = vld [vmem:[#allocation2 + $0x550] sm:$0xff] }
 0x288   :  { %9744 = vmatprep.subr.bf16.mxu1 %v10211_v56  ;;  %v2307_v61 = vld [vmem:[#allocation2 + $0x570] sm:$0xff]  ;;  %v2304_v56 = vld [vmem:[#allocation2 + $0x558] sm:$0xff] }
 0x289   :  { %9408 = vmatmul.mubr.bf16.vlgmr.msra.gmra.mrb[4].mxu0 %v17543_v55  ;;  %v10249_v36 = vcombine.high %v2303_v32, %v2307_v61  ;;  %v10248_v53 = vcombine.low %v2303_v32, %v2307_v61  ;;  %v10250_v20 = vcombine.low %v2304_v56, %v2308_v12 }
 0x28a   :  { %9736 = vmatmul.mubr.bf16.vlgmr.msra.gmra.mrb[4].mxu1 %v17543_v55  ;;  %9417 = vmatpush1.bf16.msra.mxu0 %v10208_v1  ;;  %v10251_v1 = vcombine.high %v2304_v56, %v2308_v12  ;;  %v2343_v12 = vld [vmem:[#allocation2 + $0x690] sm:$0xff] }
 0x28b   :  { %9745 = vmatpush1.bf16.msra.mxu1 %v10210_v9  ;;  %9418 = vmatprep.subr.bf16.mxu0 %v10217_v10  ;;  %v2311_v9 = vld [vmem:[#allocation2 + $0x590] sm:$0xff] }
 0x28c   :  { %9746 = vmatprep.subr.bf16.mxu1 %v10219_v50  ;;  %9448 = vmatprep.mubr.bf16.mxu0 %v17544_v60  ;;  %v2315_v10 = vld [vmem:[#allocation2 + $0x5b0] sm:$0xff]  ;;  %v2312_v50 = vld [vmem:[#allocation2 + $0x598] sm:$0xff] }
 0x28d   :  { %9776 = vmatprep.mubr.bf16.mxu1 %v17544_v60  ;;  %v10257_v13 = vcombine.high %v2311_v9, %v2315_v10  ;;  %v10259_v55 = vcombine.high %v2312_v50, %v2316_v5  ;;  %v10256_v19 = vcombine.low %v2311_v9, %v2315_v10  ;;  %v10258_v54 = vcombine.low %v2312_v50, %v2316_v5  ;;  %v2327_v60 = vld [vmem:[#allocation2 + $0x610] sm:$0xff] }
 0x28e   :  { %9419 = vmatpush1.bf16.msra.mxu0 %v10216_v30  ;;  %v2319_v30 = vld [vmem:[#allocation2 + $0x5d0] sm:$0xff] }
 0x28f   :  { %9747 = vmatpush1.bf16.msra.mxu1 %v10218_v15  ;;  %9420 = vmatprep.subr.bf16.mxu0 %v10225_v44  ;;  %v2323_v15 = vld [vmem:[#allocation2 + $0x5f0] sm:$0xff]  ;;  %v2320_v44 = vld [vmem:[#allocation2 + $0x5d8] sm:$0xff] }
 0x290   :  { %9748 = vmatprep.subr.bf16.mxu1 %v10227_v33  ;;  %v2324_v33 = vld [vmem:[#allocation2 + $0x5f8] sm:$0xff]  ;;  %v10265_v24 = vcombine.high %v2319_v30, %v2323_v15  ;;  %v2351_v5 = vld [vmem:[#allocation2 + $0x6d0] sm:$0xff] }
 0x291   :  { %v10267_v27 = vcombine.high %v2320_v44, %v2324_v33  ;;  %v10266_v48 = vcombine.low %v2320_v44, %v2324_v33  ;;  %v2359_v33 = vld [vmem:[#allocation2 + $0x710] sm:$0xff] }
 0x292   :  { %9421 = vmatpush1.bf16.msra.mxu0 %v10224_v29  ;;  %v2331_v29 = vld [vmem:[#allocation2 + $0x630] sm:$0xff] }
 0x293   :  { %9749 = vmatpush1.bf16.msra.mxu1 %v10226_v49  ;;  %9422 = vmatprep.subr.bf16.mxu0 %v10233_v18  ;;  %v2328_v49 = vld [vmem:[#allocation2 + $0x618] sm:$0xff]  ;;  %v10273_v41 = vcombine.high %v2327_v60, %v2331_v29 }
 0x294   :  { %9750 = vmatprep.subr.bf16.mxu1 %v10235_v16  ;;  %v2332_v18 = vld [vmem:[#allocation2 + $0x638] sm:$0xff]  ;;  %v10264_v16 = vcombine.low %v2319_v30, %v2323_v15 }
 0x295   :  { %v10275_v38 = vcombine.high %v2328_v49, %v2332_v18  ;;  %v10274_v32 = vcombine.low %v2328_v49, %v2332_v18  ;;  %v2367_v18 = vld [vmem:[#allocation2 + $0x750] sm:$0xff] }
 0x296   :  { %9423 = vmatpush1.bf16.msra.mxu0 %v10232_v40  ;;  %v2339_v40 = vld [vmem:[#allocation2 + $0x670] sm:$0xff] }
 0x297   :  { %9751 = vmatpush1.bf16.msra.mxu1 %v10234_v45  ;;  %9424 = vmatprep.subr.bf16.mxu0 %v10241_v43  ;;  %v2336_v45 = vld [vmem:[#allocation2 + $0x658] sm:$0xff]  ;;  %v10281_v61 = vcombine.high %v2335_v59, %v2339_v40 }
 0x298   :  { %9752 = vmatprep.subr.bf16.mxu1 %v10243_v42  ;;  %v2340_v43 = vld [vmem:[#allocation2 + $0x678] sm:$0xff]  ;;  %v10272_v42 = vcombine.low %v2327_v60, %v2331_v29 }
 0x299   :  { %v10283_v56 = vcombine.high %v2336_v45, %v2340_v43  ;;  %v10282_v9 = vcombine.low %v2336_v45, %v2340_v43  ;;  %v2375_v43 = vld [vmem:[#allocation2 + $0x790] sm:$0xff] }
 0x29a   :  { %9425 = vmatpush1.bf16.msra.mxu0 %v10240_v4  ;;  %v2347_v4 = vld [vmem:[#allocation2 + $0x6b0] sm:$0xff] }
 0x29b   :  { %9753 = vmatpush1.bf16.msra.mxu1 %v10242_v0  ;;  %9426 = vmatprep.subr.bf16.mxu0 %v10249_v36  ;;  %v2344_v0 = vld [vmem:[#allocation2 + $0x698] sm:$0xff]  ;;  %v10289_v10 = vcombine.high %v2343_v12, %v2347_v4 }
 0x29c   :  { %9754 = vmatprep.subr.bf16.mxu1 %v10251_v1  ;;  %v2348_v36 = vld [vmem:[#allocation2 + $0x6b8] sm:$0xff]  ;;  %v10280_v1 = vcombine.low %v2335_v59, %v2339_v40 }
 0x29d   :  { %v10291_v50 = vcombine.high %v2344_v0, %v2348_v36  ;;  %v10290_v30 = vcombine.low %v2344_v0, %v2348_v36  ;;  %v2383_v36 = vld [vmem:[#allocation2 + $0x7d0] sm:$0xff] }
 0x29e   :  { %9427 = vmatpush1.bf16.msra.mxu0 %v10248_v53  ;;  %v2355_v53 = vld [vmem:[#allocation2 + $0x6f0] sm:$0xff] }
 0x29f   :  { %9755 = vmatpush1.bf16.msra.mxu1 %v10250_v20  ;;  %9428 = vmatprep.subr.bf16.mxu0 %v10257_v13  ;;  %v2352_v20 = vld [vmem:[#allocation2 + $0x6d8] sm:$0xff]  ;;  %v10297_v15 = vcombine.high %v2351_v5, %v2355_v53 }
 0x2a0   :  { %9756 = vmatprep.subr.bf16.mxu1 %v10259_v55  ;;  %v2356_v13 = vld [vmem:[#allocation2 + $0x6f8] sm:$0xff]  ;;  %v10288_v55 = vcombine.low %v2343_v12, %v2347_v4 }
 0x2a1   :  { %v10299_v44 = vcombine.high %v2352_v20, %v2356_v13  ;;  %v10298_v60 = vcombine.low %v2352_v20, %v2356_v13  ;;  %v2391_v13 = vld [vmem:[#allocation2 + $0x810] sm:$0xff] }
 0x2a2   :  { %9429 = vmatpush1.bf16.msra.mxu0 %v10256_v19  ;;  %v2363_v19 = vld [vmem:[#allocation2 + $0x730] sm:$0xff] }
 0x2a3   :  { %9757 = vmatpush1.bf16.msra.mxu1 %v10258_v54  ;;  %9430 = vmatprep.subr.bf16.mxu0 %v10265_v24  ;;  %v2360_v54 = vld [vmem:[#allocation2 + $0x718] sm:$0xff]  ;;  %v10305_v29 = vcombine.high %v2359_v33, %v2363_v19 }
 0x2a4   :  { %9758 = vmatprep.subr.bf16.mxu1 %v10267_v27  ;;  %v2364_v24 = vld [vmem:[#allocation2 + $0x738] sm:$0xff]  ;;  %v10296_v27 = vcombine.low %v2351_v5, %v2355_v53 }
 0x2a5   :  { %v10307_v49 = vcombine.high %v2360_v54, %v2364_v24  ;;  %v10306_v59 = vcombine.low %v2360_v54, %v2364_v24  ;;  %v2399_v24 = vld [vmem:[#allocation2 + $0x850] sm:$0xff] }
 0x2a6   :  { %9431 = vmatpush1.bf16.msra.mxu0 %v10264_v16  ;;  %v2371_v16 = vld [vmem:[#allocation2 + $0x770] sm:$0xff] }
 0x2a7   :  { %9759 = vmatpush1.bf16.msra.mxu1 %v10266_v48  ;;  %9432 = vmatprep.subr.bf16.mxu0 %v10273_v41  ;;  %v2368_v48 = vld [vmem:[#allocation2 + $0x758] sm:$0xff]  ;;  %v10313_v40 = vcombine.high %v2367_v18, %v2371_v16 }
 0x2a8   :  { %9760 = vmatprep.subr.bf16.mxu1 %v10275_v38  ;;  %v2372_v41 = vld [vmem:[#allocation2 + $0x778] sm:$0xff]  ;;  %v10304_v38 = vcombine.low %v2359_v33, %v2363_v19 }
 0x2a9   :  { %v10315_v45 = vcombine.high %v2368_v48, %v2372_v41  ;;  %v10314_v12 = vcombine.low %v2368_v48, %v2372_v41  ;;  %v2407_v41 = vld [vmem:[#allocation2 + $0x890] sm:$0xff] }
 0x2aa   :  { %9433 = vmatpush1.bf16.msra.mxu0 %v10272_v42  ;;  %v2379_v42 = vld [vmem:[#allocation2 + $0x7b0] sm:$0xff] }
 0x2ab   :  { %9761 = vmatpush1.bf16.msra.mxu1 %v10274_v32  ;;  %9434 = vmatprep.subr.bf16.mxu0 %v10281_v61  ;;  %v2376_v32 = vld [vmem:[#allocation2 + $0x798] sm:$0xff]  ;;  %v10321_v4 = vcombine.high %v2375_v43, %v2379_v42 }
 0x2ac   :  { %9762 = vmatprep.subr.bf16.mxu1 %v10283_v56  ;;  %v2380_v61 = vld [vmem:[#allocation2 + $0x7b8] sm:$0xff]  ;;  %v10312_v56 = vcombine.low %v2367_v18, %v2371_v16 }
 0x2ad   :  { %v10323_v0 = vcombine.high %v2376_v32, %v2380_v61  ;;  %v10322_v5 = vcombine.low %v2376_v32, %v2380_v61 }
 0x2ae   :  { %9435 = vmatpush1.bf16.msra.mxu0 %v10280_v1  ;;  %v2387_v1 = vld [vmem:[#allocation2 + $0x7f0] sm:$0xff] }
 0x2af   :  { %9763 = vmatpush1.bf16.msra.mxu1 %v10282_v9  ;;  %9436 = vmatprep.subr.bf16.mxu0 %v10289_v10  ;;  %v2384_v9 = vld [vmem:[#allocation2 + $0x7d8] sm:$0xff]  ;;  %v10329_v53 = vcombine.high %v2383_v36, %v2387_v1 }
 0x2b0   :  { %9764 = vmatprep.subr.bf16.mxu1 %v10291_v50  ;;  %v2388_v10 = vld [vmem:[#allocation2 + $0x7f8] sm:$0xff]  ;;  %v10320_v50 = vcombine.low %v2375_v43, %v2379_v42 }
 0x2b1   :  { %v10331_v20 = vcombine.high %v2384_v9, %v2388_v10  ;;  %v10330_v33 = vcombine.low %v2384_v9, %v2388_v10 }
 0x2b2   :  { %9437 = vmatpush1.bf16.msra.mxu0 %v10288_v55  ;;  %v2395_v55 = vld [vmem:[#allocation2 + $0x830] sm:$0xff] }
 0x2b3   :  { %9765 = vmatpush1.bf16.msra.mxu1 %v10290_v30  ;;  %9438 = vmatprep.subr.bf16.mxu0 %v10297_v15  ;;  %v2392_v30 = vld [vmem:[#allocation2 + $0x818] sm:$0xff]  ;;  %v10337_v19 = vcombine.high %v2391_v13, %v2395_v55 }
 0x2b4   :  { %9766 = vmatprep.subr.bf16.mxu1 %v10299_v44  ;;  %v2396_v15 = vld [vmem:[#allocation2 + $0x838] sm:$0xff]  ;;  %v10328_v44 = vcombine.low %v2383_v36, %v2387_v1  ;;  %v17546_v36 = vld [vmem:[#allocation52_spill] sm:$0xff] }
 0x2b5   :  { %v10339_v54 = vcombine.high %v2392_v30, %v2396_v15  ;;  %v10338_v18 = vcombine.low %v2392_v30, %v2396_v15 }
 0x2b6   :  { %9439 = vmatpush1.bf16.msra.mxu0 %v10296_v27  ;;  %v2403_v27 = vld [vmem:[#allocation2 + $0x870] sm:$0xff] }
 0x2b7   :  { %9767 = vmatpush1.bf16.msra.mxu1 %v10298_v60  ;;  %9440 = vmatprep.subr.bf16.mxu0 %v10305_v29  ;;  %v2400_v60 = vld [vmem:[#allocation2 + $0x858] sm:$0xff]  ;;  %v10345_v16 = vcombine.high %v2399_v24, %v2403_v27  ;;  %v10344_v43 = vcombine.low %v2399_v24, %v2403_v27 }
 0x2b8   :  { %9768 = vmatprep.subr.bf16.mxu1 %v10307_v49  ;;  %v2404_v29 = vld [vmem:[#allocation2 + $0x878] sm:$0xff]  ;;  %v10336_v49 = vcombine.low %v2391_v13, %v2395_v55 }
 0x2b9   :  { %v10347_v48 = vcombine.high %v2400_v60, %v2404_v29  ;;  %v10346_v42 = vcombine.low %v2400_v60, %v2404_v29  ;;  %v2428_v13 = vld [vmem:[#allocation2 + $0x938] sm:$0xff] }
 0x2ba   :  { %9441 = vmatpush1.bf16.msra.mxu0 %v10304_v38  ;;  %v2411_v38 = vld [vmem:[#allocation2 + $0x8b0] sm:$0xff]  ;;  %v2436_v24 = vld [vmem:[#allocation2 + $0x978] sm:$0xff] }
 0x2bb   :  { %9769 = vmatpush1.bf16.msra.mxu1 %v10306_v59  ;;  %9442 = vmatprep.subr.bf16.mxu0 %v10313_v40  ;;  %v2408_v59 = vld [vmem:[#allocation2 + $0x898] sm:$0xff]  ;;  %v10353_v32 = vcombine.high %v2407_v41, %v2411_v38  ;;  %v10352_v1 = vcombine.low %v2407_v41, %v2411_v38 }
 0x2bc   :  { %9770 = vmatprep.subr.bf16.mxu1 %v10315_v45  ;;  %v2412_v40 = vld [vmem:[#allocation2 + $0x8b8] sm:$0xff]  ;;  %v17545_v45 = vld [vmem:[#allocation43_spill] sm:$0xff] }
 0x2bd   :  { %v10355_v61 = vcombine.high %v2408_v59, %v2412_v40  ;;  %v10354_v9 = vcombine.low %v2408_v59, %v2412_v40  ;;  %v2444_v41 = vld [vmem:[#allocation2 + $0x9b8] sm:$0xff] }
 0x2be   :  { %9443 = vmatpush1.bf16.msra.mxu0 %v10312_v56  ;;  %v2415_v56 = vld [vmem:[#allocation2 + $0x8d0] sm:$0xff] }
 0x2bf   :  { %9771 = vmatpush1.bf16.msra.mxu1 %v10314_v12  ;;  %9444 = vmatprep.subr.bf16.mxu0 %v10321_v4  ;;  %v2419_v12 = vld [vmem:[#allocation2 + $0x8f0] sm:$0xff]  ;;  %v2416_v4 = vld [vmem:[#allocation2 + $0x8d8] sm:$0xff] }
 0x2c0   :  { %9772 = vmatprep.subr.bf16.mxu1 %v10323_v0  ;;  %v2420_v0 = vld [vmem:[#allocation2 + $0x8f8] sm:$0xff]  ;;  %v10361_v10 = vcombine.high %v2415_v56, %v2419_v12  ;;  %v10360_v55 = vcombine.low %v2415_v56, %v2419_v12 }
 0x2c1   :  { %v10362_v30 = vcombine.low %v2416_v4, %v2420_v0 }
 0x2c2   :  { %9445 = vmatpush1.bf16.msra.mxu0 %v10320_v50  ;;  %v10363_v50 = vcombine.high %v2416_v4, %v2420_v0 }
 0x2c3   :  { %9773 = vmatpush1.bf16.msra.mxu1 %v10322_v5  ;;  %9446 = vmatprep.subr.bf16.mxu0 %v10329_v53  ;;  %v2423_v5 = vld [vmem:[#allocation2 + $0x910] sm:$0xff] }
 0x2c4   :  { %9774 = vmatprep.subr.bf16.mxu1 %v10331_v20  ;;  %v2427_v53 = vld [vmem:[#allocation2 + $0x930] sm:$0xff]  ;;  %v2424_v20 = vld [vmem:[#allocation2 + $0x918] sm:$0xff] }
 0x2c5   :  { %v10369_v15 = vcombine.high %v2423_v5, %v2427_v53  ;;  %v10368_v27 = vcombine.low %v2423_v5, %v2427_v53  ;;  %v10370_v60 = vcombine.low %v2424_v20, %v2428_v13 }
 0x2c6   :  { %9447 = vmatpush1.bf16.msra.mxu0 %v10328_v44  ;;  %v10371_v44 = vcombine.high %v2424_v20, %v2428_v13  ;;  %v2463_v13 = vld [vmem:[#allocation2 + $0xa50] sm:$0xff] }
 0x2c7   :  { %9775 = vmatpush1.bf16.msra.mxu1 %v10330_v33  ;;  %9457 = vmatprep.subr.bf16.mxu0 %v10337_v19  ;;  %v2431_v33 = vld [vmem:[#allocation2 + $0x950] sm:$0xff] }
 0x2c8   :  { %9785 = vmatprep.subr.bf16.mxu1 %v10339_v54  ;;  %v2435_v19 = vld [vmem:[#allocation2 + $0x970] sm:$0xff]  ;;  %v2432_v54 = vld [vmem:[#allocation2 + $0x958] sm:$0xff] }
 0x2c9   :  { %9449 = vmatmul.mubr.bf16.vlgmr.msra.gmra.mrb[4].mxu0 %v17545_v45  ;;  %v10377_v29 = vcombine.high %v2431_v33, %v2435_v19  ;;  %v10376_v38 = vcombine.low %v2431_v33, %v2435_v19  ;;  %v10378_v59 = vcombine.low %v2432_v54, %v2436_v24 }
 0x2ca   :  { %9777 = vmatmul.mubr.bf16.vlgmr.msra.gmra.mrb[4].mxu1 %v17545_v45  ;;  %9458 = vmatpush1.bf16.msra.mxu0 %v10336_v49  ;;  %v10379_v49 = vcombine.high %v2432_v54, %v2436_v24  ;;  %v2471_v24 = vld [vmem:[#allocation2 + $0xa90] sm:$0xff] }
 0x2cb   :  { %9786 = vmatpush1.bf16.msra.mxu1 %v10338_v18  ;;  %9459 = vmatprep.subr.bf16.mxu0 %v10345_v16  ;;  %v2439_v18 = vld [vmem:[#allocation2 + $0x990] sm:$0xff] }
 0x2cc   :  { %9787 = vmatprep.subr.bf16.mxu1 %v10347_v48  ;;  %9489 = vmatprep.mubr.bf16.mxu0 %v17546_v36  ;;  %v2443_v16 = vld [vmem:[#allocation2 + $0x9b0] sm:$0xff]  ;;  %v2440_v48 = vld [vmem:[#allocation2 + $0x998] sm:$0xff] }
 0x2cd   :  { %9817 = vmatprep.mubr.bf16.mxu1 %v17546_v36  ;;  %v10385_v40 = vcombine.high %v2439_v18, %v2443_v16  ;;  %v10387_v45 = vcombine.high %v2440_v48, %v2444_v41  ;;  %v10384_v56 = vcombine.low %v2439_v18, %v2443_v16  ;;  %v10386_v12 = vcombine.low %v2440_v48, %v2444_v41  ;;  %v2455_v36 = vld [vmem:[#allocation2 + $0xa10] sm:$0xff] }
 0x2ce   :  { %9460 = vmatpush1.bf16.msra.mxu0 %v10344_v43  ;;  %v2447_v43 = vld [vmem:[#allocation2 + $0x9d0] sm:$0xff] }
 0x2cf   :  { %9788 = vmatpush1.bf16.msra.mxu1 %v10346_v42  ;;  %9461 = vmatprep.subr.bf16.mxu0 %v10353_v32  ;;  %v2451_v42 = vld [vmem:[#allocation2 + $0x9f0] sm:$0xff]  ;;  %v2448_v32 = vld [vmem:[#allocation2 + $0x9d8] sm:$0xff] }
 0x2d0   :  { %9789 = vmatprep.subr.bf16.mxu1 %v10355_v61  ;;  %v2452_v61 = vld [vmem:[#allocation2 + $0x9f8] sm:$0xff]  ;;  %v10393_v4 = vcombine.high %v2447_v43, %v2451_v42  ;;  %v2479_v41 = vld [vmem:[#allocation2 + $0xad0] sm:$0xff] }
 0x2d1   :  { %v10395_v0 = vcombine.high %v2448_v32, %v2452_v61  ;;  %v10394_v5 = vcombine.low %v2448_v32, %v2452_v61  ;;  %v2487_v61 = vld [vmem:[#allocation2 + $0xb10] sm:$0xff] }
 0x2d2   :  { %9462 = vmatpush1.bf16.msra.mxu0 %v10352_v1  ;;  %v2459_v1 = vld [vmem:[#allocation2 + $0xa30] sm:$0xff] }
 0x2d3   :  { %9790 = vmatpush1.bf16.msra.mxu1 %v10354_v9  ;;  %9463 = vmatprep.subr.bf16.mxu0 %v10361_v10  ;;  %v2456_v9 = vld [vmem:[#allocation2 + $0xa18] sm:$0xff]  ;;  %v10401_v53 = vcombine.high %v2455_v36, %v2459_v1 }
 0x2d4   :  { %9791 = vmatprep.subr.bf16.mxu1 %v10363_v50  ;;  %v2460_v10 = vld [vmem:[#allocation2 + $0xa38] sm:$0xff]  ;;  %v10392_v50 = vcombine.low %v2447_v43, %v2451_v42 }
 0x2d5   :  { %v10403_v20 = vcombine.high %v2456_v9, %v2460_v10  ;;  %v10402_v33 = vcombine.low %v2456_v9, %v2460_v10  ;;  %v2495_v10 = vld [vmem:[#allocation2 + $0xb50] sm:$0xff] }
 0x2d6   :  { %9464 = vmatpush1.bf16.msra.mxu0 %v10360_v55  ;;  %v2467_v55 = vld [vmem:[#allocation2 + $0xa70] sm:$0xff] }
 0x2d7   :  { %9792 = vmatpush1.bf16.msra.mxu1 %v10362_v30  ;;  %9465 = vmatprep.subr.bf16.mxu0 %v10369_v15  ;;  %v2464_v30 = vld [vmem:[#allocation2 + $0xa58] sm:$0xff]  ;;  %v10409_v19 = vcombine.high %v2463_v13, %v2467_v55 }
 0x2d8   :  { %9793 = vmatprep.subr.bf16.mxu1 %v10371_v44  ;;  %v2468_v15 = vld [vmem:[#allocation2 + $0xa78] sm:$0xff]  ;;  %v10400_v44 = vcombine.low %v2455_v36, %v2459_v1 }
 0x2d9   :  { %v10411_v54 = vcombine.high %v2464_v30, %v2468_v15  ;;  %v10410_v18 = vcombine.low %v2464_v30, %v2468_v15  ;;  %v2503_v15 = vld [vmem:[#allocation2 + $0xb90] sm:$0xff] }
 0x2da   :  { %9466 = vmatpush1.bf16.msra.mxu0 %v10368_v27  ;;  %v2475_v27 = vld [vmem:[#allocation2 + $0xab0] sm:$0xff] }
 0x2db   :  { %9794 = vmatpush1.bf16.msra.mxu1 %v10370_v60  ;;  %9467 = vmatprep.subr.bf16.mxu0 %v10377_v29  ;;  %v2472_v60 = vld [vmem:[#allocation2 + $0xa98] sm:$0xff]  ;;  %v10417_v16 = vcombine.high %v2471_v24, %v2475_v27 }
 0x2dc   :  { %9795 = vmatprep.subr.bf16.mxu1 %v10379_v49  ;;  %v2476_v29 = vld [vmem:[#allocation2 + $0xab8] sm:$0xff]  ;;  %v10408_v49 = vcombine.low %v2463_v13, %v2467_v55 }
 0x2dd   :  { %v10419_v48 = vcombine.high %v2472_v60, %v2476_v29  ;;  %v10418_v43 = vcombine.low %v2472_v60, %v2476_v29  ;;  %v2511_v29 = vld [vmem:[#allocation2 + $0xbd0] sm:$0xff] }
 0x2de   :  { %9468 = vmatpush1.bf16.msra.mxu0 %v10376_v38  ;;  %v2483_v38 = vld [vmem:[#allocation2 + $0xaf0] sm:$0xff] }
 0x2df   :  { %9796 = vmatpush1.bf16.msra.mxu1 %v10378_v59  ;;  %9469 = vmatprep.subr.bf16.mxu0 %v10385_v40  ;;  %v2480_v59 = vld [vmem:[#allocation2 + $0xad8] sm:$0xff]  ;;  %v10425_v42 = vcombine.high %v2479_v41, %v2483_v38 }
 0x2e0   :  { %9797 = vmatprep.subr.bf16.mxu1 %v10387_v45  ;;  %v2484_v40 = vld [vmem:[#allocation2 + $0xaf8] sm:$0xff]  ;;  %v10416_v45 = vcombine.low %v2471_v24, %v2475_v27 }
 0x2e1   :  { %v10427_v32 = vcombine.high %v2480_v59, %v2484_v40  ;;  %v10426_v36 = vcombine.low %v2480_v59, %v2484_v40  ;;  %v2519_v40 = vld [vmem:[#allocation2 + $0xc10] sm:$0xff] }
 0x2e2   :  { %9470 = vmatpush1.bf16.msra.mxu0 %v10384_v56  ;;  %v2491_v56 = vld [vmem:[#allocation2 + $0xb30] sm:$0xff] }
 0x2e3   :  { %9798 = vmatpush1.bf16.msra.mxu1 %v10386_v12  ;;  %9471 = vmatprep.subr.bf16.mxu0 %v10393_v4  ;;  %v2488_v12 = vld [vmem:[#allocation2 + $0xb18] sm:$0xff]  ;;  %v10433_v1 = vcombine.high %v2487_v61, %v2491_v56 }
 0x2e4   :  { %9799 = vmatprep.subr.bf16.mxu1 %v10395_v0  ;;  %v2492_v4 = vld [vmem:[#allocation2 + $0xb38] sm:$0xff]  ;;  %v10424_v0 = vcombine.low %v2479_v41, %v2483_v38 }
 0x2e5   :  { %v10435_v9 = vcombine.high %v2488_v12, %v2492_v4  ;;  %v10434_v13 = vcombine.low %v2488_v12, %v2492_v4  ;;  %v2527_v4 = vld [vmem:[#allocation2 + $0xc50] sm:$0xff] }
 0x2e6   :  { %9472 = vmatpush1.bf16.msra.mxu0 %v10392_v50  ;;  %v2499_v50 = vld [vmem:[#allocation2 + $0xb70] sm:$0xff] }
 0x2e7   :  { %9800 = vmatpush1.bf16.msra.mxu1 %v10394_v5  ;;  %9473 = vmatprep.subr.bf16.mxu0 %v10401_v53  ;;  %v2496_v5 = vld [vmem:[#allocation2 + $0xb58] sm:$0xff]  ;;  %v10441_v55 = vcombine.high %v2495_v10, %v2499_v50 }
 0x2e8   :  { %9801 = vmatprep.subr.bf16.mxu1 %v10403_v20  ;;  %v2500_v53 = vld [vmem:[#allocation2 + $0xb78] sm:$0xff]  ;;  %v10432_v20 = vcombine.low %v2487_v61, %v2491_v56 }
 0x2e9   :  { %v10443_v30 = vcombine.high %v2496_v5, %v2500_v53  ;;  %v10442_v24 = vcombine.low %v2496_v5, %v2500_v53  ;;  %v2535_v53 = vld [vmem:[#allocation2 + $0xc90] sm:$0xff] }
 0x2ea   :  { %9474 = vmatpush1.bf16.msra.mxu0 %v10400_v44  ;;  %v2507_v44 = vld [vmem:[#allocation2 + $0xbb0] sm:$0xff] }
 0x2eb   :  { %9802 = vmatpush1.bf16.msra.mxu1 %v10402_v33  ;;  %9475 = vmatprep.subr.bf16.mxu0 %v10409_v19  ;;  %v2504_v33 = vld [vmem:[#allocation2 + $0xb98] sm:$0xff]  ;;  %v10449_v27 = vcombine.high %v2503_v15, %v2507_v44 }
 0x2ec   :  { %9803 = vmatprep.subr.bf16.mxu1 %v10411_v54  ;;  %v2508_v19 = vld [vmem:[#allocation2 + $0xbb8] sm:$0xff]  ;;  %v10440_v54 = vcombine.low %v2495_v10, %v2499_v50 }
 0x2ed   :  { %v10451_v60 = vcombine.high %v2504_v33, %v2508_v19  ;;  %v10450_v41 = vcombine.low %v2504_v33, %v2508_v19 }
 0x2ee   :  { %9476 = vmatpush1.bf16.msra.mxu0 %v10408_v49  ;;  %v2515_v49 = vld [vmem:[#allocation2 + $0xbf0] sm:$0xff] }
 0x2ef   :  { %9804 = vmatpush1.bf16.msra.mxu1 %v10410_v18  ;;  %9477 = vmatprep.subr.bf16.mxu0 %v10417_v16  ;;  %v2512_v18 = vld [vmem:[#allocation2 + $0xbd8] sm:$0xff]  ;;  %v10457_v38 = vcombine.high %v2511_v29, %v2515_v49 }
 0x2f0   :  { %9805 = vmatprep.subr.bf16.mxu1 %v10419_v48  ;;  %v2516_v16 = vld [vmem:[#allocation2 + $0xbf8] sm:$0xff]  ;;  %v10448_v48 = vcombine.low %v2503_v15, %v2507_v44 }
 0x2f1   :  { %v10459_v59 = vcombine.high %v2512_v18, %v2516_v16  ;;  %v10458_v61 = vcombine.low %v2512_v18, %v2516_v16 }
 0x2f2   :  { %9478 = vmatpush1.bf16.msra.mxu0 %v10416_v45  ;;  %v2523_v45 = vld [vmem:[#allocation2 + $0xc30] sm:$0xff] }
 0x2f3   :  { %9806 = vmatpush1.bf16.msra.mxu1 %v10418_v43  ;;  %9479 = vmatprep.subr.bf16.mxu0 %v10425_v42  ;;  %v2520_v43 = vld [vmem:[#allocation2 + $0xc18] sm:$0xff]  ;;  %v10465_v56 = vcombine.high %v2519_v40, %v2523_v45 }
 0x2f4   :  { %9807 = vmatprep.subr.bf16.mxu1 %v10427_v32  ;;  %v2524_v42 = vld [vmem:[#allocation2 + $0xc38] sm:$0xff]  ;;  %v10456_v32 = vcombine.low %v2511_v29, %v2515_v49 }
 0x2f5   :  { %v10467_v12 = vcombine.high %v2520_v43, %v2524_v42  ;;  %v10466_v10 = vcombine.low %v2520_v43, %v2524_v42  ;;  %v17548_v29 = vld [vmem:[#allocation70_spill] sm:$0xff] }
 0x2f6   :  { %9480 = vmatpush1.bf16.msra.mxu0 %v10424_v0  ;;  %v2531_v0 = vld [vmem:[#allocation2 + $0xc70] sm:$0xff] }
 0x2f7   :  { %9808 = vmatpush1.bf16.msra.mxu1 %v10426_v36  ;;  %9481 = vmatprep.subr.bf16.mxu0 %v10433_v1  ;;  %v2528_v36 = vld [vmem:[#allocation2 + $0xc58] sm:$0xff]  ;;  %v10473_v50 = vcombine.high %v2527_v4, %v2531_v0  ;;  %v10472_v15 = vcombine.low %v2527_v4, %v2531_v0 }
 0x2f8   :  { %9809 = vmatprep.subr.bf16.mxu1 %v10435_v9  ;;  %v2532_v1 = vld [vmem:[#allocation2 + $0xc78] sm:$0xff]  ;;  %v10464_v9 = vcombine.low %v2519_v40, %v2523_v45 }
 0x2f9   :  { %v10475_v5 = vcombine.high %v2528_v36, %v2532_v1  ;;  %v10474_v44 = vcombine.low %v2528_v36, %v2532_v1  ;;  %v2556_v40 = vld [vmem:[#allocation2 + $0xd38] sm:$0xff] }
 0x2fa   :  { %9482 = vmatpush1.bf16.msra.mxu0 %v10432_v20  ;;  %v2539_v20 = vld [vmem:[#allocation2 + $0xcb0] sm:$0xff]  ;;  %v2564_v4 = vld [vmem:[#allocation2 + $0xd78] sm:$0xff] }
 0x2fb   :  { %9810 = vmatpush1.bf16.msra.mxu1 %v10434_v13  ;;  %9483 = vmatprep.subr.bf16.mxu0 %v10441_v55  ;;  %v2536_v13 = vld [vmem:[#allocation2 + $0xc98] sm:$0xff]  ;;  %v10481_v33 = vcombine.high %v2535_v53, %v2539_v20  ;;  %v10480_v49 = vcombine.low %v2535_v53, %v2539_v20 }
 0x2fc   :  { %9811 = vmatprep.subr.bf16.mxu1 %v10443_v30  ;;  %v2540_v55 = vld [vmem:[#allocation2 + $0xcb8] sm:$0xff]  ;;  %v17547_v30 = vld [vmem:[#allocation61_spill] sm:$0xff] }
 0x2fd   :  { %v10483_v19 = vcombine.high %v2536_v13, %v2540_v55  ;;  %v10482_v18 = vcombine.low %v2536_v13, %v2540_v55  ;;  %v2572_v53 = vld [vmem:[#allocation2 + $0xdb8] sm:$0xff] }
 0x2fe   :  { %9484 = vmatpush1.bf16.msra.mxu0 %v10440_v54  ;;  %v2543_v54 = vld [vmem:[#allocation2 + $0xcd0] sm:$0xff] }
 0x2ff   :  { %9812 = vmatpush1.bf16.msra.mxu1 %v10442_v24  ;;  %9485 = vmatprep.subr.bf16.mxu0 %v10449_v27  ;;  %v2547_v24 = vld [vmem:[#allocation2 + $0xcf0] sm:$0xff]  ;;  %v2544_v27 = vld [vmem:[#allocation2 + $0xcd8] sm:$0xff] }
 0x300   :  { %9813 = vmatprep.subr.bf16.mxu1 %v10451_v60  ;;  %v2548_v60 = vld [vmem:[#allocation2 + $0xcf8] sm:$0xff]  ;;  %v10489_v16 = vcombine.high %v2543_v54, %v2547_v24  ;;  %v10488_v45 = vcombine.low %v2543_v54, %v2547_v24 }
 0x301   :  { %v10490_v43 = vcombine.low %v2544_v27, %v2548_v60  ;;  %v2576_v54 = vld [vmem:[#allocation2 + $0xdd8] sm:$0xff] }
 0x302   :  { %9486 = vmatpush1.bf16.msra.mxu0 %v10448_v48  ;;  %v10491_v48 = vcombine.high %v2544_v27, %v2548_v60  ;;  %v2580_v24 = vld [vmem:[#allocation2 + $0xdf8] sm:$0xff] }
 0x303   :  { %9814 = vmatpush1.bf16.msra.mxu1 %v10450_v41  ;;  %9487 = vmatprep.subr.bf16.mxu0 %v10457_v38  ;;  %v2551_v41 = vld [vmem:[#allocation2 + $0xd10] sm:$0xff] }
 0x304   :  { %9815 = vmatprep.subr.bf16.mxu1 %v10459_v59  ;;  %v2555_v38 = vld [vmem:[#allocation2 + $0xd30] sm:$0xff]  ;;  %v2552_v59 = vld [vmem:[#allocation2 + $0xd18] sm:$0xff] }
 0x305   :  { %v10497_v42 = vcombine.high %v2551_v41, %v2555_v38  ;;  %v10496_v0 = vcombine.low %v2551_v41, %v2555_v38  ;;  %v10498_v36 = vcombine.low %v2552_v59, %v2556_v40 }
 0x306   :  { %9488 = vmatpush1.bf16.msra.mxu0 %v10456_v32  ;;  %v10499_v32 = vcombine.high %v2552_v59, %v2556_v40  ;;  %v10523_v59 = vcombine.high %v2576_v54, %v2580_v24  ;;  %v2583_v40 = vld [vmem:[#allocation2 + $0xe10] sm:$0xff] }
 0x307   :  { %9816 = vmatpush1.bf16.msra.mxu1 %v10458_v61  ;;  %9498 = vmatprep.subr.bf16.mxu0 %v10465_v56  ;;  %v2559_v61 = vld [vmem:[#allocation2 + $0xd50] sm:$0xff] }
 0x308   :  { %9826 = vmatprep.subr.bf16.mxu1 %v10467_v12  ;;  %v2563_v56 = vld [vmem:[#allocation2 + $0xd70] sm:$0xff]  ;;  %v2560_v12 = vld [vmem:[#allocation2 + $0xd58] sm:$0xff] }
 0x309   :  { %9490 = vmatmul.mubr.bf16.vlgmr.msra.gmra.mrb[4].mxu0 %v17547_v30  ;;  %v10505_v1 = vcombine.high %v2559_v61, %v2563_v56  ;;  %v10504_v20 = vcombine.low %v2559_v61, %v2563_v56  ;;  %v10506_v13 = vcombine.low %v2560_v12, %v2564_v4  ;;  %v10522_v61 = vcombine.low %v2576_v54, %v2580_v24  ;;  %v2607_v24 = vld [vmem:[#allocation2 + $0xed0] sm:$0xff] }
 0x30a   :  { %9818 = vmatmul.mubr.bf16.vlgmr.msra.gmra.mrb[4].mxu1 %v17547_v30  ;;  %9499 = vmatpush1.bf16.msra.mxu0 %v10464_v9  ;;  %v10507_v9 = vcombine.high %v2560_v12, %v2564_v4  ;;  %v2591_v4 = vld [vmem:[#allocation2 + $0xe50] sm:$0xff] }
 0x30b   :  { %9827 = vmatpush1.bf16.msra.mxu1 %v10466_v10  ;;  %9500 = vmatprep.subr.bf16.mxu0 %v10473_v50  ;;  %v2567_v10 = vld [vmem:[#allocation2 + $0xd90] sm:$0xff] }
 0x30c   :  { %9828 = vmatprep.subr.bf16.mxu1 %v10475_v5  ;;  %9530 = vmatprep.mubr.bf16.mxu0 %v17548_v29  ;;  %v2571_v50 = vld [vmem:[#allocation2 + $0xdb0] sm:$0xff]  ;;  %v2568_v5 = vld [vmem:[#allocation2 + $0xd98] sm:$0xff] }
 0x30d   :  { %9858 = vmatprep.mubr.bf16.mxu1 %v17548_v29  ;;  %v10513_v55 = vcombine.high %v2567_v10, %v2571_v50  ;;  %v10515_v30 = vcombine.high %v2568_v5, %v2572_v53 }
 0x30e   :  { %9501 = vmatpush1.bf16.msra.mxu0 %v10472_v15  ;;  %v2575_v15 = vld [vmem:[#allocation2 + $0xdd0] sm:$0xff] }
 0x30f   :  { %9829 = vmatpush1.bf16.msra.mxu1 %v10474_v44  ;;  %9502 = vmatprep.subr.bf16.mxu0 %v10481_v33 }
 0x310   :  { %9830 = vmatprep.subr.bf16.mxu1 %v10483_v19  ;;  %v2579_v19 = vld [vmem:[#allocation2 + $0xdf0] sm:$0xff] }
 0x311   :  { %v10521_v38 = vcombine.high %v2575_v15, %v2579_v19 }
 0x312   :  { %9503 = vmatpush1.bf16.msra.mxu0 %v10480_v49 }
 0x313   :  { %9831 = vmatpush1.bf16.msra.mxu1 %v10482_v18  ;;  %9504 = vmatprep.subr.bf16.mxu0 %v10489_v16  ;;  %v10512_v18 = vcombine.low %v2567_v10, %v2571_v50  ;;  %v10514_v16 = vcombine.low %v2568_v5, %v2572_v53  ;;  %v2599_v53 = vld [vmem:[#allocation2 + $0xe90] sm:$0xff] }
 0x314   :  { %9832 = vmatprep.subr.bf16.mxu1 %v10491_v48 }
 0x316   :  { %9505 = vmatpush1.bf16.msra.mxu0 %v10488_v45  ;;  %v2587_v45 = vld [vmem:[#allocation2 + $0xe30] sm:$0xff] }
 0x317   :  { %9833 = vmatpush1.bf16.msra.mxu1 %v10490_v43  ;;  %9506 = vmatprep.subr.bf16.mxu0 %v10497_v42  ;;  %v2584_v43 = vld [vmem:[#allocation2 + $0xe18] sm:$0xff]  ;;  %v10529_v56 = vcombine.high %v2583_v40, %v2587_v45 }
 0x318   :  { %9834 = vmatprep.subr.bf16.mxu1 %v10499_v32  ;;  %v2588_v42 = vld [vmem:[#allocation2 + $0xe38] sm:$0xff]  ;;  %v10520_v32 = vcombine.low %v2575_v15, %v2579_v19 }
 0x319   :  { %v10531_v12 = vcombine.high %v2584_v43, %v2588_v42  ;;  %v10530_v10 = vcombine.low %v2584_v43, %v2588_v42  ;;  %v2620_v43 = vld [vmem:[#allocation2 + $0xf38] sm:$0xff] }
 0x31a   :  { %9507 = vmatpush1.bf16.msra.mxu0 %v10496_v0  ;;  %v2595_v0 = vld [vmem:[#allocation2 + $0xe70] sm:$0xff] }
 0x31b   :  { %9835 = vmatpush1.bf16.msra.mxu1 %v10498_v36  ;;  %9508 = vmatprep.subr.bf16.mxu0 %v10505_v1  ;;  %v2592_v36 = vld [vmem:[#allocation2 + $0xe58] sm:$0xff]  ;;  %v10537_v50 = vcombine.high %v2591_v4, %v2595_v0 }
 0x31c   :  { %9836 = vmatprep.subr.bf16.mxu1 %v10507_v9  ;;  %v14856_v44 = vpop.f32.mrb[0].mxu0  ;;  %v2596_v1 = vld [vmem:[#allocation2 + $0xe78] sm:$0xff]  ;;  %v10528_v9 = vcombine.low %v2583_v40, %v2587_v45  ;;  %v2619_v40 = vld [vmem:[#allocation2 + $0xf30] sm:$0xff] }
 0x31d   :  { %17549 = vst [vmem:[#allocation16_spill] sm:$0xff] %v14856_v44  ;;  %v14858_v33 = vpop.f32.mrb[0].mxu1  ;;  %v14860_v27 = vpop.f32.mrb[1].mxu0  ;;  %v10539_v5 = vcombine.high %v2592_v36, %v2596_v1  ;;  %v10538_v15 = vcombine.low %v2592_v36, %v2596_v1  ;;  %v2616_v45 = vld [vmem:[#allocation2 + $0xf18] sm:$0xff]  ;;  %v2851_v44 = vld [vmem:[#allocation2 + $0x1670] sm:$0xff] }
 0x31e   :  { %17550 = vst [vmem:[#allocation25_spill] sm:$0xff] %v14858_v33  ;;  %17551 = vst [vmem:[#allocation34_spill] sm:$0xff] %v14860_v27  ;;  %v14862_v60 = vpop.f32.mrb[1].mxu1  ;;  %v9044_v29 = vpop.f32.mrb[2].mxu0  ;;  %9509 = vmatpush1.bf16.msra.mxu0 %v10504_v20  ;;  %v2603_v20 = vld [vmem:[#allocation2 + $0xeb0] sm:$0xff]  ;;  %v2628_v36 = vld [vmem:[#allocation2 + $0xf78] sm:$0xff] }
 0x31f   :  { %17552 = vst [vmem:[#allocation43_spill] sm:$0xff] %v14862_v60  ;;  %v9372_v49 = vpop.f32.mrb[2].mxu1  ;;  %9837 = vmatpush1.bf16.msra.mxu1 %v10506_v13  ;;  %v9045_v48 = vpop.f32.mrb[3].mxu0  ;;  %9510 = vmatprep.subr.bf16.mxu0 %v10513_v55  ;;  %v2600_v13 = vld [vmem:[#allocation2 + $0xe98] sm:$0xff]  ;;  %v10545_v19 = vcombine.high %v2599_v53, %v2603_v20  ;;  %v2611_v29 = vld [vmem:[#allocation2 + $0xef0] sm:$0xff]  ;;  %v17562_v60 = vld [vmem:[#allocation12_spill] sm:$0xff] }
 0x320   :  { %v9373_v41 = vpop.f32.mrb[3].mxu1  ;;  %9838 = vmatprep.subr.bf16.mxu1 %v10515_v30  ;;  %v2604_v55 = vld [vmem:[#allocation2 + $0xeb8] sm:$0xff]  ;;  %v10536_v30 = vcombine.low %v2591_v4, %v2595_v0  ;;  %v10552_v42 = vcombine.low %v2607_v24, %v2611_v29  ;;  %v2627_v4 = vld [vmem:[#allocation2 + $0xf70] sm:$0xff]  ;;  %v17563_v33 = vld [vmem:[#allocation20_spill] sm:$0xff] }
 0x321   :  { %v10547_v54 = vcombine.high %v2600_v13, %v2604_v55  ;;  %v2608_v49 = vld [vmem:[#allocation2 + $0xed8] sm:$0xff]  ;;  %v10546_v48 = vcombine.low %v2600_v13, %v2604_v55  ;;  %v10553_v41 = vcombine.high %v2607_v24, %v2611_v29  ;;  %v2643_v24 = vld [vmem:[#allocation2 + $0xff0] sm:$0xff] }
 0x322   :  { %9511 = vmatpush1.bf16.msra.mxu0 %v10512_v18  ;;  %v2612_v18 = vld [vmem:[#allocation2 + $0xef8] sm:$0xff] }
 0x323   :  { %9839 = vmatpush1.bf16.msra.mxu1 %v10514_v16  ;;  %9512 = vmatprep.subr.bf16.mxu0 %v10521_v38  ;;  %v10544_v16 = vcombine.low %v2599_v53, %v2603_v20  ;;  %v10555_v38 = vcombine.high %v2608_v49, %v2612_v18  ;;  %v2624_v0 = vld [vmem:[#allocation2 + $0xf58] sm:$0xff]  ;;  %v2635_v53 = vld [vmem:[#allocation2 + $0xfb0] sm:$0xff] }
 0x324   :  { %9840 = vmatprep.subr.bf16.mxu1 %v10523_v59  ;;  %v2615_v59 = vld [vmem:[#allocation2 + $0xf10] sm:$0xff]  ;;  %v2632_v20 = vld [vmem:[#allocation2 + $0xf98] sm:$0xff] }
 0x325   :  { %v10560_v1 = vcombine.low %v2615_v59, %v2619_v40  ;;  %v2636_v13 = vld [vmem:[#allocation2 + $0xfb8] sm:$0xff] }
 0x326   :  { %9513 = vmatpush1.bf16.msra.mxu0 %v10520_v32  ;;  %v10554_v32 = vcombine.low %v2608_v49, %v2612_v18  ;;  %v2640_v29 = vld [vmem:[#allocation2 + $0xfd8] sm:$0xff] }
 0x327   :  { %9841 = vmatpush1.bf16.msra.mxu1 %v10522_v61  ;;  %9514 = vmatprep.subr.bf16.mxu0 %v10529_v56  ;;  %v10561_v61 = vcombine.high %v2615_v59, %v2619_v40  ;;  %v10563_v56 = vcombine.high %v2616_v45, %v2620_v43  ;;  %v2644_v49 = vld [vmem:[#allocation2 + $0xff8] sm:$0xff]  ;;  %v2651_v59 = vld [vmem:[#allocation2 + $0x1030] sm:$0xff] }
 0x328   :  { %9842 = vmatprep.subr.bf16.mxu1 %v10531_v12  ;;  %v2623_v12 = vld [vmem:[#allocation2 + $0xf50] sm:$0xff]  ;;  %v2648_v40 = vld [vmem:[#allocation2 + $0x1018] sm:$0xff] }
 0x329   :  { %v10568_v55 = vcombine.low %v2623_v12, %v2627_v4 }
 0x32a   :  { %9515 = vmatpush1.bf16.msra.mxu0 %v10528_v9  ;;  %v10562_v9 = vcombine.low %v2616_v45, %v2620_v43  ;;  %v2652_v45 = vld [vmem:[#allocation2 + $0x1038] sm:$0xff] }
 0x32b   :  { %9843 = vmatpush1.bf16.msra.mxu1 %v10530_v10  ;;  %9516 = vmatprep.subr.bf16.mxu0 %v10537_v50  ;;  %v10569_v10 = vcombine.high %v2623_v12, %v2627_v4  ;;  %v10571_v50 = vcombine.high %v2624_v0, %v2628_v36  ;;  %v2659_v12 = vld [vmem:[#allocation2 + $0x1070] sm:$0xff]  ;;  %v2656_v4 = vld [vmem:[#allocation2 + $0x1058] sm:$0xff] }
 0x32c   :  { %9844 = vmatprep.subr.bf16.mxu1 %v10539_v5  ;;  %v2631_v5 = vld [vmem:[#allocation2 + $0xf90] sm:$0xff] }
 0x32d   :  { %v10576_v18 = vcombine.low %v2631_v5, %v2635_v53 }
 0x32e   :  { %9517 = vmatpush1.bf16.msra.mxu0 %v10536_v30  ;;  %v10570_v30 = vcombine.low %v2624_v0, %v2628_v36  ;;  %v2660_v0 = vld [vmem:[#allocation2 + $0x1078] sm:$0xff] }
 0x32f   :  { %9845 = vmatpush1.bf16.msra.mxu1 %v10538_v15  ;;  %9518 = vmatprep.subr.bf16.mxu0 %v10545_v19  ;;  %v10577_v15 = vcombine.high %v2631_v5, %v2635_v53  ;;  %v10579_v19 = vcombine.high %v2632_v20, %v2636_v13  ;;  %v2667_v5 = vld [vmem:[#allocation2 + $0x10b0] sm:$0xff]  ;;  %v2664_v53 = vld [vmem:[#allocation2 + $0x1098] sm:$0xff] }
 0x330   :  { %9846 = vmatprep.subr.bf16.mxu1 %v10547_v54  ;;  %v2639_v54 = vld [vmem:[#allocation2 + $0xfd0] sm:$0xff] }
 0x331   :  { %v10584_v43 = vcombine.low %v2639_v54, %v2643_v24 }
 0x332   :  { %9519 = vmatpush1.bf16.msra.mxu0 %v10544_v16  ;;  %v10578_v16 = vcombine.low %v2632_v20, %v2636_v13  ;;  %v2668_v20 = vld [vmem:[#allocation2 + $0x10b8] sm:$0xff]  ;;  %v17553_v13 = vld [vmem:[#allocation79_spill] sm:$0xff] }
 0x333   :  { %9847 = vmatpush1.bf16.msra.mxu1 %v10546_v48  ;;  %9520 = vmatprep.subr.bf16.mxu0 %v10553_v41  ;;  %v10585_v48 = vcombine.high %v2639_v54, %v2643_v24  ;;  %v10587_v41 = vcombine.high %v2640_v29, %v2644_v49  ;;  %v2671_v54 = vld [vmem:[#allocation2 + $0x10d0] sm:$0xff] }
 0x334   :  { %9848 = vmatprep.subr.bf16.mxu1 %v10555_v38  ;;  %v2647_v38 = vld [vmem:[#allocation2 + $0x1010] sm:$0xff] }
 0x335   :  { %v10592_v36 = vcombine.low %v2647_v38, %v2651_v59  ;;  %v2675_v24 = vld [vmem:[#allocation2 + $0x10f0] sm:$0xff] }
 0x336   :  { %9521 = vmatpush1.bf16.msra.mxu0 %v10552_v42  ;;  %v10586_v42 = vcombine.low %v2640_v29, %v2644_v49  ;;  %v2672_v29 = vld [vmem:[#allocation2 + $0x10d8] sm:$0xff] }
 0x337   :  { %9849 = vmatpush1.bf16.msra.mxu1 %v10554_v32  ;;  %9522 = vmatprep.subr.bf16.mxu0 %v10561_v61  ;;  %v10593_v32 = vcombine.high %v2647_v38, %v2651_v59  ;;  %v10595_v61 = vcombine.high %v2648_v40, %v2652_v45  ;;  %v2676_v49 = vld [vmem:[#allocation2 + $0x10f8] sm:$0xff]  ;;  %v2679_v59 = vld [vmem:[#allocation2 + $0x1110] sm:$0xff] }
 0x338   :  { %9850 = vmatprep.subr.bf16.mxu1 %v10563_v56  ;;  %v2655_v56 = vld [vmem:[#allocation2 + $0x1050] sm:$0xff]  ;;  %v10619_v38 = vcombine.high %v2672_v29, %v2676_v49 }
 0x33a   :  { %9523 = vmatpush1.bf16.msra.mxu0 %v10560_v1  ;;  %v10594_v1 = vcombine.low %v2648_v40, %v2652_v45  ;;  %v2683_v40 = vld [vmem:[#allocation2 + $0x1130] sm:$0xff]  ;;  %v2680_v45 = vld [vmem:[#allocation2 + $0x1118] sm:$0xff] }
 0x33b   :  { %9851 = vmatpush1.bf16.msra.mxu1 %v10562_v9  ;;  %9524 = vmatprep.subr.bf16.mxu0 %v10569_v10  ;;  %v10601_v9 = vcombine.high %v2655_v56, %v2659_v12  ;;  %v10603_v10 = vcombine.high %v2656_v4, %v2660_v0 }
 0x33c   :  { %9852 = vmatprep.subr.bf16.mxu1 %v10571_v50  ;;  %v2663_v50 = vld [vmem:[#allocation2 + $0x1090] sm:$0xff] }
 0x33e   :  { %9525 = vmatpush1.bf16.msra.mxu0 %v10568_v55  ;;  %v10600_v55 = vcombine.low %v2655_v56, %v2659_v12  ;;  %v2687_v12 = vld [vmem:[#allocation2 + $0x1150] sm:$0xff] }
 0x33f   :  { %9853 = vmatpush1.bf16.msra.mxu1 %v10570_v30  ;;  %9526 = vmatprep.subr.bf16.mxu0 %v10577_v15  ;;  %v10602_v30 = vcombine.low %v2656_v4, %v2660_v0  ;;  %v10609_v15 = vcombine.high %v2663_v50, %v2667_v5  ;;  %v2691_v4 = vld [vmem:[#allocation2 + $0x1170] sm:$0xff]  ;;  %v2688_v0 = vld [vmem:[#allocation2 + $0x1158] sm:$0xff] }
 0x340   :  { %9854 = vmatprep.subr.bf16.mxu1 %v10579_v19  ;;  %v10611_v19 = vcombine.high %v2664_v53, %v2668_v20 }
 0x342   :  { %9527 = vmatpush1.bf16.msra.mxu0 %v10576_v18  ;;  %v17554_v18 = vld [vmem:[#allocation88_spill] sm:$0xff] }
 0x343   :  { %9855 = vmatpush1.bf16.msra.mxu1 %v10578_v16  ;;  %9528 = vmatprep.subr.bf16.mxu0 %v10585_v48  ;;  %v10608_v16 = vcombine.low %v2663_v50, %v2667_v5  ;;  %v10610_v48 = vcombine.low %v2664_v53, %v2668_v20  ;;  %v2695_v5 = vld [vmem:[#allocation2 + $0x1190] sm:$0xff]  ;;  %v2696_v20 = vld [vmem:[#allocation2 + $0x1198] sm:$0xff] }
 0x344   :  { %9856 = vmatprep.subr.bf16.mxu1 %v10587_v41  ;;  %v10617_v41 = vcombine.high %v2671_v54, %v2675_v24  ;;  %v2699_v53 = vld [vmem:[#allocation2 + $0x11b0] sm:$0xff] }
 0x346   :  { %9529 = vmatpush1.bf16.msra.mxu0 %v10584_v43  ;;  %v2684_v43 = vld [vmem:[#allocation2 + $0x1138] sm:$0xff] }
 0x347   :  { %9857 = vmatpush1.bf16.msra.mxu1 %v10586_v42  ;;  %9539 = vmatprep.subr.bf16.mxu0 %v10593_v32  ;;  %v10616_v42 = vcombine.low %v2671_v54, %v2675_v24  ;;  %v10618_v32 = vcombine.low %v2672_v29, %v2676_v49  ;;  %v10627_v56 = vcombine.high %v2680_v45, %v2684_v43  ;;  %v2703_v54 = vld [vmem:[#allocation2 + $0x11d0] sm:$0xff]  ;;  %v2704_v29 = vld [vmem:[#allocation2 + $0x11d8] sm:$0xff] }
 0x348   :  { %9867 = vmatprep.subr.bf16.mxu1 %v10595_v61  ;;  %v10625_v61 = vcombine.high %v2679_v59, %v2683_v40  ;;  %v2707_v24 = vld [vmem:[#allocation2 + $0x11f0] sm:$0xff]  ;;  %v2708_v49 = vld [vmem:[#allocation2 + $0x11f8] sm:$0xff] }
 0x349   :  { %9531 = vmatmul.mubr.bf16.vlgmr.msra.gmra.mrb[4].mxu0 %v17553_v13 }
 0x34a   :  { %9859 = vmatmul.mubr.bf16.vlgmr.msra.gmra.mrb[4].mxu1 %v17553_v13  ;;  %9540 = vmatpush1.bf16.msra.mxu0 %v10592_v36  ;;  %v2692_v36 = vld [vmem:[#allocation2 + $0x1178] sm:$0xff] }
 0x34b   :  { %9868 = vmatpush1.bf16.msra.mxu1 %v10594_v1  ;;  %9541 = vmatprep.subr.bf16.mxu0 %v10601_v9  ;;  %v10624_v1 = vcombine.low %v2679_v59, %v2683_v40  ;;  %v10626_v9 = vcombine.low %v2680_v45, %v2684_v43  ;;  %v10635_v50 = vcombine.high %v2688_v0, %v2692_v36  ;;  %v2700_v13 = vld [vmem:[#allocation2 + $0x11b8] sm:$0xff]  ;;  %v2715_v59 = vld [vmem:[#allocation2 + $0x1230] sm:$0xff] }
 0x34c   :  { %9869 = vmatprep.subr.bf16.mxu1 %v10603_v10  ;;  %9571 = vmatprep.mubr.bf16.mxu0 %v17554_v18  ;;  %v10633_v10 = vcombine.high %v2687_v12, %v2691_v4  ;;  %v2712_v40 = vld [vmem:[#allocation2 + $0x1218] sm:$0xff]  ;;  %v10648_v43 = vcombine.low %v2703_v54, %v2707_v24 }
 0x34d   :  { %9899 = vmatprep.mubr.bf16.mxu1 %v17554_v18  ;;  %v10640_v18 = vcombine.low %v2695_v5, %v2699_v53  ;;  %v2716_v45 = vld [vmem:[#allocation2 + $0x1238] sm:$0xff] }
 0x34e   :  { %9542 = vmatpush1.bf16.msra.mxu0 %v10600_v55  ;;  %v10632_v55 = vcombine.low %v2687_v12, %v2691_v4  ;;  %v2723_v12 = vld [vmem:[#allocation2 + $0x1270] sm:$0xff]  ;;  %v2720_v4 = vld [vmem:[#allocation2 + $0x1258] sm:$0xff] }
 0x34f   :  { %9870 = vmatpush1.bf16.msra.mxu1 %v10602_v30  ;;  %9543 = vmatprep.subr.bf16.mxu0 %v10609_v15  ;;  %v10634_v30 = vcombine.low %v2688_v0, %v2692_v36  ;;  %v10641_v15 = vcombine.high %v2695_v5, %v2699_v53  ;;  %v2724_v0 = vld [vmem:[#allocation2 + $0x1278] sm:$0xff]  ;;  %v2731_v5 = vld [vmem:[#allocation2 + $0x12b0] sm:$0xff] }
 0x350   :  { %9871 = vmatprep.subr.bf16.mxu1 %v10611_v19  ;;  %v10643_v19 = vcombine.high %v2696_v20, %v2700_v13  ;;  %v2728_v53 = vld [vmem:[#allocation2 + $0x1298] sm:$0xff] }
 0x352   :  { %9544 = vmatpush1.bf16.msra.mxu0 %v10608_v16  ;;  %v10642_v16 = vcombine.low %v2696_v20, %v2700_v13  ;;  %v2732_v20 = vld [vmem:[#allocation2 + $0x12b8] sm:$0xff] }
 0x353   :  { %9872 = vmatpush1.bf16.msra.mxu1 %v10610_v48  ;;  %9545 = vmatprep.subr.bf16.mxu0 %v10617_v41  ;;  %v10649_v48 = vcombine.high %v2703_v54, %v2707_v24  ;;  %v10651_v41 = vcombine.high %v2704_v29, %v2708_v49  ;;  %v2739_v54 = vld [vmem:[#allocation2 + $0x12f0] sm:$0xff]  ;;  %v2736_v24 = vld [vmem:[#allocation2 + $0x12d8] sm:$0xff] }
 0x354   :  { %9873 = vmatprep.subr.bf16.mxu1 %v10619_v38  ;;  %v2711_v38 = vld [vmem:[#allocation2 + $0x1210] sm:$0xff] }
 0x355   :  { %v10656_v36 = vcombine.low %v2711_v38, %v2715_v59 }
 0x356   :  { %9546 = vmatpush1.bf16.msra.mxu0 %v10616_v42  ;;  %v10650_v42 = vcombine.low %v2704_v29, %v2708_v49  ;;  %v2740_v29 = vld [vmem:[#allocation2 + $0x12f8] sm:$0xff] }
 0x357   :  { %9874 = vmatpush1.bf16.msra.mxu1 %v10618_v32  ;;  %9547 = vmatprep.subr.bf16.mxu0 %v10625_v61  ;;  %v10657_v32 = vcombine.high %v2711_v38, %v2715_v59  ;;  %v10659_v61 = vcombine.high %v2712_v40, %v2716_v45  ;;  %v2747_v38 = vld [vmem:[#allocation2 + $0x1330] sm:$0xff]  ;;  %v2744_v59 = vld [vmem:[#allocation2 + $0x1318] sm:$0xff] }
 0x358   :  { %9875 = vmatprep.subr.bf16.mxu1 %v10627_v56  ;;  %v2719_v56 = vld [vmem:[#allocation2 + $0x1250] sm:$0xff] }
 0x359   :  { %v10664_v13 = vcombine.low %v2719_v56, %v2723_v12 }
 0x35a   :  { %9548 = vmatpush1.bf16.msra.mxu0 %v10624_v1  ;;  %v10658_v1 = vcombine.low %v2712_v40, %v2716_v45  ;;  %v2748_v40 = vld [vmem:[#allocation2 + $0x1338] sm:$0xff] }
 0x35b   :  { %9876 = vmatpush1.bf16.msra.mxu1 %v10626_v9  ;;  %9549 = vmatprep.subr.bf16.mxu0 %v10633_v10  ;;  %v10665_v9 = vcombine.high %v2719_v56, %v2723_v12  ;;  %v10667_v10 = vcombine.high %v2720_v4, %v2724_v0  ;;  %v2755_v56 = vld [vmem:[#allocation2 + $0x1370] sm:$0xff]  ;;  %v2752_v12 = vld [vmem:[#allocation2 + $0x1358] sm:$0xff] }
 0x35c   :  { %9877 = vmatprep.subr.bf16.mxu1 %v10635_v50  ;;  %v2727_v50 = vld [vmem:[#allocation2 + $0x1290] sm:$0xff] }
 0x35d   :  { %v10672_v49 = vcombine.low %v2727_v50, %v2731_v5 }
 0x35e   :  { %9550 = vmatpush1.bf16.msra.mxu0 %v10632_v55  ;;  %v10666_v55 = vcombine.low %v2720_v4, %v2724_v0  ;;  %v2756_v4 = vld [vmem:[#allocation2 + $0x1378] sm:$0xff] }
 0x35f   :  { %9878 = vmatpush1.bf16.msra.mxu1 %v10634_v30  ;;  %9551 = vmatprep.subr.bf16.mxu0 %v10641_v15  ;;  %v10673_v30 = vcombine.high %v2727_v50, %v2731_v5  ;;  %v10675_v15 = vcombine.high %v2728_v53, %v2732_v20  ;;  %v2763_v50 = vld [vmem:[#allocation2 + $0x13b0] sm:$0xff]  ;;  %v2760_v5 = vld [vmem:[#allocation2 + $0x1398] sm:$0xff] }
 0x360   :  { %9879 = vmatprep.subr.bf16.mxu1 %v10643_v19  ;;  %v2735_v19 = vld [vmem:[#allocation2 + $0x12d0] sm:$0xff] }
 0x361   :  { %v10680_v45 = vcombine.low %v2735_v19, %v2739_v54 }
 0x362   :  { %9552 = vmatpush1.bf16.msra.mxu0 %v10640_v18  ;;  %v10674_v18 = vcombine.low %v2728_v53, %v2732_v20  ;;  %v2764_v53 = vld [vmem:[#allocation2 + $0x13b8] sm:$0xff] }
 0x363   :  { %9880 = vmatpush1.bf16.msra.mxu1 %v10642_v16  ;;  %9553 = vmatprep.subr.bf16.mxu0 %v10649_v48  ;;  %v10681_v16 = vcombine.high %v2735_v19, %v2739_v54  ;;  %v10683_v48 = vcombine.high %v2736_v24, %v2740_v29  ;;  %v2771_v19 = vld [vmem:[#allocation2 + $0x13f0] sm:$0xff]  ;;  %v2768_v54 = vld [vmem:[#allocation2 + $0x13d8] sm:$0xff] }
 0x364   :  { %9881 = vmatprep.subr.bf16.mxu1 %v10651_v41  ;;  %v2743_v41 = vld [vmem:[#allocation2 + $0x1310] sm:$0xff] }
 0x365   :  { %v10688_v0 = vcombine.low %v2743_v41, %v2747_v38 }
 0x366   :  { %9554 = vmatpush1.bf16.msra.mxu0 %v10648_v43  ;;  %v10682_v43 = vcombine.low %v2736_v24, %v2740_v29  ;;  %v2772_v24 = vld [vmem:[#allocation2 + $0x13f8] sm:$0xff] }
 0x367   :  { %9882 = vmatpush1.bf16.msra.mxu1 %v10650_v42  ;;  %9555 = vmatprep.subr.bf16.mxu0 %v10657_v32  ;;  %v10689_v42 = vcombine.high %v2743_v41, %v2747_v38  ;;  %v10691_v32 = vcombine.high %v2744_v59, %v2748_v40  ;;  %v2779_v41 = vld [vmem:[#allocation2 + $0x1430] sm:$0xff]  ;;  %v2776_v38 = vld [vmem:[#allocation2 + $0x1418] sm:$0xff] }
 0x368   :  { %9883 = vmatprep.subr.bf16.mxu1 %v10659_v61  ;;  %v2751_v61 = vld [vmem:[#allocation2 + $0x1350] sm:$0xff] }
 0x369   :  { %v10696_v20 = vcombine.low %v2751_v61, %v2755_v56 }
 0x36a   :  { %9556 = vmatpush1.bf16.msra.mxu0 %v10656_v36  ;;  %v10690_v36 = vcombine.low %v2744_v59, %v2748_v40  ;;  %v2780_v59 = vld [vmem:[#allocation2 + $0x1438] sm:$0xff] }
 0x36b   :  { %9884 = vmatpush1.bf16.msra.mxu1 %v10658_v1  ;;  %9557 = vmatprep.subr.bf16.mxu0 %v10665_v9  ;;  %v10697_v1 = vcombine.high %v2751_v61, %v2755_v56  ;;  %v10699_v9 = vcombine.high %v2752_v12, %v2756_v4  ;;  %v2787_v61 = vld [vmem:[#allocation2 + $0x1470] sm:$0xff]  ;;  %v2784_v56 = vld [vmem:[#allocation2 + $0x1458] sm:$0xff] }
 0x36c   :  { %9885 = vmatprep.subr.bf16.mxu1 %v10667_v10  ;;  %v2759_v10 = vld [vmem:[#allocation2 + $0x1390] sm:$0xff] }
 0x36d   :  { %v10704_v29 = vcombine.low %v2759_v10, %v2763_v50 }
 0x36e   :  { %9558 = vmatpush1.bf16.msra.mxu0 %v10664_v13  ;;  %v10698_v13 = vcombine.low %v2752_v12, %v2756_v4  ;;  %v2788_v12 = vld [vmem:[#allocation2 + $0x1478] sm:$0xff] }
 0x36f   :  { %9886 = vmatpush1.bf16.msra.mxu1 %v10666_v55  ;;  %9559 = vmatprep.subr.bf16.mxu0 %v10673_v30  ;;  %v10705_v55 = vcombine.high %v2759_v10, %v2763_v50  ;;  %v10707_v30 = vcombine.high %v2760_v5, %v2764_v53  ;;  %v2795_v10 = vld [vmem:[#allocation2 + $0x14b0] sm:$0xff]  ;;  %v2792_v50 = vld [vmem:[#allocation2 + $0x1498] sm:$0xff] }
 0x370   :  { %9887 = vmatprep.subr.bf16.mxu1 %v10675_v15  ;;  %v2767_v15 = vld [vmem:[#allocation2 + $0x13d0] sm:$0xff] }
 0x371   :  { %v10712_v40 = vcombine.low %v2767_v15, %v2771_v19 }
 0x372   :  { %9560 = vmatpush1.bf16.msra.mxu0 %v10672_v49  ;;  %v10706_v49 = vcombine.low %v2760_v5, %v2764_v53  ;;  %v2796_v5 = vld [vmem:[#allocation2 + $0x14b8] sm:$0xff] }
 0x373   :  { %9888 = vmatpush1.bf16.msra.mxu1 %v10674_v18  ;;  %9561 = vmatprep.subr.bf16.mxu0 %v10681_v16  ;;  %v10713_v18 = vcombine.high %v2767_v15, %v2771_v19  ;;  %v10715_v16 = vcombine.high %v2768_v54, %v2772_v24  ;;  %v2803_v15 = vld [vmem:[#allocation2 + $0x14f0] sm:$0xff]  ;;  %v2800_v19 = vld [vmem:[#allocation2 + $0x14d8] sm:$0xff] }
 0x374   :  { %9889 = vmatprep.subr.bf16.mxu1 %v10683_v48  ;;  %v2775_v48 = vld [vmem:[#allocation2 + $0x1410] sm:$0xff] }
 0x375   :  { %v10720_v4 = vcombine.low %v2775_v48, %v2779_v41 }
 0x376   :  { %9562 = vmatpush1.bf16.msra.mxu0 %v10680_v45  ;;  %v10714_v45 = vcombine.low %v2768_v54, %v2772_v24  ;;  %v2804_v54 = vld [vmem:[#allocation2 + $0x14f8] sm:$0xff] }
 0x377   :  { %9890 = vmatpush1.bf16.msra.mxu1 %v10682_v43  ;;  %9563 = vmatprep.subr.bf16.mxu0 %v10689_v42  ;;  %v10721_v43 = vcombine.high %v2775_v48, %v2779_v41  ;;  %v10723_v42 = vcombine.high %v2776_v38, %v2780_v59  ;;  %v2808_v48 = vld [vmem:[#allocation2 + $0x1518] sm:$0xff] }
 0x378   :  { %9891 = vmatprep.subr.bf16.mxu1 %v10691_v32  ;;  %v2783_v32 = vld [vmem:[#allocation2 + $0x1450] sm:$0xff]  ;;  %v2812_v41 = vld [vmem:[#allocation2 + $0x1538] sm:$0xff] }
 0x379   :  { %v10728_v53 = vcombine.low %v2783_v32, %v2787_v61 }
 0x37a   :  { %9564 = vmatpush1.bf16.msra.mxu0 %v10688_v0  ;;  %v10722_v0 = vcombine.low %v2776_v38, %v2780_v59  ;;  %v10746_v59 = vcombine.low %v2800_v19, %v2804_v54 }
 0x37b   :  { %9892 = vmatpush1.bf16.msra.mxu1 %v10690_v36  ;;  %9565 = vmatprep.subr.bf16.mxu0 %v10697_v1  ;;  %v10729_v36 = vcombine.high %v2783_v32, %v2787_v61  ;;  %v10731_v1 = vcombine.high %v2784_v56, %v2788_v12  ;;  %v2820_v32 = vld [vmem:[#allocation2 + $0x1578] sm:$0xff]  ;;  %v17555_v61 = vld [vmem:[#allocation8_spill] sm:$0xff] }
 0x37c   :  { %9893 = vmatprep.subr.bf16.mxu1 %v10699_v9  ;;  %v2791_v9 = vld [vmem:[#allocation2 + $0x1490] sm:$0xff] }
 0x37d   :  { %v10736_v24 = vcombine.low %v2791_v9, %v2795_v10 }
 0x37e   :  { %9566 = vmatpush1.bf16.msra.mxu0 %v10696_v20  ;;  %v10730_v20 = vcombine.low %v2784_v56, %v2788_v12  ;;  %v1068_v56 = vmul.f32 %v17555_v61, %v17555_v61  ;;  %v17556_v12 = vld [vmem:[#allocation9_spill] sm:$0xff] }
 0x37f   :  { %9894 = vmatpush1.bf16.msra.mxu1 %v10698_v13  ;;  %9567 = vmatprep.subr.bf16.mxu0 %v10705_v55  ;;  %v10737_v13 = vcombine.high %v2791_v9, %v2795_v10  ;;  %v10739_v55 = vcombine.high %v2792_v50, %v2796_v5  ;;  %v2823_v10 = vld [vmem:[#allocation2 + $0x1590] sm:$0xff] }
 0x380   :  { %9895 = vmatprep.subr.bf16.mxu1 %v10707_v30  ;;  %v2799_v30 = vld [vmem:[#allocation2 + $0x14d0] sm:$0xff] }
 0x381   :  { %v10744_v38 = vcombine.low %v2799_v30, %v2803_v15 }
 0x382   :  { %9568 = vmatpush1.bf16.msra.mxu0 %v10704_v29  ;;  %v10745_v29 = vcombine.high %v2799_v30, %v2803_v15  ;;  %v17558_v30 = vld [vmem:[#allocation17_spill] sm:$0xff] }
 0x383   :  { %9896 = vmatpush1.bf16.msra.mxu1 %v10706_v49  ;;  %9569 = vmatprep.subr.bf16.mxu0 %v10713_v18  ;;  %v10747_v49 = vcombine.high %v2800_v19, %v2804_v54  ;;  %v2807_v18 = vld [vmem:[#allocation2 + $0x1510] sm:$0xff]  ;;  %v1067_v15 = vmul.f32 %v17558_v30, %v17558_v30  ;;  %v17559_v19 = vld [vmem:[#allocation18_spill] sm:$0xff] }
 0x384   :  { %9897 = vmatprep.subr.bf16.mxu1 %v10715_v16  ;;  %v2811_v16 = vld [vmem:[#allocation2 + $0x1530] sm:$0xff]  ;;  %v1083_v54 = vmul.f32 %v17559_v19, %v17559_v19 }
 0x385   :  { %v14996_v19 = vld [vmem:[#allocation2 + $0x17d0] sm:$0xff] }
 0x386   :  { %9570 = vmatpush1.bf16.msra.mxu0 %v10712_v40  ;;  %v10753_v40 = vcombine.high %v2807_v18, %v2811_v16  ;;  %v17617_v30 = vld [vmem:[#allocation57_spill] sm:$0xff] }
 0x387   :  { %9898 = vmatpush1.bf16.msra.mxu1 %v10714_v45  ;;  %9580 = vmatprep.subr.bf16.mxu0 %v10721_v43  ;;  %v2815_v45 = vld [vmem:[#allocation2 + $0x1550] sm:$0xff]  ;;  %v15038_v46 = vmul.f32 %v17617_v30, %v17617_v30 }
 0x388   :  { %9908 = vmatprep.subr.bf16.mxu1 %v10723_v42  ;;  %v2819_v43 = vld [vmem:[#allocation2 + $0x1570] sm:$0xff]  ;;  %v2816_v42 = vld [vmem:[#allocation2 + $0x1558] sm:$0xff] }
 0x389   :  { %9572 = vmatmul.mubr.bf16.vlgmr.msra.gmra.mrb[4].mxu0 %v13816_v57  ;;  %v10763_v9 = vcombine.high %v2816_v42, %v2820_v32  ;;  %17618 = vst [vmem:[#allocation161_spill] sm:$0xff] %v15038_v46 }
 0x38a   :  { %9900 = vmatmul.mubr.bf16.vlgmr.msra.gmra.mrb[4].mxu1 %v13816_v57  ;;  %9581 = vmatpush1.bf16.msra.mxu0 %v10720_v4  ;;  %v10738_v57 = vcombine.low %v2792_v50, %v2796_v5  ;;  %v1084_v4 = vmul.f32 %v17556_v12, %v17556_v12  ;;  %v2827_v50 = vld [vmem:[#allocation2 + $0x15b0] sm:$0xff]  ;;  %v2824_v5 = vld [vmem:[#allocation2 + $0x1598] sm:$0xff] }
 0x38b   :  { %9909 = vmatpush1.bf16.msra.mxu1 %v10722_v0  ;;  %9582 = vmatprep.subr.bf16.mxu0 %v10729_v36  ;;  %v10752_v0 = vcombine.low %v2807_v18, %v2811_v16  ;;  %v10754_v36 = vcombine.low %v2808_v48, %v2812_v41  ;;  %v2831_v18 = vld [vmem:[#allocation2 + $0x15d0] sm:$0xff] }
 0x38c   :  { %9910 = vmatprep.subr.bf16.mxu1 %v10731_v1  ;;  %9612 = vmatprep.mubr.bf16.mxu0 %v14015_v39  ;;  %v10761_v1 = vcombine.high %v2815_v45, %v2819_v43  ;;  %v2835_v16 = vld [vmem:[#allocation2 + $0x15f0] sm:$0xff] }
 0x38d   :  { %9940 = vmatprep.mubr.bf16.mxu1 %v14015_v39  ;;  %v10755_v39 = vcombine.high %v2808_v48, %v2812_v41  ;;  %v2832_v48 = vld [vmem:[#allocation2 + $0x15d8] sm:$0xff] }
 0x38e   :  { %9583 = vmatpush1.bf16.msra.mxu0 %v10728_v53  ;;  %v2828_v53 = vld [vmem:[#allocation2 + $0x15b8] sm:$0xff] }
 0x38f   :  { %9911 = vmatpush1.bf16.msra.mxu1 %v10730_v20  ;;  %9584 = vmatprep.subr.bf16.mxu0 %v10737_v13  ;;  %v17557_v20 = vld [vmem:[#allocation10_spill] sm:$0xff] }
 0x390   :  { %9912 = vmatprep.subr.bf16.mxu1 %v10739_v55  ;;  %v1100_v13 = vmul.f32 %v17557_v20, %v17557_v20  ;;  %v1337_v55 = vsel %vm1323_vm0, %v1084_v4, %v1068_v56  ;;  %v2836_v41 = vld [vmem:[#allocation2 + $0x15f8] sm:$0xff]  ;;  %v1324_v4 = vsel %vm1323_vm0, %v1083_v54, %v1067_v15  ;;  %v1115_v15 = vmul.f32 %v17563_v33, %v17563_v33  ;;  %v2855_v20 = vld [vmem:[#allocation2 + $0x1690] sm:$0xff] }
 0x392   :  { %9585 = vmatpush1.bf16.msra.mxu0 %v10736_v24  ;;  %v10760_v24 = vcombine.low %v2815_v45, %v2819_v43  ;;  %v10768_v45 = vcombine.low %v2823_v10, %v2827_v50  ;;  %v10770_v43 = vcombine.low %v2824_v5, %v2828_v53 }
 0x393   :  { %9913 = vmatpush1.bf16.msra.mxu1 %v10738_v57  ;;  %9586 = vmatprep.subr.bf16.mxu0 %v10745_v29  ;;  %v10762_v57 = vcombine.low %v2816_v42, %v2820_v32  ;;  %v10769_v29 = vcombine.high %v2823_v10, %v2827_v50  ;;  %v10777_v42 = vcombine.high %v2831_v18, %v2835_v16  ;;  %v17564_v10 = vld [vmem:[#allocation35_spill] sm:$0xff] }
 0x394   :  { %9914 = vmatprep.subr.bf16.mxu1 %v10747_v49  ;;  %v10771_v49 = vcombine.high %v2824_v5, %v2828_v53  ;;  %v10779_v32 = vcombine.high %v2832_v48, %v2836_v41  ;;  %v1069_v50 = vmul.f32 %v17564_v10, %v17564_v10  ;;  %v10776_v5 = vcombine.low %v2831_v18, %v2835_v16  ;;  %v17568_v16 = vld [vmem:[#allocation22_spill] sm:$0xff] }
 0x395   :  { %v10778_v53 = vcombine.low %v2832_v48, %v2836_v41  ;;  %v1147_v48 = vmul.f32 %v17568_v16, %v17568_v16  ;;  %v2856_v16 = vld [vmem:[#allocation2 + $0x1698] sm:$0xff] }
 0x396   :  { %9587 = vmatpush1.bf16.msra.mxu0 %v10744_v38  ;;  %v17560_v38 = vld [vmem:[#allocation11_spill] sm:$0xff] }
 0x397   :  { %9915 = vmatpush1.bf16.msra.mxu1 %v10746_v59  ;;  %9588 = vmatprep.subr.bf16.mxu0 %v10753_v40  ;;  %v1116_v59 = vmul.f32 %v17560_v38, %v17560_v38  ;;  %v1338_v40 = vsel %vm1325_vm1, %v1100_v13, %v1337_v55  ;;  %v1132_v13 = vmul.f32 %v17562_v60, %v17562_v60  ;;  %v17567_v60 = vld [vmem:[#allocation13_spill] sm:$0xff] }
 0x398   :  { %9916 = vmatprep.subr.bf16.mxu1 %v10755_v39  ;;  %v17561_v39 = vld [vmem:[#allocation19_spill] sm:$0xff] }
 0x399   :  { %v1099_v56 = vmul.f32 %v17561_v39, %v17561_v39  ;;  %v1339_v55 = vsel %vm1327_vm2, %v1116_v59, %v1338_v40  ;;  %v2847_v59 = vld [vmem:[#allocation2 + $0x1650] sm:$0xff]  ;;  %v2860_v39 = vld [vmem:[#allocation2 + $0x16b8] sm:$0xff] }
 0x39a   :  { %9589 = vmatpush1.bf16.msra.mxu0 %v10752_v0  ;;  %v2839_v0 = vld [vmem:[#allocation2 + $0x1610] sm:$0xff]  ;;  %v1340_v18 = vsel %vm1329_vm3, %v1132_v13, %v1339_v55  ;;  %v10793_v33 = vcombine.high %v2847_v59, %v2851_v44 }
 0x39b   :  { %9917 = vmatpush1.bf16.msra.mxu1 %v10754_v36  ;;  %9590 = vmatprep.subr.bf16.mxu0 %v10761_v1  ;;  %v2843_v36 = vld [vmem:[#allocation2 + $0x1630] sm:$0xff]  ;;  %v2840_v1 = vld [vmem:[#allocation2 + $0x1618] sm:$0xff]  ;;  %v1326_v54 = vsel %vm1325_vm1, %v1099_v56, %v1324_v4 }
 0x39c   :  { %9918 = vmatprep.subr.bf16.mxu1 %v10763_v9  ;;  %v2844_v9 = vld [vmem:[#allocation2 + $0x1638] sm:$0xff]  ;;  %v17566_v40 = vld [vmem:[#allocation21_spill] sm:$0xff]  ;;  %v1328_v41 = vsel %vm1327_vm2, %v1115_v15, %v1326_v54 }
 0x39d   :  { %v1131_v27 = vmul.f32 %v17566_v40, %v17566_v40  ;;  %v2848_v56 = vld [vmem:[#allocation2 + $0x1658] sm:$0xff]  ;;  %v10786_v40 = vcombine.low %v2840_v1, %v2844_v9  ;;  %v2859_v55 = vld [vmem:[#allocation2 + $0x16b0] sm:$0xff] }
 0x39e   :  { %9591 = vmatpush1.bf16.msra.mxu0 %v10760_v24  ;;  %v17565_v24 = vld [vmem:[#allocation36_spill] sm:$0xff]  ;;  %v2852_v4 = vld [vmem:[#allocation2 + $0x1678] sm:$0xff] }
 0x39f   :  { %9919 = vmatpush1.bf16.msra.mxu1 %v10762_v57  ;;  %9592 = vmatprep.subr.bf16.mxu0 %v10769_v29  ;;  %v1085_v57 = vmul.f32 %v17565_v24, %v17565_v24  ;;  %v10785_v29 = vcombine.high %v2839_v0, %v2843_v36  ;;  %v1330_v13 = vsel %vm1329_vm3, %v1131_v27, %v1328_v41  ;;  %v17570_v15 = vld [vmem:[#allocation14_spill] sm:$0xff]  ;;  %v2863_v41 = vld [vmem:[#allocation2 + $0x16d0] sm:$0xff]  ;;  %v17601_v24 = vld [vmem:[#allocation47_spill] sm:$0xff] }
 0x3a0   :  { %9920 = vmatprep.subr.bf16.mxu1 %v10771_v49  ;;  %v10787_v49 = vcombine.high %v2840_v1, %v2844_v9  ;;  %v1164_v54 = vmul.f32 %v17570_v15, %v17570_v15  ;;  %v10794_v27 = vcombine.low %v2848_v56, %v2852_v4  ;;  %v2867_v15 = vld [vmem:[#allocation2 + $0x16f0] sm:$0xff] }
 0x3a1   :  { %v1344_v38 = vsel %vm1323_vm0, %v1085_v57, %v1069_v50  ;;  %v10792_v50 = vcombine.low %v2847_v59, %v2851_v44  ;;  %v1332_v57 = vsel %vm1331_vm4, %v1147_v48, %v1330_v13  ;;  %v17575_v44 = vld [vmem:[#allocation24_spill] sm:$0xff] }
 0x3a2   :  { %9593 = vmatpush1.bf16.msra.mxu0 %v10768_v45  ;;  %v1148_v45 = vmul.f32 %v17567_v60, %v17567_v60  ;;  %v10795_v60 = vcombine.high %v2848_v56, %v2852_v4  ;;  %v1179_v59 = vmul.f32 %v17575_v44, %v17575_v44  ;;  %v10800_v56 = vcombine.low %v2855_v20, %v2859_v55  ;;  %v17576_v48 = vld [vmem:[#allocation40_spill] sm:$0xff]  ;;  %v2872_v44 = vld [vmem:[#allocation2 + $0x1718] sm:$0xff] }
 0x3a3   :  { %9921 = vmatpush1.bf16.msra.mxu1 %v10770_v43  ;;  %9594 = vmatprep.subr.bf16.mxu0 %v10777_v42  ;;  %v17569_v43 = vld [vmem:[#allocation37_spill] sm:$0xff]  ;;  %v10802_v4 = vcombine.low %v2856_v16, %v2860_v39 }
 0x3a4   :  { %9922 = vmatprep.subr.bf16.mxu1 %v10779_v32  ;;  %v1101_v42 = vmul.f32 %v17569_v43, %v17569_v43  ;;  %v10784_v32 = vcombine.low %v2839_v0, %v2843_v36  ;;  %v17572_v36 = vld [vmem:[#allocation38_spill] sm:$0xff] }
 0x3a5   :  { %v1117_v1 = vmul.f32 %v17572_v36, %v17572_v36  ;;  %v2868_v43 = vld [vmem:[#allocation2 + $0x16f8] sm:$0xff]  ;;  %v17574_v36 = vld [vmem:[#allocation15_spill] sm:$0xff] }
 0x3a6   :  { %9595 = vmatpush1.bf16.msra.mxu0 %v10776_v5  ;;  %v1341_v5 = vsel %vm1331_vm4, %v1148_v45, %v1340_v18  ;;  %v1345_v9 = vsel %vm1325_vm1, %v1101_v42, %v1344_v38  ;;  %v17573_v45 = vld [vmem:[#allocation39_spill] sm:$0xff]  ;;  %v1180_v38 = vmul.f32 %v17574_v36, %v17574_v36  ;;  %v1149_v42 = vmul.f32 %v17576_v48, %v17576_v48  ;;  %v2871_v36 = vld [vmem:[#allocation2 + $0x1710] sm:$0xff]  ;;  %v17595_v48 = vld [vmem:[#allocation44_spill] sm:$0xff] }
 0x3a7   :  { %9923 = vmatpush1.bf16.msra.mxu1 %v10778_v53  ;;  %9596 = vmatprep.subr.bf16.mxu0 %v10785_v29  ;;  %v17571_v53 = vld [vmem:[#allocation23_spill] sm:$0xff]  ;;  %v10801_v29 = vcombine.high %v2855_v20, %v2859_v55  ;;  %v1133_v18 = vmul.f32 %v17573_v45, %v17573_v45  ;;  %v2876_v45 = vld [vmem:[#allocation2 + $0x1738] sm:$0xff] }
 0x3a8   :  { %9924 = vmatprep.subr.bf16.mxu1 %v10787_v49  ;;  %v1163_v0 = vmul.f32 %v17571_v53, %v17571_v53  ;;  %v10803_v49 = vcombine.high %v2856_v16, %v2860_v39  ;;  %v2864_v53 = vld [vmem:[#allocation2 + $0x16d8] sm:$0xff]  ;;  %v10808_v39 = vcombine.low %v2863_v41, %v2867_v15 }
 0x3a9   :  { %v10811_v13 = vcombine.high %v2864_v53, %v2868_v43  ;;  %v10810_v16 = vcombine.low %v2864_v53, %v2868_v43  ;;  %v17581_v43 = vld [vmem:[#allocation42_spill] sm:$0xff] }
 0x3aa   :  { %9597 = vmatpush1.bf16.msra.mxu0 %v10784_v32  ;;  %v10809_v32 = vcombine.high %v2863_v41, %v2867_v15  ;;  %v1181_v53 = vmul.f32 %v17581_v43, %v17581_v43  ;;  %v17586_v43 = vld [vmem:[#allocation30_spill] sm:$0xff] }
 0x3ab   :  { %9925 = vmatpush1.bf16.msra.mxu1 %v10786_v40  ;;  %9598 = vmatprep.subr.bf16.mxu0 %v10793_v33  ;;  %v1342_v40 = vsel %vm1333_vm5, %v1164_v54, %v1341_v5  ;;  %v1346_v33 = vsel %vm1327_vm2, %v1117_v1, %v1345_v9  ;;  %v2875_v5 = vld [vmem:[#allocation2 + $0x1730] sm:$0xff] }
 0x3ac   :  { %9926 = vmatprep.subr.bf16.mxu1 %v10795_v60  ;;  %v1334_v60 = vsel %vm1333_vm5, %v1163_v0, %v1332_v57  ;;  %v1347_v54 = vsel %vm1329_vm3, %v1133_v18, %v1346_v33  ;;  %v1343_v1 = vsel %vm1335_vm6, %v1180_v38, %v1342_v40  ;;  %v17577_v9 = vld [vmem:[#allocation41_spill] sm:$0xff]  ;;  %v2884_v18 = vld [vmem:[#allocation2 + $0x1778] sm:$0xff]  ;;  %v17580_v33 = vld [vmem:[#allocation27_spill] sm:$0xff] }
 0x3ad   :  { %v1336_v0 = vsel %vm1335_vm6, %v1179_v59, %v1334_v60  ;;  %v1165_v20 = vmul.f32 %v17577_v9, %v17577_v9  ;;  %v1348_v55 = vsel %vm1331_vm4, %v1149_v42, %v1347_v54  ;;  %v2879_v57 = vld [vmem:[#allocation2 + $0x1750] sm:$0xff]  ;;  %v17579_v40 = vld [vmem:[#allocation26_spill] sm:$0xff]  ;;  %v14945_v15 = vmul.f32 %v17580_v33, %v17580_v33 }
 0x3ae   :  { %9599 = vmatpush1.bf16.msra.mxu0 %v10792_v50  ;;  %v10817_v50 = vcombine.high %v2871_v36, %v2875_v5  ;;  %v14937_v38 = vadd.f32 %v1343_v1, %v1336_v0  ;;  %v14941_v59 = vmul.f32 %v17579_v40, %v17579_v40  ;;  %v10816_v60 = vcombine.low %v2871_v36, %v2875_v5  ;;  %v14954_v54 = vld [vmem:[#allocation2 + $0x1790] sm:$0xff]  ;;  %v17588_v36 = vld [vmem:[#allocation31_spill] sm:$0xff] }
 0x3af   :  { %9927 = vmatpush1.bf16.msra.mxu1 %v10794_v27  ;;  %9600 = vmatprep.subr.bf16.mxu0 %v10801_v29  ;;  %v10819_v27 = vcombine.high %v2872_v44, %v2876_v45  ;;  %v2883_v29 = vld [vmem:[#allocation2 + $0x1770] sm:$0xff]  ;;  %v1349_v41 = vsel %vm1333_vm5, %v1165_v20, %v1348_v55  ;;  %v14962_v20 = vmul.f32 %v17586_v43, %v17586_v43  ;;  %v2892_v55 = vld [vmem:[#allocation2 + $0x17b8] sm:$0xff] }
 0x3b0   :  { %9928 = vmatprep.subr.bf16.mxu1 %v10803_v49  ;;  %v2880_v49 = vld [vmem:[#allocation2 + $0x1758] sm:$0xff]  ;;  %17578 = vst [vmem:[#allocation52_spill] sm:$0xff] %v14937_v38  ;;  %v17584_v1 = vld [vmem:[#allocation29_spill] sm:$0xff]  ;;  %v14977_v9 = vsel %vm1335_vm6, %v1181_v53, %v1349_v41  ;;  %v14981_v43 = vmul.f32 %v17595_v48, %v17595_v48  ;;  %v10824_v33 = vcombine.low %v2879_v57, %v2883_v29 }
 0x3b1   :  { %v14958_v0 = vmul.f32 %v17584_v1, %v17584_v1  ;;  %17587 = vst [vmem:[#allocation79_spill] sm:$0xff] %v14962_v20  ;;  %17594 = vst [vmem:[#allocation150_spill] sm:$0xff] %v14977_v9  ;;  %v14993_v53 = vmul.f32 %v17601_v24, %v17601_v24  ;;  %v15079_v38 = vld [vmem:[#allocation2 + $0x1878] sm:$0xff]  ;;  %v15081_v9 = vld [vmem:[#allocation2 + $0x1890] sm:$0xff] }
 0x3b2   :  { %9601 = vmatpush1.bf16.msra.mxu0 %v10800_v56  ;;  %v10818_v56 = vcombine.low %v2872_v44, %v2876_v45  ;;  %v14966_v45 = vmul.f32 %v17588_v36, %v17588_v36  ;;  %v17590_v44 = vld [vmem:[#allocation32_spill] sm:$0xff]  ;;  %17596 = vst [vmem:[#allocation151_spill] sm:$0xff] %v14981_v43  ;;  %v17597_v36 = vld [vmem:[#allocation45_spill] sm:$0xff]  ;;  %v15149_v20 = vld [vmem:[#allocation2 + $0x1958] sm:$0xff] }
 0x3b3   :  { %9929 = vmatpush1.bf16.msra.mxu1 %v10802_v4  ;;  %9602 = vmatprep.subr.bf16.mxu0 %v10809_v32  ;;  %v17582_v4 = vld [vmem:[#allocation28_spill] sm:$0xff]  ;;  %v10825_v32 = vcombine.high %v2879_v57, %v2883_v29  ;;  %17585 = vst [vmem:[#allocation70_spill] sm:$0xff] %v14958_v0  ;;  %v14970_v5 = vmul.f32 %v17590_v44, %v17590_v44  ;;  %v17599_v44 = vld [vmem:[#allocation46_spill] sm:$0xff]  ;;  %17602 = vst [vmem:[#allocation154_spill] sm:$0xff] %v14993_v53 }
 0x3b4   :  { %9930 = vmatprep.subr.bf16.mxu1 %v10811_v13  ;;  %v14952_v42 = vmul.f32 %v17582_v4, %v17582_v4  ;;  %v10827_v13 = vcombine.high %v2880_v49, %v2884_v18  ;;  %17589 = vst [vmem:[#allocation88_spill] sm:$0xff] %v14966_v45  ;;  %v14985_v1 = vmul.f32 %v17597_v36, %v17597_v36  ;;  %v17603_v36 = vld [vmem:[#allocation48_spill] sm:$0xff]  ;;  %v17607_v57 = vld [vmem:[#allocation50_spill] sm:$0xff]  ;;  %v15105_v45 = vld [vmem:[#allocation2 + $0x18d0] sm:$0xff] }
 0x3b5   :  { %17591 = vst [vmem:[#allocation148_spill] sm:$0xff] %v14970_v5  ;;  %v14989_v4 = vmul.f32 %v17599_v44, %v17599_v44  ;;  %v15000_v48 = vmul.f32 %v17603_v36, %v17603_v36  ;;  %v17605_v44 = vld [vmem:[#allocation49_spill] sm:$0xff]  ;;  %v15008_v29 = vmul.f32 %v17607_v57, %v17607_v57  ;;  %v17613_v57 = vld [vmem:[#allocation55_spill] sm:$0xff]  ;;  %v15187_v0 = vld [vmem:[#allocation2 + $0x19f8] sm:$0xff] }
 0x3b6   :  { %9603 = vmatpush1.bf16.msra.mxu0 %v10808_v39  ;;  %17583 = vst [vmem:[#allocation61_spill] sm:$0xff] %v14952_v42  ;;  %v2891_v39 = vld [vmem:[#allocation2 + $0x17b0] sm:$0xff]  ;;  %17598 = vst [vmem:[#allocation152_spill] sm:$0xff] %v14985_v1  ;;  %v15030_v10 = vmul.f32 %v17613_v57, %v17613_v57  ;;  %v17619_v57 = vld [vmem:[#allocation58_spill] sm:$0xff] }
 0x3b7   :  { %9931 = vmatpush1.bf16.msra.mxu1 %v10810_v16  ;;  %9604 = vmatprep.subr.bf16.mxu0 %v10817_v50  ;;  %v2888_v16 = vld [vmem:[#allocation2 + $0x1798] sm:$0xff]  ;;  %v17592_v50 = vld [vmem:[#allocation33_spill] sm:$0xff]  ;;  %17600 = vst [vmem:[#allocation153_spill] sm:$0xff] %v14989_v4  ;;  %v10833_v41 = vcombine.high %v14954_v54, %v2891_v39  ;;  %17604 = vst [vmem:[#allocation155_spill] sm:$0xff] %v15000_v48  ;;  %v15049_v34 = vmul.f32 %v17619_v57, %v17619_v57 }
 0x3b8   :  { %9932 = vmatprep.subr.bf16.mxu1 %v10819_v27  ;;  %v14974_v27 = vmul.f32 %v17592_v50, %v17592_v50  ;;  %v10826_v50 = vcombine.low %v2880_v49, %v2884_v18  ;;  %v10835_v12 = vcombine.high %v2888_v16, %v2892_v55  ;;  %17608 = vst [vmem:[#allocation157_spill] sm:$0xff] %v15008_v29  ;;  %v17609_v49 = vld [vmem:[#allocation51_spill] sm:$0xff]  ;;  %v17611_v36 = vld [vmem:[#allocation53_spill] sm:$0xff]  ;;  %17614 = vst [vmem:[#allocation159_spill] sm:$0xff] %v15030_v10 }
 0x3b9   :  { %v15012_v18 = vmul.f32 %v17609_v49, %v17609_v49  ;;  %v15022_v24 = vmul.f32 %v17611_v36, %v17611_v36  ;;  %v17615_v49 = vld [vmem:[#allocation56_spill] sm:$0xff]  ;;  %v10832_v36 = vcombine.low %v14954_v54, %v2891_v39  ;;  %v10834_v31 = vcombine.low %v2888_v16, %v2892_v55  ;;  %17620 = vst [vmem:[#allocation162_spill] sm:$0xff] %v15049_v34  ;;  %v15055_v54 = vld [vmem:[#allocation2 + $0x1838] sm:$0xff]  ;;  %v15057_v39 = vld [vmem:[#allocation2 + $0x1850] sm:$0xff] }
 0x3ba   :  { %17593 = vst [vmem:[#allocation149_spill] sm:$0xff] %v14974_v27  ;;  %9605 = vmatpush1.bf16.msra.mxu0 %v10816_v60  ;;  %v15004_v60 = vmul.f32 %v17605_v44, %v17605_v44  ;;  %v17612_v44 = vld [vmem:[#allocation54_spill] sm:$0xff]  ;;  %v15034_v61 = vmul.f32 %v17615_v49, %v17615_v49  ;;  %v15059_v16 = vld [vmem:[#allocation2 + $0x1870] sm:$0xff]  ;;  %v17621_v55 = vld [vmem:[#allocation59_spill] sm:$0xff] }
 0x3bb   :  { %9933 = vmatpush1.bf16.msra.mxu1 %v10818_v56  ;;  %9606 = vmatprep.subr.bf16.mxu0 %v10825_v32  ;;  %17610 = vst [vmem:[#allocation158_spill] sm:$0xff] %v15012_v18  ;;  %v15014_v56 = vld [vmem:[#allocation2 + $0x17f0] sm:$0xff]  ;;  %v15016_v32 = vld [vmem:[#allocation2 + $0x17d8] sm:$0xff]  ;;  %v15026_v40 = vmul.f32 %v17612_v44, %v17612_v44  ;;  %v17623_v57 = vld [vmem:[#allocation60_spill] sm:$0xff] }
 0x3bc   :  { %9934 = vmatprep.subr.bf16.mxu1 %v10827_v13  ;;  %17606 = vst [vmem:[#allocation156_spill] sm:$0xff] %v15004_v60  ;;  %v15018_v13 = vld [vmem:[#allocation2 + $0x17f8] sm:$0xff]  ;;  %17616 = vst [vmem:[#allocation160_spill] sm:$0xff] %v15034_v61  ;;  %v15043_v44 = vld [vmem:[#allocation2 + $0x1830] sm:$0xff]  ;;  %v10841_v30 = vcombine.high %v14996_v19, %v15014_v56 }
 0x3bd   :  { %v15077_v18 = vld [vmem:[#allocation2 + $0x1858] sm:$0xff]  ;;  %v17629_v27 = vld [vmem:[#allocation73_spill] sm:$0xff]  ;;  %v17633_v29 = vld [vmem:[#allocation75_spill] sm:$0xff]  ;;  %17643 = vst [vmem:[#allocation175_spill] sm:$0xff] %v15187_v0 }
 0x3be   :  { %9607 = vmatpush1.bf16.msra.mxu0 %v10824_v33  ;;  %v10843_v33 = vcombine.high %v15016_v32, %v15018_v13  ;;  %v15095_v28 = vmul.f32 %v17633_v29, %v17633_v29  ;;  %v15101_v60 = vld [vmem:[#allocation2 + $0x1898] sm:$0xff]  ;;  %v10840_v29 = vcombine.low %v14996_v19, %v15014_v56  ;;  %v10851_v19 = vcombine.high %v15045_v47, %v15055_v54  ;;  %v15131_v56 = vld [vmem:[#allocation2 + $0x1930] sm:$0xff] }
 0x3bf   :  { %9935 = vmatpush1.bf16.msra.mxu1 %v10826_v50  ;;  %9608 = vmatprep.subr.bf16.mxu0 %v10833_v41  ;;  %v15063_v50 = vmul.f32 %v17621_v55, %v17621_v55  ;;  %v15067_v41 = vmul.f32 %v17623_v57, %v17623_v57  ;;  %v15083_v55 = vld [vmem:[#allocation2 + $0x18b0] sm:$0xff]  ;;  %v15087_v57 = vmul.f32 %v17629_v27, %v17629_v27  ;;  %v15103_v34 = vld [vmem:[#allocation2 + $0x18b8] sm:$0xff] }
 0x3c0   :  { %9936 = vmatprep.subr.bf16.mxu1 %v10835_v12  ;;  %v17625_v12 = vld [vmem:[#allocation71_spill] sm:$0xff]  ;;  %17634 = vst [vmem:[#allocation169_spill] sm:$0xff] %v15095_v28  ;;  %v17637_v27 = vld [vmem:[#allocation77_spill] sm:$0xff]  ;;  %v15119_v28 = vld [vmem:[#allocation2 + $0x18f8] sm:$0xff]  ;;  %v17656_v43 = vcombine.low %v15077_v18, %v15079_v38  ;;  %v17670_v63 = vcombine.low %v15101_v60, %v15103_v34 }
 0x3c1   :  { %17622 = vst [vmem:[#allocation163_spill] sm:$0xff] %v15063_v50  ;;  %17624 = vst [vmem:[#allocation164_spill] sm:$0xff] %v15067_v41  ;;  %v15071_v49 = vmul.f32 %v17625_v12, %v17625_v12  ;;  %v17631_v41 = vld [vmem:[#allocation74_spill] sm:$0xff]  ;;  %v17635_v50 = vld [vmem:[#allocation76_spill] sm:$0xff]  ;;  %v15109_v48 = vmul.f32 %v17637_v27, %v17637_v27  ;;  %v10857_v27 = vcombine.high %v15057_v39, %v15059_v16 }
 0x3c2   :  { %17630 = vst [vmem:[#allocation167_spill] sm:$0xff] %v15087_v57  ;;  %v15091_v12 = vmul.f32 %v17631_v41, %v17631_v41  ;;  %v15099_v5 = vmul.f32 %v17635_v50, %v17635_v50  ;;  %9609 = vmatpush1.bf16.msra.mxu0 %v10832_v36  ;;  %v10842_v41 = vcombine.low %v15016_v32, %v15018_v13  ;;  %v15115_v50 = vld [vmem:[#allocation2 + $0x18f0] sm:$0xff]  ;;  %v15133_v32 = vld [vmem:[#allocation2 + $0x1918] sm:$0xff] }
 0x3c3   :  { %17626 = vst [vmem:[#allocation165_spill] sm:$0xff] %v15071_v49  ;;  %17638 = vst [vmem:[#allocation171_spill] sm:$0xff] %v15109_v48  ;;  %9937 = vmatpush1.bf16.msra.mxu1 %v10834_v31  ;;  %9610 = vmatprep.subr.bf16.mxu0 %v10841_v30  ;;  %v10849_v31 = vcombine.high %v15041_v6, %v15043_v44  ;;  %v15129_v36 = vld [vmem:[#allocation2 + $0x1910] sm:$0xff]  ;;  %v15135_v13 = vld [vmem:[#allocation2 + $0x1938] sm:$0xff]  ;;  %v10850_v30 = vcombine.low %v15045_v47, %v15055_v54 }
 0x3c4   :  { %17632 = vst [vmem:[#allocation168_spill] sm:$0xff] %v15091_v12  ;;  %17636 = vst [vmem:[#allocation170_spill] sm:$0xff] %v15099_v5  ;;  %v15117_v5 = vld [vmem:[#allocation2 + $0x18d8] sm:$0xff]  ;;  %9938 = vmatprep.subr.bf16.mxu1 %v10843_v33  ;;  %v15147_v48 = vld [vmem:[#allocation2 + $0x1970] sm:$0xff] }
 0x3c5   :  { %v17639_v12 = vld [vmem:[#allocation78_spill] sm:$0xff]  ;;  %v15161_v33 = vld [vmem:[#allocation2 + $0x1990] sm:$0xff] }
 0x3c6   :  { %v15123_v46 = vmul.f32 %v17639_v12, %v17639_v12  ;;  %v10848_v12 = vcombine.low %v15041_v6, %v15043_v44  ;;  %v10859_v6 = vcombine.high %v15077_v18, %v15079_v38  ;;  %v15159_v54 = vld [vmem:[#allocation2 + $0x1978] sm:$0xff]  ;;  %9611 = vmatpush1.bf16.msra.mxu0 %v10840_v29  ;;  %v15183_v53 = vld [vmem:[#allocation2 + $0x19f0] sm:$0xff]  ;;  %v17659_v38 = vcombine.high %v15101_v60, %v15103_v34 }
 0x3c7   :  { %9939 = vmatpush1.bf16.msra.mxu1 %v10842_v41  ;;  %v15171_v61 = vld [vmem:[#allocation2 + $0x1998] sm:$0xff]  ;;  %9621 = vmatprep.subr.bf16.mxu0 %v10849_v31  ;;  %17641 = vst [vmem:[#allocation173_spill] sm:$0xff] %v15183_v53  ;;  %v15197_v29 = vld [vmem:[#allocation2 + $0x1a10] sm:$0xff]  ;;  %v17680_v34 = vcombine.low %v15117_v5, %v15119_v28  ;;  %v15433_v60 = vmul.f32 %v14799_v17, %v14799_v17 }
 0x3c8   :  { %17640 = vst [vmem:[#allocation172_spill] sm:$0xff] %v15123_v46  ;;  %v15145_v46 = vld [vmem:[#allocation2 + $0x1950] sm:$0xff]  ;;  %v15173_v44 = vld [vmem:[#allocation2 + $0x19b8] sm:$0xff]  ;;  %9949 = vmatprep.subr.bf16.mxu1 %v10851_v19  ;;  %v17690_v17 = vcombine.low %v15133_v32, %v15135_v13 }
 0x3c9   :  { %v15185_v47 = vld [vmem:[#allocation2 + $0x19d8] sm:$0xff]  ;;  %v15199_v57 = vld [vmem:[#allocation2 + $0x1a30] sm:$0xff]  ;;  %9613 = vmatmul.mubr.bf16.vlgmr.msra.gmra.mrb[4].mxu0 %v14265_v62 }
 0x3ca   :  { %17642 = vst [vmem:[#allocation174_spill] sm:$0xff] %v15185_v47  ;;  %17644 = vst [vmem:[#allocation176_spill] sm:$0xff] %v15199_v57  ;;  %v15201_v49 = vld [vmem:[#allocation2 + $0x1a18] sm:$0xff]  ;;  %9941 = vmatmul.mubr.bf16.vlgmr.msra.gmra.mrb[4].mxu1 %v14265_v62  ;;  %v15213_v4 = vld [vmem:[#allocation2 + $0x1a50] sm:$0xff]  ;;  %9622 = vmatpush1.bf16.msra.mxu0 %v10848_v12 }
 0x3cb   :  { %17645 = vst [vmem:[#allocation177_spill] sm:$0xff] %v15201_v49  ;;  %v15211_v41 = vld [vmem:[#allocation2 + $0x1a38] sm:$0xff]  ;;  %v15215_v10 = vld [vmem:[#allocation2 + $0x1a70] sm:$0xff]  ;;  %9950 = vmatpush1.bf16.msra.mxu1 %v10850_v30  ;;  %9623 = vmatprep.subr.bf16.mxu0 %v10857_v27 }
 0x3cc   :  { %17646 = vst [vmem:[#allocation178_spill] sm:$0xff] %v15211_v41  ;;  %v15223_v42 = vld [vmem:[#allocation2 + $0x1a58] sm:$0xff]  ;;  %9951 = vmatprep.subr.bf16.mxu1 %v10859_v6  ;;  %v15235_v62 = vld [vmem:[#allocation2 + $0x1ab0] sm:$0xff]  ;;  %9653 = vmatprep.mubr.bf16.mxu0 %v14420_v14 }
 0x3cd   :  { %v15225_v19 = vld [vmem:[#allocation2 + $0x1a78] sm:$0xff]  ;;  %17648 = vst [vmem:[#allocation180_spill] sm:$0xff] %v15235_v62  ;;  %v15247_v12 = vld [vmem:[#allocation2 + $0x1ad0] sm:$0xff]  ;;  %9981 = vmatprep.mubr.bf16.mxu1 %v14420_v14  ;;  %v17655_v14 = vcombine.low %v15057_v39, %v15059_v16  ;;  %v17658_v39 = vcombine.high %v15081_v9, %v15083_v55 }
 0x3ce   :  { %v15237_v31 = vld [vmem:[#allocation2 + $0x1a98] sm:$0xff]  ;;  %17650 = vst [vmem:[#allocation182_spill] sm:$0xff] %v15247_v12  ;;  %v15249_v30 = vld [vmem:[#allocation2 + $0x1af0] sm:$0xff]  ;;  %v17669_v12 = vcombine.low %v15081_v9, %v15083_v55  ;;  %v17674_v9 = vcombine.high %v15105_v45, %v15115_v50 }
 0x3cf   :  { %17651 = vst [vmem:[#allocation183_spill] sm:$0xff] %v15249_v30  ;;  %v15263_v0 = vld [vmem:[#allocation2 + $0x1af8] sm:$0xff]  ;;  %v15265_v47 = vld [vmem:[#allocation2 + $0x1b10] sm:$0xff]  ;;  %9624 = vmatpush1.bf16.msra.mxu0 %v17655_v14  ;;  %9952 = vmatpush1.bf16.msra.mxu1 %v17656_v43  ;;  %v15429_v43 = vmul.f32 %v14297_v26, %v14297_v26  ;;  %v17689_v26 = vcombine.low %v15129_v36, %v15131_v56 }
 0x3d0   :  { %17652 = vst [vmem:[#allocation184_spill] sm:$0xff] %v15263_v0  ;;  %17653 = vst [vmem:[#allocation185_spill] sm:$0xff] %v15265_v47  ;;  %v15267_v53 = vld [vmem:[#allocation2 + $0x1b30] sm:$0xff]  ;;  %v15281_v41 = vld [vmem:[#allocation2 + $0x1b18] sm:$0xff]  ;;  %9625 = vmatprep.subr.bf16.mxu0 %v17658_v39  ;;  %9953 = vmatprep.subr.bf16.mxu1 %v17659_v38 }
 0x3d1   :  { %17654 = vst [vmem:[#allocation186_spill] sm:$0xff] %v15267_v53  ;;  %v15283_v49 = vld [vmem:[#allocation2 + $0x1b38] sm:$0xff]  ;;  %v15285_v57 = vld [vmem:[#allocation2 + $0x1b50] sm:$0xff] }
 0x3d2   :  { %17657 = vst [vmem:[#allocation187_spill] sm:$0xff] %v15285_v57  ;;  %v15299_v14 = vld [vmem:[#allocation2 + $0x1b70] sm:$0xff]  ;;  %v15301_v1 = vld [vmem:[#allocation2 + $0x1b58] sm:$0xff] }
 0x3d3   :  { %17660 = vst [vmem:[#allocation188_spill] sm:$0xff] %v15299_v14  ;;  %17661 = vst [vmem:[#allocation189_spill] sm:$0xff] %v15301_v1  ;;  %v15303_v27 = vld [vmem:[#allocation2 + $0x1b78] sm:$0xff]  ;;  %v15313_v6 = vld [vmem:[#allocation2 + $0x1b90] sm:$0xff]  ;;  %9626 = vmatpush1.bf16.msra.mxu0 %v17669_v12  ;;  %9954 = vmatpush1.bf16.msra.mxu1 %v17670_v63  ;;  %v17675_v63 = vcombine.high %v15117_v5, %v15119_v28 }
 0x3d4   :  { %17662 = vst [vmem:[#allocation190_spill] sm:$0xff] %v15303_v27  ;;  %17663 = vst [vmem:[#allocation191_spill] sm:$0xff] %v15313_v6  ;;  %v15315_v16 = vld [vmem:[#allocation2 + $0x1bb0] sm:$0xff]  ;;  %v15317_v62 = vld [vmem:[#allocation2 + $0x1b98] sm:$0xff]  ;;  %9627 = vmatprep.subr.bf16.mxu0 %v17674_v9  ;;  %v17681_v9 = vcombine.high %v15129_v36, %v15131_v56  ;;  %v15417_v27 = vmul.f32 %v14031_v7, %v14031_v7  ;;  %v15437_v7 = vmul.f32 %v14689_v51, %v14689_v51 }
 0x3d5   :  { %17664 = vst [vmem:[#allocation192_spill] sm:$0xff] %v15315_v16  ;;  %17665 = vst [vmem:[#allocation193_spill] sm:$0xff] %v15317_v62  ;;  %v15329_v18 = vld [vmem:[#allocation2 + $0x1bd0] sm:$0xff]  ;;  %v15345_v53 = vld [vmem:[#allocation2 + $0x1bd8] sm:$0xff]  ;;  %9955 = vmatprep.subr.bf16.mxu1 %v17675_v63  ;;  %v17679_v63 = vcombine.low %v15105_v45, %v15115_v50  ;;  %v17682_v45 = vcombine.high %v15133_v32, %v15135_v13  ;;  %v17694_v36 = vcombine.high %v15145_v46, %v15147_v48 }
 0x3d6   :  { %17667 = vst [vmem:[#allocation195_spill] sm:$0xff] %v15329_v18  ;;  %v15331_v30 = vld [vmem:[#allocation2 + $0x1bf0] sm:$0xff]  ;;  %17671 = vst [vmem:[#allocation197_spill] sm:$0xff] %v15345_v53  ;;  %v15347_v47 = vld [vmem:[#allocation2 + $0x1bf8] sm:$0xff] }
 0x3d7   :  { %17668 = vst [vmem:[#allocation196_spill] sm:$0xff] %v15331_v30  ;;  %17672 = vst [vmem:[#allocation198_spill] sm:$0xff] %v15347_v47  ;;  %v15349_v0 = vld [vmem:[#allocation2 + $0x1c10] sm:$0xff]  ;;  %v15365_v39 = vld [vmem:[#allocation2 + $0x1c18] sm:$0xff]  ;;  %9628 = vmatpush1.bf16.msra.mxu0 %v17679_v63  ;;  %9956 = vmatpush1.bf16.msra.mxu1 %v17680_v34 }
 0x3d8   :  { %17673 = vst [vmem:[#allocation199_spill] sm:$0xff] %v15349_v0  ;;  %v15363_v12 = vld [vmem:[#allocation2 + $0x1c30] sm:$0xff]  ;;  %17677 = vst [vmem:[#allocation201_spill] sm:$0xff] %v15365_v39  ;;  %v15367_v38 = vld [vmem:[#allocation2 + $0x1c38] sm:$0xff]  ;;  %9629 = vmatprep.subr.bf16.mxu0 %v17681_v9  ;;  %9957 = vmatprep.subr.bf16.mxu1 %v17682_v45  ;;  %v15421_v9 = vmul.f32 %v13892_v8, %v13892_v8  ;;  %v15425_v45 = vmul.f32 %v14437_v2, %v14437_v2 }
 0x3d9   :  { %17676 = vst [vmem:[#allocation200_spill] sm:$0xff] %v15363_v12  ;;  %17678 = vst [vmem:[#allocation202_spill] sm:$0xff] %v15367_v38  ;;  %v17683_v50 = vld [vmem:[#allocation62_spill] sm:$0xff]  ;;  %v17684_v5 = vld [vmem:[#allocation89_spill] sm:$0xff] }
 0x3da   :  { %v15405_v28 = vmul.f32 %v17683_v50, %v17683_v50  ;;  %v15409_v34 = vmul.f32 %v17684_v5, %v17684_v5  ;;  %v17685_v63 = vld [vmem:[#allocation80_spill] sm:$0xff]  ;;  %17686 = vst [vmem:[#allocation203_spill] sm:$0xff] %v15437_v7  ;;  %v17688_v5 = vld [vmem:[#allocation90_spill] sm:$0xff]  ;;  %v17691_v50 = vld [vmem:[#allocation81_spill] sm:$0xff] }
 0x3db   :  { %v15413_v55 = vmul.f32 %v17685_v63, %v17685_v63  ;;  %v17687_v63 = vld [vmem:[#allocation63_spill] sm:$0xff]  ;;  %v15445_v2 = vmul.f32 %v17688_v5, %v17688_v5  ;;  %9630 = vmatpush1.bf16.msra.mxu0 %v17689_v26  ;;  %9958 = vmatpush1.bf16.msra.mxu1 %v17690_v17  ;;  %v15455_v51 = vmul.f32 %v17691_v50, %v17691_v50  ;;  %v17692_v12 = vld [vmem:[#allocation106_spill] sm:$0xff]  ;;  %v17703_v47 = vld [vmem:[#allocation100_spill] sm:$0xff] }
 0x3dc   :  { %v15441_v8 = vmul.f32 %v17687_v63, %v17687_v63  ;;  %v15459_v63 = vmul.f32 %v17692_v12, %v17692_v12  ;;  %v17693_v0 = vld [vmem:[#allocation99_spill] sm:$0xff]  ;;  %9631 = vmatprep.subr.bf16.mxu0 %v17694_v36  ;;  %v17695_v26 = vcombine.high %v15149_v20, %v15159_v54  ;;  %v17696_v17 = vld [vmem:[#allocation122_spill] sm:$0xff]  ;;  %v15485_v12 = vmul.f32 %v14697_v3, %v14697_v3  ;;  %v17699_v36 = vld [vmem:[#allocation64_spill] sm:$0xff] }
 0x3dd   :  { %v15463_v5 = vmul.f32 %v17693_v0, %v17693_v0  ;;  %v15473_v56 = vmul.f32 %v17696_v17, %v17696_v17  ;;  %v17697_v32 = vld [vmem:[#allocation114_spill] sm:$0xff]  ;;  %v15481_v0 = vmul.f32 %v14801_v35, %v14801_v35  ;;  %v15489_v50 = vmul.f32 %v17699_v36, %v17699_v36  ;;  %v17702_v38 = vld [vmem:[#allocation107_spill] sm:$0xff]  ;;  %v17710_v18 = vld [vmem:[#allocation65_spill] sm:$0xff] }
 0x3de   :  { %9959 = vmatprep.subr.bf16.mxu1 %v17695_v26  ;;  %v15477_v13 = vmul.f32 %v17697_v32, %v17697_v32  ;;  %17698 = vst [vmem:[#allocation204_spill] sm:$0xff] %v15485_v12  ;;  %v17700_v26 = vld [vmem:[#allocation91_spill] sm:$0xff]  ;;  %v17701_v39 = vld [vmem:[#allocation82_spill] sm:$0xff]  ;;  %v15501_v35 = vmul.f32 %v17702_v38, %v17702_v38  ;;  %v15505_v3 = vmul.f32 %v17703_v47, %v17703_v47  ;;  %v17724_v6 = vld [vmem:[#allocation93_spill] sm:$0xff] }
 0x3df   :  { %v15493_v17 = vmul.f32 %v17700_v26, %v17700_v26  ;;  %v15497_v32 = vmul.f32 %v17701_v39, %v17701_v39  ;;  %v17704_v53 = vld [vmem:[#allocation123_spill] sm:$0xff]  ;;  %v17706_v39 = vcombine.low %v15145_v46, %v15147_v48  ;;  %v17707_v38 = vcombine.low %v15149_v20, %v15159_v54  ;;  %v17713_v20 = vld [vmem:[#allocation92_spill] sm:$0xff]  ;;  %v17723_v16 = vld [vmem:[#allocation66_spill] sm:$0xff] }
 0x3e0   :  { %v15509_v36 = vmul.f32 %v17704_v53, %v17704_v53  ;;  %v17705_v30 = vld [vmem:[#allocation115_spill] sm:$0xff]  ;;  %v15523_v47 = vmul.f32 %v14803_v11, %v14803_v11  ;;  %v15527_v53 = vmul.f32 %v14699_v37, %v14699_v37  ;;  %v17711_v46 = vcombine.high %v15161_v33, %v15163_v23  ;;  %v17715_v37 = vld [vmem:[#allocation108_spill] sm:$0xff]  ;;  %v17716_v11 = vld [vmem:[#allocation101_spill] sm:$0xff] }
 0x3e1   :  { %v15513_v26 = vmul.f32 %v17705_v30, %v17705_v30  ;;  %9632 = vmatpush1.bf16.msra.mxu0 %v17706_v39  ;;  %9960 = vmatpush1.bf16.msra.mxu1 %v17707_v38  ;;  %v15531_v30 = vmul.f32 %v17710_v18, %v17710_v18  ;;  %v17712_v48 = vcombine.high %v15171_v61, %v15173_v44  ;;  %v17714_v39 = vld [vmem:[#allocation83_spill] sm:$0xff]  ;;  %v17746_v1 = vld [vmem:[#allocation61_spill] sm:$0xff] }
 0x3e2   :  { %17708 = vst [vmem:[#allocation205_spill] sm:$0xff] %v15523_v47  ;;  %17709 = vst [vmem:[#allocation206_spill] sm:$0xff] %v15527_v53  ;;  %9633 = vmatprep.subr.bf16.mxu0 %v17711_v46  ;;  %v15541_v54 = vmul.f32 %v17713_v20, %v17713_v20  ;;  %v15545_v38 = vmul.f32 %v17714_v39, %v17714_v39  ;;  %v15549_v18 = vmul.f32 %v17715_v37, %v17715_v37  ;;  %v17717_v46 = vld [vmem:[#allocation124_spill] sm:$0xff] }
 0x3e3   :  { %9961 = vmatprep.subr.bf16.mxu1 %v17712_v48  ;;  %v15553_v21 = vmul.f32 %v17716_v11, %v17716_v11  ;;  %v15557_v62 = vmul.f32 %v17717_v46, %v17717_v46  ;;  %v17719_v48 = vld [vmem:[#allocation116_spill] sm:$0xff]  ;;  %v15565_v39 = vmul.f32 %v14809_v52, %v14809_v52  ;;  %v15569_v37 = vmul.f32 %v14701_v58, %v14701_v58 }
 0x3e4   :  { %v15561_v20 = vmul.f32 %v17719_v48, %v17719_v48  ;;  %v15573_v11 = vmul.f32 %v17723_v16, %v17723_v16  ;;  %v15577_v46 = vmul.f32 %v17724_v6, %v17724_v6  ;;  %v1351_v48 = vsel %vm1323_vm0, %v14945_v15, %v14941_v59  ;;  %v17729_v53 = vld [vmem:[#allocation152_spill] sm:$0xff]  ;;  %v17730_v15 = vld [vmem:[#allocation173_spill] sm:$0xff] }
 0x3e5   :  { %17718 = vst [vmem:[#allocation207_spill] sm:$0xff] %v15557_v62  ;;  %17721 = vst [vmem:[#allocation209_spill] sm:$0xff] %v15565_v39  ;;  %v17725_v52 = vcombine.low %v15161_v33, %v15163_v23  ;;  %v17726_v58 = vcombine.low %v15171_v61, %v15173_v44  ;;  %v1358_v6 = vsel %vm1323_vm0, %v15026_v40, %v15022_v24  ;;  %v17728_v39 = vld [vmem:[#allocation151_spill] sm:$0xff]  ;;  %v17738_v24 = vld [vmem:[#allocation125_spill] sm:$0xff] }
 0x3e6   :  { %17720 = vst [vmem:[#allocation208_spill] sm:$0xff] %v15561_v20  ;;  %17722 = vst [vmem:[#allocation210_spill] sm:$0xff] %v15569_v37  ;;  %v17727_v37 = vld [vmem:[#allocation84_spill] sm:$0xff]  ;;  %v1365_v59 = vsel %vm1323_vm0, %v17729_v53, %v17728_v39  ;;  %v17731_v23 = vcombine.high %v15175_v22, %v17730_v15  ;;  %v17733_v33 = vld [vmem:[#allocation175_spill] sm:$0xff]  ;;  %v15614_v40 = vmul.f32 %v17738_v24, %v17738_v24 }
 0x3e7   :  { %9634 = vmatpush1.bf16.msra.mxu0 %v17725_v52  ;;  %9962 = vmatpush1.bf16.msra.mxu1 %v17726_v58  ;;  %v15590_v16 = vmul.f32 %v17727_v37, %v17727_v37  ;;  %v17732_v52 = vld [vmem:[#allocation174_spill] sm:$0xff]  ;;  %v17735_v58 = vld [vmem:[#allocation109_spill] sm:$0xff] }
 0x3e8   :  { %9635 = vmatprep.subr.bf16.mxu0 %v17731_v23  ;;  %v17734_v61 = vcombine.high %v17732_v52, %v17733_v33  ;;  %v15606_v44 = vmul.f32 %v17735_v58, %v17735_v58  ;;  %v17736_v37 = vld [vmem:[#allocation102_spill] sm:$0xff]  ;;  %17739 = vst [vmem:[#allocation152_spill] sm:$0xff] %v15614_v40  ;;  %v17740_v53 = vld [vmem:[#allocation117_spill] sm:$0xff]  ;;  %v17742_v23 = vld [vmem:[#allocation143_spill] sm:$0xff] }
 0x3e9   :  { %v15610_v20 = vmul.f32 %v17736_v37, %v17736_v37  ;;  %v15618_v39 = vmul.f32 %v17740_v53, %v17740_v53  ;;  %v15622_v47 = vmul.f32 %v17742_v23, %v17742_v23  ;;  %v1352_v37 = vsel %vm1325_vm1, %v17746_v1, %v1351_v48  ;;  %v17748_v24 = vld [vmem:[#allocation94_spill] sm:$0xff]  ;;  %v17749_v53 = vld [vmem:[#allocation159_spill] sm:$0xff]  ;;  %v17750_v23 = vld [vmem:[#allocation153_spill] sm:$0xff] }
 0x3ea   :  { %9963 = vmatprep.subr.bf16.mxu1 %v17734_v61  ;;  %v17744_v61 = vld [vmem:[#allocation133_spill] sm:$0xff]  ;;  %v15636_v40 = vmul.f32 %v17748_v24, %v17748_v24  ;;  %v17752_v1 = vcombine.low %v17732_v52, %v17733_v33  ;;  %v17754_v24 = vld [vmem:[#allocation110_spill] sm:$0xff]  ;;  %v17763_v33 = vld [vmem:[#allocation103_spill] sm:$0xff] }
 0x3eb   :  { %17737 = vst [vmem:[#allocation151_spill] sm:$0xff] %v15610_v20  ;;  %17741 = vst [vmem:[#allocation173_spill] sm:$0xff] %v15618_v39  ;;  %v15626_v58 = vmul.f32 %v17744_v61, %v17744_v61  ;;  %v17747_v20 = vld [vmem:[#allocation67_spill] sm:$0xff]  ;;  %v1359_v39 = vsel %vm1325_vm1, %v17749_v53, %v1358_v6  ;;  %v17751_v61 = vcombine.low %v15175_v22, %v17730_v15  ;;  %v17753_v48 = vld [vmem:[#allocation85_spill] sm:$0xff] }
 0x3ec   :  { %17743 = vst [vmem:[#allocation174_spill] sm:$0xff] %v15622_v47  ;;  %v15632_v14 = vmul.f32 %v17747_v20, %v17747_v20  ;;  %v1366_v47 = vsel %vm1325_vm1, %v17750_v23, %v1365_v59  ;;  %9964 = vmatpush1.bf16.msra.mxu1 %v17752_v1  ;;  %v15650_v20 = vmul.f32 %v17753_v48, %v17753_v48  ;;  %v17756_v6 = vld [vmem:[#allocation165_spill] sm:$0xff]  ;;  %v17757_v53 = vld [vmem:[#allocation166_spill] sm:$0xff]  ;;  %v17758_v23 = vld [vmem:[#allocation176_spill] sm:$0xff] }
 0x3ed   :  { %17745 = vst [vmem:[#allocation175_spill] sm:$0xff] %v15626_v58  ;;  %9636 = vmatpush1.bf16.msra.mxu0 %v17751_v61  ;;  %v15654_v58 = vmul.f32 %v17754_v24, %v17754_v24  ;;  %v1372_v59 = vsel %vm1323_vm0, %v17757_v53, %v17756_v6  ;;  %v17759_v22 = vcombine.high %v15197_v29, %v17758_v23  ;;  %v17760_v15 = vld [vmem:[#allocation177_spill] sm:$0xff]  ;;  %v17761_v61 = vld [vmem:[#allocation178_spill] sm:$0xff] }
 0x3ee   :  { %v17762_v52 = vcombine.high %v17760_v15, %v17761_v61  ;;  %v15667_v1 = vmul.f32 %v17763_v33, %v17763_v33  ;;  %v17765_v48 = vld [vmem:[#allocation126_spill] sm:$0xff] }
 0x3ef   :  { %17755 = vst [vmem:[#allocation61_spill] sm:$0xff] %v15654_v58  ;;  %9637 = vmatprep.subr.bf16.mxu0 %v17759_v22  ;;  %v15671_v24 = vmul.f32 %v17765_v48, %v17765_v48  ;;  %v17767_v58 = vld [vmem:[#allocation70_spill] sm:$0xff]  ;;  %v17769_v22 = vld [vmem:[#allocation144_spill] sm:$0xff] }
 0x3f0   :  { %9965 = vmatprep.subr.bf16.mxu1 %v17762_v52  ;;  %17764 = vst [vmem:[#allocation159_spill] sm:$0xff] %v15667_v1  ;;  %v1353_v57 = vsel %vm1327_vm2, %v17767_v58, %v1352_v37  ;;  %v17768_v6 = vld [vmem:[#allocation118_spill] sm:$0xff]  ;;  %v15681_v12 = vmul.f32 %v17769_v22, %v17769_v22  ;;  %v17770_v52 = vld [vmem:[#allocation160_spill] sm:$0xff]  ;;  %v17774_v58 = vld [vmem:[#allocation167_spill] sm:$0xff]  ;;  %v1379_v22 = vsel %vm1323_vm0, %v15441_v8, %v15405_v28 }
 0x3f1   :  { %17766 = vst [vmem:[#allocation153_spill] sm:$0xff] %v15671_v24  ;;  %v15677_v53 = vmul.f32 %v17768_v6, %v17768_v6  ;;  %v1360_v7 = vsel %vm1327_vm2, %v17770_v52, %v1359_v39  ;;  %v17771_v33 = vld [vmem:[#allocation154_spill] sm:$0xff]  ;;  %v17773_v24 = vld [vmem:[#allocation68_spill] sm:$0xff]  ;;  %v1373_v6 = vsel %vm1325_vm1, %v17774_v58, %v1372_v59  ;;  %v17775_v39 = vcombine.low %v15197_v29, %v17758_v23  ;;  %v17784_v58 = vld [vmem:[#allocation111_spill] sm:$0xff] }
 0x3f2   :  { %v1367_v1 = vsel %vm1327_vm2, %v17771_v33, %v1366_v47  ;;  %v17772_v62 = vld [vmem:[#allocation134_spill] sm:$0xff]  ;;  %v15693_v37 = vmul.f32 %v17773_v24, %v17773_v24  ;;  %v17776_v47 = vcombine.low %v17760_v15, %v17761_v61  ;;  %v17777_v33 = vld [vmem:[#allocation95_spill] sm:$0xff]  ;;  %v1386_v59 = vsel %vm1323_vm0, %v15445_v2, %v15409_v34  ;;  %v17782_v15 = vld [vmem:[#allocation161_spill] sm:$0xff] }
 0x3f3   :  { %v15689_v48 = vmul.f32 %v17772_v62, %v17772_v62  ;;  %9638 = vmatpush1.bf16.msra.mxu0 %v17775_v39  ;;  %v15708_v52 = vmul.f32 %v17777_v33, %v17777_v33  ;;  %v17778_v24 = vld [vmem:[#allocation79_spill] sm:$0xff]  ;;  %v17779_v8 = vcombine.high %v15213_v4, %v15215_v10  ;;  %v17780_v29 = vcombine.high %v15223_v42, %v15225_v19  ;;  %v17781_v28 = vld [vmem:[#allocation86_spill] sm:$0xff]  ;;  %v17785_v34 = vld [vmem:[#allocation104_spill] sm:$0xff] }
 0x3f4   :  { %9966 = vmatpush1.bf16.msra.mxu1 %v17776_v47  ;;  %v1354_v62 = vsel %vm1329_vm3, %v17778_v24, %v1353_v57  ;;  %v15723_v23 = vmul.f32 %v17781_v28, %v17781_v28  ;;  %v1361_v61 = vsel %vm1329_vm3, %v17782_v15, %v1360_v7  ;;  %v17783_v57 = vld [vmem:[#allocation155_spill] sm:$0xff]  ;;  %v15731_v2 = vmul.f32 %v17784_v58, %v17784_v58  ;;  %v17786_v47 = vld [vmem:[#allocation168_spill] sm:$0xff] }
 0x3f5   :  { %9639 = vmatprep.subr.bf16.mxu0 %v17779_v8  ;;  %9967 = vmatprep.subr.bf16.mxu1 %v17780_v29  ;;  %v1368_v24 = vsel %vm1329_vm3, %v17783_v57, %v1367_v1  ;;  %v15735_v39 = vmul.f32 %v17785_v34, %v17785_v34  ;;  %v1374_v8 = vsel %vm1327_vm2, %v17786_v47, %v1373_v6  ;;  %v17787_v28 = vld [vmem:[#allocation127_spill] sm:$0xff]  ;;  %v17789_v57 = vld [vmem:[#allocation88_spill] sm:$0xff] }
 0x3f6   :  { %v1380_v29 = vsel %vm1325_vm1, %v15489_v50, %v1379_v22  ;;  %v15743_v7 = vmul.f32 %v17787_v28, %v17787_v28  ;;  %v17788_v15 = vld [vmem:[#allocation119_spill] sm:$0xff]  ;;  %v1355_v58 = vsel %vm1331_vm4, %v17789_v57, %v1354_v62  ;;  %v1387_v34 = vsel %vm1325_vm1, %v15493_v17, %v1386_v59  ;;  %v17792_v22 = vld [vmem:[#allocation162_spill] sm:$0xff]  ;;  %v17793_v28 = vld [vmem:[#allocation156_spill] sm:$0xff] }
 0x3f7   :  { %v15747_v1 = vmul.f32 %v17788_v15, %v17788_v15  ;;  %v17790_v6 = vcombine.low %v15213_v4, %v15215_v10  ;;  %v17791_v50 = vcombine.low %v15223_v42, %v15225_v19  ;;  %v1362_v47 = vsel %vm1331_vm4, %v17792_v22, %v1361_v61  ;;  %v17794_v57 = vld [vmem:[#allocation179_spill] sm:$0xff]  ;;  %v17795_v17 = vld [vmem:[#allocation180_spill] sm:$0xff]  ;;  %v17797_v10 = vld [vmem:[#allocation181_spill] sm:$0xff] }
 0x3f8   :  { %v1369_v15 = vsel %vm1331_vm4, %v17793_v28, %v1368_v24  ;;  %v1393_v62 = vsel %vm1323_vm0, %v15455_v51, %v15413_v55  ;;  %v17796_v59 = vcombine.high %v17794_v57, %v17795_v17  ;;  %v17798_v4 = vcombine.high %v15237_v31, %v17797_v10  ;;  %v17799_v42 = vld [vmem:[#allocation69_spill] sm:$0xff]  ;;  %v17801_v24 = vld [vmem:[#allocation96_spill] sm:$0xff] }
 0x3f9   :  { %9640 = vmatpush1.bf16.msra.mxu0 %v17790_v6  ;;  %9968 = vmatpush1.bf16.msra.mxu1 %v17791_v50  ;;  %v1186_v19 = vmul.f32 %v17799_v42, %v17799_v42  ;;  %v17800_v6 = vld [vmem:[#allocation169_spill] sm:$0xff]  ;;  %v1381_v28 = vsel %vm1327_vm2, %v15531_v30, %v1380_v29  ;;  %v15780_v51 = vmul.f32 %v17801_v24, %v17801_v24  ;;  %v17802_v55 = vld [vmem:[#allocation148_spill] sm:$0xff] }
 0x3fa   :  { %9641 = vmatprep.subr.bf16.mxu0 %v17796_v59  ;;  %9969 = vmatprep.subr.bf16.mxu1 %v17798_v4  ;;  %v1375_v61 = vsel %vm1329_vm3, %v17800_v6, %v1374_v8  ;;  %v1356_v50 = vsel %vm1333_vm5, %v17802_v55, %v1355_v58  ;;  %v1388_v22 = vsel %vm1327_vm2, %v15541_v54, %v1387_v34  ;;  %v17803_v4 = vld [vmem:[#allocation87_spill] sm:$0xff]  ;;  %v17805_v29 = vld [vmem:[#allocation157_spill] sm:$0xff]  ;;  %v17809_v55 = vld [vmem:[#allocation182_spill] sm:$0xff] }
 0x3fb   :  { %v1400_v59 = vsel %vm1323_vm0, %v15459_v63, %v15417_v27  ;;  %v15791_v8 = vmul.f32 %v17803_v4, %v17803_v4  ;;  %v17804_v6 = vld [vmem:[#allocation163_spill] sm:$0xff]  ;;  %v1370_v24 = vsel %vm1333_vm5, %v17805_v29, %v1369_v15  ;;  %v1394_v58 = vsel %vm1325_vm1, %v15497_v32, %v1393_v62  ;;  %v17808_v63 = vld [vmem:[#allocation170_spill] sm:$0xff] }
 0x3fc   :  { %v1363_v30 = vsel %vm1333_vm5, %v17804_v6, %v1362_v47  ;;  %v17806_v54 = vcombine.low %v17794_v57, %v17795_v17  ;;  %v17807_v27 = vcombine.low %v15237_v31, %v17797_v10  ;;  %v1376_v34 = vsel %vm1331_vm4, %v17808_v63, %v1375_v61  ;;  %v17810_v32 = vld [vmem:[#allocation183_spill] sm:$0xff]  ;;  %v17812_v57 = vld [vmem:[#allocation184_spill] sm:$0xff]  ;;  %v17814_v31 = vld [vmem:[#allocation149_spill] sm:$0xff] }
 0x3fd   :  { %v1382_v47 = vsel %vm1329_vm3, %v15573_v11, %v1381_v28  ;;  %v1407_v15 = vsel %vm1323_vm0, %v15463_v5, %v15421_v9  ;;  %v17811_v62 = vcombine.high %v17809_v55, %v17810_v32  ;;  %v17813_v17 = vcombine.high %v15251_v25, %v17812_v57  ;;  %v17815_v28 = vld [vmem:[#allocation164_spill] sm:$0xff]  ;;  %v17816_v29 = vld [vmem:[#allocation150_spill] sm:$0xff] }
 0x3fe   :  { %9642 = vmatpush1.bf16.msra.mxu0 %v17806_v54  ;;  %9970 = vmatpush1.bf16.msra.mxu1 %v17807_v27  ;;  %v1357_v10 = vsel %vm1335_vm6, %v17814_v31, %v1356_v50  ;;  %v1389_v61 = vsel %vm1329_vm3, %v15577_v46, %v1388_v22  ;;  %v1401_v11 = vsel %vm1325_vm1, %v15501_v35, %v1400_v59  ;;  %v17817_v54 = vld [vmem:[#allocation52_spill] sm:$0xff]  ;;  %v17818_v50 = vld [vmem:[#allocation158_spill] sm:$0xff]  ;;  %v17819_v46 = vld [vmem:[#allocation171_spill] sm:$0xff] }
 0x3ff   :  { %9643 = vmatprep.subr.bf16.mxu0 %v17811_v62  ;;  %9971 = vmatprep.subr.bf16.mxu1 %v17813_v17  ;;  %v1364_v5 = vsel %vm1335_vm6, %v17815_v28, %v1363_v30  ;;  %v1395_v9 = vsel %vm1327_vm2, %v15545_v38, %v1394_v58  ;;  %v1414_v6 = vsel %vm1323_vm0, %v15473_v56, %v15425_v45  ;;  %v17822_v30 = vld [vmem:[#allocation185_spill] sm:$0xff]  ;;  %v17833_v31 = vld [vmem:[#allocation188_spill] sm:$0xff] }
 0x400   :  { %v1459_v27 = vadd.f32 %v17817_v54, %v17816_v29  ;;  %v1371_v63 = vsel %vm1335_vm6, %v17818_v50, %v1370_v24  ;;  %v1377_v22 = vsel %vm1333_vm5, %v17819_v46, %v1376_v34  ;;  %v1383_v35 = vsel %vm1331_vm4, %v15632_v14, %v1382_v47  ;;  %v17842_v46 = vld [vmem:[#allocation208_spill] sm:$0xff] }
 0x401   :  { %v1408_v59 = vsel %vm1325_vm1, %v15505_v3, %v1407_v15  ;;  %v17820_v38 = vcombine.low %v17809_v55, %v17810_v32  ;;  %v17821_v45 = vcombine.low %v15251_v25, %v17812_v57  ;;  %v1390_v56 = vsel %vm1331_vm4, %v15636_v40, %v1389_v61  ;;  %v17823_v3 = vld [vmem:[#allocation186_spill] sm:$0xff]  ;;  %v17830_v57 = vld [vmem:[#allocation203_spill] sm:$0xff]  ;;  %v17835_v61 = vld [vmem:[#allocation189_spill] sm:$0xff] }
 0x402   :  { %v1402_v24 = vsel %vm1327_vm2, %v15549_v18, %v1401_v11  ;;  %v1421_v14 = vsel %vm1323_vm0, %v15477_v13, %v15429_v43  ;;  %v17824_v58 = vcombine.high %v17822_v30, %v17823_v3  ;;  %v17825_v34 = vcombine.high %v15281_v41, %v15283_v49  ;;  %v17826_v18 = vld [vmem:[#allocation172_spill] sm:$0xff]  ;;  %v17836_v11 = vld [vmem:[#allocation190_spill] sm:$0xff] }
 0x403   :  { %9644 = vmatpush1.bf16.msra.mxu0 %v17820_v38  ;;  %9972 = vmatpush1.bf16.msra.mxu1 %v17821_v45  ;;  %v1396_v25 = vsel %vm1329_vm3, %v15590_v16, %v1395_v9  ;;  %v1415_v40 = vsel %vm1325_vm1, %v15509_v36, %v1414_v6  ;;  %v1460_v47 = vadd.f32 %v1459_v27, %v1357_v10  ;;  %v17840_v6 = vld [vmem:[#allocation112_spill] sm:$0xff]  ;;  %v17841_v27 = vld [vmem:[#allocation61_spill] sm:$0xff]  ;;  %v17844_v45 = vld [vmem:[#allocation206_spill] sm:$0xff] }
 0x404   :  { %9645 = vmatprep.subr.bf16.mxu0 %v17824_v58  ;;  %9973 = vmatprep.subr.bf16.mxu1 %v17825_v34  ;;  %v1378_v15 = vsel %vm1335_vm6, %v17826_v18, %v1377_v22  ;;  %v1384_v43 = vsel %vm1333_vm5, %v15693_v37, %v1383_v35  ;;  %v1409_v13 = vsel %vm1327_vm2, %v15553_v21, %v1408_v59  ;;  %v17843_v59 = vld [vmem:[#allocation152_spill] sm:$0xff]  ;;  %v17849_v34 = vld [vmem:[#allocation191_spill] sm:$0xff]  ;;  %v17853_v18 = vld [vmem:[#allocation194_spill] sm:$0xff] }
 0x405   :  { %v1428_v55 = vsel %vm1323_vm0, %v15481_v0, %v15433_v60  ;;  %v1391_v16 = vsel %vm1333_vm5, %v15708_v52, %v1390_v56  ;;  %v1403_v36 = vsel %vm1329_vm3, %v15606_v44, %v1402_v24  ;;  %v1422_v32 = vsel %vm1325_vm1, %v15513_v26, %v1421_v14  ;;  %v17829_v60 = vld [vmem:[#allocation207_spill] sm:$0xff]  ;;  %v17831_v44 = vld [vmem:[#allocation204_spill] sm:$0xff] }
 0x406   :  { %v1461_v62 = vadd.f32 %v1460_v47, %v1364_v5  ;;  %v17827_v37 = vcombine.low %v17822_v30, %v17823_v3  ;;  %v17828_v21 = vcombine.low %v15281_v41, %v15283_v49  ;;  %v1397_v0 = vsel %vm1331_vm4, %v15650_v20, %v1396_v25  ;;  %v17832_v26 = vld [vmem:[#allocation187_spill] sm:$0xff]  ;;  %v17839_v5 = vld [vmem:[#allocation205_spill] sm:$0xff]  ;;  %v17850_v25 = vld [vmem:[#allocation192_spill] sm:$0xff] }
 0x407   :  { %v1416_v52 = vsel %vm1327_vm2, %v17829_v60, %v1415_v40  ;;  %v1435_v17 = vsel %vm1323_vm0, %v17831_v44, %v17830_v57  ;;  %v17834_v10 = vcombine.high %v17832_v26, %v17833_v31  ;;  %v17837_v28 = vcombine.high %v17835_v61, %v17836_v11  ;;  %v17838_v49 = vld [vmem:[#allocation151_spill] sm:$0xff]  ;;  %v17848_v3 = vld [vmem:[#allocation209_spill] sm:$0xff]  ;;  %v17860_v57 = vld [vmem:[#allocation174_spill] sm:$0xff] }
 0x408   :  { %9646 = vmatpush1.bf16.msra.mxu0 %v17827_v37  ;;  %9974 = vmatpush1.bf16.msra.mxu1 %v17828_v21  ;;  %v1410_v41 = vsel %vm1329_vm3, %v17838_v49, %v1409_v13  ;;  %v1429_v20 = vsel %vm1325_vm1, %v17839_v5, %v1428_v55  ;;  %v1462_v9 = vadd.f32 %v1461_v62, %v1371_v63  ;;  %v17847_v30 = vld [vmem:[#allocation159_spill] sm:$0xff]  ;;  %v17852_v47 = vld [vmem:[#allocation193_spill] sm:$0xff]  ;;  %v17858_v21 = vld [vmem:[#allocation210_spill] sm:$0xff] }
 0x409   :  { %9647 = vmatprep.subr.bf16.mxu0 %v17834_v10  ;;  %9975 = vmatprep.subr.bf16.mxu1 %v17837_v28  ;;  %v1189_v29 = vmul.f32 %v17840_v6, %v17840_v6  ;;  %v1385_v54 = vsel %vm1335_vm6, %v1186_v19, %v1384_v43  ;;  %v1404_v50 = vsel %vm1331_vm4, %v17841_v27, %v1403_v36  ;;  %v17855_v13 = vld [vmem:[#allocation173_spill] sm:$0xff]  ;;  %v17864_v49 = vld [vmem:[#allocation195_spill] sm:$0xff] }
 0x40a   :  { %v1423_v22 = vsel %vm1327_vm2, %v17842_v46, %v1422_v32  ;;  %v1398_v35 = vsel %vm1333_vm5, %v15723_v23, %v1397_v0  ;;  %v1417_v38 = vsel %vm1329_vm3, %v17843_v59, %v1416_v52  ;;  %v1436_v63 = vsel %vm1325_vm1, %v17844_v45, %v1435_v17  ;;  %v17857_v62 = vld [vmem:[#allocation153_spill] sm:$0xff]  ;;  %v17873_v45 = vld [vmem:[#allocation120_spill] sm:$0xff] }
 0x40b   :  { %v1463_v56 = vadd.f32 %v1462_v9, %v1378_v15  ;;  %v17845_v24 = vcombine.low %v17832_v26, %v17833_v31  ;;  %v17846_v19 = vcombine.low %v17835_v61, %v17836_v11  ;;  %v1392_v14 = vsel %vm1335_vm6, %v15780_v51, %v1391_v16  ;;  %v17856_v16 = vld [vmem:[#allocation105_spill] sm:$0xff]  ;;  %v17863_v61 = vld [vmem:[#allocation128_spill] sm:$0xff]  ;;  %v17868_v9 = vld [vmem:[#allocation198_spill] sm:$0xff] }
 0x40c   :  { %v1411_v23 = vsel %vm1331_vm4, %v17847_v30, %v1410_v41  ;;  %v1430_v58 = vsel %vm1327_vm2, %v17848_v3, %v1429_v20  ;;  %v17851_v40 = vcombine.high %v17849_v34, %v17850_v25  ;;  %v17854_v15 = vcombine.high %v17852_v47, %v17853_v18  ;;  %v17859_v60 = vld [vmem:[#allocation145_spill] sm:$0xff]  ;;  %v17865_v41 = vld [vmem:[#allocation196_spill] sm:$0xff] }
 0x40d   :  { %9648 = vmatpush1.bf16.msra.mxu0 %v17845_v24  ;;  %9976 = vmatpush1.bf16.msra.mxu1 %v17846_v19  ;;  %v1405_v43 = vsel %vm1333_vm5, %v15731_v2, %v1404_v50  ;;  %v1424_v51 = vsel %vm1329_vm3, %v17855_v13, %v1423_v22  ;;  %v1464_v55 = vadd.f32 %v1463_v56, %v1385_v54  ;;  %v3039_v31 = vld [vmem:[#allocation2 + $0x1c50] sm:$0xff]  ;;  %v17870_v50 = vld [vmem:[#allocation175_spill] sm:$0xff] }
 0x40e   :  { %9649 = vmatprep.subr.bf16.mxu0 %v17851_v40  ;;  %9977 = vmatprep.subr.bf16.mxu1 %v17854_v15  ;;  %v1190_v36 = vmul.f32 %v17856_v16, %v17856_v16  ;;  %v1399_v32 = vsel %vm1335_vm6, %v15791_v8, %v1398_v35  ;;  %v1418_v37 = vsel %vm1331_vm4, %v17857_v62, %v1417_v38  ;;  %v3043_v10 = vld [vmem:[#allocation2 + $0x1c70] sm:$0xff]  ;;  %v17871_v35 = vld [vmem:[#allocation202_spill] sm:$0xff] }
 0x40f   :  { %v1437_v0 = vsel %vm1327_vm2, %v17858_v21, %v1436_v63  ;;  %v1177_v52 = vmul.f32 %v17859_v60, %v17859_v60  ;;  %v1412_v2 = vsel %vm1333_vm5, %v15735_v39, %v1411_v23  ;;  %v1431_v44 = vsel %vm1329_vm3, %v17860_v57, %v1430_v58  ;;  %v17867_v20 = vld [vmem:[#allocation197_spill] sm:$0xff]  ;;  %v3040_v38 = vld [vmem:[#allocation2 + $0x1c58] sm:$0xff] }
 0x410   :  { %v1465_v17 = vadd.f32 %v1464_v55, %v1392_v14  ;;  %v17861_v26 = vcombine.low %v17849_v34, %v17850_v25  ;;  %v17862_v8 = vcombine.low %v17852_v47, %v17853_v18  ;;  %v1191_v11 = vmul.f32 %v17863_v61, %v17863_v61  ;;  %v17874_v14 = vld [vmem:[#allocation135_spill] sm:$0xff]  ;;  %v17877_v34 = vld [vmem:[#allocation146_spill] sm:$0xff]  ;;  %v17879_v18 = vld [vmem:[#allocation200_spill] sm:$0xff] }
 0x411   :  { %v1406_v28 = vsel %vm1335_vm6, %v1189_v29, %v1405_v43  ;;  %v1425_v39 = vsel %vm1331_vm4, %v15677_v53, %v1424_v51  ;;  %v17866_v5 = vcombine.high %v17864_v49, %v17865_v41  ;;  %v17869_v54 = vcombine.high %v17867_v20, %v17868_v9  ;;  %v17872_v29 = vld [vmem:[#allocation201_spill] sm:$0xff]  ;;  %v3044_v53 = vld [vmem:[#allocation2 + $0x1c78] sm:$0xff]  ;;  %v17878_v47 = vld [vmem:[#allocation199_spill] sm:$0xff] }
 0x412   :  { %9650 = vmatpush1.bf16.msra.mxu0 %v17861_v26  ;;  %9978 = vmatpush1.bf16.msra.mxu1 %v17862_v8  ;;  %v1419_v27 = vsel %vm1333_vm5, %v15743_v7, %v1418_v37  ;;  %v1438_v46 = vsel %vm1329_vm3, %v17870_v50, %v1437_v0  ;;  %v1466_v22 = vadd.f32 %v1465_v17, %v1399_v32  ;;  %v3047_v13 = vld [vmem:[#allocation2 + $0x1c90] sm:$0xff]  ;;  %v3048_v32 = vld [vmem:[#allocation2 + $0x1c98] sm:$0xff]  ;;  %v17882_v37 = vld [vmem:[#allocation136_spill] sm:$0xff] }
 0x413   :  { %9651 = vmatprep.subr.bf16.mxu0 %v17866_v5  ;;  %9979 = vmatprep.subr.bf16.mxu1 %v17869_v54  ;;  %v10978_v59 = vcombine.low %v17872_v29, %v17871_v35  ;;  %v1192_v63 = vmul.f32 %v17873_v45, %v17873_v45  ;;  %v1413_v56 = vsel %vm1335_vm6, %v1190_v36, %v1412_v2  ;;  %v3051_v36 = vld [vmem:[#allocation2 + $0x1cb0] sm:$0xff]  ;;  %v3052_v62 = vld [vmem:[#allocation2 + $0x1cb8] sm:$0xff] }
 0x414   :  { %v1432_v24 = vsel %vm1331_vm4, %v15681_v12, %v1431_v44  ;;  %v10985_v19 = vcombine.high %v3039_v31, %v3043_v10  ;;  %v1178_v7 = vmul.f32 %v17874_v14, %v17874_v14  ;;  %v1426_v30 = vsel %vm1333_vm5, %v15747_v1, %v1425_v39  ;;  %v17883_v0 = vld [vmem:[#allocation137_spill] sm:$0xff]  ;;  %v3060_v5 = vld [vmem:[#allocation2 + $0x1cf8] sm:$0xff] }
 0x415   :  { %v1467_v23 = vadd.f32 %v1466_v22, %v1406_v28  ;;  %v17875_v3 = vcombine.low %v17864_v49, %v17865_v41  ;;  %v17876_v58 = vcombine.low %v17867_v20, %v17868_v9  ;;  %v1193_v25 = vmul.f32 %v17877_v34, %v17877_v34  ;;  %v3055_v28 = vld [vmem:[#allocation2 + $0x1cd0] sm:$0xff]  ;;  %v3056_v41 = vld [vmem:[#allocation2 + $0x1cd8] sm:$0xff] }
 0x416   :  { %v1420_v12 = vsel %vm1335_vm6, %v1191_v11, %v1419_v27  ;;  %v1439_v40 = vsel %vm1331_vm4, %v15689_v48, %v1438_v46  ;;  %v17880_v1 = vcombine.high %v17878_v47, %v17879_v18  ;;  %v17881_v15 = vcombine.high %v17872_v29, %v17871_v35  ;;  %v3059_v49 = vld [vmem:[#allocation2 + $0x1cf0] sm:$0xff]  ;;  %v17885_v20 = vld [vmem:[#allocation138_spill] sm:$0xff] }
 0x417   :  { %9652 = vmatpush1.bf16.msra.mxu0 %v17875_v3  ;;  %9980 = vmatpush1.bf16.msra.mxu1 %v17876_v58  ;;  %v10987_v43 = vcombine.high %v3040_v38, %v3044_v53  ;;  %v1433_v51 = vsel %vm1333_vm5, %v1177_v52, %v1432_v24  ;;  %v1468_v55 = vadd.f32 %v1467_v23, %v1413_v56  ;;  %v3063_v46 = vld [vmem:[#allocation2 + $0x1d10] sm:$0xff]  ;;  %v3064_v29 = vld [vmem:[#allocation2 + $0x1d18] sm:$0xff] }
 0x418   :  { %9662 = vmatprep.subr.bf16.mxu0 %v17880_v1  ;;  %9990 = vmatprep.subr.bf16.mxu1 %v17881_v15  ;;  %v1194_v21 = vmul.f32 %v17882_v37, %v17882_v37  ;;  %v1427_v48 = vsel %vm1335_vm6, %v1192_v63, %v1426_v30  ;;  %v1440_v2 = vsel %vm1333_vm5, %v1178_v7, %v1439_v40  ;;  %v3067_v35 = vld [vmem:[#allocation2 + $0x1d30] sm:$0xff]  ;;  %v3072_v7 = vld [vmem:[#allocation2 + $0x1d58] sm:$0xff] }
 0x419   :  { %v1469_v57 = vadd.f32 %v1468_v55, %v1420_v12  ;;  %v17884_v44 = vcombine.low %v17878_v47, %v17879_v18  ;;  %v10984_v52 = vcombine.low %v3039_v31, %v3043_v10  ;;  %v10986_v17 = vcombine.low %v3040_v38, %v3044_v53  ;;  %v3071_v24 = vld [vmem:[#allocation2 + $0x1d50] sm:$0xff]  ;;  %v3076_v30 = vld [vmem:[#allocation2 + $0x1d78] sm:$0xff] }
 0x41a   :  { %9654 = vmatmul.mubr.bf16.vlgmr.msra.gmra.mrb[4].mxu0 %v17883_v0  ;;  %9982 = vmatmul.mubr.bf16.vlgmr.msra.gmra.mrb[4].mxu1 %v17883_v0  ;;  %v1434_v26 = vsel %vm1335_vm6, %v1193_v25, %v1433_v51  ;;  %v10993_v8 = vcombine.high %v3047_v13, %v3051_v36  ;;  %v10995_v11 = vcombine.high %v3048_v32, %v3052_v62  ;;  %v3079_v12 = vld [vmem:[#allocation2 + $0x1d90] sm:$0xff]  ;;  %v3080_v47 = vld [vmem:[#allocation2 + $0x1d98] sm:$0xff] }
 0x41b   :  { %9663 = vmatpush1.bf16.msra.mxu0 %v17884_v44  ;;  %9991 = vmatpush1.bf16.msra.mxu1 %v10978_v59  ;;  %v1470_v39 = vadd.f32 %v1469_v57, %v1427_v48  ;;  %v1441_v9 = vsel %vm1335_vm6, %v1194_v21, %v1440_v2  ;;  %v10992_v31 = vcombine.low %v3047_v13, %v3051_v36  ;;  %v3068_v59 = vld [vmem:[#allocation2 + $0x1d38] sm:$0xff]  ;;  %v3083_v40 = vld [vmem:[#allocation2 + $0x1db0] sm:$0xff] }
 0x41c   :  { %9664 = vmatprep.subr.bf16.mxu0 %v10985_v19  ;;  %9992 = vmatprep.subr.bf16.mxu1 %v10987_v43  ;;  %v10994_v10 = vcombine.low %v3048_v32, %v3052_v62  ;;  %v11001_v27 = vcombine.high %v3055_v28, %v3059_v49  ;;  %v11003_v50 = vcombine.high %v3056_v41, %v3060_v5  ;;  %v3075_v19 = vld [vmem:[#allocation2 + $0x1d70] sm:$0xff]  ;;  %v3084_v18 = vld [vmem:[#allocation2 + $0x1db8] sm:$0xff] }
 0x41d   :  { %9694 = vmatprep.mubr.bf16.mxu0 %v17885_v20  ;;  %10022 = vmatprep.mubr.bf16.mxu1 %v17885_v20  ;;  %v1471_v54 = vadd.f32 %v1470_v39, %v1434_v26  ;;  %v11000_v38 = vcombine.low %v3055_v28, %v3059_v49  ;;  %v11002_v53 = vcombine.low %v3056_v41, %v3060_v5  ;;  %v3087_v51 = vld [vmem:[#allocation2 + $0x1dd0] sm:$0xff]  ;;  %v3088_v36 = vld [vmem:[#allocation2 + $0x1dd8] sm:$0xff] }
 0x41e   :  { %v11009_v63 = vcombine.high %v3063_v46, %v3067_v35  ;;  %v11011_v56 = vcombine.high %v3064_v29, %v3068_v59  ;;  %v11008_v23 = vcombine.low %v3063_v46, %v3067_v35  ;;  %v11010_v3 = vcombine.low %v3064_v29, %v3068_v59  ;;  %v3091_v55 = vld [vmem:[#allocation2 + $0x1df0] sm:$0xff]  ;;  %v3092_v32 = vld [vmem:[#allocation2 + $0x1df8] sm:$0xff] }
 0x41f   :  { %9665 = vmatpush1.bf16.msra.mxu0 %v10984_v52  ;;  %9993 = vmatpush1.bf16.msra.mxu1 %v10986_v17  ;;  %v1472_v22 = vadd.f32 %v1471_v54, %v1441_v9  ;;  %v11017_v58 = vcombine.high %v3071_v24, %v3075_v19  ;;  %v11019_v25 = vcombine.high %v3072_v7, %v3076_v30  ;;  %v3095_v2 = vld [vmem:[#allocation2 + $0x1e10] sm:$0xff]  ;;  %v3096_v44 = vld [vmem:[#allocation2 + $0x1e18] sm:$0xff] }
 0x420   :  { %9666 = vmatprep.subr.bf16.mxu0 %v10993_v8  ;;  %9994 = vmatprep.subr.bf16.mxu1 %v10995_v11  ;;  %v11016_v1 = vcombine.low %v3071_v24, %v3075_v19  ;;  %v11018_v15 = vcombine.low %v3072_v7, %v3076_v30  ;;  %v11025_v43 = vcombine.high %v3079_v12, %v3083_v40  ;;  %v3099_v57 = vld [vmem:[#allocation2 + $0x1e30] sm:$0xff]  ;;  %v3100_v52 = vld [vmem:[#allocation2 + $0x1e38] sm:$0xff] }
 0x421   :  { %1473 = vadd.xlane.f32.xlu0 %v1472_v22  ;;  %v11027_v13 = vcombine.high %v3080_v47, %v3084_v18  ;;  %v11024_v62 = vcombine.low %v3079_v12, %v3083_v40  ;;  %v11026_v21 = vcombine.low %v3080_v47, %v3084_v18  ;;  %v11033_v48 = vcombine.high %v3087_v51, %v3091_v55  ;;  %v3103_v28 = vld [vmem:[#allocation2 + $0x1e50] sm:$0xff]  ;;  %v3104_v49 = vld [vmem:[#allocation2 + $0x1e58] sm:$0xff] }
 0x422   :  { %v11035_v0 = vcombine.high %v3088_v36, %v3092_v32  ;;  %v11032_v17 = vcombine.low %v3087_v51, %v3091_v55  ;;  %v11034_v26 = vcombine.low %v3088_v36, %v3092_v32  ;;  %v11041_v8 = vcombine.high %v3095_v2, %v3099_v57  ;;  %v3107_v39 = vld [vmem:[#allocation2 + $0x1e70] sm:$0xff]  ;;  %v3108_v41 = vld [vmem:[#allocation2 + $0x1e78] sm:$0xff] }
 0x423   :  { %9667 = vmatpush1.bf16.msra.mxu0 %v10992_v31  ;;  %9995 = vmatpush1.bf16.msra.mxu1 %v10994_v10  ;;  %v11043_v11 = vcombine.high %v3096_v44, %v3100_v52  ;;  %v11040_v5 = vcombine.low %v3095_v2, %v3099_v57  ;;  %v11042_v20 = vcombine.low %v3096_v44, %v3100_v52  ;;  %v3111_v31 = vld [vmem:[#allocation2 + $0x1e90] sm:$0xff] }
 0x424   :  { %9668 = vmatprep.subr.bf16.mxu0 %v11001_v27  ;;  %9996 = vmatprep.subr.bf16.mxu1 %v11003_v50  ;;  %v11049_v9 = vcombine.high %v3103_v28, %v3107_v39  ;;  %v11051_v54 = vcombine.high %v3104_v49, %v3108_v41  ;;  %v3115_v10 = vld [vmem:[#allocation2 + $0x1eb0] sm:$0xff]  ;;  %v3112_v27 = vld [vmem:[#allocation2 + $0x1e98] sm:$0xff]  ;;  %v11048_v46 = vcombine.low %v3103_v28, %v3107_v39 }
 0x425   :  { %v3116_v50 = vld [vmem:[#allocation2 + $0x1eb8] sm:$0xff]  ;;  %v11050_v22 = vcombine.low %v3104_v49, %v3108_v41  ;;  %v11057_v35 = vcombine.high %v3111_v31, %v3115_v10  ;;  %v3119_v59 = vld [vmem:[#allocation2 + $0x1ed0] sm:$0xff] }
 0x426   :  { %v11059_v29 = vcombine.high %v3112_v27, %v3116_v50  ;;  %v11058_v24 = vcombine.low %v3112_v27, %v3116_v50  ;;  %v3127_v30 = vld [vmem:[#allocation2 + $0x1f10] sm:$0xff] }
 0x427   :  { %9669 = vmatpush1.bf16.msra.mxu0 %v11000_v38  ;;  %9997 = vmatpush1.bf16.msra.mxu1 %v11002_v53  ;;  %v3123_v38 = vld [vmem:[#allocation2 + $0x1ef0] sm:$0xff]  ;;  %v3120_v53 = vld [vmem:[#allocation2 + $0x1ed8] sm:$0xff] }
 0x428   :  { %9670 = vmatprep.subr.bf16.mxu0 %v11009_v63  ;;  %9998 = vmatprep.subr.bf16.mxu1 %v11011_v56  ;;  %v3124_v63 = vld [vmem:[#allocation2 + $0x1ef8] sm:$0xff]  ;;  %v11056_v56 = vcombine.low %v3111_v31, %v3115_v10  ;;  %v11065_v19 = vcombine.high %v3119_v59, %v3123_v38  ;;  %v3135_v18 = vld [vmem:[#allocation2 + $0x1f50] sm:$0xff] }
 0x429   :  { %v11067_v7 = vcombine.high %v3120_v53, %v3124_v63  ;;  %v11066_v12 = vcombine.low %v3120_v53, %v3124_v63  ;;  %v3143_v32 = vld [vmem:[#allocation2 + $0x1f90] sm:$0xff] }
 0x42a   :  { %v3151_v52 = vld [vmem:[#allocation2 + $0x1fd0] sm:$0xff] }
 0x42b   :  { %9671 = vmatpush1.bf16.msra.mxu0 %v11008_v23  ;;  %9999 = vmatpush1.bf16.msra.mxu1 %v11010_v3  ;;  %v3131_v23 = vld [vmem:[#allocation2 + $0x1f30] sm:$0xff]  ;;  %v3128_v3 = vld [vmem:[#allocation2 + $0x1f18] sm:$0xff] }
 0x42c   :  { %9672 = vmatprep.subr.bf16.mxu0 %v11017_v58  ;;  %10000 = vmatprep.subr.bf16.mxu1 %v11019_v25  ;;  %v3132_v58 = vld [vmem:[#allocation2 + $0x1f38] sm:$0xff]  ;;  %v11064_v25 = vcombine.low %v3119_v59, %v3123_v38  ;;  %v11073_v40 = vcombine.high %v3127_v30, %v3131_v23 }
 0x42d   :  { %v11075_v47 = vcombine.high %v3128_v3, %v3132_v58  ;;  %v11074_v51 = vcombine.low %v3128_v3, %v3132_v58  ;;  %v17892_v3 = vld [vmem:[#allocation8_spill] sm:$0xff] }
 0x42f   :  { %9673 = vmatpush1.bf16.msra.mxu0 %v11016_v1  ;;  %10001 = vmatpush1.bf16.msra.mxu1 %v11018_v15  ;;  %v3139_v1 = vld [vmem:[#allocation2 + $0x1f70] sm:$0xff]  ;;  %v3136_v15 = vld [vmem:[#allocation2 + $0x1f58] sm:$0xff] }
 0x430   :  { %9674 = vmatprep.subr.bf16.mxu0 %v11025_v43  ;;  %10002 = vmatprep.subr.bf16.mxu1 %v11027_v13  ;;  %v3140_v43 = vld [vmem:[#allocation2 + $0x1f78] sm:$0xff]  ;;  %v11072_v13 = vcombine.low %v3127_v30, %v3131_v23  ;;  %v11081_v55 = vcombine.high %v3135_v18, %v3139_v1  ;;  %v17891_v30 = vld [vmem:[#allocation17_spill] sm:$0xff] }
 0x431   :  { %v11083_v36 = vcombine.high %v3136_v15, %v3140_v43  ;;  %v11082_v2 = vcombine.low %v3136_v15, %v3140_v43  ;;  %v17896_v15 = vld [vmem:[#allocation44_spill] sm:$0xff] }
 0x433   :  { %9675 = vmatpush1.bf16.msra.mxu0 %v11024_v62  ;;  %10003 = vmatpush1.bf16.msra.mxu1 %v11026_v21  ;;  %v3147_v62 = vld [vmem:[#allocation2 + $0x1fb0] sm:$0xff]  ;;  %v3144_v21 = vld [vmem:[#allocation2 + $0x1f98] sm:$0xff] }
 0x434   :  { %9676 = vmatprep.subr.bf16.mxu0 %v11033_v48  ;;  %10004 = vmatprep.subr.bf16.mxu1 %v11035_v0  ;;  %v3148_v48 = vld [vmem:[#allocation2 + $0x1fb8] sm:$0xff]  ;;  %v11080_v0 = vcombine.low %v3135_v18, %v3139_v1  ;;  %v11089_v57 = vcombine.high %v3143_v32, %v3147_v62  ;;  %v17895_v18 = vld [vmem:[#allocation53_spill] sm:$0xff] }
 0x435   :  { %v11091_v44 = vcombine.high %v3144_v21, %v3148_v48  ;;  %v11090_v28 = vcombine.low %v3144_v21, %v3148_v48  ;;  %v17903_v21 = vld [vmem:[#allocation80_spill] sm:$0xff] }
 0x437   :  { %9677 = vmatpush1.bf16.msra.mxu0 %v11032_v17  ;;  %10005 = vmatpush1.bf16.msra.mxu1 %v11034_v26  ;;  %v3155_v17 = vld [vmem:[#allocation2 + $0x1ff0] sm:$0xff]  ;;  %v3152_v26 = vld [vmem:[#allocation2 + $0x1fd8] sm:$0xff] }
 0x438   :  { %9678 = vmatprep.subr.bf16.mxu0 %v11041_v8  ;;  %10006 = vmatprep.subr.bf16.mxu1 %v11043_v11  ;;  %v3156_v8 = vld [vmem:[#allocation2 + $0x1ff8] sm:$0xff]  ;;  %v11088_v11 = vcombine.low %v3143_v32, %v3147_v62  ;;  %v11097_v39 = vcombine.high %v3151_v52, %v3155_v17  ;;  %v11096_v41 = vcombine.low %v3151_v52, %v3155_v17  ;;  %v17901_v32 = vld [vmem:[#allocation89_spill] sm:$0xff] }
 0x439   :  { %v11099_v49 = vcombine.high %v3152_v26, %v3156_v8  ;;  %v17909_v52 = vld [vmem:[#allocation121_spill] sm:$0xff] }
 0x43b   :  { %9679 = vmatpush1.bf16.msra.mxu0 %v11040_v5  ;;  %10007 = vmatpush1.bf16.msra.mxu1 %v11042_v20  ;;  %v11098_v5 = vcombine.low %v3152_v26, %v3156_v8  ;;  %v17886_v20 = vld [vmem:[#allocation147_spill] sm:$0xff]  ;;  %v17911_v26 = vld [vmem:[#allocation113_spill] sm:$0xff] }
 0x43c   :  { %9680 = vmatprep.subr.bf16.mxu0 %v11049_v9  ;;  %10008 = vmatprep.subr.bf16.mxu1 %v11051_v54  ;;  %v3159_v54 = vlaneseq }
 0x43e   :  { %v16016_v10 = vshrl.u32 %v3159_v54, 7  ;;  %v17919_v54 = vld [vmem:[#allocation36_spill] sm:$0xff] }
 0x43f   :  { %9681 = vmatpush1.bf16.msra.mxu0 %v11048_v46  ;;  %10009 = vmatpush1.bf16.msra.mxu1 %v11050_v22  ;;  %v16020_v46 = vld [vmem:[#allocation4] sm:$0xff] }
 0x440   :  { %9682 = vmatprep.subr.bf16.mxu0 %v11057_v35  ;;  %10010 = vmatprep.subr.bf16.mxu1 %v11059_v29  ;;  %17887 = vst [vmem:[#allocation165_spill] sm:$0xff] %v16016_v10  ;;  %v3161_v27 = vsub.s32 0, %v16016_v10  ;;  %v3165_v50 = vsub.s32 1, %v16016_v10  ;;  %17888 = vst [vmem:[#allocation166_spill] sm:$0xff] %v16020_v46 }
 0x442   :  { %v16023_v35 = vrot.slane %v16020_v46, %v3161_v27  ;;  %v16027_v59 = vrot.slane %v16020_v46, %v3165_v50  ;;  %v17920_v27 = vld [vmem:[#allocation27_spill] sm:$0xff] }
 0x443   :  { %9683 = vmatpush1.bf16.msra.mxu0 %v11056_v56  ;;  %10011 = vmatpush1.bf16.msra.mxu1 %v11058_v24 }
 0x444   :  { %9684 = vmatprep.subr.bf16.mxu0 %v11065_v19  ;;  %10012 = vmatprep.subr.bf16.mxu1 %v11067_v7  ;;  %17889 = vst [vmem:[#allocation176_spill] sm:$0xff] %v16023_v35  ;;  %17890 = vst [vmem:[#allocation177_spill] sm:$0xff] %v16027_v59 }
 0x447   :  { %9685 = vmatpush1.bf16.msra.mxu0 %v11064_v25  ;;  %10013 = vmatpush1.bf16.msra.mxu1 %v11066_v12  ;;  %v17893_v25 = vld [vmem:[#allocation35_spill] sm:$0xff] }
 0x448   :  { %9686 = vmatprep.subr.bf16.mxu0 %v11073_v40  ;;  %10014 = vmatprep.subr.bf16.mxu1 %v11075_v47  ;;  %v17894_v40 = vld [vmem:[#allocation26_spill] sm:$0xff] }
 0x44b   :  { %9687 = vmatpush1.bf16.msra.mxu0 %v11072_v13  ;;  %10015 = vmatpush1.bf16.msra.mxu1 %v11074_v51  ;;  %v17897_v13 = vld [vmem:[#allocation71_spill] sm:$0xff] }
 0x44c   :  { %9688 = vmatprep.subr.bf16.mxu0 %v11081_v55  ;;  %10016 = vmatprep.subr.bf16.mxu1 %v11083_v36  ;;  %v17899_v55 = vld [vmem:[#allocation62_spill] sm:$0xff] }
 0x44f   :  { %9689 = vmatpush1.bf16.msra.mxu0 %v11080_v0  ;;  %10017 = vmatpush1.bf16.msra.mxu1 %v11082_v2  ;;  %v17905_v0 = vld [vmem:[#allocation97_spill] sm:$0xff] }
 0x450   :  { %9690 = vmatprep.subr.bf16.mxu0 %v11089_v57  ;;  %10018 = vmatprep.subr.bf16.mxu1 %v11091_v44  ;;  %v17907_v57 = vld [vmem:[#allocation98_spill] sm:$0xff] }
 0x453   :  { %9691 = vmatpush1.bf16.msra.mxu0 %v11088_v11  ;;  %10019 = vmatpush1.bf16.msra.mxu1 %v11090_v28  ;;  %v17913_v11 = vld [vmem:[#allocation139_spill] sm:$0xff] }
 0x454   :  { %9692 = vmatprep.subr.bf16.mxu0 %v11097_v39  ;;  %10020 = vmatprep.subr.bf16.mxu1 %v11099_v49  ;;  %v17915_v39 = vld [vmem:[#allocation129_spill] sm:$0xff] }
 0x457   :  { %9693 = vmatpush1.bf16.msra.mxu0 %v11096_v41  ;;  %10021 = vmatpush1.bf16.msra.mxu1 %v11098_v5  ;;  %v17917_v41 = vld [vmem:[#allocation18_spill] sm:$0xff] }
 0x45a   :  { %9695 = vmatmul.mubr.bf16.vlgmr.msra.gmra.mrb[4].mxu0 %v17886_v20  ;;  %10023 = vmatmul.mubr.bf16.vlgmr.msra.gmra.mrb[4].mxu1 %v17886_v20  ;;  %v17918_v20 = vld [vmem:[#allocation9_spill] sm:$0xff] }
 0x4ae   :  { %v1474_v9 = vpop.xlane.xlu0 %1473 }
 0x4af   :  { %v1475_v31 = vmax.f32 %v1474_v9, 1e-24 }
 0x4b1   :  { %11224 = vrsqrt.f32 %v1475_v31 }
 0x4bb   :  { %v11225_v22 = vpop.eup %11224 }
 0x4bc   :  { %v1478_v38 = vrot.slane %v11225_v22, 1  ;;  %v1479_v53 = vrot.slane %v11225_v22, 2  ;;  %v16029_v63 = vrot.slane %v11225_v22, 3  ;;  %v16031_v56 = vrot.slane %v11225_v22, 4 }
 0x4bd   :  { %v16033_v24 = vrot.slane %v11225_v22, 5  ;;  %v16035_v19 = vrot.slane %v11225_v22, 6  ;;  %v16037_v7 = vrot.slane %v11225_v22, 7  ;;  %v16040_v23 = vmul.f32 %v11225_v22, %v17891_v30  ;;  %v17921_v30 = vld [vmem:[#allocation54_spill] sm:$0xff] }
 0x4be   :  { %v16043_v58 = vmul.f32 %v11225_v22, %v17892_v3  ;;  %v16046_v12 = vmul.f32 %v11225_v22, %v17893_v25  ;;  %v16049_v47 = vmul.f32 %v11225_v22, %v17894_v40  ;;  %v16052_v1 = vmul.f32 %v11225_v22, %v17895_v18  ;;  %v17922_v25 = vld [vmem:[#allocation45_spill] sm:$0xff] }
 0x4bf   :  { %v16055_v43 = vmul.f32 %v11225_v22, %v17896_v15  ;;  %v16058_v51 = vmul.f32 %v11225_v22, %v17897_v13  ;;  %v16061_v36 = vmul.f32 %v11225_v22, %v17899_v55  ;;  %v16064_v62 = vmul.f32 %v11225_v22, %v17901_v32  ;;  %v17925_v15 = vld [vmem:[#allocation63_spill] sm:$0xff]  ;;  %v17927_v55 = vld [vmem:[#allocation90_spill] sm:$0xff] }
 0x4c0   :  { %v16067_v48 = vmul.f32 %v11225_v22, %v17903_v21  ;;  %v16070_v2 = vmul.f32 %v11225_v22, %v17905_v0  ;;  %v16073_v44 = vmul.f32 %v11225_v22, %v17907_v57  ;;  %v16076_v17 = vmul.f32 %v11225_v22, %v17909_v52  ;;  %v17929_v21 = vld [vmem:[#allocation81_spill] sm:$0xff]  ;;  %v17931_v57 = vld [vmem:[#allocation106_spill] sm:$0xff] }
 0x4c1   :  { %17898 = vst [vmem:[#allocation178_spill] sm:$0xff] %v16058_v51  ;;  %17900 = vst [vmem:[#allocation70_spill] sm:$0xff] %v16061_v36  ;;  %v16079_v8 = vmul.f32 %v11225_v22, %v17911_v26  ;;  %v16082_v28 = vmul.f32 %v11225_v22, %v17913_v11  ;;  %v16085_v49 = vmul.f32 %v11225_v22, %v17915_v39  ;;  %v17923_v22 = vld [vmem:[#allocation72_spill] sm:$0xff]  ;;  %v17933_v26 = vld [vmem:[#allocation99_spill] sm:$0xff] }
 0x4c2   :  { %17902 = vst [vmem:[#allocation160_spill] sm:$0xff] %v16064_v62  ;;  %17904 = vst [vmem:[#allocation154_spill] sm:$0xff] %v16067_v48  ;;  %v16088_v5 = vmul.f32 %v1478_v38, %v17917_v41  ;;  %v16091_v9 = vmul.f32 %v1478_v38, %v17918_v20  ;;  %v16094_v31 = vmul.f32 %v1478_v38, %v17919_v54  ;;  %v17935_v39 = vld [vmem:[#allocation122_spill] sm:$0xff]  ;;  %v17989_v48 = vld [vmem:[#allocation116_spill] sm:$0xff] }
 0x4c3   :  { %17906 = vst [vmem:[#allocation167_spill] sm:$0xff] %v16070_v2  ;;  %17908 = vst [vmem:[#allocation95_spill] sm:$0xff] %v16073_v44  ;;  %v16097_v50 = vmul.f32 %v1478_v38, %v17920_v27  ;;  %v16100_v3 = vmul.f32 %v1478_v38, %v17921_v30  ;;  %v16103_v40 = vmul.f32 %v1478_v38, %v17922_v25  ;;  %v17937_v20 = vld [vmem:[#allocation114_spill] sm:$0xff]  ;;  %v17939_v27 = vld [vmem:[#allocation140_spill] sm:$0xff] }
 0x4c4   :  { %17910 = vst [vmem:[#allocation79_spill] sm:$0xff] %v16076_v17  ;;  %17912 = vst [vmem:[#allocation161_spill] sm:$0xff] %v16079_v8  ;;  %v16106_v18 = vmul.f32 %v1478_v38, %v17923_v22  ;;  %v16109_v13 = vmul.f32 %v1478_v38, %v17925_v15  ;;  %v16112_v32 = vmul.f32 %v1478_v38, %v17927_v55  ;;  %v17941_v25 = vld [vmem:[#allocation130_spill] sm:$0xff]  ;;  %v17943_v15 = vld [vmem:[#allocation19_spill] sm:$0xff] }
 0x4c5   :  { %17914 = vst [vmem:[#allocation155_spill] sm:$0xff] %v16082_v28  ;;  %17916 = vst [vmem:[#allocation168_spill] sm:$0xff] %v16085_v49  ;;  %v16115_v0 = vmul.f32 %v1478_v38, %v17929_v21  ;;  %v16118_v52 = vmul.f32 %v1478_v38, %v17931_v57  ;;  %v16121_v11 = vmul.f32 %v1478_v38, %v17933_v26  ;;  %v17944_v21 = vld [vmem:[#allocation10_spill] sm:$0xff]  ;;  %v17945_v26 = vld [vmem:[#allocation37_spill] sm:$0xff] }
 0x4c6   :  { %17924 = vst [vmem:[#allocation88_spill] sm:$0xff] %v16106_v18  ;;  %17926 = vst [vmem:[#allocation162_spill] sm:$0xff] %v16109_v13  ;;  %v16124_v41 = vmul.f32 %v1478_v38, %v17935_v39  ;;  %v16127_v54 = vmul.f32 %v1478_v38, %v17937_v20  ;;  %v16130_v30 = vmul.f32 %v1478_v38, %v17939_v27  ;;  %v17946_v39 = vld [vmem:[#allocation28_spill] sm:$0xff]  ;;  %v17947_v20 = vld [vmem:[#allocation55_spill] sm:$0xff] }
 0x4c7   :  { %17928 = vst [vmem:[#allocation156_spill] sm:$0xff] %v16112_v32  ;;  %17930 = vst [vmem:[#allocation179_spill] sm:$0xff] %v16115_v0  ;;  %v16133_v22 = vmul.f32 %v1478_v38, %v17941_v25  ;;  %v16136_v55 = vmul.f32 %v1479_v53, %v17943_v15  ;;  %v16139_v57 = vmul.f32 %v1479_v53, %v17944_v21  ;;  %v17948_v27 = vld [vmem:[#allocation46_spill] sm:$0xff]  ;;  %v17949_v38 = vld [vmem:[#allocation73_spill] sm:$0xff] }
 0x4c8   :  { %17932 = vst [vmem:[#allocation180_spill] sm:$0xff] %v16118_v52  ;;  %17934 = vst [vmem:[#allocation181_spill] sm:$0xff] %v16121_v11  ;;  %v16142_v29 = vmul.f32 %v1479_v53, %v17945_v26  ;;  %v16145_v46 = vmul.f32 %v1479_v53, %v17946_v39  ;;  %v16148_v10 = vmul.f32 %v1479_v53, %v17947_v20  ;;  %v17951_v15 = vld [vmem:[#allocation64_spill] sm:$0xff]  ;;  %v17953_v21 = vld [vmem:[#allocation91_spill] sm:$0xff] }
 0x4c9   :  { %17936 = vst [vmem:[#allocation69_spill] sm:$0xff] %v16124_v41  ;;  %17938 = vst [vmem:[#allocation169_spill] sm:$0xff] %v16127_v54  ;;  %v16151_v59 = vmul.f32 %v1479_v53, %v17948_v27  ;;  %v16154_v25 = vmul.f32 %v1479_v53, %v17949_v38  ;;  %v16157_v35 = vmul.f32 %v1479_v53, %v17951_v15  ;;  %v17955_v26 = vld [vmem:[#allocation82_spill] sm:$0xff]  ;;  %v17957_v39 = vld [vmem:[#allocation107_spill] sm:$0xff] }
 0x4ca   :  { %17940 = vst [vmem:[#allocation148_spill] sm:$0xff] %v16130_v30  ;;  %17942 = vst [vmem:[#allocation87_spill] sm:$0xff] %v16133_v22  ;;  %v16160_v49 = vmul.f32 %v1479_v53, %v17953_v21  ;;  %v16163_v22 = vmul.f32 %v1479_v53, %v17955_v26  ;;  %v16166_v28 = vmul.f32 %v1479_v53, %v17957_v39  ;;  %v17959_v20 = vld [vmem:[#allocation100_spill] sm:$0xff]  ;;  %v17961_v27 = vld [vmem:[#allocation123_spill] sm:$0xff] }
 0x4cb   :  { %17950 = vst [vmem:[#allocation163_spill] sm:$0xff] %v16154_v25  ;;  %17952 = vst [vmem:[#allocation157_spill] sm:$0xff] %v16157_v35  ;;  %v16169_v30 = vmul.f32 %v1479_v53, %v17959_v20  ;;  %v16172_v8 = vmul.f32 %v1479_v53, %v17961_v27  ;;  %v17963_v38 = vld [vmem:[#allocation115_spill] sm:$0xff]  ;;  %v17965_v15 = vld [vmem:[#allocation141_spill] sm:$0xff] }
 0x4cc   :  { %17954 = vst [vmem:[#allocation170_spill] sm:$0xff] %v16160_v49  ;;  %17956 = vst [vmem:[#allocation182_spill] sm:$0xff] %v16163_v22  ;;  %v16175_v54 = vmul.f32 %v1479_v53, %v17963_v38  ;;  %v16178_v17 = vmul.f32 %v1479_v53, %v17965_v15  ;;  %v17967_v21 = vld [vmem:[#allocation131_spill] sm:$0xff]  ;;  %v17969_v26 = vld [vmem:[#allocation20_spill] sm:$0xff] }
 0x4cd   :  { %17958 = vst [vmem:[#allocation183_spill] sm:$0xff] %v16166_v28  ;;  %17960 = vst [vmem:[#allocation184_spill] sm:$0xff] %v16169_v30  ;;  %v16181_v41 = vmul.f32 %v1479_v53, %v17967_v21  ;;  %v16185_v44 = vmul.f32 %v16029_v63, %v17969_v26  ;;  %v17970_v39 = vld [vmem:[#allocation11_spill] sm:$0xff]  ;;  %v17971_v30 = vld [vmem:[#allocation38_spill] sm:$0xff] }
 0x4ce   :  { %17962 = vst [vmem:[#allocation149_spill] sm:$0xff] %v16172_v8  ;;  %17964 = vst [vmem:[#allocation164_spill] sm:$0xff] %v16175_v54  ;;  %v16189_v20 = vmul.f32 %v16029_v63, %v17970_v39  ;;  %v16193_v27 = vmul.f32 %v16029_v63, %v17971_v30  ;;  %v17972_v38 = vld [vmem:[#allocation29_spill] sm:$0xff]  ;;  %v17973_v15 = vld [vmem:[#allocation56_spill] sm:$0xff] }
 0x4cf   :  { %17966 = vst [vmem:[#allocation150_spill] sm:$0xff] %v16178_v17  ;;  %17968 = vst [vmem:[#allocation52_spill] sm:$0xff] %v16181_v41  ;;  %v16197_v54 = vmul.f32 %v16029_v63, %v17972_v38  ;;  %v16201_v53 = vmul.f32 %v16029_v63, %v17973_v15  ;;  %v17974_v21 = vld [vmem:[#allocation47_spill] sm:$0xff]  ;;  %v17975_v41 = vld [vmem:[#allocation74_spill] sm:$0xff] }
 0x4d0   :  { %v16205_v26 = vmul.f32 %v16029_v63, %v17974_v21  ;;  %v16209_v39 = vmul.f32 %v16029_v63, %v17975_v41  ;;  %v17977_v17 = vld [vmem:[#allocation65_spill] sm:$0xff]  ;;  %v17979_v8 = vld [vmem:[#allocation92_spill] sm:$0xff]  ;;  %v17981_v11 = vld [vmem:[#allocation83_spill] sm:$0xff] }
 0x4d1   :  { %v16213_v30 = vmul.f32 %v16029_v63, %v17977_v17  ;;  %v16217_v38 = vmul.f32 %v16029_v63, %v17979_v8  ;;  %v16221_v15 = vmul.f32 %v16029_v63, %v17981_v11  ;;  %v17983_v2 = vld [vmem:[#allocation108_spill] sm:$0xff]  ;;  %v17985_v28 = vld [vmem:[#allocation101_spill] sm:$0xff]  ;;  %v16237_v8 = vmul.f32 %v16029_v63, %v17989_v48  ;;  %v17991_v22 = vld [vmem:[#allocation142_spill] sm:$0xff] }
 0x4d2   :  { %17976 = vst [vmem:[#allocation158_spill] sm:$0xff] %v16209_v39  ;;  %v16225_v21 = vmul.f32 %v16029_v63, %v17983_v2  ;;  %v16229_v41 = vmul.f32 %v16029_v63, %v17985_v28  ;;  %v17987_v52 = vld [vmem:[#allocation124_spill] sm:$0xff]  ;;  %v16241_v11 = vmul.f32 %v16029_v63, %v17991_v22  ;;  %v18003_v0 = vld [vmem:[#allocation66_spill] sm:$0xff]  ;;  %v18005_v62 = vld [vmem:[#allocation93_spill] sm:$0xff] }
 0x4d3   :  { %17978 = vst [vmem:[#allocation171_spill] sm:$0xff] %v16213_v30  ;;  %17980 = vst [vmem:[#allocation185_spill] sm:$0xff] %v16217_v38  ;;  %v16233_v17 = vmul.f32 %v16029_v63, %v17987_v52  ;;  %v18007_v38 = vld [vmem:[#allocation84_spill] sm:$0xff]  ;;  %v18009_v49 = vld [vmem:[#allocation109_spill] sm:$0xff] }
 0x4d4   :  { %17982 = vst [vmem:[#allocation186_spill] sm:$0xff] %v16221_v15  ;;  %17984 = vst [vmem:[#allocation172_spill] sm:$0xff] %v16225_v21  ;;  %v17993_v15 = vld [vmem:[#allocation132_spill] sm:$0xff]  ;;  %v17995_v21 = vld [vmem:[#allocation21_spill] sm:$0xff] }
 0x4d5   :  { %17986 = vst [vmem:[#allocation207_spill] sm:$0xff] %v16229_v41  ;;  %17988 = vst [vmem:[#allocation203_spill] sm:$0xff] %v16233_v17  ;;  %v16245_v2 = vmul.f32 %v16029_v63, %v17993_v15  ;;  %v16249_v28 = vmul.f32 %v16031_v56, %v17995_v21  ;;  %v17996_v41 = vld [vmem:[#allocation12_spill] sm:$0xff]  ;;  %v17997_v17 = vld [vmem:[#allocation39_spill] sm:$0xff] }
 0x4d6   :  { %17990 = vst [vmem:[#allocation204_spill] sm:$0xff] %v16237_v8  ;;  %17992 = vst [vmem:[#allocation187_spill] sm:$0xff] %v16241_v11  ;;  %v16253_v52 = vmul.f32 %v16031_v56, %v17996_v41  ;;  %v16257_v48 = vmul.f32 %v16031_v56, %v17997_v17  ;;  %v17998_v8 = vld [vmem:[#allocation30_spill] sm:$0xff]  ;;  %v17999_v11 = vld [vmem:[#allocation57_spill] sm:$0xff]  ;;  %v16277_v17 = vmul.f32 %v16031_v56, %v18003_v0 }
 0x4d7   :  { %17994 = vst [vmem:[#allocation188_spill] sm:$0xff] %v16245_v2  ;;  %v16261_v22 = vmul.f32 %v16031_v56, %v17998_v8  ;;  %v16265_v63 = vmul.f32 %v16031_v56, %v17999_v11  ;;  %v18000_v15 = vld [vmem:[#allocation48_spill] sm:$0xff]  ;;  %v18001_v2 = vld [vmem:[#allocation75_spill] sm:$0xff]  ;;  %v16281_v8 = vmul.f32 %v16031_v56, %v18005_v62  ;;  %v16285_v11 = vmul.f32 %v16031_v56, %v18007_v38  ;;  %v18011_v32 = vld [vmem:[#allocation102_spill] sm:$0xff] }
 0x4d8   :  { %v16269_v21 = vmul.f32 %v16031_v56, %v18000_v15  ;;  %v16273_v41 = vmul.f32 %v16031_v56, %v18001_v2  ;;  %18004 = vst [vmem:[#allocation190_spill] sm:$0xff] %v16277_v17  ;;  %v16289_v15 = vmul.f32 %v16031_v56, %v18009_v49  ;;  %v16293_v2 = vmul.f32 %v16031_v56, %v18011_v32  ;;  %v18013_v36 = vld [vmem:[#allocation125_spill] sm:$0xff]  ;;  %v18029_v30 = vld [vmem:[#allocation67_spill] sm:$0xff]  ;;  %v18031_v35 = vld [vmem:[#allocation94_spill] sm:$0xff] }
 0x4d9   :  { %18006 = vst [vmem:[#allocation151_spill] sm:$0xff] %v16281_v8  ;;  %18008 = vst [vmem:[#allocation205_spill] sm:$0xff] %v16285_v11  ;;  %v16297_v0 = vmul.f32 %v16031_v56, %v18013_v36  ;;  %v18015_v17 = vld [vmem:[#allocation117_spill] sm:$0xff]  ;;  %v18017_v8 = vld [vmem:[#allocation143_spill] sm:$0xff] }
 0x4da   :  { %18002 = vst [vmem:[#allocation189_spill] sm:$0xff] %v16273_v41  ;;  %18010 = vst [vmem:[#allocation112_spill] sm:$0xff] %v16289_v15  ;;  %v16301_v62 = vmul.f32 %v16031_v56, %v18015_v17  ;;  %v16305_v38 = vmul.f32 %v16031_v56, %v18017_v8  ;;  %v18019_v11 = vld [vmem:[#allocation133_spill] sm:$0xff]  ;;  %v18021_v15 = vld [vmem:[#allocation22_spill] sm:$0xff] }
 0x4db   :  { %18012 = vst [vmem:[#allocation61_spill] sm:$0xff] %v16293_v2  ;;  %18014 = vst [vmem:[#allocation208_spill] sm:$0xff] %v16297_v0  ;;  %v16309_v49 = vmul.f32 %v16031_v56, %v18019_v11  ;;  %v16313_v32 = vmul.f32 %v16033_v24, %v18021_v15  ;;  %v18022_v2 = vld [vmem:[#allocation13_spill] sm:$0xff]  ;;  %v18023_v0 = vld [vmem:[#allocation40_spill] sm:$0xff] }
 0x4dc   :  { %18016 = vst [vmem:[#allocation152_spill] sm:$0xff] %v16301_v62  ;;  %18018 = vst [vmem:[#allocation206_spill] sm:$0xff] %v16305_v38  ;;  %v16317_v36 = vmul.f32 %v16033_v24, %v18022_v2  ;;  %v16321_v17 = vmul.f32 %v16033_v24, %v18023_v0  ;;  %v18024_v62 = vld [vmem:[#allocation31_spill] sm:$0xff]  ;;  %v18025_v38 = vld [vmem:[#allocation58_spill] sm:$0xff]  ;;  %v16341_v0 = vmul.f32 %v16033_v24, %v18029_v30 }
 0x4dd   :  { %18020 = vst [vmem:[#allocation159_spill] sm:$0xff] %v16309_v49  ;;  %v16325_v8 = vmul.f32 %v16033_v24, %v18024_v62  ;;  %v16329_v56 = vmul.f32 %v16033_v24, %v18025_v38  ;;  %v18026_v11 = vld [vmem:[#allocation49_spill] sm:$0xff]  ;;  %v18027_v49 = vld [vmem:[#allocation76_spill] sm:$0xff]  ;;  %v16345_v62 = vmul.f32 %v16033_v24, %v18031_v35  ;;  %v18035_v51 = vld [vmem:[#allocation110_spill] sm:$0xff] }
 0x4de   :  { %v16333_v15 = vmul.f32 %v16033_v24, %v18026_v11  ;;  %v16337_v2 = vmul.f32 %v16033_v24, %v18027_v49  ;;  %18030 = vst [vmem:[#allocation191_spill] sm:$0xff] %v16341_v0  ;;  %v18033_v13 = vld [vmem:[#allocation85_spill] sm:$0xff]  ;;  %v16353_v11 = vmul.f32 %v16033_v24, %v18035_v51  ;;  %v18037_v41 = vld [vmem:[#allocation103_spill] sm:$0xff]  ;;  %v18041_v0 = vld [vmem:[#allocation118_spill] sm:$0xff] }
 0x4df   :  { %18032 = vst [vmem:[#allocation192_spill] sm:$0xff] %v16345_v62  ;;  %v16349_v38 = vmul.f32 %v16033_v24, %v18033_v13  ;;  %v16357_v49 = vmul.f32 %v16033_v24, %v18037_v41  ;;  %v16365_v35 = vmul.f32 %v16033_v24, %v18041_v0  ;;  %v18043_v62 = vld [vmem:[#allocation144_spill] sm:$0xff]  ;;  %v18058_v25 = vld [vmem:[#allocation86_spill] sm:$0xff]  ;;  %v18060_v18 = vld [vmem:[#allocation111_spill] sm:$0xff] }
 0x4e0   :  { %18028 = vst [vmem:[#allocation209_spill] sm:$0xff] %v16337_v2  ;;  %18036 = vst [vmem:[#allocation194_spill] sm:$0xff] %v16353_v11  ;;  %v18039_v2 = vld [vmem:[#allocation126_spill] sm:$0xff]  ;;  %v16369_v13 = vmul.f32 %v16033_v24, %v18043_v62  ;;  %v18047_v11 = vld [vmem:[#allocation23_spill] sm:$0xff] }
 0x4e1   :  { %18034 = vst [vmem:[#allocation193_spill] sm:$0xff] %v16349_v38  ;;  %18038 = vst [vmem:[#allocation173_spill] sm:$0xff] %v16357_v49  ;;  %v16361_v30 = vmul.f32 %v16033_v24, %v18039_v2  ;;  %v18045_v38 = vld [vmem:[#allocation134_spill] sm:$0xff]  ;;  %v1589_v41 = vmul.f32 %v16035_v19, %v18047_v11  ;;  %v18049_v2 = vld [vmem:[#allocation41_spill] sm:$0xff] }
 0x4e2   :  { %18042 = vst [vmem:[#allocation153_spill] sm:$0xff] %v16365_v35  ;;  %18044 = vst [vmem:[#allocation210_spill] sm:$0xff] %v16369_v13  ;;  %v16373_v51 = vmul.f32 %v16033_v24, %v18045_v38  ;;  %v18048_v49 = vld [vmem:[#allocation14_spill] sm:$0xff]  ;;  %v18050_v0 = vld [vmem:[#allocation32_spill] sm:$0xff] }
 0x4e3   :  { %18040 = vst [vmem:[#allocation105_spill] sm:$0xff] %v16361_v30  ;;  %v16379_v39 = vmul.f32 %v16035_v19, %v18048_v49  ;;  %v16383_v30 = vmul.f32 %v16035_v19, %v18049_v2  ;;  %v16387_v35 = vmul.f32 %v16035_v19, %v18050_v0  ;;  %v18051_v62 = vld [vmem:[#allocation59_spill] sm:$0xff]  ;;  %v18052_v24 = vld [vmem:[#allocation50_spill] sm:$0xff]  ;;  %v18054_v11 = vld [vmem:[#allocation77_spill] sm:$0xff]  ;;  %v16407_v0 = vmul.f32 %v16035_v19, %v17777_v33 }
 0x4e4   :  { %18046 = vst [vmem:[#allocation145_spill] sm:$0xff] %v16373_v51  ;;  %v16391_v13 = vmul.f32 %v16035_v19, %v18051_v62  ;;  %v16395_v38 = vmul.f32 %v16035_v19, %v18052_v24  ;;  %v16399_v49 = vmul.f32 %v16035_v19, %v18054_v11  ;;  %v18056_v51 = vld [vmem:[#allocation68_spill] sm:$0xff]  ;;  %v16411_v62 = vmul.f32 %v16035_v19, %v18058_v25 }
 0x4e5   :  { %v16403_v2 = vmul.f32 %v16035_v19, %v18056_v51  ;;  %v16415_v24 = vmul.f32 %v16035_v19, %v18060_v18  ;;  %v16431_v25 = vmul.f32 %v16035_v19, %v17859_v60  ;;  %v16435_v18 = vmul.f32 %v16035_v19, %v17874_v14  ;;  %v18074_v60 = vld [vmem:[#allocation60_spill] sm:$0xff]  ;;  %v18075_v14 = vld [vmem:[#allocation51_spill] sm:$0xff] }
 0x4e6   :  { %18053 = vst [vmem:[#allocation174_spill] sm:$0xff] %v16395_v38  ;;  %18055 = vst [vmem:[#allocation128_spill] sm:$0xff] %v16399_v49  ;;  %v18062_v38 = vld [vmem:[#allocation104_spill] sm:$0xff]  ;;  %v18064_v49 = vld [vmem:[#allocation127_spill] sm:$0xff] }
 0x4e7   :  { %18057 = vst [vmem:[#allocation195_spill] sm:$0xff] %v16403_v2  ;;  %18059 = vst [vmem:[#allocation196_spill] sm:$0xff] %v16411_v62  ;;  %v16419_v11 = vmul.f32 %v16035_v19, %v18062_v38  ;;  %v16423_v51 = vmul.f32 %v16035_v19, %v18064_v49  ;;  %v18066_v2 = vld [vmem:[#allocation119_spill] sm:$0xff]  ;;  %v18072_v49 = vld [vmem:[#allocation42_spill] sm:$0xff] }
 0x4e8   :  { %18061 = vst [vmem:[#allocation197_spill] sm:$0xff] %v16415_v24  ;;  %v16427_v33 = vmul.f32 %v16035_v19, %v18066_v2  ;;  %18068 = vst [vmem:[#allocation201_spill] sm:$0xff] %v16431_v25  ;;  %v18070_v24 = vld [vmem:[#allocation24_spill] sm:$0xff]  ;;  %v18073_v2 = vld [vmem:[#allocation33_spill] sm:$0xff]  ;;  %v16451_v25 = vmul.f32 %v16037_v7, %v18074_v60  ;;  %v16455_v19 = vmul.f32 %v16037_v7, %v18075_v14 }
 0x4e9   :  { %18063 = vst [vmem:[#allocation198_spill] sm:$0xff] %v16419_v11  ;;  %18065 = vst [vmem:[#allocation175_spill] sm:$0xff] %v16423_v51  ;;  %v1605_v38 = vmul.f32 %v16037_v7, %v18070_v24  ;;  %v18071_v11 = vld [vmem:[#allocation15_spill] sm:$0xff]  ;;  %v16443_v51 = vmul.f32 %v16037_v7, %v18072_v49  ;;  %v18076_v24 = vld [vmem:[#allocation78_spill] sm:$0xff]  ;;  %v16471_v60 = vmul.f32 %v16037_v7, %v17803_v4 }
 0x4ea   :  { %18067 = vst [vmem:[#allocation202_spill] sm:$0xff] %v16427_v33  ;;  %18069 = vst [vmem:[#allocation120_spill] sm:$0xff] %v16435_v18  ;;  %v1606_v62 = vmul.f32 %v16037_v7, %v18071_v11  ;;  %v16447_v33 = vmul.f32 %v16037_v7, %v18073_v2  ;;  %v16459_v18 = vmul.f32 %v16037_v7, %v18076_v24  ;;  %v18077_v49 = vld [vmem:[#allocation96_spill] sm:$0xff] }
 0x4eb   :  { %v16463_v11 = vmul.f32 %v16037_v7, %v17799_v42  ;;  %v16467_v2 = vmul.f32 %v16037_v7, %v18077_v49  ;;  %v16475_v14 = vmul.f32 %v16037_v7, %v17840_v6  ;;  %v16479_v24 = vmul.f32 %v16037_v7, %v17856_v16 }
 0x4ec   :  { %v16483_v42 = vmul.f32 %v16037_v7, %v17863_v61  ;;  %v16487_v49 = vmul.f32 %v16037_v7, %v17873_v45  ;;  %v16491_v4 = vmul.f32 %v16037_v7, %v17877_v34  ;;  %v16495_v6 = vmul.f32 %v16037_v7, %v17882_v37 }
 0x4ed   :  { %18078 = vst [vmem:[#allocation135_spill] sm:$0xff] %v16475_v14  ;;  %18079 = vst [vmem:[#allocation146_spill] sm:$0xff] %v16479_v24  ;;  %v1749_v14 = vrot.slane %v16088_v5, 7  ;;  %v1751_v16 = vrot.slane %v16136_v55, 6  ;;  %v1753_v24 = vrot.slane %v16185_v44, 5  ;;  %v1755_v61 = vrot.slane %v16249_v28, 4 }
 0x4ee   :  { %18080 = vst [vmem:[#allocation199_spill] sm:$0xff] %v16483_v42  ;;  %18081 = vst [vmem:[#allocation200_spill] sm:$0xff] %v16487_v49  ;;  %v1757_v42 = vrot.slane %v16313_v32, 3  ;;  %v1759_v49 = vrot.slane %v1589_v41, 2  ;;  %v1761_v34 = vrot.slane %v1605_v38, 1  ;;  %v1765_v7 = vrot.slane %v16139_v57, 6 }
 0x4ef   :  { %18082 = vst [vmem:[#allocation136_spill] sm:$0xff] %v16491_v4  ;;  %v1750_v45 = vsel %vm1323_vm0, %v1749_v14, %v16040_v23  ;;  %v1763_v4 = vrot.slane %v16091_v9, 7  ;;  %v1767_v5 = vrot.slane %v16189_v20, 5  ;;  %v1769_v55 = vrot.slane %v16253_v52, 4 }
 0x4f0   :  { %v1752_v37 = vsel %vm1325_vm1, %v1751_v16, %v1750_v45  ;;  %v1771_v32 = vrot.slane %v16317_v36, 3  ;;  %v1773_v23 = vrot.slane %v16379_v39, 2  ;;  %v1775_v38 = vrot.slane %v1606_v62, 1 }
 0x4f1   :  { %v1754_v44 = vsel %vm1327_vm2, %v1753_v24, %v1752_v37  ;;  %v1764_v28 = vsel %vm1323_vm0, %v1763_v4, %v16043_v58  ;;  %v1777_v57 = vrot.slane %v16094_v31, 7  ;;  %v1779_v14 = vrot.slane %v16142_v29, 6 }
 0x4f2   :  { %v1756_v41 = vsel %vm1329_vm3, %v1755_v61, %v1754_v44  ;;  %v1766_v9 = vsel %vm1325_vm1, %v1765_v7, %v1764_v28  ;;  %v1781_v24 = vrot.slane %v16193_v27, 5  ;;  %v1783_v4 = vrot.slane %v16257_v48, 4 }
 0x4f3   :  { %v1758_v20 = vsel %vm1331_vm4, %v1757_v42, %v1756_v41  ;;  %v1768_v52 = vsel %vm1327_vm2, %v1767_v5, %v1766_v9  ;;  %v1778_v39 = vsel %vm1323_vm0, %v1777_v57, %v16046_v12  ;;  %v1785_v16 = vrot.slane %v16321_v17, 3 }
 0x4f4   :  { %v1760_v58 = vsel %vm1333_vm5, %v1759_v49, %v1758_v20  ;;  %v1770_v36 = vsel %vm1329_vm3, %v1769_v55, %v1768_v52  ;;  %v1780_v42 = vsel %vm1325_vm1, %v1779_v14, %v1778_v39  ;;  %v1787_v49 = vrot.slane %v16383_v30, 2  ;;  %v18083_v52 = vld [vmem:[#allocation174_spill] sm:$0xff] }
 0x4f5   :  { %v1762_v62 = vsel %vm1335_vm6, %v1761_v34, %v1760_v58  ;;  %v1772_v31 = vsel %vm1331_vm4, %v1771_v32, %v1770_v36  ;;  %v1782_v27 = vsel %vm1327_vm2, %v1781_v24, %v1780_v42  ;;  %v1789_v61 = vrot.slane %v16443_v51, 1  ;;  %v18084_v58 = vld [vmem:[#allocation88_spill] sm:$0xff]  ;;  %v18085_v36 = vld [vmem:[#allocation163_spill] sm:$0xff]  ;;  %v18087_v42 = vld [vmem:[#allocation189_spill] sm:$0xff] }
 0x4f6   :  { %v1774_v29 = vsel %vm1333_vm5, %v1773_v23, %v1772_v31  ;;  %1989 = vst [vmem:[%s16829_s4] sm:$0xff] %v1762_v62  ;;  %v1784_v48 = vsel %vm1329_vm3, %v1783_v4, %v1782_v27  ;;  %v1791_v45 = vrot.slane %v16097_v50, 7  ;;  %v1793_v17 = vrot.slane %v16145_v46, 6  ;;  %v18086_v62 = vld [vmem:[#allocation158_spill] sm:$0xff] }
 0x4f7   :  { %v1776_v12 = vsel %vm1335_vm6, %v1775_v38, %v1774_v29  ;;  %v1786_v34 = vsel %vm1331_vm4, %v1785_v16, %v1784_v48  ;;  %v1795_v37 = vrot.slane %v16197_v54, 5  ;;  %v1797_v30 = vrot.slane %v16261_v22, 4  ;;  %v18088_v29 = vld [vmem:[#allocation178_spill] sm:$0xff] }
 0x4f8   :  { %v1799_v51 = vrot.slane %v16325_v8, 3  ;;  %1990 = vst [vmem:[%s16829_s4 + $0x8] sm:$0xff] %v1776_v12  ;;  %v1788_v7 = vsel %vm1333_vm5, %v1787_v49, %v1786_v34  ;;  %v1792_v5 = vsel %vm1323_vm0, %v1791_v45, %v16049_v47  ;;  %v1801_v50 = vrot.slane %v16387_v35, 2  ;;  %v18089_v49 = vld [vmem:[#allocation209_spill] sm:$0xff]  ;;  %v18090_v12 = vld [vmem:[#allocation128_spill] sm:$0xff] }
 0x4f9   :  { %v1803_v46 = vrot.slane %v16447_v33, 1  ;;  %v1790_v55 = vsel %vm1335_vm6, %v1789_v61, %v1788_v7  ;;  %v1794_v54 = vsel %vm1325_vm1, %v1793_v17, %v1792_v5  ;;  %v1805_v22 = vrot.slane %v16100_v3, 7  ;;  %v18092_v5 = vld [vmem:[#allocation157_spill] sm:$0xff] }
 0x4fa   :  { %v1807_v8 = vrot.slane %v16148_v10, 6  ;;  %v1796_v44 = vsel %vm1327_vm2, %v1795_v37, %v1794_v54  ;;  %v1809_v28 = vrot.slane %v16201_v53, 5  ;;  %v1811_v32 = vrot.slane %v16265_v63, 4  ;;  %1991 = vst [vmem:[%s16829_s4 + $0x10] sm:$0xff] %v1790_v55  ;;  %v18091_v37 = vld [vmem:[#allocation162_spill] sm:$0xff] }
 0x4fb   :  { %v1813_v47 = vrot.slane %v16329_v56, 3  ;;  %v1798_v35 = vsel %vm1329_vm3, %v1797_v30, %v1796_v44  ;;  %v1806_v33 = vsel %vm1323_vm0, %v1805_v22, %v16052_v1  ;;  %v1815_v3 = vrot.slane %v16391_v13, 2  ;;  %v18094_v22 = vld [vmem:[#allocation70_spill] sm:$0xff] }
 0x4fc   :  { %v1817_v10 = vrot.slane %v16451_v25, 1  ;;  %v1800_v23 = vsel %vm1331_vm4, %v1799_v51, %v1798_v35  ;;  %v1808_v53 = vsel %vm1325_vm1, %v1807_v8, %v1806_v33  ;;  %v1819_v63 = vrot.slane %v16103_v40, 7  ;;  %v18095_v44 = vld [vmem:[#allocation190_spill] sm:$0xff]  ;;  %v18097_v33 = vld [vmem:[#allocation195_spill] sm:$0xff] }
 0x4fd   :  { %v1821_v56 = vrot.slane %v16151_v59, 6  ;;  %v1802_v41 = vsel %vm1333_vm5, %v1801_v50, %v1800_v23  ;;  %v1810_v9 = vsel %vm1327_vm2, %v1809_v28, %v1808_v53  ;;  %v1823_v38 = vrot.slane %v16205_v26, 5 }
 0x4fe   :  { %v1825_v1 = vrot.slane %v16269_v21, 4  ;;  %v1804_v13 = vsel %vm1335_vm6, %v1803_v46, %v1802_v41  ;;  %v1812_v25 = vsel %vm1329_vm3, %v1811_v32, %v1810_v9  ;;  %v1820_v57 = vsel %vm1323_vm0, %v1819_v63, %v16055_v43  ;;  %v18093_v46 = vld [vmem:[#allocation171_spill] sm:$0xff]  ;;  %v18098_v63 = vld [vmem:[#allocation156_spill] sm:$0xff]  ;;  %v18099_v41 = vld [vmem:[#allocation170_spill] sm:$0xff] }
 0x4ff   :  { %v1827_v20 = vrot.slane %v16333_v15, 3  ;;  %v1814_v40 = vsel %vm1331_vm4, %v1813_v47, %v1812_v25  ;;  %v1822_v59 = vsel %vm1325_vm1, %v1821_v56, %v1820_v57  ;;  %v1829_v14 = vrot.slane %v18083_v52, 2  ;;  %1992 = vst [vmem:[%s16829_s4 + $0x18] sm:$0xff] %v1804_v13  ;;  %v18096_v32 = vld [vmem:[#allocation191_spill] sm:$0xff]  ;;  %v18100_v13 = vld [vmem:[#allocation185_spill] sm:$0xff]  ;;  %v18103_v52 = vld [vmem:[#allocation192_spill] sm:$0xff] }
 0x500   :  { %v1831_v24 = vrot.slane %v16455_v19, 1  ;;  %v1816_v26 = vsel %vm1333_vm5, %v1815_v3, %v1814_v40  ;;  %v1824_v21 = vsel %vm1327_vm2, %v1823_v38, %v1822_v59  ;;  %v1833_v43 = vrot.slane %v18084_v58, 7  ;;  %v18101_v57 = vld [vmem:[#allocation151_spill] sm:$0xff]  ;;  %v18102_v59 = vld [vmem:[#allocation160_spill] sm:$0xff] }
 0x501   :  { %v1835_v15 = vrot.slane %v18085_v36, 6  ;;  %v1818_v39 = vsel %vm1335_vm6, %v1817_v10, %v1816_v26  ;;  %v1826_v4 = vsel %vm1329_vm3, %v1825_v1, %v1824_v21  ;;  %v1837_v31 = vrot.slane %v18086_v62, 5 }
 0x502   :  { %v1839_v19 = vrot.slane %v18087_v42, 4  ;;  %v1828_v16 = vsel %vm1331_vm4, %v1827_v20, %v1826_v4  ;;  %v1834_v27 = vsel %vm1323_vm0, %v1833_v43, %v18088_v29  ;;  %v1841_v61 = vrot.slane %v18089_v49, 3  ;;  %1993 = vst [vmem:[%s16829_s4 + $0x20] sm:$0xff] %v1818_v39  ;;  %v18104_v43 = vld [vmem:[#allocation179_spill] sm:$0xff]  ;;  %v18105_v4 = vld [vmem:[#allocation182_spill] sm:$0xff]  ;;  %v18108_v29 = vld [vmem:[#allocation205_spill] sm:$0xff] }
 0x503   :  { %v1843_v48 = vrot.slane %v18090_v12, 2  ;;  %v1830_v45 = vsel %vm1333_vm5, %v1829_v14, %v1828_v16  ;;  %v1836_v17 = vsel %vm1325_vm1, %v1835_v15, %v1834_v27  ;;  %v1845_v34 = vrot.slane %v16459_v18, 1  ;;  %v18109_v49 = vld [vmem:[#allocation193_spill] sm:$0xff] }
 0x504   :  { %v1847_v30 = vrot.slane %v18091_v37, 7  ;;  %v1832_v51 = vsel %vm1335_vm6, %v1831_v24, %v1830_v45  ;;  %v1838_v7 = vsel %vm1327_vm2, %v1837_v31, %v1836_v17  ;;  %v1849_v50 = vrot.slane %v18092_v5, 6  ;;  %v18106_v31 = vld [vmem:[#allocation186_spill] sm:$0xff] }
 0x505   :  { %v1851_v55 = vrot.slane %v18093_v46, 5  ;;  %v1840_v54 = vsel %vm1329_vm3, %v1839_v19, %v1838_v7  ;;  %v1853_v28 = vrot.slane %v18095_v44, 4  ;;  %v1855_v47 = vrot.slane %v18096_v32, 3  ;;  %1994 = vst [vmem:[%s16829_s4 + $0x28] sm:$0xff] %v1832_v51  ;;  %v18107_v19 = vld [vmem:[#allocation154_spill] sm:$0xff]  ;;  %v18112_v7 = vld [vmem:[#allocation183_spill] sm:$0xff] }
 0x506   :  { %v1848_v8 = vsel %vm1323_vm0, %v1847_v30, %v18094_v22  ;;  %v1842_v18 = vsel %vm1331_vm4, %v1841_v61, %v1840_v54  ;;  %v1857_v3 = vrot.slane %v18097_v33, 2  ;;  %v1859_v10 = vrot.slane %v16463_v11, 1  ;;  %v18111_v30 = vld [vmem:[#allocation180_spill] sm:$0xff]  ;;  %v18116_v32 = vld [vmem:[#allocation194_spill] sm:$0xff] }
 0x507   :  { %v1850_v35 = vsel %vm1325_vm1, %v1849_v50, %v1848_v8  ;;  %v1844_v23 = vsel %vm1333_vm5, %v1843_v48, %v1842_v18  ;;  %v1861_v56 = vrot.slane %v18098_v63, 7  ;;  %v1863_v9 = vrot.slane %v18099_v41, 6  ;;  %v18110_v48 = vld [vmem:[#allocation196_spill] sm:$0xff]  ;;  %v18117_v18 = vld [vmem:[#allocation197_spill] sm:$0xff] }
 0x508   :  { %v1852_v53 = vsel %vm1327_vm2, %v1851_v55, %v1850_v35  ;;  %v1846_v38 = vsel %vm1335_vm6, %v1845_v34, %v1844_v23  ;;  %v1865_v25 = vrot.slane %v18100_v13, 5  ;;  %v1867_v20 = vrot.slane %v18101_v57, 4  ;;  %v18113_v55 = vld [vmem:[#allocation172_spill] sm:$0xff]  ;;  %v18122_v57 = vld [vmem:[#allocation95_spill] sm:$0xff] }
 0x509   :  { %v1854_v1 = vsel %vm1329_vm3, %v1853_v28, %v1852_v53  ;;  %v1862_v11 = vsel %vm1323_vm0, %v1861_v56, %v18102_v59  ;;  %v1869_v14 = vrot.slane %v18103_v52, 3  ;;  %v1871_v24 = vrot.slane %v16407_v0, 2  ;;  %1995 = vst [vmem:[%s16829_s4 + $0x30] sm:$0xff] %v1846_v38  ;;  %v18114_v22 = vld [vmem:[#allocation112_spill] sm:$0xff]  ;;  %v18115_v28 = vld [vmem:[#allocation167_spill] sm:$0xff]  ;;  %v18119_v53 = vld [vmem:[#allocation181_spill] sm:$0xff] }
 0x50a   :  { %v1856_v40 = vsel %vm1331_vm4, %v1855_v47, %v1854_v1  ;;  %v1864_v21 = vsel %vm1325_vm1, %v1863_v9, %v1862_v11  ;;  %v1873_v58 = vrot.slane %v16467_v2, 1  ;;  %v1875_v36 = vrot.slane %v18104_v43, 7  ;;  %v18120_v9 = vld [vmem:[#allocation184_spill] sm:$0xff]  ;;  %v18121_v1 = vld [vmem:[#allocation207_spill] sm:$0xff]  ;;  %v18124_v11 = vld [vmem:[#allocation173_spill] sm:$0xff] }
 0x50b   :  { %v1858_v26 = vsel %vm1333_vm5, %v1857_v3, %v1856_v40  ;;  %v1866_v39 = vsel %vm1327_vm2, %v1865_v25, %v1864_v21  ;;  %v1877_v62 = vrot.slane %v18105_v4, 6  ;;  %v1879_v0 = vrot.slane %v18106_v31, 5  ;;  %v18123_v40 = vld [vmem:[#allocation61_spill] sm:$0xff] }
 0x50c   :  { %v1860_v15 = vsel %vm1335_vm6, %v1859_v10, %v1858_v26  ;;  %v1868_v42 = vsel %vm1329_vm3, %v1867_v20, %v1866_v39  ;;  %v1876_v16 = vsel %vm1323_vm0, %v1875_v36, %v18107_v19  ;;  %v1881_v27 = vrot.slane %v18108_v29, 4  ;;  %v18118_v10 = vld [vmem:[#allocation135_spill] sm:$0xff]  ;;  %v18125_v26 = vld [vmem:[#allocation198_spill] sm:$0xff]  ;;  %v18127_v39 = vld [vmem:[#allocation69_spill] sm:$0xff] }
 0x50d   :  { %v1883_v61 = vrot.slane %v18109_v49, 3  ;;  %1996 = vst [vmem:[%s16829_s4 + $0x38] sm:$0xff] %v1860_v15  ;;  %v1870_v2 = vsel %vm1331_vm4, %v1869_v14, %v1868_v42  ;;  %v1878_v12 = vsel %vm1325_vm1, %v1877_v62, %v1876_v16  ;;  %v1885_v45 = vrot.slane %v18110_v48, 2  ;;  %v18128_v62 = vld [vmem:[#allocation149_spill] sm:$0xff]  ;;  %v18129_v19 = vld [vmem:[#allocation203_spill] sm:$0xff]  ;;  %v18130_v29 = vld [vmem:[#allocation208_spill] sm:$0xff] }
 0x50e   :  { %v1887_v17 = vrot.slane %v16471_v60, 1  ;;  %v1872_v34 = vsel %vm1333_vm5, %v1871_v24, %v1870_v2  ;;  %v1880_v37 = vsel %vm1327_vm2, %v1879_v0, %v1878_v12  ;;  %v1889_v51 = vrot.slane %v18111_v30, 7  ;;  %v18132_v12 = vld [vmem:[#allocation105_spill] sm:$0xff]  ;;  %v18134_v30 = vld [vmem:[#allocation199_spill] sm:$0xff] }
 0x50f   :  { %v1891_v5 = vrot.slane %v18112_v7, 6  ;;  %v1874_v50 = vsel %vm1335_vm6, %v1873_v58, %v1872_v34  ;;  %v1882_v46 = vsel %vm1329_vm3, %v1881_v27, %v1880_v37  ;;  %v1893_v54 = vrot.slane %v18113_v55, 5  ;;  %v18126_v58 = vld [vmem:[#allocation146_spill] sm:$0xff]  ;;  %v18135_v7 = vld [vmem:[#allocation169_spill] sm:$0xff]  ;;  %v18136_v55 = vld [vmem:[#allocation164_spill] sm:$0xff] }
 0x510   :  { %v1895_v8 = vrot.slane %v18114_v22, 4  ;;  %v1884_v44 = vsel %vm1331_vm4, %v1883_v61, %v1882_v46  ;;  %v1890_v60 = vsel %vm1323_vm0, %v1889_v51, %v18115_v28  ;;  %v1897_v47 = vrot.slane %v18116_v32, 3  ;;  %1997 = vst [vmem:[%s16829_s4 + $0x40] sm:$0xff] %v1874_v50  ;;  %v18131_v61 = vld [vmem:[#allocation79_spill] sm:$0xff]  ;;  %v18137_v22 = vld [vmem:[#allocation204_spill] sm:$0xff]  ;;  %v18138_v28 = vld [vmem:[#allocation161_spill] sm:$0xff] }
 0x511   :  { %v1899_v35 = vrot.slane %v18117_v18, 2  ;;  %v1886_v33 = vsel %vm1333_vm5, %v1885_v45, %v1884_v44  ;;  %v1892_v3 = vsel %vm1325_vm1, %v1891_v5, %v1890_v60  ;;  %v1901_v23 = vrot.slane %v18118_v10, 1  ;;  %v18133_v45 = vld [vmem:[#allocation175_spill] sm:$0xff]  ;;  %v18139_v32 = vld [vmem:[#allocation152_spill] sm:$0xff]  ;;  %v18140_v18 = vld [vmem:[#allocation153_spill] sm:$0xff] }
 0x512   :  { %v1903_v63 = vrot.slane %v18119_v53, 7  ;;  %v1888_v56 = vsel %vm1335_vm6, %v1887_v17, %v1886_v33  ;;  %v1894_v41 = vsel %vm1327_vm2, %v1893_v54, %v1892_v3  ;;  %v1905_v38 = vrot.slane %v18120_v9, 6  ;;  %v18141_v10 = vld [vmem:[#allocation202_spill] sm:$0xff]  ;;  %v18142_v53 = vld [vmem:[#allocation200_spill] sm:$0xff] }
 0x513   :  { %v1907_v13 = vrot.slane %v18121_v1, 5  ;;  %v1896_v25 = vsel %vm1329_vm3, %v1895_v8, %v1894_v41  ;;  %v1909_v59 = vrot.slane %v18123_v40, 4  ;;  %v1911_v52 = vrot.slane %v18124_v11, 3  ;;  %1998 = vst [vmem:[%s16829_s4 + $0x48] sm:$0xff] %v1888_v56  ;;  %v18143_v9 = vld [vmem:[#allocation148_spill] sm:$0xff]  ;;  %v18144_v1 = vld [vmem:[#allocation150_spill] sm:$0xff] }
 0x514   :  { %v1904_v20 = vsel %vm1323_vm0, %v1903_v63, %v18122_v57  ;;  %v1898_v14 = vsel %vm1331_vm4, %v1897_v47, %v1896_v25  ;;  %v1913_v21 = vrot.slane %v18125_v26, 2  ;;  %v1915_v43 = vrot.slane %v18126_v58, 1  ;;  %v18148_v26 = vld [vmem:[#allocation210_spill] sm:$0xff]  ;;  %v18149_v58 = vld [vmem:[#allocation201_spill] sm:$0xff] }
 0x515   :  { %v1906_v24 = vsel %vm1325_vm1, %v1905_v38, %v1904_v20  ;;  %v1900_v36 = vsel %vm1333_vm5, %v1899_v35, %v1898_v14  ;;  %v1917_v4 = vrot.slane %v18127_v39, 7  ;;  %v1919_v31 = vrot.slane %v18128_v62, 6  ;;  %v18145_v20 = vld [vmem:[#allocation187_spill] sm:$0xff]  ;;  %v18150_v39 = vld [vmem:[#allocation136_spill] sm:$0xff] }
 0x516   :  { %v1908_v15 = vsel %vm1327_vm2, %v1907_v13, %v1906_v24  ;;  %v1902_v0 = vsel %vm1335_vm6, %v1901_v23, %v1900_v36  ;;  %v1921_v16 = vrot.slane %v18129_v19, 5  ;;  %v1923_v27 = vrot.slane %v18130_v29, 4  ;;  %v18147_v14 = vld [vmem:[#allocation155_spill] sm:$0xff]  ;;  %v18152_v19 = vld [vmem:[#allocation52_spill] sm:$0xff] }
 0x517   :  { %v1910_v42 = vsel %vm1329_vm3, %v1909_v59, %v1908_v15  ;;  %v1918_v2 = vsel %vm1323_vm0, %v1917_v4, %v18131_v61  ;;  %v1925_v48 = vrot.slane %v18132_v12, 3  ;;  %v1927_v17 = vrot.slane %v18133_v45, 2  ;;  %1999 = vst [vmem:[%s16829_s4 + $0x50] sm:$0xff] %v1902_v0  ;;  %v18146_v59 = vld [vmem:[#allocation206_spill] sm:$0xff]  ;;  %v18151_v62 = vld [vmem:[#allocation87_spill] sm:$0xff]  ;;  %v18153_v29 = vld [vmem:[#allocation188_spill] sm:$0xff] }
 0x518   :  { %v1912_v49 = vsel %vm1331_vm4, %v1911_v52, %v1910_v42  ;;  %v1920_v37 = vsel %vm1325_vm1, %v1919_v31, %v1918_v2  ;;  %v1929_v51 = vrot.slane %v18134_v30, 1  ;;  %v1931_v5 = vrot.slane %v18135_v7, 7  ;;  %v18154_v61 = vld [vmem:[#allocation168_spill] sm:$0xff]  ;;  %v18155_v12 = vld [vmem:[#allocation159_spill] sm:$0xff]  ;;  %v18156_v45 = vld [vmem:[#allocation145_spill] sm:$0xff] }
 0x519   :  { %v1914_v34 = vsel %vm1333_vm5, %v1913_v21, %v1912_v49  ;;  %v1922_v46 = vsel %vm1327_vm2, %v1921_v16, %v1920_v37  ;;  %v1933_v54 = vrot.slane %v18136_v55, 6  ;;  %v1935_v8 = vrot.slane %v18137_v22, 5  ;;  %v18158_v37 = vld [vmem:[#allocation16_spill] sm:$0xff]  ;;  %v18161_v55 = vld [vmem:[#allocation34_spill] sm:$0xff] }
 0x51a   :  { %v1916_v50 = vsel %vm1335_vm6, %v1915_v43, %v1914_v34  ;;  %v1924_v44 = vsel %vm1329_vm3, %v1923_v27, %v1922_v46  ;;  %v1932_v60 = vsel %vm1323_vm0, %v1931_v5, %v18138_v28  ;;  %v1937_v47 = vrot.slane %v18139_v32, 4  ;;  %v18157_v34 = vld [vmem:[#allocation176_spill] sm:$0xff]  ;;  %v18160_v46 = vld [vmem:[#allocation177_spill] sm:$0xff] }
 0x51b   :  { %v1939_v35 = vrot.slane %v18140_v18, 3  ;;  %2000 = vst [vmem:[%s16829_s4 + $0x58] sm:$0xff] %v1916_v50  ;;  %v1926_v33 = vsel %vm1331_vm4, %v1925_v48, %v1924_v44  ;;  %v1934_v3 = vsel %vm1325_vm1, %v1933_v54, %v1932_v60  ;;  %v1941_v23 = vrot.slane %v18141_v10, 2  ;;  %v18159_v5 = vld [vmem:[#allocation120_spill] sm:$0xff]  ;;  %v18162_v32 = vld [vmem:[#allocation165_spill] sm:$0xff]  ;;  %v18164_v18 = vld [vmem:[#allocation166_spill] sm:$0xff] }
 0x51c   :  { %v1943_v63 = vrot.slane %v18142_v53, 1  ;;  %v1928_v56 = vsel %vm1333_vm5, %v1927_v17, %v1926_v33  ;;  %v1936_v41 = vsel %vm1327_vm2, %v1935_v8, %v1934_v3  ;;  %v1945_v38 = vrot.slane %v18143_v9, 7 }
 0x51d   :  { %v1947_v13 = vrot.slane %v18144_v1, 6  ;;  %v1930_v25 = vsel %vm1335_vm6, %v1929_v51, %v1928_v56  ;;  %v1938_v57 = vsel %vm1329_vm3, %v1937_v47, %v1936_v41  ;;  %v1949_v40 = vrot.slane %v18145_v20, 5 }
 0x51e   :  { %v1951_v11 = vrot.slane %v18146_v59, 4  ;;  %v1940_v52 = vsel %vm1331_vm4, %v1939_v35, %v1938_v57  ;;  %v1946_v24 = vsel %vm1323_vm0, %v1945_v38, %v18147_v14  ;;  %v1953_v21 = vrot.slane %v18148_v26, 3  ;;  %2001 = vst [vmem:[%s16829_s4 + $0x60] sm:$0xff] %v1930_v25  ;;  %v18166_v57 = vld [vmem:[#allocation43_spill] sm:$0xff] }
 0x51f   :  { %v1955_v43 = vrot.slane %v18149_v58, 2  ;;  %v1942_v36 = vsel %vm1333_vm5, %v1941_v23, %v1940_v52  ;;  %v1948_v15 = vsel %vm1325_vm1, %v1947_v13, %v1946_v24  ;;  %v1957_v4 = vrot.slane %v18150_v39, 1 }
 0x520   :  { %v1959_v31 = vrot.slane %v18151_v62, 7  ;;  %v1944_v0 = vsel %vm1335_vm6, %v1943_v63, %v1942_v36  ;;  %v1950_v42 = vsel %vm1327_vm2, %v1949_v40, %v1948_v15  ;;  %v1961_v16 = vrot.slane %v18152_v19, 6  ;;  %v18165_v63 = vld [vmem:[#allocation25_spill] sm:$0xff] }
 0x521   :  { %v1963_v27 = vrot.slane %v18153_v29, 5  ;;  %v1952_v49 = vsel %vm1329_vm3, %v1951_v11, %v1950_v42  ;;  %v1965_v48 = vrot.slane %v18155_v12, 4  ;;  %v1967_v17 = vrot.slane %v18156_v45, 3  ;;  %2002 = vst [vmem:[%s16829_s4 + $0x68] sm:$0xff] %v1944_v0 }
 0x522   :  { %v1960_v2 = vsel %vm1323_vm0, %v1959_v31, %v18154_v61  ;;  %v11100_v30 = vadd.f32 %v18158_v37, %v18157_v34  ;;  %v1954_v51 = vsel %vm1331_vm4, %v1953_v21, %v1952_v49  ;;  %v1969_v50 = vrot.slane %v18159_v5, 2 }
 0x523   :  { %v1962_v7 = vsel %vm1325_vm1, %v1961_v16, %v1960_v2  ;;  %v11101_v54 = vadd.f32 %v18161_v55, %v18160_v46  ;;  %v1956_v22 = vsel %vm1333_vm5, %v1955_v43, %v1954_v51  ;;  %v1971_v44 = vrot.slane %v16495_v6, 1 }
 0x524   :  { %v1964_v8 = vsel %vm1327_vm2, %v1963_v27, %v1962_v7  ;;  %v1958_v28 = vsel %vm1335_vm6, %v1957_v4, %v1956_v22  ;;  %v18163_v47 = vsub.s32 2, %v18162_v32  ;;  %v3173_v33 = vsub.s32 3, %v18162_v32 }
 0x525   :  { %v1966_v60 = vsel %vm1329_vm3, %v1965_v48, %v1964_v8  ;;  %2003 = vst [vmem:[%s16829_s4 + $0x70] sm:$0xff] %v1958_v28  ;;  %v10031_v23 = vmul.f32 %v11100_v30, %v11100_v30  ;;  %v10032_v6 = vmul.f32 %v11101_v54, %v11101_v54  ;;  %v3177_v9 = vsub.s32 4, %v18162_v32 }
 0x526   :  { %v3170_v35 = vrot.slane %v18164_v18, %v18163_v47  ;;  %v1968_v3 = vsel %vm1331_vm4, %v1967_v17, %v1966_v60  ;;  %v3174_v41 = vrot.slane %v18164_v18, %v3173_v33  ;;  %v3181_v38 = vsub.s32 5, %v18162_v32 }
 0x527   :  { %v1970_v10 = vsel %vm1333_vm5, %v1969_v50, %v1968_v3  ;;  %v10039_v1 = vadd.f32 %v10032_v6, %v10031_v23  ;;  %v3185_v13 = vsub.s32 6, %v18162_v32  ;;  %v3178_v40 = vrot.slane %v18164_v18, %v3177_v9 }
 0x528   :  { %v1972_v53 = vsel %vm1335_vm6, %v1971_v44, %v1970_v10  ;;  %v11102_v56 = vadd.f32 %v18165_v63, %v3170_v35  ;;  %v11103_v20 = vadd.f32 %v18166_v57, %v3174_v41  ;;  %v3189_v59 = vsub.s32 7, %v18162_v32 }
 0x529   :  { %2004 = vst [vmem:[%s16829_s4 + $0x78] sm:$0xff] %v1972_v53  ;;  %v3182_v11 = vrot.slane %v18164_v18, %v3181_v38  ;;  %v3186_v14 = vrot.slane %v18164_v18, %v3185_v13 }
 0x52a   :  { %v10033_v25 = vmul.f32 %v11102_v56, %v11102_v56  ;;  %v10034_v21 = vmul.f32 %v11103_v20, %v11103_v20  ;;  %v3190_v36 = vrot.slane %v18164_v18, %v3189_v59 }
 0x52c   :  { %v10040_v52 = vadd.f32 %v10039_v1, %v10033_v25 }
 0x52d   :  { %v9696_v24 = vpop.f32.mrb[4].mxu0  ;;  %v10024_v26 = vpop.f32.mrb[4].mxu1 }
 0x52e   :  { %v11104_v58 = vadd.f32 %v9696_v24, %v3178_v40  ;;  %v9698_v43 = vpop.f32.mrb[5].mxu0  ;;  %v10026_v15 = vpop.f32.mrb[5].mxu1  ;;  %v10041_v31 = vadd.f32 %v10040_v52, %v10034_v21  ;;  %v11106_v42 = vadd.f32 %v10024_v26, %v3186_v14 }
 0x52f   :  { %v11105_v39 = vadd.f32 %v9698_v43, %v3182_v11  ;;  %v9700_v4 = vpop.f32.mrb[6].mxu0  ;;  %v10028_v62 = vpop.f32.mrb[6].mxu1  ;;  %v11107_v49 = vadd.f32 %v10026_v15, %v3190_v36 }
 0x530   :  { %v10035_v0 = vmul.f32 %v11104_v58, %v11104_v58  ;;  %v9701_v19 = vpop.f32.mrb[7].mxu0  ;;  %v10029_v16 = vpop.f32.mrb[7].mxu1  ;;  %v10037_v61 = vmul.f32 %v11106_v42, %v11106_v42 }
 0x531   :  { %v10036_v29 = vmul.f32 %v11105_v39, %v11105_v39  ;;  %v10038_v12 = vmul.f32 %v11107_v49, %v11107_v49 }
 0x532   :  { %v10042_v27 = vadd.f32 %v10041_v31, %v10035_v0 }
 0x534   :  { %v10043_v2 = vadd.f32 %v10042_v27, %v10036_v29 }
 0x536   :  { %v10044_v48 = vadd.f32 %v10043_v2, %v10037_v61 }
 0x538   :  { %v10045_v45 = vadd.f32 %v10044_v48, %v10038_v12 }
 0x53a   :  { %10046 = vadd.xlane.f32.xlu0 %v10045_v45 }
 0x5c7   :  { %v10047_v17 = vpop.xlane.xlu0 %10046 }
 0x5c8   :  { %v10048_v34 = vmax.f32 %v10047_v17, 1e-24 }
 0x5ca   :  { %11226 = vrsqrt.f32 %v10048_v34 }
 0x5d4   :  { %v11227_v37 = vpop.eup %11226 }
 0x5d5   :  { %v10050_v51 = vmul.f32 %v11227_v37, %v11100_v30  ;;  %v10051_v7 = vmul.f32 %v11227_v37, %v11101_v54  ;;  %v10052_v5 = vmul.f32 %v11227_v37, %v11102_v56  ;;  %v10053_v50 = vmul.f32 %v11227_v37, %v11103_v20 }
 0x5d6   :  { %v10054_v46 = vmul.f32 %v11227_v37, %v11104_v58  ;;  %v10055_v55 = vmul.f32 %v11227_v37, %v11105_v39  ;;  %v10056_v22 = vmul.f32 %v11227_v37, %v11106_v42  ;;  %v10057_v8 = vmul.f32 %v11227_v37, %v11107_v49 }
 0x5d7   :  { %10058 = vst [vmem:[%s16828_s3] sm:$0xff] %v10050_v51  ;;  %10059 = vst [vmem:[%s16828_s3 + $0x8] sm:$0xff] %v10051_v7 }
 0x5d8   :  { %10060 = vst [vmem:[%s16828_s3 + $0x10] sm:$0xff] %v10052_v5  ;;  %10061 = vst [vmem:[%s16828_s3 + $0x18] sm:$0xff] %v10053_v50 }
 0x5d9   :  { %10062 = vst [vmem:[%s16828_s3 + $0x20] sm:$0xff] %v10054_v46  ;;  %10063 = vst [vmem:[%s16828_s3 + $0x28] sm:$0xff] %v10055_v55 }
 0x5da   :  { %10064 = vst [vmem:[%s16828_s3 + $0x30] sm:$0xff] %v10056_v22  ;;  %10065 = vst [vmem:[%s16828_s3 + $0x38] sm:$0xff] %v10057_v8 }
 0x5db   :  { %10074 = vsyncpa [#allocation3], 1 }
 0x5dc   :  { %10075 = vsyncpa [#allocation5], 1 }

</bundles_post_ra>
